<compile_context>
chip_gen: v6e
topology: v6e:2x2x1
jax: 0.10.0
libtpu: 0.0.40
codegen_flags: <defaults>
</compile_context>

<pallas_src>
import functools

import jax
import jax.numpy as jnp
from jax import lax
from jax.experimental import pallas as pl
from jax.experimental.pallas import tpu as pltpu


def _round_up(n, m):
    return ((n + m - 1) // m) * m


# ----------------------------------------------------------------------------
# Fused kernel: encoder + max-pool + decoder head
# ----------------------------------------------------------------------------
def _pointnet_kernel(
    x_ref,                                        # (1, d, tile_n) f32, native layout
    w1t, s1,                                      # (64, d) f32, (64, 1) f32  (VPU layer)
    w2t, s2, w3t, s3, w4t, s4, w5t, s5,           # bf16 weights, f32 shifts (encoder)
    w6t, s6, w7t, s7, w8t, b8,                    # bf16 weights, f32 shifts (decoder)
    out_ref,                                      # (1, nc, 1) f32 logits
    acc_ref,                                      # (c_feat, 128) f32 running max
    *, n_valid, tile_n,
):
    n_idx = pl.program_id(1)
    n_last = pl.num_programs(1) - 1

    # ---- init running-max accumulator (post-ReLU activations are >= 0) -----
    @pl.when(n_idx == 0)
    def _():
        acc_ref[...] = jnp.zeros_like(acc_ref)

    # ---- layer 1: K = d (tiny) -> broadcast multiply-adds on the VPU -------
    x_t = x_ref[0]                                # (d, tile_n) f32
    d = x_t.shape[0]
    w1 = w1t[...]                                 # (64, d) f32
    h = w1[:, 0:1] * x_t[0:1, :]
    for k in range(1, d):
        h = h + w1[:, k:k + 1] * x_t[k:k + 1, :]
    h = jnp.maximum(h + s1[...], 0.0)             # (64, tile_n) f32

    # ---- layers 2..5: bf16 operands, f32 accumulation on the MXU -----------
    def _mm_relu(wt_ref, s_ref, hin):
        return jnp.maximum(
            jnp.dot(wt_ref[...], hin.astype(jnp.bfloat16),
                    preferred_element_type=jnp.float32) + s_ref[...], 0.0)

    h = _mm_relu(w2t, s2, h)                      # (64,   tile_n)
    h = _mm_relu(w3t, s3, h)                      # (64,   tile_n)
    h = _mm_relu(w4t, s4, h)                      # (128,  tile_n)
    h = _mm_relu(w5t, s5, h)                      # (1024, tile_n) f32

    # ---- fold this tile into the resident running max ----------------------
    def _fold(hv):
        m = hv[:, 0:128]
        for j in range(1, tile_n // 128):
            m = jnp.maximum(m, hv[:, j * 128:(j + 1) * 128])
        acc_ref[...] = jnp.maximum(acc_ref[...], m)

    if n_valid % tile_n != 0:
        # Only the last tile contains padded columns; gate the mask there.
        @pl.when(n_idx < n_last)
        def _():
            _fold(h)

        @pl.when(n_idx == n_last)
        def _():
            col = lax.broadcasted_iota(jnp.int32, (1, tile_n), 1)
            valid = (n_idx * tile_n + col) < n_valid
            _fold(jnp.where(valid, h, 0.0))
    else:
        _fold(h)

    # ---- finalize: max-pool reduce + fused decoder head -> logits ----------
    @pl.when(n_idx == n_last)
    def _():
        feat = jnp.max(acc_ref[...], axis=1, keepdims=True)      # (1024, 1) f32

        def _dec(wt_ref, s_ref, hin):
            return jnp.dot(wt_ref[...], hin.astype(jnp.bfloat16),
                           preferred_element_type=jnp.float32) + s_ref[...]

        g = jnp.maximum(_dec(w6t, s6, feat), 0.0)                 # (512, 1)
        g = jnp.maximum(_dec(w7t, s7, g), 0.0)                    # (256, 1)
        logits = _dec(w8t, b8, g)                                 # (nc,  1)
        out_ref[0] = logits.astype(out_ref.dtype)


# ----------------------------------------------------------------------------
# Wrapper
# ----------------------------------------------------------------------------
def pointnet_cls_forward(X, params, tile_n=1024):
    """X: (B, d, N) float32 -> logits (B, num_classes)."""
    X = X.astype(jnp.float32)
    B, d, N = X.shape
    tile_n = min(_round_up(max(tile_n, 128), 128), _round_up(N, 128))
    n_tiles = -(-N // tile_n)

    enc, dec = params["enc"], params["dec"]
    w8t, b8 = params["out"]
    nc = w8t.shape[0]
    c_feat = enc[-1][0].shape[0]

    kernel = functools.partial(_pointnet_kernel, n_valid=N, tile_n=tile_n)

    def _const(b, n):
        return (0, 0)

    in_specs = [pl.BlockSpec((1, d, tile_n), lambda b, n: (b, 0, n))]
    flat_params = []
    for w, s in enc + dec + [(w8t, b8)]:
        in_specs.append(pl.BlockSpec(w.shape, _const))     # resident weight
        in_specs.append(pl.BlockSpec(s.shape, _const))     # resident shift/bias
        flat_params += [w, s]

    out = pl.pallas_call(
        kernel,
        out_shape=jax.ShapeDtypeStruct((B, nc, 1), jnp.float32),
        grid=(B, n_tiles),
        in_specs=in_specs,
        out_specs=pl.BlockSpec((1, nc, 1), lambda b, n: (b, 0, 0)),
        scratch_shapes=[pltpu.VMEM((c_feat, 128), jnp.float32)],
        compiler_params=pltpu.CompilerParams(
            dimension_semantics=("parallel", "arbitrary"),
            vmem_limit_bytes=32 * 1024 * 1024),
    )(X, *flat_params)
    return out[:, :, 0]


# ----------------------------------------------------------------------------
# Parameter construction (deterministic, synthetic; BN folded; bf16 weights)
# ----------------------------------------------------------------------------
def make_params(key, d=3, num_classes=40):
    enc_dims = [(d, 64), (64, 64), (64, 64), (64, 128), (128, 1024)]
    dec_dims = [(1024, 512), (512, 256)]

    def bn_fold(k, c, eps=1e-5):
        k1, k2, k3, k4 = jax.random.split(k, 4)
        gamma = 1.0 + 0.1 * jax.random.normal(k1, (c,), jnp.float32)
        beta = 0.1 * jax.random.normal(k2, (c,), jnp.float32)
        rmean = 0.1 * jax.random.normal(k3, (c,), jnp.float32)
        rvar = jax.random.uniform(k4, (c,), jnp.float32, 0.5, 1.5)
        scale = gamma / jnp.sqrt(rvar + eps)
        shift = beta - rmean * scale
        return scale, shift

    def folded_layer(k, cin, cout, wdtype):
        kw, kb, kbn = jax.random.split(k, 3)
        wt = 0.05 * jax.random.normal(kw, (cout, cin), jnp.float32)   # (C_out, C_in)
        b = 0.05 * jax.random.normal(kb, (cout,), jnp.float32)
        scale, shift = bn_fold(kbn, cout)
        # relu(scale*(wT h + b) + shift) == relu((wT*scale) h + (b*scale + shift))
        wt_f = (wt * scale[:, None]).astype(wdtype)
        s_f = (b * scale + shift)[:, None].astype(jnp.float32)
        return wt_f, s_f

    params = {"enc": [], "dec": []}
    for i, (cin, cout) in enumerate(enc_dims):
        key, k = jax.random.split(key)
        wdtype = jnp.float32 if i == 0 else jnp.bfloat16   # layer 1 runs on the VPU in f32
        params["enc"].append(folded_layer(k, cin, cout, wdtype))
    for cin, cout in dec_dims:
        key, k = jax.random.split(key)
        params["dec"].append(folded_layer(k, cin, cout, jnp.bfloat16))

    key, kw, kb = jax.random.split(key, 3)
    w8t = (0.05 * jax.random.normal(kw, (num_classes, 256), jnp.float32)).astype(jnp.bfloat16)
    b8 = 0.05 * jax.random.normal(kb, (num_classes, 1), jnp.float32)
    params["out"] = (w8t, b8)
    return params


# ----------------------------------------------------------------------------
# Pure-JAX reference (identical folded/bf16 math) for validation
# ----------------------------------------------------------------------------
def pointnet_cls_reference(X, params):
    B, d, N = X.shape
    x = jnp.transpose(X, (0, 2, 1)).reshape(B * N, d).astype(jnp.float32)
    w1t, s1 = params["enc"][0]
    h = jnp.maximum(jnp.dot(x, w1t.T) + s1[:, 0], 0.0)
    for wt, s in params["enc"][1:]:
        h = jnp.maximum(
            jnp.dot(h.astype(jnp.bfloat16), wt.T,
                    preferred_element_type=jnp.float32) + s[:, 0], 0.0)
    feat = jnp.max(h.reshape(B, N, -1), axis=1)
    g = feat
    for wt, s in params["dec"]:
        g = jnp.maximum(
            jnp.dot(g.astype(jnp.bfloat16), wt.T,
                    preferred_element_type=jnp.float32) + s[:, 0], 0.0)
    w8t, b8 = params["out"]
    return jnp.dot(g.astype(jnp.bfloat16), w8t.T,
                   preferred_element_type=jnp.float32) + b8[:, 0]


# ----------------------------------------------------------------------------
# Main
# ----------------------------------------------------------------------------
if __name__ == "__main__":
    B, d, num_classes = 2, 3, 40
    key = jax.random.PRNGKey(0)
    key, kx1, kx2, kp = jax.random.split(key, 4)
    params = make_params(kp, d=d, num_classes=num_classes)

    # Case 1: N divides the tile (single tile, no masking path).
    X1 = jax.random.normal(kx1, (B, d, 128), dtype=jnp.float32)
    logits1 = jax.block_until_ready(pointnet_cls_forward(X1, params))
    ref1 = jax.block_until_ready(pointnet_cls_reference(X1, params))
    assert logits1.shape == (B, num_classes), logits1.shape
    err1 = float(jnp.max(jnp.abs(logits1 - ref1)))
    assert err1 < 5e-3, err1

    # Case 2: multi-tile, ragged last tile (exercises accumulation + gated mask).
    X2 = jax.random.normal(kx2, (B, d, 384), dtype=jnp.float32)
    logits2 = jax.block_until_ready(pointnet_cls_forward(X2, params, tile_n=256))
    ref2 = jax.block_until_ready(pointnet_cls_reference(X2, params))
    assert logits2.shape == (B, num_classes), logits2.shape
    err2 = float(jnp.max(jnp.abs(logits2 - ref2)))
    assert err2 < 5e-3, err2

    print("KERNEL_OK")
</pallas_src>

<mosaic_0001>
module attributes {stable_mosaic.version = 11 : i64} {
  func.func @_pointnet_kernel(%arg0: i32, %arg1: i32, %arg2: memref<1x3x128xf32, #tpu.memory_space<vmem>>, %arg3: memref<64x3xf32, #tpu.memory_space<vmem>>, %arg4: memref<64x1xf32, #tpu.memory_space<vmem>>, %arg5: memref<64x64xbf16, #tpu.memory_space<vmem>>, %arg6: memref<64x1xf32, #tpu.memory_space<vmem>>, %arg7: memref<64x64xbf16, #tpu.memory_space<vmem>>, %arg8: memref<64x1xf32, #tpu.memory_space<vmem>>, %arg9: memref<128x64xbf16, #tpu.memory_space<vmem>>, %arg10: memref<128x1xf32, #tpu.memory_space<vmem>>, %arg11: memref<1024x128xbf16, #tpu.memory_space<vmem>>, %arg12: memref<1024x1xf32, #tpu.memory_space<vmem>>, %arg13: memref<512x1024xbf16, #tpu.memory_space<vmem>>, %arg14: memref<512x1xf32, #tpu.memory_space<vmem>>, %arg15: memref<256x512xbf16, #tpu.memory_space<vmem>>, %arg16: memref<256x1xf32, #tpu.memory_space<vmem>>, %arg17: memref<40x256xbf16, #tpu.memory_space<vmem>>, %arg18: memref<40x1xf32, #tpu.memory_space<vmem>>, %arg19: memref<1x40x1xf32, #tpu.memory_space<vmem>>, %arg20: memref<1024x128xf32, #tpu.memory_space<vmem>>) attributes {dimension_semantics = [#tpu.dimension_semantics<parallel>, #tpu.dimension_semantics<arbitrary>], iteration_bounds = array<i64: 2, 1>, scalar_prefetch = 0 : i64, scratch_operands = 1 : i64, tpu.core_type = #tpu.core_type<tc>, window_params = [{transform_indices = @transform_0, window_bounds = array<i64: 1, 3, 128>}, {pipeline_mode = #tpu.pipeline_mode<synchronous>, transform_indices = @transform_1, window_bounds = array<i64: 64, 3>}, {pipeline_mode = #tpu.pipeline_mode<synchronous>, transform_indices = @transform_2, window_bounds = array<i64: 64, 1>}, {pipeline_mode = #tpu.pipeline_mode<synchronous>, transform_indices = @transform_3, window_bounds = array<i64: 64, 64>}, {pipeline_mode = #tpu.pipeline_mode<synchronous>, transform_indices = @transform_4, window_bounds = array<i64: 64, 1>}, {pipeline_mode = #tpu.pipeline_mode<synchronous>, transform_indices = @transform_5, window_bounds = array<i64: 64, 64>}, {pipeline_mode = #tpu.pipeline_mode<synchronous>, transform_indices = @transform_6, window_bounds = array<i64: 64, 1>}, {pipeline_mode = #tpu.pipeline_mode<synchronous>, transform_indices = @transform_7, window_bounds = array<i64: 128, 64>}, {pipeline_mode = #tpu.pipeline_mode<synchronous>, transform_indices = @transform_8, window_bounds = array<i64: 128, 1>}, {pipeline_mode = #tpu.pipeline_mode<synchronous>, transform_indices = @transform_9, window_bounds = array<i64: 1024, 128>}, {pipeline_mode = #tpu.pipeline_mode<synchronous>, transform_indices = @transform_10, window_bounds = array<i64: 1024, 1>}, {pipeline_mode = #tpu.pipeline_mode<synchronous>, transform_indices = @transform_11, window_bounds = array<i64: 512, 1024>}, {pipeline_mode = #tpu.pipeline_mode<synchronous>, transform_indices = @transform_12, window_bounds = array<i64: 512, 1>}, {pipeline_mode = #tpu.pipeline_mode<synchronous>, transform_indices = @transform_13, window_bounds = array<i64: 256, 512>}, {pipeline_mode = #tpu.pipeline_mode<synchronous>, transform_indices = @transform_14, window_bounds = array<i64: 256, 1>}, {pipeline_mode = #tpu.pipeline_mode<synchronous>, transform_indices = @transform_15, window_bounds = array<i64: 40, 256>}, {pipeline_mode = #tpu.pipeline_mode<synchronous>, transform_indices = @transform_16, window_bounds = array<i64: 40, 1>}, {transform_indices = @transform_17, window_bounds = array<i64: 1, 40, 1>}]} {
    %c0_i32 = arith.constant 0 : i32
    %0 = arith.cmpi eq, %arg1, %c0_i32 : i32
    %1 = arith.extui %0 : i1 to i32
    %c0_i32_0 = arith.constant 0 : i32
    %2 = arith.cmpi ne, %1, %c0_i32_0 : i32
    scf.if %2 {
      %cst_37 = arith.constant 0.000000e+00 : f32
      %66 = vector.broadcast %cst_37 : f32 to vector<1024x128xf32>
      %c0_38 = arith.constant 0 : index
      %c0_39 = arith.constant 0 : index
      %67 = vector.load %arg20[%c0_38, %c0_39] : memref<1024x128xf32, #tpu.memory_space<vmem>>, vector<1024x128xf32>
      tpu.vector_store %arg20[%c0_38, %c0_39], %66 {strides = array<i32>} : memref<1024x128xf32, #tpu.memory_space<vmem>>, vector<1024x128xf32>,
    } else {
    }
    %c0 = arith.constant 0 : index
    %c0_1 = arith.constant 0 : index
    %c0_2 = arith.constant 0 : index
    %3 = vector.load %arg2[%c0, %c0_1, %c0_2] : memref<1x3x128xf32, #tpu.memory_space<vmem>>, vector<1x3x128xf32>
    %4 = vector.shape_cast %3 : vector<1x3x128xf32> to vector<3x128xf32>
    %c0_3 = arith.constant 0 : index
    %c0_4 = arith.constant 0 : index
    %5 = vector.load %arg3[%c0_3, %c0_4] : memref<64x3xf32, #tpu.memory_space<vmem>>, vector<64x3xf32>
    %6 = vector.extract_strided_slice %5 {offsets = [0, 0], sizes = [64, 1], strides = [1, 1]} : vector<64x3xf32> to vector<64x1xf32>
    %7 = vector.extract_strided_slice %4 {offsets = [0, 0], sizes = [1, 128], strides = [1, 1]} : vector<3x128xf32> to vector<1x128xf32>
    %8 = vector.broadcast %6 : vector<64x1xf32> to vector<64x128xf32>
    %9 = vector.broadcast %7 : vector<1x128xf32> to vector<64x128xf32>
    %10 = arith.mulf %8, %9 : vector<64x128xf32>
    %11 = vector.extract_strided_slice %5 {offsets = [0, 1], sizes = [64, 1], strides = [1, 1]} : vector<64x3xf32> to vector<64x1xf32>
    %12 = vector.extract_strided_slice %4 {offsets = [1, 0], sizes = [1, 128], strides = [1, 1]} : vector<3x128xf32> to vector<1x128xf32>
    %13 = vector.broadcast %11 : vector<64x1xf32> to vector<64x128xf32>
    %14 = vector.broadcast %12 : vector<1x128xf32> to vector<64x128xf32>
    %15 = arith.mulf %13, %14 : vector<64x128xf32>
    %16 = arith.addf %10, %15 : vector<64x128xf32>
    %17 = vector.extract_strided_slice %5 {offsets = [0, 2], sizes = [64, 1], strides = [1, 1]} : vector<64x3xf32> to vector<64x1xf32>
    %18 = vector.extract_strided_slice %4 {offsets = [2, 0], sizes = [1, 128], strides = [1, 1]} : vector<3x128xf32> to vector<1x128xf32>
    %19 = vector.broadcast %17 : vector<64x1xf32> to vector<64x128xf32>
    %20 = vector.broadcast %18 : vector<1x128xf32> to vector<64x128xf32>
    %21 = arith.mulf %19, %20 : vector<64x128xf32>
    %22 = arith.addf %16, %21 : vector<64x128xf32>
    %c0_5 = arith.constant 0 : index
    %c0_6 = arith.constant 0 : index
    %23 = vector.load %arg4[%c0_5, %c0_6] : memref<64x1xf32, #tpu.memory_space<vmem>>, vector<64x1xf32>
    %24 = vector.broadcast %23 : vector<64x1xf32> to vector<64x128xf32>
    %25 = arith.addf %22, %24 : vector<64x128xf32>
    %cst = arith.constant 0.000000e+00 : f32
    %26 = vector.broadcast %cst : f32 to vector<64x128xf32>
    %27 = arith.maximumf %25, %26 : vector<64x128xf32>
    %c0_7 = arith.constant 0 : index
    %c0_8 = arith.constant 0 : index
    %28 = vector.load %arg5[%c0_7, %c0_8] : memref<64x64xbf16, #tpu.memory_space<vmem>>, vector<64x64xbf16>
    %29 = arith.truncf %27 : vector<64x128xf32> to vector<64x128xbf16>
    %cst_9 = arith.constant dense<0.000000e+00> : vector<64x128xf32>
    %30 = tpu.matmul %28, %29, %cst_9 {dimension_numbers = #tpu.dot_dimension_numbers<[1], [0], [0], [1], [0, 0, 1, 1], [], []>} : vector<64x64xbf16>, vector<64x128xbf16>, vector<64x128xf32> -> vector<64x128xf32>
    %c0_10 = arith.constant 0 : index
    %c0_11 = arith.constant 0 : index
    %31 = vector.load %arg6[%c0_10, %c0_11] : memref<64x1xf32, #tpu.memory_space<vmem>>, vector<64x1xf32>
    %32 = vector.broadcast %31 : vector<64x1xf32> to vector<64x128xf32>
    %33 = arith.addf %30, %32 : vector<64x128xf32>
    %cst_12 = arith.constant 0.000000e+00 : f32
    %34 = vector.broadcast %cst_12 : f32 to vector<64x128xf32>
    %35 = arith.maximumf %33, %34 : vector<64x128xf32>
    %c0_13 = arith.constant 0 : index
    %c0_14 = arith.constant 0 : index
    %36 = vector.load %arg7[%c0_13, %c0_14] : memref<64x64xbf16, #tpu.memory_space<vmem>>, vector<64x64xbf16>
    %37 = arith.truncf %35 : vector<64x128xf32> to vector<64x128xbf16>
    %cst_15 = arith.constant dense<0.000000e+00> : vector<64x128xf32>
    %38 = tpu.matmul %36, %37, %cst_15 {dimension_numbers = #tpu.dot_dimension_numbers<[1], [0], [0], [1], [0, 0, 1, 1], [], []>} : vector<64x64xbf16>, vector<64x128xbf16>, vector<64x128xf32> -> vector<64x128xf32>
    %c0_16 = arith.constant 0 : index
    %c0_17 = arith.constant 0 : index
    %39 = vector.load %arg8[%c0_16, %c0_17] : memref<64x1xf32, #tpu.memory_space<vmem>>, vector<64x1xf32>
    %40 = vector.broadcast %39 : vector<64x1xf32> to vector<64x128xf32>
    %41 = arith.addf %38, %40 : vector<64x128xf32>
    %cst_18 = arith.constant 0.000000e+00 : f32
    %42 = vector.broadcast %cst_18 : f32 to vector<64x128xf32>
    %43 = arith.maximumf %41, %42 : vector<64x128xf32>
    %c0_19 = arith.constant 0 : index
    %c0_20 = arith.constant 0 : index
    %44 = vector.load %arg9[%c0_19, %c0_20] : memref<128x64xbf16, #tpu.memory_space<vmem>>, vector<128x64xbf16>
    %45 = arith.truncf %43 : vector<64x128xf32> to vector<64x128xbf16>
    %cst_21 = arith.constant dense<0.000000e+00> : vector<128x128xf32>
    %46 = tpu.matmul %44, %45, %cst_21 {dimension_numbers = #tpu.dot_dimension_numbers<[1], [0], [0], [1], [0, 0, 1, 1], [], []>} : vector<128x64xbf16>, vector<64x128xbf16>, vector<128x128xf32> -> vector<128x128xf32>
    %c0_22 = arith.constant 0 : index
    %c0_23 = arith.constant 0 : index
    %47 = vector.load %arg10[%c0_22, %c0_23] : memref<128x1xf32, #tpu.memory_space<vmem>>, vector<128x1xf32>
    %48 = vector.broadcast %47 : vector<128x1xf32> to vector<128x128xf32>
    %49 = arith.addf %46, %48 : vector<128x128xf32>
    %cst_24 = arith.constant 0.000000e+00 : f32
    %50 = vector.broadcast %cst_24 : f32 to vector<128x128xf32>
    %51 = arith.maximumf %49, %50 : vector<128x128xf32>
    %c0_25 = arith.constant 0 : index
    %c0_26 = arith.constant 0 : index
    %52 = vector.load %arg11[%c0_25, %c0_26] : memref<1024x128xbf16, #tpu.memory_space<vmem>>, vector<1024x128xbf16>
    %53 = arith.truncf %51 : vector<128x128xf32> to vector<128x128xbf16>
    %cst_27 = arith.constant dense<0.000000e+00> : vector<1024x128xf32>
    %54 = tpu.matmul %52, %53, %cst_27 {dimension_numbers = #tpu.dot_dimension_numbers<[1], [0], [0], [1], [0, 0, 1, 1], [], []>} : vector<1024x128xbf16>, vector<128x128xbf16>, vector<1024x128xf32> -> vector<1024x128xf32>
    %c0_28 = arith.constant 0 : index
    %c0_29 = arith.constant 0 : index
    %55 = vector.load %arg12[%c0_28, %c0_29] : memref<1024x1xf32, #tpu.memory_space<vmem>>, vector<1024x1xf32>
    %56 = vector.broadcast %55 : vector<1024x1xf32> to vector<1024x128xf32>
    %57 = arith.addf %54, %56 : vector<1024x128xf32>
    %cst_30 = arith.constant 0.000000e+00 : f32
    %58 = vector.broadcast %cst_30 : f32 to vector<1024x128xf32>
    %59 = arith.maximumf %57, %58 : vector<1024x128xf32>
    %c0_31 = arith.constant 0 : index
    %c0_32 = arith.constant 0 : index
    %60 = vector.load %arg20[%c0_31, %c0_32] : memref<1024x128xf32, #tpu.memory_space<vmem>>, vector<1024x128xf32>
    %61 = arith.maximumf %60, %59 : vector<1024x128xf32>
    %c0_33 = arith.constant 0 : index
    %c0_34 = arith.constant 0 : index
    %62 = vector.load %arg20[%c0_33, %c0_34] : memref<1024x128xf32, #tpu.memory_space<vmem>>, vector<1024x128xf32>
    tpu.vector_store %arg20[%c0_33, %c0_34], %61 {strides = array<i32>} : memref<1024x128xf32, #tpu.memory_space<vmem>>, vector<1024x128xf32>,
    %c0_i32_35 = arith.constant 0 : i32
    %63 = arith.cmpi eq, %arg1, %c0_i32_35 : i32
    %64 = arith.extui %63 : i1 to i32
    %c0_i32_36 = arith.constant 0 : i32
    %65 = arith.cmpi ne, %64, %c0_i32_36 : i32
    scf.if %65 {
      %c0_37 = arith.constant 0 : index
      %c0_38 = arith.constant 0 : index
      %66 = vector.load %arg20[%c0_37, %c0_38] : memref<1024x128xf32, #tpu.memory_space<vmem>>, vector<1024x128xf32>
      %cst_39 = arith.constant dense<0xFF800000> : vector<1024xf32>
      %67 = vector.multi_reduction <maximumf>, %66, %cst_39 [1] : vector<1024x128xf32> to vector<1024xf32>
      %68 = vector.shape_cast %67 : vector<1024xf32> to vector<1024x1xf32>
      %c0_40 = arith.constant 0 : index
      %c0_41 = arith.constant 0 : index
      %69 = vector.load %arg13[%c0_40, %c0_41] : memref<512x1024xbf16, #tpu.memory_space<vmem>>, vector<512x1024xbf16>
      %70 = arith.truncf %68 : vector<1024x1xf32> to vector<1024x1xbf16>
      %cst_42 = arith.constant dense<0.000000e+00> : vector<512x1xf32>
      %71 = tpu.matmul %69, %70, %cst_42 {dimension_numbers = #tpu.dot_dimension_numbers<[1], [0], [0], [1], [0, 0, 1, 1], [], []>} : vector<512x1024xbf16>, vector<1024x1xbf16>, vector<512x1xf32> -> vector<512x1xf32>
      %c0_43 = arith.constant 0 : index
      %c0_44 = arith.constant 0 : index
      %72 = vector.load %arg14[%c0_43, %c0_44] : memref<512x1xf32, #tpu.memory_space<vmem>>, vector<512x1xf32>
      %73 = arith.addf %71, %72 : vector<512x1xf32>
      %cst_45 = arith.constant 0.000000e+00 : f32
      %74 = vector.broadcast %cst_45 : f32 to vector<512x1xf32>
      %75 = arith.maximumf %73, %74 : vector<512x1xf32>
      %c0_46 = arith.constant 0 : index
      %c0_47 = arith.constant 0 : index
      %76 = vector.load %arg15[%c0_46, %c0_47] : memref<256x512xbf16, #tpu.memory_space<vmem>>, vector<256x512xbf16>
      %77 = arith.truncf %75 : vector<512x1xf32> to vector<512x1xbf16>
      %cst_48 = arith.constant dense<0.000000e+00> : vector<256x1xf32>
      %78 = tpu.matmul %76, %77, %cst_48 {dimension_numbers = #tpu.dot_dimension_numbers<[1], [0], [0], [1], [0, 0, 1, 1], [], []>} : vector<256x512xbf16>, vector<512x1xbf16>, vector<256x1xf32> -> vector<256x1xf32>
      %c0_49 = arith.constant 0 : index
      %c0_50 = arith.constant 0 : index
      %79 = vector.load %arg16[%c0_49, %c0_50] : memref<256x1xf32, #tpu.memory_space<vmem>>, vector<256x1xf32>
      %80 = arith.addf %78, %79 : vector<256x1xf32>
      %cst_51 = arith.constant 0.000000e+00 : f32
      %81 = vector.broadcast %cst_51 : f32 to vector<256x1xf32>
      %82 = arith.maximumf %80, %81 : vector<256x1xf32>
      %c0_52 = arith.constant 0 : index
      %c0_53 = arith.constant 0 : index
      %83 = vector.load %arg17[%c0_52, %c0_53] : memref<40x256xbf16, #tpu.memory_space<vmem>>, vector<40x256xbf16>
      %84 = arith.truncf %82 : vector<256x1xf32> to vector<256x1xbf16>
      %cst_54 = arith.constant dense<0.000000e+00> : vector<40x1xf32>
      %85 = tpu.matmul %83, %84, %cst_54 {dimension_numbers = #tpu.dot_dimension_numbers<[1], [0], [0], [1], [0, 0, 1, 1], [], []>} : vector<40x256xbf16>, vector<256x1xbf16>, vector<40x1xf32> -> vector<40x1xf32>
      %c0_55 = arith.constant 0 : index
      %c0_56 = arith.constant 0 : index
      %86 = vector.load %arg18[%c0_55, %c0_56] : memref<40x1xf32, #tpu.memory_space<vmem>>, vector<40x1xf32>
      %87 = arith.addf %85, %86 : vector<40x1xf32>
      %c0_57 = arith.constant 0 : index
      %c0_58 = arith.constant 0 : index
      %c0_59 = arith.constant 0 : index
      %88 = vector.load %arg19[%c0_57, %c0_58, %c0_59] : memref<1x40x1xf32, #tpu.memory_space<vmem>>, vector<1x40x1xf32>
      %89 = vector.shape_cast %88 : vector<1x40x1xf32> to vector<40x1xf32>
      %90 = vector.shape_cast %87 : vector<40x1xf32> to vector<1x40x1xf32>
      tpu.vector_store %arg19[%c0_57, %c0_58, %c0_59], %90 {strides = array<i32>} : memref<1x40x1xf32, #tpu.memory_space<vmem>>, vector<1x40x1xf32>,
    } else {
    }
    return
  }
  func.func @transform_0(%arg0: i32, %arg1: i32) -> (i32, i32, i32) {
    %c0_i32 = arith.constant 0 : i32
    %c0_i32_0 = arith.constant 0 : i32
    return %arg0, %c0_i32, %arg1 : i32, i32, i32
  }
  func.func @transform_1(%arg0: i32, %arg1: i32) -> (i32, i32) {
    %c0_i32 = arith.constant 0 : i32
    %c0_i32_0 = arith.constant 0 : i32
    %c0_i32_1 = arith.constant 0 : i32
    return %c0_i32, %c0_i32_0 : i32, i32
  }
  func.func @transform_2(%arg0: i32, %arg1: i32) -> (i32, i32) {
    %c0_i32 = arith.constant 0 : i32
    %c0_i32_0 = arith.constant 0 : i32
    %c0_i32_1 = arith.constant 0 : i32
    return %c0_i32, %c0_i32_0 : i32, i32
  }
  func.func @transform_3(%arg0: i32, %arg1: i32) -> (i32, i32) {
    %c0_i32 = arith.constant 0 : i32
    %c0_i32_0 = arith.constant 0 : i32
    %c0_i32_1 = arith.constant 0 : i32
    return %c0_i32, %c0_i32_0 : i32, i32
  }
  func.func @transform_4(%arg0: i32, %arg1: i32) -> (i32, i32) {
    %c0_i32 = arith.constant 0 : i32
    %c0_i32_0 = arith.constant 0 : i32
    %c0_i32_1 = arith.constant 0 : i32
    return %c0_i32, %c0_i32_0 : i32, i32
  }
  func.func @transform_5(%arg0: i32, %arg1: i32) -> (i32, i32) {
    %c0_i32 = arith.constant 0 : i32
    %c0_i32_0 = arith.constant 0 : i32
    %c0_i32_1 = arith.constant 0 : i32
    return %c0_i32, %c0_i32_0 : i32, i32
  }
  func.func @transform_6(%arg0: i32, %arg1: i32) -> (i32, i32) {
    %c0_i32 = arith.constant 0 : i32
    %c0_i32_0 = arith.constant 0 : i32
    %c0_i32_1 = arith.constant 0 : i32
    return %c0_i32, %c0_i32_0 : i32, i32
  }
  func.func @transform_7(%arg0: i32, %arg1: i32) -> (i32, i32) {
    %c0_i32 = arith.constant 0 : i32
    %c0_i32_0 = arith.constant 0 : i32
    %c0_i32_1 = arith.constant 0 : i32
    return %c0_i32, %c0_i32_0 : i32, i32
  }
  func.func @transform_8(%arg0: i32, %arg1: i32) -> (i32, i32) {
    %c0_i32 = arith.constant 0 : i32
    %c0_i32_0 = arith.constant 0 : i32
    %c0_i32_1 = arith.constant 0 : i32
    return %c0_i32, %c0_i32_0 : i32, i32
  }
  func.func @transform_9(%arg0: i32, %arg1: i32) -> (i32, i32) {
    %c0_i32 = arith.constant 0 : i32
    %c0_i32_0 = arith.constant 0 : i32
    %c0_i32_1 = arith.constant 0 : i32
    return %c0_i32, %c0_i32_0 : i32, i32
  }
  func.func @transform_10(%arg0: i32, %arg1: i32) -> (i32, i32) {
    %c0_i32 = arith.constant 0 : i32
    %c0_i32_0 = arith.constant 0 : i32
    %c0_i32_1 = arith.constant 0 : i32
    return %c0_i32, %c0_i32_0 : i32, i32
  }
  func.func @transform_11(%arg0: i32, %arg1: i32) -> (i32, i32) {
    %c0_i32 = arith.constant 0 : i32
    %c0_i32_0 = arith.constant 0 : i32
    %c0_i32_1 = arith.constant 0 : i32
    return %c0_i32, %c0_i32_0 : i32, i32
  }
  func.func @transform_12(%arg0: i32, %arg1: i32) -> (i32, i32) {
    %c0_i32 = arith.constant 0 : i32
    %c0_i32_0 = arith.constant 0 : i32
    %c0_i32_1 = arith.constant 0 : i32
    return %c0_i32, %c0_i32_0 : i32, i32
  }
  func.func @transform_13(%arg0: i32, %arg1: i32) -> (i32, i32) {
    %c0_i32 = arith.constant 0 : i32
    %c0_i32_0 = arith.constant 0 : i32
    %c0_i32_1 = arith.constant 0 : i32
    return %c0_i32, %c0_i32_0 : i32, i32
  }
  func.func @transform_14(%arg0: i32, %arg1: i32) -> (i32, i32) {
    %c0_i32 = arith.constant 0 : i32
    %c0_i32_0 = arith.constant 0 : i32
    %c0_i32_1 = arith.constant 0 : i32
    return %c0_i32, %c0_i32_0 : i32, i32
  }
  func.func @transform_15(%arg0: i32, %arg1: i32) -> (i32, i32) {
    %c0_i32 = arith.constant 0 : i32
    %c0_i32_0 = arith.constant 0 : i32
    %c0_i32_1 = arith.constant 0 : i32
    return %c0_i32, %c0_i32_0 : i32, i32
  }
  func.func @transform_16(%arg0: i32, %arg1: i32) -> (i32, i32) {
    %c0_i32 = arith.constant 0 : i32
    %c0_i32_0 = arith.constant 0 : i32
    %c0_i32_1 = arith.constant 0 : i32
    return %c0_i32, %c0_i32_0 : i32, i32
  }
  func.func @transform_17(%arg0: i32, %arg1: i32) -> (i32, i32, i32) {
    %c0_i32 = arith.constant 0 : i32
    %c0_i32_0 = arith.constant 0 : i32
    %c0_i32_1 = arith.constant 0 : i32
    return %arg0, %c0_i32, %c0_i32_0 : i32, i32, i32
  }
}

</mosaic_0001>

<bundles_post_ra>
// kernel: tpu_custom_call.1
= control target key start
LH: loop header
LB: loop body
LE: loop exit
PB: predicated region body
PF: predicated region fallthrough
CT: control target
= control target key end

     0   :  { %s12832_s0 = inlined_call_operand.vmem [shape: f32[2,3,128], index: 0, kind: input, shape index: {}]   ;;  %s12833_s1 = inlined_call_operand.vmem [shape: f32[64,3], index: 1, kind: input, shape index: {}]   ;;  %s12834_s2 = inlined_call_operand.vmem [shape: f32[64,1], index: 2, kind: input, shape index: {}]   ;;  %s12835_s3 = inlined_call_operand.vmem [shape: bf16[64,64], index: 3, kind: input, shape index: {}]   ;;  %s12836_s4 = inlined_call_operand.vmem [shape: f32[64,1], index: 4, kind: input, shape index: {}]   ;;  %s12837_s5 = inlined_call_operand.vmem [shape: bf16[64,64], index: 5, kind: input, shape index: {}]   ;;  %s12838_s6 = inlined_call_operand.vmem [shape: f32[64,1], index: 6, kind: input, shape index: {}]   ;;  %s12839_s7 = inlined_call_operand.vmem [shape: bf16[128,64], index: 7, kind: input, shape index: {}]   ;;  %s12840_s8 = inlined_call_operand.vmem [shape: f32[128,1], index: 8, kind: input, shape index: {}]   ;;  %s12841_s9 = inlined_call_operand.hbm [shape: bf16[1024,128], index: 9, kind: input, shape index: {}]   ;;  %s12842_s10 = inlined_call_operand.vmem [shape: f32[1024,1], index: 10, kind: input, shape index: {}]   ;;  %s12843_s11 = inlined_call_operand.vmem [shape: bf16[512,1024], index: 11, kind: input, shape index: {}]   ;;  %s12844_s12 = inlined_call_operand.vmem [shape: f32[512,1], index: 12, kind: input, shape index: {}]   ;;  %s12845_s13 = inlined_call_operand.hbm [shape: bf16[256,512], index: 13, kind: input, shape index: {}]   ;;  %s12846_s14 = inlined_call_operand.vmem [shape: f32[256,1], index: 14, kind: input, shape index: {}]   ;;  %s12847_s15 = inlined_call_operand.vmem [shape: bf16[40,256], index: 15, kind: input, shape index: {}]   ;;  %s12848_s16 = inlined_call_operand.vmem [shape: f32[40,1], index: 16, kind: input, shape index: {}]   ;;  %s12849_s17 = inlined_call_operand.vmem [shape: f32[2,40,1], index: 17, kind: output, shape index: {}]  }
   0x1   :  { %12856 = sst [smem:[#allocation33_spill]] %s12832_s0 }
   0x2   :  { %12857 = sst [smem:[#allocation34_spill]] %s12833_s1 }
   0x3   :  { %22 = vsyncpa [#allocation4], 0 }
   0x4   :  { %23 = vsyncpa [#allocation6], 0  ;;  %s9635_s24 = smov 0   ;;  %s9637_s25 = smov 0  }
   0x5   :  { %s9639_s26 = smov 0  }
   0x6 LB: > { %12858 = sst [smem:[#allocation9_spill]] %s9530_s25  ;;  %s8207_s27 = sadd.s32 4294967295, %s9534_s26   ;;  %s9534_s26 = sphi %s9639_s26, %s29_s26   ;;  %s9530_s25 = sphi %s9637_s25, %s12957_s25   ;;  %s9526_s24 = sphi %s9635_s24, %s12956_s24  }
   0x7   : > { %12859 = sst [smem:[#allocation10_spill]] %s9534_s26  ;;  %s41_s28 = sadd.s32 1, %s9530_s25 }
   0x8   : > { %p43_p0 = scmp.ge.s32.totalorder %s41_s28, 2  ;;  %p8209_p1 = scmp.ge.s32.totalorder %s9534_s26, 1 }
   0x9   : > { %p436_p2 = scmp.lt.s32.totalorder %s9534_s26, 3  ;;  %p9660_p4 = scmp.eq.s32.totalorder %s8207_s27, 0 }
   0xa   : > { %s12959_s28 = smov (%p43_p0, %s41_s28), 0  ;;  %s9536_s30 = smov [#allocation3]  }
   0xb   : > { %12860 = sst [smem:[#allocation11_spill]] %s12959_s28  ;;  %p9656_p3 = pnand %p8209_p1, %p436_p2 }
   0xc   : > { %s472_s18 = sshll.u32 %s9536_s30, 4  ;;  %s9537_s1 = smov [#allocation5]   ;;  %s473_s18 = int_to_ptr.vmem [resolvable:$true] %s472_s18 }
   0xd   : > { %p9209_p5 = pneg %p9656_p3  ;;  %s494_s20 = sshll.u32 %s9537_s1, 4  ;;  %s495_s20 = int_to_ptr.vmem [resolvable:$true] %s494_s20 }
   0xe   : > { %s9463_s21 = scalar_lea.vmem %s473_s18, 8192  ;;  %p9471_p11 = scmp.lt.s32.totalorder %s473_s18, %s473_s18 }
   0xf   : > { %p9668_p6 = pnand %p9660_p4, %p9209_p5  ;;  %p9464_p8 = scmp.ne.s32.totalorder %s473_s18, %s9463_s21 }
  0x10   : > { %p9472_p12 = scmp.lt.s32.totalorder %s9463_s21, %s9463_s21 }
  0x11   : > { %p9454_p7 = pneg %p9668_p6 }
  0x12   : > { %p9473_p13 = por %p9472_p12, %p9471_p11 }
  0x13   : > { %p9466_p9 = pnand %p9464_p8, %p9454_p7 }
  0x15   : > { %p9467_p10 = pneg %p9466_p9 }
  0x17   : > { %p9474_p0 = pnand %p9473_p13, %p9467_p10 }
  0x19   : > { %9477 = shalt.err (!%p9474_p0)
}
  0x1a   : > { %s9538_s22 = smov 64   ;;  %s9539_s23 = smov 4  }
  0x1b   : > { %9212 = dma.hbm_to_vmem [thread:$0]  (!%p9668_p6), %s12841_s9, 8192, %s473_s18, [#allocation4], %s9538_s22, %s9538_s22, %s9539_s23  }
  0x1c   : > { %s9489_s1 = scalar_lea.vmem %s495_s20, 8192  ;;  %p9497_p8 = scmp.lt.s32.totalorder %s495_s20, %s495_s20 }
  0x1d   : > { %p9490_p1 = scmp.ne.s32.totalorder %s495_s20, %s9489_s1  ;;  %p9498_p9 = scmp.lt.s32.totalorder %s9489_s1, %s9489_s1 }
  0x1f   : > { %p9492_p2 = pnand %p9490_p1, %p9454_p7  ;;  %p9499_p11 = por %p9498_p9, %p9497_p8 }
  0x21   : > { %p9493_p5 = pneg %p9492_p2 }
  0x23   : > { %p9500_p10 = pnand %p9499_p11, %p9493_p5 }
  0x25   : > { %9503 = shalt.err (!%p9500_p10)
}
  0x26   : > { %s9540_s21 = smov 256   ;;  %s9541_s28 = smov 16  }
  0x27   : > { %9215 = dma.hbm_to_vmem [thread:$0]  (!%p9668_p6), %s12845_s13, 8192, %s495_s20, [#allocation6], %s9540_s21, %s9540_s21, %s9541_s28  }
  0x28   : > { %529 = sbr.rel (%p9656_p3) target bundleno = 2823 (0xb07), region = 88 }
  0x2d   : > { %9517 = dma.done.wait (%p9660_p4), [#allocation4], 8192  }
  0x2e   : > { %9519 = vsyncadd (%p9660_p4), [#allocation4], 4294959104 }
  0x2f   : > { %9521 = dma.done.wait (%p9660_p4), [#allocation6], 8192  }
  0x30   : > { %9523 = vsyncadd (%p9660_p4), [#allocation6], 4294959104  ;;  %v9542_v0 = vmov 2   ;;  %v9543_v1 = vmov 1   ;;  %s12864_s28 = sld [smem:[#allocation34_spill]]  ;;  %v12853_v7 = vmov 0   ;;  %v781_v60 = vlaneseq }
  0x31   : > { %9254 = vset.pattern.permute.xlu0 %v9542_v0  ;;  %9253 = vset.pattern.permute.xlu1 %v9543_v1  ;;  %v903_v10 = vld [vmem:[%s12834_s2 + $0x30] sm:$0xff]  ;;  %v904_v11 = vld [vmem:[%s12834_s2 + $0x38] sm:$0xff]  ;;  %v898_v14 = vld [vmem:[%s12834_s2 + $0x8] sm:$0xff]  ;;  %vm1041_vm0 = vcmask 523264   ;;  %p587_p3 = scmp.lt.s32.totalorder %s9526_s24, 1  ;;  %s12865_s20 = sld [smem:[#allocation33_spill]] }
  0x32   : > { %v899_v13 = vld [vmem:[%s12834_s2 + $0x10] sm:$0xff]  ;;  %v980_v15 = vld [vmem:[%s12836_s4 + $0x38] sm:$0xff]  ;;  %v978_v16 = vld [vmem:[%s12836_s4 + $0x28] sm:$0xff]  ;;  %vm8112_vm1 = vcmask 7168  }
  0x33   : > { %v901_v17 = vld [vmem:[%s12834_s2 + $0x20] sm:$0xff]  ;;  %v976_v18 = vld [vmem:[%s12836_s4 + $0x18] sm:$0xff]  ;;  %v902_v19 = vld [vmem:[%s12834_s2 + $0x28] sm:$0xff]  ;;  %s12961_s24 = smov (!%p587_p3, %s9526_s24), 1 }
  0x34   : > { %v974_v20 = vld [vmem:[%s12836_s4 + $0x8] sm:$0xff]  ;;  %v1146_v21 = vld [vmem:[%s12838_s6 + $0x38] sm:$0xff]  ;;  %v897_v28 = vld [vmem:[%s12834_s2] sm:$0xff]  ;;  %s8216_s25 = sshll.u32 %s12961_s24, 2  ;;  %s9200_s1 = smul.u32 40, %s12961_s24 }
  0x35   : > { %v1144_v22 = vld [vmem:[%s12838_s6 + $0x28] sm:$0xff]  ;;  %v1142_v23 = vld [vmem:[%s12838_s6 + $0x18] sm:$0xff]  ;;  %v979_v30 = vld [vmem:[%s12836_s4 + $0x30] sm:$0xff] }
  0x36   : > { %v739_v2 = vld [vmem:[%s12864_s28 + $0x30] sm:$0xff]  ;;  %v740_v3 = vld [vmem:[%s12864_s28 + $0x38] sm:$0xff]  ;;  %v737_v4 = vld [vmem:[%s12864_s28 + $0x20] sm:$0xff]  ;;  %s598_s18 = scalar_lea.vmem %s12849_s17, %s9200_s1 }
  0x37   : > { %870 = vperm.xlu0 %9254, %v739_v2   ;;  %818 = vperm.xlu1 %9253, %v739_v2   ;;  %v736_v5 = vld [vmem:[%s12864_s28 + $0x18] sm:$0xff]  ;;  %v735_v6 = vld [vmem:[%s12864_s28 + $0x10] sm:$0xff]  ;;  %v734_v8 = vld [vmem:[%s12864_s28 + $0x8] sm:$0xff]  ;;  %s593_s0 = scalar_lea.vmem %s12865_s20, %s8216_s25 }
  0x38   : > { %v738_v9 = vld [vmem:[%s12864_s28 + $0x28] sm:$0xff]  ;;  %v733_v12 = vld [vmem:[%s12864_s28] sm:$0xff]  ;;  %v1327_v25 = vld [vmem:[%s12840_s8 + $0x78] sm:$0xff] }
  0x39   : > { %v1140_v24 = vld [vmem:[%s12838_s6 + $0x8] sm:$0xff]  ;;  %v900_v26 = vld [vmem:[%s12834_s2 + $0x18] sm:$0xff]  ;;  %v9268_v32 = vld [vmem:[%s12835_s3] sm:$0xff]  }
  0x3a   : > { %v1325_v27 = vld [vmem:[%s12840_s8 + $0x68] sm:$0xff]  ;;  %v1323_v29 = vld [vmem:[%s12840_s8 + $0x58] sm:$0xff]  ;;  %v977_v33 = vld [vmem:[%s12836_s4 + $0x20] sm:$0xff]  ;;  %9008 = vmatprep.mubr.msk.bf16.mxu1 %vm1041_vm0, %v9268_v32 }
  0x3b   : > { %822 = vperm.xlu1 %9253, %v740_v3   ;;  %862 = vperm.xlu0 %9254, %v737_v4   ;;  %v1321_v31 = vld [vmem:[%s12840_s8 + $0x48] sm:$0xff]  ;;  %v1319_v34 = vld [vmem:[%s12840_s8 + $0x38] sm:$0xff]  ;;  %v975_v35 = vld [vmem:[%s12836_s4 + $0x10] sm:$0xff] }
  0x3c   : > { %v1317_v36 = vld [vmem:[%s12840_s8 + $0x28] sm:$0xff]  ;;  %v973_v37 = vld [vmem:[%s12836_s4] sm:$0xff]  ;;  %v1315_v38 = vld [vmem:[%s12840_s8 + $0x18] sm:$0xff] }
  0x3d   : > { %v1145_v39 = vld [vmem:[%s12838_s6 + $0x30] sm:$0xff]  ;;  %v1313_v40 = vld [vmem:[%s12840_s8 + $0x8] sm:$0xff]  ;;  %v1143_v41 = vld [vmem:[%s12838_s6 + $0x20] sm:$0xff] }
  0x3e   : > { %v1736_v42 = vld [vmem:[%s12842_s10 + $0x78] sm:$0xff]  ;;  %v1141_v43 = vld [vmem:[%s12838_s6 + $0x10] sm:$0xff]  ;;  %v1139_v45 = vld [vmem:[%s12838_s6] sm:$0xff] }
  0x3f   : > { %9255 = vset.pattern.permute.xlu1 %v9542_v0  ;;  %858 = vperm.xlu0 %9254, %v736_v5   ;;  %v1768_v44 = vld [vmem:[%s12842_s10 + $0x178] sm:$0xff]  ;;  %v1734_v46 = vld [vmem:[%s12842_s10 + $0x68] sm:$0xff]  ;;  %v1326_v47 = vld [vmem:[%s12840_s8 + $0x70] sm:$0xff] }
  0x40   : > { %874 = vperm.xlu1 %9255, %v740_v3   ;;  %v1766_v50 = vld [vmem:[%s12842_s10 + $0x168] sm:$0xff]  ;;  %v1324_v51 = vld [vmem:[%s12840_s8 + $0x60] sm:$0xff]  ;;  %v1732_v54 = vld [vmem:[%s12842_s10 + $0x58] sm:$0xff] }
  0x41   : > { %v1322_v55 = vld [vmem:[%s12840_s8 + $0x50] sm:$0xff]  ;;  %v1764_v57 = vld [vmem:[%s12842_s10 + $0x158] sm:$0xff]  ;;  %v1320_v59 = vld [vmem:[%s12840_s8 + $0x40] sm:$0xff] }
  0x42   : > { %v1730_v61 = vld [vmem:[%s12842_s10 + $0x48] sm:$0xff]  ;;  %v1318_v63 = vld [vmem:[%s12840_s8 + $0x30] sm:$0xff] }
  0x43   : > { %9262 = vset.pattern.permute.xlu0 %v9543_v1 }
  0x44   : > { %9256 = vset.pattern.permute.xlu1 %v12853_v7  ;;  %802 = vperm.xlu0 %9262, %v735_v6  }
  0x45   : > { %763 = vperm.xlu1 %9256, %v737_v4  }
  0x48   : > { %798 = vperm.xlu0 %9262, %v734_v8  }
  0x49   : > { %9257 = vset.pattern.permute.xlu1 %v9543_v1 }
  0x4a   : > { %810 = vperm.xlu1 %9257, %v737_v4   ;;  %v1316_v4 = vld [vmem:[%s12840_s8 + $0x20] sm:$0xff] }
  0x4c   : > { %9265 = vset.pattern.permute.xlu0 %v12853_v7 }
  0x4d   : > { %773 = vperm.xlu0 %9265, %v739_v2   ;;  %v1762_v2 = vld [vmem:[%s12842_s10 + $0x148] sm:$0xff] }
  0x4e   : > { %814 = vperm.xlu1 %9257, %v738_v9  }
  0x51   : > { %778 = vperm.xlu0 %9265, %v740_v3  }
  0x52   : > { %9258 = vset.pattern.permute.xlu1 %v9542_v0 }
  0x53   : > { %866 = vperm.xlu1 %9258, %v738_v9  }
  0x55   : > { %768 = vperm.xlu0 %9265, %v738_v9  }
  0x57   : > { %9259 = vset.pattern.permute.xlu1 %v12853_v7 }
  0x58   : > { %937 = vperm.xlu1 %9259, %v903_v10   ;;  %v1728_v10 = vld [vmem:[%s12842_s10 + $0x38] sm:$0xff] }
  0x59   : > { %942 = vperm.xlu0 %9265, %v904_v11   ;;  %v1314_v11 = vld [vmem:[%s12840_s8 + $0x10] sm:$0xff] }
  0x5c   : > { %753 = vperm.xlu1 %9259, %v735_v6  }
  0x5d   : > { %743 = vperm.xlu0 %9265, %v733_v12  }
  0x60   : > { %758 = vperm.xlu1 %9259, %v736_v5  }
  0x61   : > { %917 = vperm.xlu0 %9265, %v899_v13  }
  0x64   : > { %9260 = vset.pattern.permute.xlu1 %v9543_v1 }
  0x65   : > { %806 = vperm.xlu1 %9260, %v736_v5   ;;  %912 = vperm.xlu0 %9265, %v898_v14  }
  0x69   : > { %9261 = vset.pattern.permute.xlu1 %v9542_v0  ;;  %1018 = vperm.xlu0 %9265, %v980_v15  }
  0x6a   : > { %854 = vperm.xlu1 %9261, %v735_v6  }
  0x6d   : > { %1008 = vperm.xlu0 %9265, %v978_v16  }
  0x6e   : > { %9263 = vset.pattern.permute.xlu1 %v12853_v7 }
  0x6f   : > { %927 = vperm.xlu1 %9263, %v901_v17  }
  0x71   : > { %998 = vperm.xlu0 %9265, %v976_v18   ;;  %v1760_v18 = vld [vmem:[%s12842_s10 + $0x138] sm:$0xff] }
  0x73   : > { %932 = vperm.xlu1 %9263, %v902_v19   ;;  %v1312_v19 = vld [vmem:[%s12840_s8] sm:$0xff] }
  0x75   : > { %988 = vperm.xlu0 %9265, %v974_v20  }
  0x77   : > { %748 = vperm.xlu1 %9263, %v734_v8  }
  0x79   : > { %1184 = vperm.xlu0 %9265, %v1146_v21  }
  0x7b   : > { %9264 = vset.pattern.permute.xlu1 %v9543_v1 }
  0x7c   : > { %794 = vperm.xlu1 %9264, %v733_v12  }
  0x7d   : > { %1174 = vperm.xlu0 %9265, %v1144_v22  }
  0x80   : > { %9266 = vset.pattern.permute.xlu1 %v9542_v0  ;;  %v782_v0 = vshrl.u32 %v781_v60, 7 }
  0x81   : > { %1164 = vperm.xlu0 %9265, %v1142_v23   ;;  %846 = vperm.xlu1 %9266, %v733_v12  }
  0x82   : > { %v827_v5 = vsub.s32 1, %v782_v0  ;;  %v783_v6 = vsub.s32 0, %v782_v0  ;;  %v879_v13 = vsub.s32 2, %v782_v0 }
  0x85   : > { %1154 = vperm.xlu0 %9265, %v1140_v24   ;;  %850 = vperm.xlu1 %9266, %v734_v8   ;;  %v732_v8 = vld [vmem:[%s593_s0] sm:$0x7] }
  0x86   : > { %v9907_v12 = vrot.slane %v732_v8, %v827_v5  ;;  %v9909_v14 = vrot.slane %v732_v8, %v783_v6  ;;  %v9921_v21 = vrot.slane %v732_v8, %v879_v13  ;;  %v1784_v6 = vld [vmem:[%s12842_s10 + $0x1f8] sm:$0xff] }
  0x89   : > { %1405 = vperm.xlu0 %9265, %v1327_v25   ;;  %9267 = vset.pattern.permute.xlu1 %v12853_v7 }
  0x8a   : > { %922 = vperm.xlu1 %9267, %v900_v26  }
  0x8d   : > { %1395 = vperm.xlu0 %9265, %v1325_v27  }
  0x8e   : > { %907 = vperm.xlu1 %9267, %v897_v28   ;;  %v1726_v28 = vld [vmem:[%s12842_s10 + $0x28] sm:$0xff] }
  0x91   : > { %1385 = vperm.xlu0 %9265, %v1323_v29  }
  0x92   : > { %1013 = vperm.xlu1 %9267, %v979_v30   ;;  %v1735_v30 = vld [vmem:[%s12842_s10 + $0x70] sm:$0xff] }
  0x95   : > { %1375 = vperm.xlu0 %9265, %v1321_v31  }
  0x96   : > { %1003 = vperm.xlu1 %9267, %v977_v33  }
  0x99   : > { %1365 = vperm.xlu0 %9265, %v1319_v34   ;;  %v1758_v34 = vld [vmem:[%s12842_s10 + $0x128] sm:$0xff] }
  0x9a   : > { %993 = vperm.xlu1 %9267, %v975_v35  }
  0x9d   : > { %1355 = vperm.xlu0 %9265, %v1317_v36  }
  0x9e   : > { %983 = vperm.xlu1 %9267, %v973_v37   ;;  %v1767_v37 = vld [vmem:[%s12842_s10 + $0x170] sm:$0xff] }
  0xa1   : > { %1345 = vperm.xlu0 %9265, %v1315_v38  }
  0xa2   : > { %1179 = vperm.xlu1 %9267, %v1145_v39  }
  0xa5   : > { %1335 = vperm.xlu0 %9265, %v1313_v40  }
  0xa6   : > { %1169 = vperm.xlu1 %9267, %v1143_v41  }
  0xa9   : > { %1926 = vperm.xlu0 %9265, %v1736_v42   ;;  %v1724_v42 = vld [vmem:[%s12842_s10 + $0x18] sm:$0xff] }
  0xaa   : > { %1159 = vperm.xlu1 %9267, %v1141_v43  }
  0xad   : > { %2086 = vperm.xlu0 %9265, %v1768_v44  }
  0xae   : > { %1149 = vperm.xlu1 %9267, %v1139_v45   ;;  %v1733_v45 = vld [vmem:[%s12842_s10 + $0x60] sm:$0xff] }
  0xb1   : > { %1916 = vperm.xlu0 %9265, %v1734_v46  }
  0xb2   : > { %v819_v48 = vpop.permute.xlu1 %818  ;;  %1400 = vperm.xlu1 %9267, %v1326_v47   ;;  %v871_v49 = vpop.permute.xlu0 %870  ;;  %v1756_v47 = vld [vmem:[%s12842_s10 + $0x118] sm:$0xff] }
  0xb3   : > { %v835_v20 = vmul.f32 %v9907_v12, %v819_v48  ;;  %v887_v25 = vmul.f32 %v9921_v21, %v871_v49  ;;  %v1765_v49 = vld [vmem:[%s12842_s10 + $0x160] sm:$0xff] }
  0xb5   : > { %2076 = vperm.xlu0 %9265, %v1766_v50   ;;  %v1722_v50 = vld [vmem:[%s12842_s10 + $0x8] sm:$0xff] }
  0xb6   : > { %v823_v52 = vpop.permute.xlu1 %822  ;;  %1390 = vperm.xlu1 %9267, %v1324_v51   ;;  %v9857_v53 = vpop.permute.xlu0 %862  ;;  %v1731_v51 = vld [vmem:[%s12842_s10 + $0x50] sm:$0xff] }
  0xb7   : > { %v836_v23 = vmul.f32 %v9907_v12, %v823_v52 }
  0xb9   : > { %1906 = vperm.xlu0 %9265, %v1732_v54   ;;  %v1754_v54 = vld [vmem:[%s12842_s10 + $0x108] sm:$0xff] }
  0xba   : > { %1380 = vperm.xlu1 %9267, %v1322_v55   ;;  %v9866_v56 = vpop.permute.xlu0 %858 }
  0xbb   : > { %v875_v58 = vpop.permute.xlu1 %874 }
  0xbc   : > { %v888_v32 = vmul.f32 %v9921_v21, %v875_v58 }
  0xbd   : > { %2066 = vperm.xlu0 %9265, %v1764_v57   ;;  %v1763_v57 = vld [vmem:[%s12842_s10 + $0x150] sm:$0xff] }
  0xbe   : > { %1370 = vperm.xlu1 %9267, %v1320_v59  }
  0xbf   : > { %v9881_v62 = vpop.permute.xlu0 %802 }
  0xc0   : > { %v9886_v1 = vpop.permute.xlu1 %763 }
  0xc1   : > { %1896 = vperm.xlu0 %9265, %v1730_v61   ;;  %v789_v58 = vmul.f32 %v9909_v14, %v9886_v1  ;;  %v1752_v61 = vld [vmem:[%s12842_s10 + $0xf8] sm:$0xff]  ;;  %v1729_v1 = vld [vmem:[%s12842_s10 + $0x40] sm:$0xff] }
  0xc2   : > { %1360 = vperm.xlu1 %9267, %v1318_v63   ;;  %v885_v63 = vmul.f32 %v9921_v21, %v9857_v53  ;;  %v1761_v53 = vld [vmem:[%s12842_s10 + $0x140] sm:$0xff] }
  0xc3   : > { %v9894_v3 = vpop.permute.xlu0 %798 }
  0xc5   : > { %v9899_v9 = vpop.permute.xlu1 %810  ;;  %2056 = vperm.xlu0 %9265, %v1762_v2  }
  0xc6   : > { %1350 = vperm.xlu1 %9267, %v1316_v4   ;;  %v833_v55 = vmul.f32 %v9907_v12, %v9899_v9 }
  0xc8   : > { %v774_v15 = vpop.permute.xlu0 %773  ;;  %v841_v0 = vadd.f32 %v833_v55, %v789_v58  ;;  %v1744_v58 = vld [vmem:[%s12842_s10 + $0xb8] sm:$0xff] }
  0xc9   : > { %v9911_v16 = vpop.permute.xlu1 %814  ;;  %1886 = vperm.xlu0 %9265, %v1728_v10   ;;  %v791_v17 = vmul.f32 %v9909_v14, %v774_v15  ;;  %v1750_v15 = vld [vmem:[%s12842_s10 + $0xe8] sm:$0xff] }
  0xca   : > { %1340 = vperm.xlu1 %9267, %v1314_v11   ;;  %v834_v2 = vmul.f32 %v9907_v12, %v9911_v16  ;;  %v893_v9 = vadd.f32 %v885_v63, %v841_v0 }
  0xcb   : > { %v843_v26 = vadd.f32 %v835_v20, %v791_v17  ;;  %v1727_v17 = vld [vmem:[%s12842_s10 + $0x30] sm:$0xff] }
  0xcc   : > { %v779_v22 = vpop.permute.xlu0 %778 }
  0xcd   : > { %v792_v24 = vmul.f32 %v9909_v14, %v779_v22  ;;  %2046 = vperm.xlu0 %9265, %v1760_v18   ;;  %v895_v33 = vadd.f32 %v887_v25, %v843_v26  ;;  %v1782_v22 = vld [vmem:[%s12842_s10 + $0x1e8] sm:$0xff]  ;;  %v1748_v25 = vld [vmem:[%s12842_s10 + $0xd8] sm:$0xff] }
  0xce   : > { %v867_v27 = vpop.permute.xlu1 %866  ;;  %1330 = vperm.xlu1 %9267, %v1312_v19  }
  0xcf   : > { %v844_v29 = vadd.f32 %v836_v23, %v792_v24  ;;  %v886_v8 = vmul.f32 %v9921_v21, %v867_v27  ;;  %v1759_v24 = vld [vmem:[%s12842_s10 + $0x130] sm:$0xff]  ;;  %v1725_v27 = vld [vmem:[%s12842_s10 + $0x20] sm:$0xff] }
  0xd0   : > { %v769_v31 = vpop.permute.xlu0 %768 }
  0xd1   : > { %1876 = vperm.xlu0 %9265, %v1726_v28   ;;  %v896_v36 = vadd.f32 %v888_v32, %v844_v29  ;;  %v790_v59 = vmul.f32 %v9909_v14, %v769_v31  ;;  %v831_v28 = vmul.f32 %v9907_v12, %v9881_v62  ;;  %v1757_v32 = vld [vmem:[%s12842_s10 + $0x120] sm:$0xff] }
  0xd2   : > { %1921 = vperm.xlu1 %9267, %v1735_v30   ;;  %v1780_v30 = vld [vmem:[%s12842_s10 + $0x1d8] sm:$0xff] }
  0xd3   : > { %v938_v35 = vpop.permute.xlu1 %937  ;;  %v842_v4 = vadd.f32 %v834_v2, %v790_v59 }
  0xd4   : > { %v951_v38 = vadd.f32 %v938_v35, %v895_v33  ;;  %v943_v39 = vpop.permute.xlu0 %942 }
  0xd5   : > { %v952_v40 = vadd.f32 %v943_v39, %v896_v36  ;;  %2036 = vperm.xlu0 %9265, %v1758_v34   ;;  %v894_v11 = vadd.f32 %v886_v8, %v842_v4  ;;  %v1723_v39 = vld [vmem:[%s12842_s10 + $0x10] sm:$0xff]  ;;  %v1776_v4 = vld [vmem:[%s12842_s10 + $0x1b8] sm:$0xff] }
  0xd6   : > { %v959_v41 = vmax.f32 %v951_v38, 0.0  ;;  %2081 = vperm.xlu1 %9267, %v1767_v37   ;;  %v1746_v38 = vld [vmem:[%s12842_s10 + $0xc8] sm:$0xff] }
  0xd7   : > { %v960_v43 = vmax.f32 %v952_v40, 0.0  ;;  %v9942_v44 = vpop.permute.xlu1 %753  ;;  %v830_v40 = vmul.f32 %v9907_v12, %v9894_v3 }
  0xd8   : > { %v787_v29 = vmul.f32 %v9909_v14, %v9942_v44  ;;  %v744_v31 = vpop.permute.xlu0 %743 }
  0xd9   : > { %1866 = vperm.xlu0 %9265, %v1724_v42   ;;  %v972_v46 = vpack.c.bf16 %v960_v43, %v959_v41  ;;  %v785_v3 = vmul.f32 %v9909_v14, %v744_v31  ;;  %v1777_v31 = vld [vmem:[%s12842_s10 + $0x1c0] sm:$0xff] }
  0xda   : > { %1911 = vperm.xlu1 %9267, %v1733_v45   ;;  %v839_v62 = vadd.f32 %v831_v28, %v787_v29  ;;  %v1745_v29 = vld [vmem:[%s12842_s10 + $0xc0] sm:$0xff] }
  0xdb   : > { %v9950_v48 = vpop.permute.xlu1 %758  ;;  %9000 = vmatprep.subr.bf16.mxu1 %v972_v46 }
  0xdc   : > { %9001 = vmatpush3.bf16.msra.mxu1 %v972_v46  ;;  %v788_v36 = vmul.f32 %v9909_v14, %v9950_v48  ;;  %v918_v44 = vpop.permute.xlu0 %917  ;;  %v884_v46 = vmul.f32 %v9921_v21, %v9866_v56 }
  0xdd   : > { %2026 = vperm.xlu0 %9265, %v1756_v47  }
  0xde   : > { %2071 = vperm.xlu1 %9267, %v1765_v49   ;;  %v1778_v49 = vld [vmem:[%s12842_s10 + $0x1c8] sm:$0xff] }
  0xe0   : > { %v807_v52 = vpop.permute.xlu1 %806  ;;  %v913_v59 = vpop.permute.xlu0 %912 }
  0xe1   : > { %1856 = vperm.xlu0 %9265, %v1722_v50   ;;  %v832_v33 = vmul.f32 %v9907_v12, %v807_v52  ;;  %v1755_v50 = vld [vmem:[%s12842_s10 + $0x110] sm:$0xff] }
  0xe2   : > { %1901 = vperm.xlu1 %9267, %v1731_v51  }
  0xe3   : > { %v840_v41 = vadd.f32 %v832_v33, %v788_v36  ;;  %v1798_v33 = vld [vmem:[%s12842_s10 + $0x268] sm:$0xff]  ;;  %v1775_v36 = vld [vmem:[%s12842_s10 + $0x1b0] sm:$0xff] }
  0xe4   : > { %v1019_v28 = vpop.permute.xlu0 %1018 }
  0xe5   : > { %v855_v60 = vpop.permute.xlu1 %854  ;;  %2016 = vperm.xlu0 %9265, %v1754_v54   ;;  %v892_v55 = vadd.f32 %v884_v46, %v840_v41  ;;  %v1739_v41 = vld [vmem:[%s12842_s10 + $0x90] sm:$0xff] }
  0xe6   : > { %2061 = vperm.xlu1 %9267, %v1763_v57   ;;  %v883_v34 = vmul.f32 %v9921_v21, %v855_v60 }
  0xe8   : > { %v891_v42 = vadd.f32 %v883_v34, %v839_v62  ;;  %v1743_v34 = vld [vmem:[%s12842_s10 + $0xb0] sm:$0xff] }
  0xe9   : > { %2006 = vperm.xlu0 %9265, %v1752_v61  }
  0xea   : > { %v928_v5 = vpop.permute.xlu1 %927  ;;  %1891 = vperm.xlu1 %9267, %v1729_v1   ;;  %v947_v51 = vadd.f32 %v918_v44, %v891_v42  ;;  %v1771_v42 = vld [vmem:[%s12842_s10 + $0x190] sm:$0xff]  ;;  %v1769_v44 = vld [vmem:[%s12842_s10 + $0x180] sm:$0xff] }
  0xeb   : > { %v949_v10 = vadd.f32 %v928_v5, %v893_v9  ;;  %v1753_v5 = vld [vmem:[%s12842_s10 + $0x100] sm:$0xff] }
  0xed   : > { %2166 = vperm.xlu0 %9265, %v1784_v6   ;;  %v957_v18 = vmax.f32 %v949_v10, 0.0  ;;  %v1751_v10 = vld [vmem:[%s12842_s10 + $0xf0] sm:$0xff] }
  0xee   : > { %v933_v13 = vpop.permute.xlu1 %932  ;;  %2051 = vperm.xlu1 %9267, %v1761_v53   ;;  %v1742_v53 = vld [vmem:[%s12842_s10 + $0xa8] sm:$0xff] }
  0xef   : > { %v950_v16 = vadd.f32 %v933_v13, %v894_v11  ;;  %v9269_v11 = vld [vmem:[%s12835_s3 + $0x8] sm:$0xff]   ;;  %v9270_v13 = vld [vmem:[%s12835_s3 + $0x10] sm:$0xff]  }
  0xf1   : > { %v958_v19 = vmax.f32 %v950_v16, 0.0  ;;  %1996 = vperm.xlu0 %9265, %v1750_v15   ;;  %v1774_v15 = vld [vmem:[%s12842_s10 + $0x1a8] sm:$0xff]  ;;  %v1783_v16 = vld [vmem:[%s12842_s10 + $0x1f0] sm:$0xff] }
  0xf2   : > { %v749_v20 = vpop.permute.xlu1 %748  ;;  %1881 = vperm.xlu1 %9267, %v1727_v17   ;;  %v1740_v17 = vld [vmem:[%s12842_s10 + $0x98] sm:$0xff] }
  0xf3   : > { %v971_v23 = vpack.c.bf16 %v958_v19, %v957_v18  ;;  %v786_v37 = vmul.f32 %v9909_v14, %v749_v20  ;;  %v1721_v14 = vld [vmem:[%s12842_s10] sm:$0xff]  ;;  %v9271_v19 = vld [vmem:[%s12835_s3 + $0x18] sm:$0xff]  }
  0xf4   : > { %v1749_v18 = vld [vmem:[%s12842_s10 + $0xe0] sm:$0xff]  ;;  %v1772_v20 = vld [vmem:[%s12842_s10 + $0x198] sm:$0xff] }
  0xf5   : > { %2156 = vperm.xlu0 %9265, %v1782_v22   ;;  %9002 = vmatprep.subr.bf16.mxu1 %v971_v23  ;;  %v838_v47 = vadd.f32 %v830_v40, %v786_v37  ;;  %v1781_v22 = vld [vmem:[%s12842_s10 + $0x1e0] sm:$0xff]  ;;  %v1796_v37 = vld [vmem:[%s12842_s10 + $0x258] sm:$0xff] }
  0xf6   : > { %2041 = vperm.xlu1 %9267, %v1759_v24   ;;  %9003 = vmatpush3.bf16.msra.mxu1 %v971_v23  ;;  %v1738_v23 = vld [vmem:[%s12842_s10 + $0x88] sm:$0xff]  ;;  %v1747_v24 = vld [vmem:[%s12842_s10 + $0xd0] sm:$0xff]  ;;  %v1773_v40 = vld [vmem:[%s12842_s10 + $0x1a0] sm:$0xff] }
  0xf7   : > { %v795_v26 = vpop.permute.xlu1 %794 }
  0xf8   : > { %v829_v48 = vmul.f32 %v9907_v12, %v795_v26  ;;  %v1779_v26 = vld [vmem:[%s12842_s10 + $0x1d0] sm:$0xff] }
  0xf9   : > { %1986 = vperm.xlu0 %9265, %v1748_v25   ;;  %v1770_v25 = vld [vmem:[%s12842_s10 + $0x188] sm:$0xff] }
  0xfa   : > { %1871 = vperm.xlu1 %9267, %v1725_v27   ;;  %v837_v57 = vadd.f32 %v829_v48, %v785_v3  ;;  %v1799_v27 = vld [vmem:[%s12842_s10 + $0x270] sm:$0xff]  ;;  %v1829_v3 = vld [vmem:[%s12842_s10 + $0x360] sm:$0xff] }
  0xfc   : > { %v847_v35 = vpop.permute.xlu1 %846 }
  0xfd   : > { %2146 = vperm.xlu0 %9265, %v1780_v30   ;;  %v881_v52 = vmul.f32 %v9921_v21, %v847_v35  ;;  %v1832_v30 = vld [vmem:[%s12842_s10 + $0x378] sm:$0xff]  ;;  %v1830_v35 = vld [vmem:[%s12842_s10 + $0x368] sm:$0xff] }
  0xfe   : > { %2031 = vperm.xlu1 %9267, %v1757_v32   ;;  %v1009_v32 = vpop.permute.xlu0 %1008 }
  0xff   : > { %v889_v63 = vadd.f32 %v881_v52, %v837_v57 }
 0x100   : > { %v851_v43 = vpop.permute.xlu1 %850 }
 0x101   : > { %v882_v45 = vmul.f32 %v9921_v21, %v851_v43  ;;  %1976 = vperm.xlu0 %9265, %v1746_v38   ;;  %v955_v21 = vmax.f32 %v947_v51, 0.0  ;;  %v1741_v38 = vld [vmem:[%s12842_s10 + $0xa0] sm:$0xff]  ;;  %v1795_v51 = vld [vmem:[%s12842_s10 + $0x250] sm:$0xff] }
 0x102   : > { %1861 = vperm.xlu1 %9267, %v1723_v39   ;;  %v999_v62 = vpop.permute.xlu0 %998  ;;  %v1737_v43 = vld [vmem:[%s12842_s10 + $0x80] sm:$0xff] }
 0x103   : > { %v890_v54 = vadd.f32 %v882_v45, %v838_v47  ;;  %v1800_v45 = vld [vmem:[%s12842_s10 + $0x278] sm:$0xff]  ;;  %v1831_v47 = vld [vmem:[%s12842_s10 + $0x370] sm:$0xff] }
 0x105   : > { %2136 = vperm.xlu0 %9265, %v1778_v49   ;;  %v923_v56 = vpop.permute.xlu1 %922  ;;  %v946_v60 = vadd.f32 %v913_v59, %v890_v54  ;;  %v1797_v49 = vld [vmem:[%s12842_s10 + $0x260] sm:$0xff] }
 0x106   : > { %v948_v12 = vadd.f32 %v923_v56, %v892_v55  ;;  %2021 = vperm.xlu1 %9267, %v1755_v50   ;;  %v989_v39 = vpop.permute.xlu0 %988  ;;  %v9272_v54 = vld [vmem:[%s12837_s5] sm:$0xff]  }
 0x107   : > { %v954_v8 = vmax.f32 %v946_v60, 0.0 }
 0x108   : > { %v956_v61 = vmax.f32 %v948_v12, 0.0 }
 0x109   : > { %1966 = vperm.xlu0 %9265, %v1744_v58   ;;  %v908_v0 = vpop.permute.xlu1 %907 }
 0x10a   : > { %v945_v2 = vadd.f32 %v908_v0, %v889_v63  ;;  %1851 = vperm.xlu1 %9267, %v1721_v14   ;;  %v970_v1 = vpack.c.bf16 %v956_v61, %v955_v21 }
 0x10c   : > { %v953_v6 = vmax.f32 %v945_v2, 0.0  ;;  %9004 = vmatprep.subr.bf16.mxu1 %v970_v1 }
 0x10d   : > { %2126 = vperm.xlu0 %9265, %v1776_v4   ;;  %9005 = vmatpush3.bf16.msra.mxu1 %v970_v1  ;;  %v1014_v46 = vpop.permute.xlu1 %1013 }
 0x10e   : > { %2011 = vperm.xlu1 %9267, %v1753_v5   ;;  %v969_v9 = vpack.c.bf16 %v954_v8, %v953_v6 }
 0x110   : > { %9006 = vmatprep.subr.bf16.mxu1 %v969_v9 }
 0x111   : > { %1956 = vperm.xlu0 %9265, %v1742_v53   ;;  %9007 = vmatpush3.bf16.msra.mxu1 %v969_v9  ;;  %v1004_v48 = vpop.permute.xlu1 %1003 }
 0x112   : > { %2001 = vperm.xlu1 %9267, %v1751_v10  }
 0x114   : > { %9009 = vmatmul.mubr.msk.bf16.vlgmr.msra.gmra.mxu1 %vm1041_vm0, %v9269_v11 }
 0x115   : > { %2116 = vperm.xlu0 %9265, %v1774_v15   ;;  %9012 = vmatprep.mubr.msk.bf16.mxu1 %vm1041_vm0, %v9270_v13  ;;  %v994_v50 = vpop.permute.xlu1 %993 }
 0x116   : > { %2161 = vperm.xlu1 %9267, %v1783_v16  }
 0x119   : > { %1946 = vperm.xlu0 %9265, %v1740_v17   ;;  %v984_v52 = vpop.permute.xlu1 %983 }
 0x11a   : > { %1991 = vperm.xlu1 %9267, %v1749_v18  }
 0x11c   : > { %9013 = vmatmul.mubr.msk.bf16.gmra.mxu1 %vm1041_vm0, %v9271_v19 }
 0x11d   : > { %2106 = vperm.xlu0 %9265, %v1772_v20   ;;  %9024 = vmatprep.mubr.msk.bf16.mxu1 %vm1041_vm0, %v9272_v54  ;;  %v9273_v20 = vld [vmem:[%s12837_s5 + $0x8] sm:$0xff]  }
 0x11e   : > { %2151 = vperm.xlu1 %9267, %v1781_v22   ;;  %v9274_v22 = vld [vmem:[%s12837_s5 + $0x10] sm:$0xff]  }
 0x121   : > { %1936 = vperm.xlu0 %9265, %v1738_v23   ;;  %v9275_v23 = vld [vmem:[%s12837_s5 + $0x18] sm:$0xff]  }
 0x122   : > { %1981 = vperm.xlu1 %9267, %v1747_v24   ;;  %v9276_v24 = vld [vmem:[%s12839_s7] sm:$0xff]  }
 0x123   : > { %9040 = vmatprep.mubr.msk.bf16.mxu0 %vm1041_vm0, %v9276_v24 }
 0x125   : > { %2096 = vperm.xlu0 %9265, %v1770_v25   ;;  %v1185_v25 = vpop.permute.xlu0 %1184 }
 0x126   : > { %2141 = vperm.xlu1 %9267, %v1779_v26  }
 0x129   : > { %2241 = vperm.xlu0 %9265, %v1799_v27   ;;  %v1180_v27 = vpop.permute.xlu1 %1179 }
 0x12a   : > { %1971 = vperm.xlu1 %9267, %v1745_v29  }
 0x12d   : > { %2406 = vperm.xlu0 %9265, %v1832_v30   ;;  %v1175_v30 = vpop.permute.xlu0 %1174 }
 0x12e   : > { %2131 = vperm.xlu1 %9267, %v1777_v31  }
 0x131   : > { %2236 = vperm.xlu0 %9265, %v1798_v33  }
 0x132   : > { %1961 = vperm.xlu1 %9267, %v1743_v34  }
 0x135   : > { %2396 = vperm.xlu0 %9265, %v1830_v35  }
 0x136   : > { %2121 = vperm.xlu1 %9267, %v1775_v36  }
 0x139   : > { %2226 = vperm.xlu0 %9265, %v1796_v37  }
 0x13a   : > { %1951 = vperm.xlu1 %9267, %v1741_v38  }
 0x13e   : > { %2111 = vperm.xlu1 %9267, %v1773_v40  }
 0x142   : > { %1941 = vperm.xlu1 %9267, %v1739_v41  }
 0x146   : > { %2101 = vperm.xlu1 %9267, %v1771_v42  }
 0x14a   : > { %1931 = vperm.xlu1 %9267, %v1737_v43  }
 0x14e   : > { %2091 = vperm.xlu1 %9267, %v1769_v44  }
 0x152   : > { %2246 = vperm.xlu1 %9267, %v1800_v45  }
 0x156   : > { %2401 = vperm.xlu1 %9267, %v1831_v47  }
 0x15a   : > { %2231 = vperm.xlu1 %9267, %v1797_v49  }
 0x15e   : > { %2391 = vperm.xlu1 %9267, %v1829_v3  }
 0x162   : > { %2221 = vperm.xlu1 %9267, %v1795_v51  }
 0x1d4   : > { %v9010_v55 = vpop.f32.mrf.mxu1 }
 0x1d5   : > { %v1097_v5 = vadd.f32 %v9010_v55, %v994_v50 }
 0x1d6   : > { %v1088_v56 = vpop.f32.mrf.mxu1 }
 0x1d7   : > { %v1121_v13 = vmax.f32 %v1097_v5, 0.0  ;;  %v1089_v15 = vadd.f32 %v1088_v56, %v984_v52 }
 0x1d8   : > { %v9011_v57 = vpop.f32.mrf.mxu1 }
 0x1d9   : > { %v1100_v0 = vadd.f32 %v9011_v57, %v999_v62  ;;  %v1119_v18 = vmax.f32 %v1089_v15, 0.0  ;;  %v1165_v62 = vpop.permute.xlu0 %1164 }
 0x1da   : > { %v1091_v12 = vpop.f32.mrf.mxu1 }
 0x1db   : > { %v1122_v53 = vmax.f32 %v1100_v0, 0.0  ;;  %v1092_v10 = vadd.f32 %v1091_v12, %v989_v39  ;;  %v9283_v0 = vld [vmem:[%s12839_s7 + $0x38] sm:$0xff]  }
 0x1dc   : > { %v9014_v58 = vpop.f32.mrf.mxu1 }
 0x1dd   : > { %v1113_v14 = vadd.f32 %v9014_v58, %v1014_v46  ;;  %v1136_v16 = vpack.c.bf16 %v1122_v53, %v1121_v13  ;;  %v1120_v17 = vmax.f32 %v1092_v10, 0.0  ;;  %v1155_v49 = vpop.permute.xlu0 %1154 }
 0x1de   : > { %v1104_v59 = vpop.f32.mrf.mxu1 }
 0x1df   : > { %v1105_v61 = vadd.f32 %v1104_v59, %v1004_v48  ;;  %v1125_v2 = vmax.f32 %v1113_v14, 0.0  ;;  %v1135_v19 = vpack.c.bf16 %v1120_v17, %v1119_v18  ;;  %v9277_v59 = vld [vmem:[%s12839_s7 + $0x8] sm:$0xff]   ;;  %v9278_v14 = vld [vmem:[%s12839_s7 + $0x10] sm:$0xff]  }
 0x1e0   : > { %v9015_v60 = vpop.f32.mrf.mxu1 }
 0x1e1   : > { %v1116_v63 = vadd.f32 %v9015_v60, %v1019_v28  ;;  %v1123_v6 = vmax.f32 %v1105_v61, 0.0  ;;  %v9279_v60 = vld [vmem:[%s12839_s7 + $0x18] sm:$0xff]   ;;  %v9280_v61 = vld [vmem:[%s12839_s7 + $0x20] sm:$0xff]  }
 0x1e2   : > { %v1107_v21 = vpop.f32.mrf.mxu1 }
 0x1e3   : > { %v1126_v1 = vmax.f32 %v1116_v63, 0.0  ;;  %v1108_v4 = vadd.f32 %v1107_v21, %v1009_v32  ;;  %v1170_v32 = vpop.permute.xlu1 %1169  ;;  %v9281_v63 = vld [vmem:[%s12839_s7 + $0x28] sm:$0xff]   ;;  %v9282_v21 = vld [vmem:[%s12839_s7 + $0x30] sm:$0xff]  }
 0x1e5   : > { %v1138_v8 = vpack.c.bf16 %v1126_v1, %v1125_v2  ;;  %v1124_v9 = vmax.f32 %v1108_v4, 0.0  ;;  %v9284_v2 = vld [vmem:[#allocation3] sm:$0xff]  }
 0x1e7   : > { %9016 = vmatprep.subr.bf16.mxu1 %v1138_v8  ;;  %v1137_v11 = vpack.c.bf16 %v1124_v9, %v1123_v6  ;;  %v1160_v39 = vpop.permute.xlu1 %1159 }
 0x1e8   : > { %9017 = vmatpush3.bf16.msra.mxu1 %v1138_v8  ;;  %v1406_v8 = vpop.permute.xlu0 %1405 }
 0x1e9   : > { %9018 = vmatprep.subr.bf16.mxu1 %v1137_v11 }
 0x1eb   : > { %v1150_v52 = vpop.permute.xlu1 %1149 }
 0x1ec   : > { %9019 = vmatpush3.bf16.msra.mxu1 %v1137_v11  ;;  %v1396_v13 = vpop.permute.xlu0 %1395 }
 0x1ed   : > { %9020 = vmatprep.subr.bf16.mxu1 %v1136_v16 }
 0x1ef   : > { %v1401_v53 = vpop.permute.xlu1 %1400 }
 0x1f0   : > { %9021 = vmatpush3.bf16.msra.mxu1 %v1136_v16 }
 0x1f1   : > { %9022 = vmatprep.subr.bf16.mxu1 %v1135_v19 }
 0x1f3   : > { %v1391_v16 = vpop.permute.xlu1 %1390 }
 0x1f4   : > { %9023 = vmatpush3.bf16.msra.mxu1 %v1135_v19  ;;  %v1386_v19 = vpop.permute.xlu0 %1385 }
 0x1f7   : > { %9025 = vmatmul.mubr.msk.bf16.vlgmr.msra.gmra.mxu1 %vm1041_vm0, %v9273_v20 }
 0x1f8   : > { %9028 = vmatprep.mubr.msk.bf16.mxu1 %vm1041_vm0, %v9274_v22  ;;  %v1381_v22 = vpop.permute.xlu1 %1380 }
 0x1ff   : > { %9029 = vmatmul.mubr.msk.bf16.gmra.mxu1 %vm1041_vm0, %v9275_v23 }
 0x200   : > { %9072 = vmatprep.mubr.bf16.mxu1 %v9284_v2 }
 0x2b7   : > { %v9026_v26 = vpop.f32.mrf.mxu1 }
 0x2b8   : > { %v1262_v45 = vadd.f32 %v9026_v26, %v1160_v39 }
 0x2b9   : > { %v1253_v28 = vpop.f32.mrf.mxu1 }
 0x2ba   : > { %v1286_v54 = vmax.f32 %v1262_v45, 0.0  ;;  %v1254_v55 = vadd.f32 %v1253_v28, %v1150_v52  ;;  %v1371_v28 = vpop.permute.xlu1 %1370 }
 0x2bb   : > { %v9027_v29 = vpop.f32.mrf.mxu1 }
 0x2bc   : > { %v1265_v41 = vadd.f32 %v9027_v29, %v1165_v62  ;;  %v1284_v12 = vmax.f32 %v1254_v55, 0.0 }
 0x2bd   : > { %v1256_v31 = vpop.f32.mrf.mxu1 }
 0x2be   : > { %v1287_v3 = vmax.f32 %v1265_v41, 0.0  ;;  %v1257_v50 = vadd.f32 %v1256_v31, %v1155_v49  ;;  %v1361_v41 = vpop.permute.xlu1 %1360 }
 0x2bf   : > { %v9030_v33 = vpop.f32.mrf.mxu1 }
 0x2c0   : > { %v1278_v35 = vadd.f32 %v9030_v33, %v1180_v27  ;;  %v1309_v56 = vpack.c.bf16 %v1287_v3, %v1286_v54  ;;  %v1285_v57 = vmax.f32 %v1257_v50, 0.0 }
 0x2c1   : > { %v1269_v34 = vpop.f32.mrf.mxu1 }
 0x2c2   : > { %v1270_v37 = vadd.f32 %v1269_v34, %v1170_v32  ;;  %v1290_v42 = vmax.f32 %v1278_v35, 0.0  ;;  %v1308_v58 = vpack.c.bf16 %v1285_v57, %v1284_v12  ;;  %v1351_v50 = vpop.permute.xlu1 %1350 }
 0x2c3   : > { %v9031_v36 = vpop.f32.mrf.mxu1 }
 0x2c4   : > { %v1281_v38 = vadd.f32 %v9031_v36, %v1185_v25  ;;  %v1288_v46 = vmax.f32 %v1270_v37, 0.0  ;;  %v1376_v25 = vpop.permute.xlu0 %1375 }
 0x2c5   : > { %v1272_v40 = vpop.f32.mrf.mxu1 }
 0x2c6   : > { %v1291_v43 = vmax.f32 %v1281_v38, 0.0  ;;  %v1273_v44 = vadd.f32 %v1272_v40, %v1175_v30 }
 0x2c8   : > { %v1289_v47 = vmax.f32 %v1273_v44, 0.0  ;;  %v1311_v48 = vpack.c.bf16 %v1291_v43, %v1290_v42  ;;  %v1366_v36 = vpop.permute.xlu0 %1365 }
 0x2ca   : > { %9032 = vmatprep.subr.bf16.mxu0 %v1311_v48  ;;  %v1310_v51 = vpack.c.bf16 %v1289_v47, %v1288_v46 }
 0x2cb   : > { %9033 = vmatpush3.bf16.msra.mxu0 %v1311_v48 }
 0x2cc   : > { %9034 = vmatprep.subr.bf16.mxu0 %v1310_v51  ;;  %v1356_v47 = vpop.permute.xlu0 %1355 }
 0x2cf   : > { %9035 = vmatpush3.bf16.msra.mxu0 %v1310_v51 }
 0x2d0   : > { %9036 = vmatprep.subr.bf16.mxu0 %v1309_v56  ;;  %v1346_v57 = vpop.permute.xlu0 %1345 }
 0x2d3   : > { %9037 = vmatpush3.bf16.msra.mxu0 %v1309_v56 }
 0x2d4   : > { %9038 = vmatprep.subr.bf16.mxu0 %v1308_v58 }
 0x2d7   : > { %9039 = vmatpush3.bf16.msra.mxu0 %v1308_v58 }
 0x2d8   : > { %5981 = vmatprep.subr.bf16.mxu0 %v12853_v7 }
 0x2da   : > { %9041 = vmatmul.mubr.msk.bf16.vlgmr.msra.gmra.mxu0 %vm1041_vm0, %v9277_v59  ;;  %v1341_v59 = vpop.permute.xlu1 %1340 }
 0x2db   : > { %9044 = vmatprep.mubr.msk.bf16.mxu0 %vm1041_vm0, %v9278_v14 }
 0x2e2   : > { %9045 = vmatmul.mubr.msk.bf16.gmra.mxu0 %vm1041_vm0, %v9279_v60 }
 0x2e3   : > { %9048 = vmatprep.mubr.msk.bf16.mxu0 %vm1041_vm0, %v9280_v61 }
 0x2ea   : > { %9049 = vmatmul.mubr.msk.bf16.gmra.mxu0 %vm1041_vm0, %v9281_v63 }
 0x2eb   : > { %9052 = vmatprep.mubr.msk.bf16.mxu0 %vm1041_vm0, %v9282_v21 }
 0x2f2   : > { %9053 = vmatmul.mubr.msk.bf16.gmra.mxu0 %vm1041_vm0, %v9283_v0  ;;  %v1336_v0 = vpop.permute.xlu0 %1335 }
 0x39a   : > { %v10211_v1 = vpop.f32.mrf.mxu0 }
 0x39b   : > { %v1515_v63 = vadd.f32 %v10211_v1, %v1341_v59  ;;  %v9285_v1 = vld [vmem:[#allocation3 + $0x8] sm:$0xff]   ;;  %v9312_v59 = vld [vmem:[#allocation3 + $0xe0] sm:$0xff]  }
 0x39c   : > { %v10213_v4 = vpop.f32.mrf.mxu0 }
 0x39e   : > { %v9043_v5 = vpop.f32.mrf.mxu0 }
 0x39f   : > { %v1518_v14 = vadd.f32 %v9043_v5, %v1346_v57 }
 0x3a0   : > { %v10215_v6 = vpop.f32.mrf.mxu0 }
 0x3a1   : > { %v1572_v2 = vmax.f32 %v1518_v14, 0.0 }
 0x3a2   : > { %v9046_v9 = vpop.f32.mrf.mxu0 }
 0x3a3   : > { %v1531_v51 = vadd.f32 %v9046_v9, %v1361_v41  ;;  %v9304_v41 = vld [vmem:[#allocation3 + $0xa0] sm:$0xff]  }
 0x3a4   : > { %v1522_v10 = vpop.f32.mrf.mxu0 }
 0x3a5   : > { %v1575_v12 = vmax.f32 %v1531_v51, 0.0  ;;  %v1523_v58 = vadd.f32 %v1522_v10, %v1351_v50 }
 0x3a6   : > { %v9047_v11 = vpop.f32.mrf.mxu0 }
 0x3a7   : > { %v1534_v48 = vadd.f32 %v9047_v11, %v1366_v36  ;;  %v1573_v21 = vmax.f32 %v1523_v58, 0.0  ;;  %v1571_v11 = vmax.f32 %v1515_v63, 0.0  ;;  %v9302_v36 = vld [vmem:[#allocation3 + $0x90] sm:$0xff]   ;;  %v9311_v58 = vld [vmem:[#allocation3 + $0xd8] sm:$0xff]  }
 0x3a8   : > { %v1525_v15 = vpop.f32.mrf.mxu0  ;;  %v9314_v63 = vld [vmem:[#allocation3 + $0xf0] sm:$0xff]  }
 0x3a9   : > { %v1576_v54 = vmax.f32 %v1534_v48, 0.0  ;;  %v1526_v55 = vadd.f32 %v1525_v15, %v1356_v47 }
 0x3aa   : > { %v9050_v17 = vpop.f32.mrf.mxu0 }
 0x3ab   : > { %v1547_v37 = vadd.f32 %v9050_v17, %v1381_v22  ;;  %v1716_v60 = vpack.c.bf16 %v1576_v54, %v1575_v12  ;;  %v1574_v61 = vmax.f32 %v1526_v55, 0.0  ;;  %v9286_v17 = vld [vmem:[#allocation3 + $0x10] sm:$0xff]   ;;  %v9292_v22 = vld [vmem:[#allocation3 + $0x40] sm:$0xff]   ;;  %v9309_v54 = vld [vmem:[#allocation3 + $0xc8] sm:$0xff]  }
 0x3ac   : > { %v1538_v18 = vpop.f32.mrf.mxu0  ;;  %v9310_v55 = vld [vmem:[#allocation3 + $0xd0] sm:$0xff]  }
 0x3ad   : > { %v1579_v45 = vmax.f32 %v1547_v37, 0.0  ;;  %v1539_v46 = vadd.f32 %v1538_v18, %v1371_v28  ;;  %v1715_v9 = vpack.c.bf16 %v1574_v61, %v1573_v21  ;;  %v9288_v18 = vld [vmem:[#allocation3 + $0x20] sm:$0xff]   ;;  %v9298_v28 = vld [vmem:[#allocation3 + $0x70] sm:$0xff]   ;;  %v9313_v61 = vld [vmem:[#allocation3 + $0xe8] sm:$0xff]  }
 0x3ae   : > { %v9051_v20 = vpop.f32.mrf.mxu0 }
 0x3af   : > { %v1550_v33 = vadd.f32 %v9051_v20, %v1386_v19  ;;  %v1577_v52 = vmax.f32 %v1539_v46, 0.0  ;;  %v9290_v19 = vld [vmem:[#allocation3 + $0x30] sm:$0xff]   ;;  %v9291_v20 = vld [vmem:[#allocation3 + $0x38] sm:$0xff]  }
 0x3b0   : > { %v1541_v23 = vpop.f32.mrf.mxu0  ;;  %v9306_v46 = vld [vmem:[#allocation3 + $0xb0] sm:$0xff]  }
 0x3b1   : > { %v1580_v42 = vmax.f32 %v1550_v33, 0.0  ;;  %v1542_v43 = vadd.f32 %v1541_v23, %v1376_v25  ;;  %v9293_v23 = vld [vmem:[#allocation3 + $0x48] sm:$0xff]   ;;  %v9295_v25 = vld [vmem:[#allocation3 + $0x58] sm:$0xff]   ;;  %v9300_v33 = vld [vmem:[#allocation3 + $0x80] sm:$0xff]  }
 0x3b2   : > { %v9054_v24 = vpop.f32.mrf.mxu0 }
 0x3b3   : > { %v1563_v27 = vadd.f32 %v9054_v24, %v1401_v53  ;;  %v1718_v49 = vpack.c.bf16 %v1580_v42, %v1579_v45  ;;  %v1578_v3 = vmax.f32 %v1542_v43, 0.0  ;;  %v1331_v53 = vpop.permute.xlu1 %1330  ;;  %v9294_v24 = vld [vmem:[#allocation3 + $0x50] sm:$0xff]   ;;  %v9305_v45 = vld [vmem:[#allocation3 + $0xa8] sm:$0xff]  }
 0x3b4   : > { %v1554_v26 = vpop.f32.mrf.mxu0  ;;  %v1507_v10 = vadd.f32 %v10213_v4, %v1331_v53  ;;  %v9289_v4 = vld [vmem:[#allocation3 + $0x28] sm:$0xff]  }
 0x3b5   : > { %v1555_v30 = vadd.f32 %v1554_v26, %v1391_v16  ;;  %v1583_v34 = vmax.f32 %v1563_v27, 0.0  ;;  %v1717_v56 = vpack.c.bf16 %v1578_v3, %v1577_v52  ;;  %v9296_v26 = vld [vmem:[#allocation3 + $0x60] sm:$0xff]   ;;  %v9297_v27 = vld [vmem:[#allocation3 + $0x68] sm:$0xff]  }
 0x3b6   : > { %v9055_v29 = vpop.f32.mrf.mxu0  ;;  %v1569_v15 = vmax.f32 %v1507_v10, 0.0  ;;  %v9308_v3 = vld [vmem:[#allocation3 + $0xc0] sm:$0xff]  }
 0x3b7   : > { %v1566_v31 = vadd.f32 %v9055_v29, %v1406_v8  ;;  %v1581_v38 = vmax.f32 %v1555_v30, 0.0  ;;  %v1510_v8 = vadd.f32 %v10215_v6, %v1336_v0  ;;  %v9287_v6 = vld [vmem:[#allocation3 + $0x18] sm:$0xff]   ;;  %v10221_v29 = vpop.permute.xlu1 %1921  ;;  %v10223_v30 = vpop.permute.xlu0 %1926 }
 0x3b8   : > { %v1557_v32 = vpop.f32.mrf.mxu0 }
 0x3b9   : > { %v1584_v35 = vmax.f32 %v1566_v31, 0.0  ;;  %v1558_v62 = vadd.f32 %v1557_v32, %v1396_v13  ;;  %v1714_v13 = vpack.c.bf16 %v1572_v2, %v1571_v11  ;;  %v1570_v5 = vmax.f32 %v1510_v8, 0.0  ;;  %v9299_v32 = vld [vmem:[#allocation3 + $0x78] sm:$0xff]  }
 0x3ba   : > { %v9315_v8 = vld [vmem:[#allocation3 + $0xf8] sm:$0xff]  }
 0x3bb   : > { %v1720_v39 = vpack.c.bf16 %v1584_v35, %v1583_v34  ;;  %v1582_v40 = vmax.f32 %v1558_v62, 0.0  ;;  %v1713_v16 = vpack.c.bf16 %v1570_v5, %v1569_v15  ;;  %v10225_v31 = vpop.permute.xlu1 %2081  ;;  %v10227_v34 = vpop.permute.xlu0 %2086  ;;  %v9301_v62 = vld [vmem:[#allocation3 + $0x88] sm:$0xff]   ;;  %v9318_v5 = vld [vmem:[#allocation3 + $0x110] sm:$0xff]  }
 0x3bd   : > { %9056 = vmatprep.subr.bf16.mxu1 %v1720_v39  ;;  %v1719_v44 = vpack.c.bf16 %v1582_v40, %v1581_v38  ;;  %v9303_v40 = vld [vmem:[#allocation3 + $0x98] sm:$0xff]  }
 0x3be   : > { %9057 = vmatpush3.bf16.msra.mxu1 %v1720_v39 }
 0x3bf   : > { %9058 = vmatprep.subr.bf16.mxu1 %v1719_v44  ;;  %v10229_v35 = vpop.permute.xlu1 %1911  ;;  %v10231_v37 = vpop.permute.xlu0 %1916 }
 0x3c2   : > { %9059 = vmatpush3.bf16.msra.mxu1 %v1719_v44 }
 0x3c3   : > { %9060 = vmatprep.subr.bf16.mxu1 %v1718_v49  ;;  %v10233_v38 = vpop.permute.xlu1 %2071  ;;  %v10235_v39 = vpop.permute.xlu0 %2076 }
 0x3c6   : > { %9061 = vmatpush3.bf16.msra.mxu1 %v1718_v49  ;;  %v9307_v49 = vld [vmem:[#allocation3 + $0xb8] sm:$0xff]  }
 0x3c7   : > { %9062 = vmatprep.subr.bf16.mxu1 %v1717_v56  ;;  %v10237_v42 = vpop.permute.xlu1 %1901  ;;  %v10239_v43 = vpop.permute.xlu0 %1906 }
 0x3ca   : > { %9063 = vmatpush3.bf16.msra.mxu1 %v1717_v56 }
 0x3cb   : > { %9064 = vmatprep.subr.bf16.mxu1 %v1716_v60  ;;  %v10241_v44 = vpop.permute.xlu1 %2061  ;;  %v10243_v47 = vpop.permute.xlu0 %2066 }
 0x3ce   : > { %9065 = vmatpush3.bf16.msra.mxu1 %v1716_v60 }
 0x3cf   : > { %9066 = vmatprep.subr.bf16.mxu1 %v1715_v9  ;;  %v10245_v48 = vpop.permute.xlu1 %1891  ;;  %v10247_v50 = vpop.permute.xlu0 %1896 }
 0x3d2   : > { %9067 = vmatpush3.bf16.msra.mxu1 %v1715_v9  ;;  %v9316_v9 = vld [vmem:[#allocation3 + $0x100] sm:$0xff]  }
 0x3d3   : > { %9068 = vmatprep.subr.bf16.mxu1 %v1714_v13  ;;  %v10249_v51 = vpop.permute.xlu1 %2051  ;;  %v10251_v52 = vpop.permute.xlu0 %2056 }
 0x3d6   : > { %9069 = vmatpush3.bf16.msra.mxu1 %v1714_v13  ;;  %v9317_v13 = vld [vmem:[#allocation3 + $0x108] sm:$0xff]  }
 0x3d7   : > { %9070 = vmatprep.subr.bf16.mxu1 %v1713_v16  ;;  %v10253_v56 = vpop.permute.xlu1 %1881  ;;  %v10255_v57 = vpop.permute.xlu0 %1886 }
 0x3da   : > { %9071 = vmatpush3.bf16.msra.mxu1 %v1713_v16 }
 0x3db   : > { %6270 = vmatprep.subr.bf16.mxu1 %v12853_v7  ;;  %v10257_v12 = vpop.permute.xlu1 %2041  ;;  %v10259_v14 = vpop.permute.xlu0 %2046  ;;  %v9336_v7 = vld [vmem:[#allocation3 + $0x1a0] sm:$0xff]  }
 0x3dd   : > { %9073 = vmatmul.mubr.bf16.vlgmr.msra.gmra.mxu1 %v9285_v1  ;;  %v9319_v1 = vld [vmem:[#allocation3 + $0x118] sm:$0xff]  }
 0x3de   : > { %9076 = vmatprep.mubr.bf16.mxu1 %v9286_v17  ;;  %v9320_v17 = vld [vmem:[#allocation3 + $0x120] sm:$0xff]  }
 0x3df   : > { %v10261_v60 = vpop.permute.xlu1 %1871  ;;  %v10263_v21 = vpop.permute.xlu0 %1876 }
 0x3e3   : > { %v10265_v0 = vpop.permute.xlu1 %2031  ;;  %v10267_v2 = vpop.permute.xlu0 %2036 }
 0x3e5   : > { %9077 = vmatmul.mubr.bf16.gmra.mxu1 %v9287_v6 }
 0x3e6   : > { %9080 = vmatprep.mubr.bf16.mxu1 %v9288_v18 }
 0x3e7   : > { %v10269_v53 = vpop.permute.xlu1 %1861  ;;  %v10271_v11 = vpop.permute.xlu0 %1866 }
 0x3eb   : > { %v10273_v10 = vpop.permute.xlu1 %2021  ;;  %v10275_v15 = vpop.permute.xlu0 %2026 }
 0x3ed   : > { %9081 = vmatmul.mubr.bf16.gmra.mxu1 %v9289_v4 }
 0x3ee   : > { %9084 = vmatprep.mubr.bf16.mxu1 %v9290_v19  ;;  %v9321_v19 = vld [vmem:[#allocation3 + $0x128] sm:$0xff]  }
 0x3ef   : > { %v1852_v16 = vpop.permute.xlu1 %1851  ;;  %v10277_v6 = vpop.permute.xlu0 %1856 }
 0x3f3   : > { %v10279_v18 = vpop.permute.xlu1 %2011  ;;  %v10281_v4 = vpop.permute.xlu0 %2016 }
 0x3f5   : > { %9085 = vmatmul.mubr.bf16.gmra.mxu1 %v9291_v20  ;;  %v9322_v20 = vld [vmem:[#allocation3 + $0x130] sm:$0xff]  }
 0x3f6   : > { %9088 = vmatprep.mubr.bf16.mxu1 %v9292_v22 }
 0x3f7   : > { %v10283_v22 = vpop.permute.xlu1 %2001 }
 0x3fd   : > { %9089 = vmatmul.mubr.bf16.gmra.mxu1 %v9293_v23  ;;  %v10285_v23 = vpop.permute.xlu0 %2006 }
 0x3fe   : > { %9092 = vmatprep.mubr.bf16.mxu1 %v9294_v24  ;;  %v10287_v24 = vpop.permute.xlu1 %2161 }
 0x405   : > { %9093 = vmatmul.mubr.bf16.gmra.mxu1 %v9295_v25  ;;  %v9323_v25 = vld [vmem:[#allocation3 + $0x138] sm:$0xff]  }
 0x406   : > { %9096 = vmatprep.mubr.bf16.mxu1 %v9296_v26  ;;  %v9324_v26 = vld [vmem:[#allocation3 + $0x140] sm:$0xff]  }
 0x40d   : > { %9097 = vmatmul.mubr.bf16.gmra.mxu1 %v9297_v27  ;;  %v10289_v27 = vpop.permute.xlu0 %2166 }
 0x40e   : > { %9100 = vmatprep.mubr.bf16.mxu1 %v9298_v28  ;;  %12866 = vst [vmem:[#allocation12_spill] sm:$0xff] %v10289_v27  ;;  %v10291_v28 = vpop.permute.xlu1 %1991 }
 0x415   : > { %9101 = vmatmul.mubr.bf16.gmra.mxu1 %v9299_v32  ;;  %v9325_v32 = vld [vmem:[#allocation3 + $0x148] sm:$0xff]  }
 0x416   : > { %9104 = vmatprep.mubr.bf16.mxu1 %v9300_v33  ;;  %v9326_v33 = vld [vmem:[#allocation3 + $0x150] sm:$0xff]  }
 0x41d   : > { %9105 = vmatmul.mubr.bf16.gmra.mxu1 %v9301_v62  ;;  %v10293_v62 = vpop.permute.xlu0 %1996 }
 0x41e   : > { %9108 = vmatprep.mubr.bf16.mxu1 %v9302_v36  ;;  %v10295_v36 = vpop.permute.xlu1 %2151 }
 0x41f   : > { %12867 = vst [vmem:[#allocation13_spill] sm:$0xff] %v10295_v36 }
 0x425   : > { %9109 = vmatmul.mubr.bf16.gmra.mxu1 %v9303_v40  ;;  %v10297_v40 = vpop.permute.xlu0 %2156 }
 0x426   : > { %9112 = vmatprep.mubr.bf16.mxu1 %v9304_v41  ;;  %12868 = vst [vmem:[#allocation14_spill] sm:$0xff] %v10297_v40  ;;  %v9327_v41 = vld [vmem:[#allocation3 + $0x158] sm:$0xff]  }
 0x42d   : > { %9113 = vmatmul.mubr.bf16.gmra.mxu1 %v9305_v45  ;;  %v9328_v45 = vld [vmem:[#allocation3 + $0x160] sm:$0xff]  }
 0x42e   : > { %9116 = vmatprep.mubr.bf16.mxu1 %v9306_v46  ;;  %v10299_v46 = vpop.permute.xlu1 %1981 }
 0x435   : > { %9117 = vmatmul.mubr.bf16.gmra.mxu1 %v9307_v49  ;;  %v10301_v49 = vpop.permute.xlu0 %1986 }
 0x436   : > { %9120 = vmatprep.mubr.bf16.mxu1 %v9308_v3  ;;  %v10303_v3 = vpop.permute.xlu1 %2141 }
 0x43d   : > { %9121 = vmatmul.mubr.bf16.gmra.mxu1 %v9309_v54  ;;  %v9329_v54 = vld [vmem:[#allocation3 + $0x168] sm:$0xff]  }
 0x43e   : > { %9124 = vmatprep.mubr.bf16.mxu1 %v9310_v55  ;;  %v9330_v55 = vld [vmem:[#allocation3 + $0x170] sm:$0xff]  }
 0x445   : > { %9125 = vmatmul.mubr.bf16.gmra.mxu1 %v9311_v58  ;;  %v10305_v58 = vpop.permute.xlu0 %2146 }
 0x446   : > { %9128 = vmatprep.mubr.bf16.mxu1 %v9312_v59  ;;  %v10307_v59 = vpop.permute.xlu1 %1971 }
 0x44d   : > { %9129 = vmatmul.mubr.bf16.gmra.mxu1 %v9313_v61  ;;  %v9331_v61 = vld [vmem:[#allocation3 + $0x178] sm:$0xff]  }
 0x44e   : > { %9132 = vmatprep.mubr.bf16.mxu1 %v9314_v63  ;;  %v9332_v63 = vld [vmem:[#allocation3 + $0x180] sm:$0xff]  }
 0x455   : > { %9133 = vmatmul.mubr.bf16.gmra.mxu1 %v9315_v8  ;;  %v10309_v8 = vpop.permute.xlu0 %1976 }
 0x456   : > { %9136 = vmatprep.mubr.bf16.mxu1 %v9316_v9  ;;  %v10311_v9 = vpop.permute.xlu1 %2131 }
 0x45d   : > { %9137 = vmatmul.mubr.bf16.gmra.mxu1 %v9317_v13  ;;  %v10313_v13 = vpop.permute.xlu0 %2136 }
 0x45e   : > { %9140 = vmatprep.mubr.bf16.mxu1 %v9318_v5  ;;  %v9333_v5 = vld [vmem:[#allocation3 + $0x188] sm:$0xff]  }
 0x465   : > { %9141 = vmatmul.mubr.bf16.gmra.mxu1 %v9319_v1  ;;  %v9334_v1 = vld [vmem:[#allocation3 + $0x190] sm:$0xff]  }
 0x466   : > { %9144 = vmatprep.mubr.bf16.mxu1 %v9320_v17  ;;  %v10315_v17 = vpop.permute.xlu1 %1961 }
 0x46d   : > { %9145 = vmatmul.mubr.bf16.gmra.mxu1 %v9321_v19 }
 0x46e   : > { %9148 = vmatprep.mubr.bf16.mxu1 %v9322_v20 }
 0x475   : > { %9149 = vmatmul.mubr.bf16.gmra.mxu1 %v9323_v25  ;;  %v10318_v25 = vpop.permute.xlu0 %1966 }
 0x476   : > { %9152 = vmatprep.mubr.bf16.mxu1 %v9324_v26 }
 0x47d   : > { %9153 = vmatmul.mubr.bf16.gmra.mxu1 %v9325_v32 }
 0x47e   : > { %9156 = vmatprep.mubr.bf16.mxu1 %v9326_v33 }
 0x485   : > { %9157 = vmatmul.mubr.bf16.gmra.mxu1 %v9327_v41  ;;  %v10320_v41 = vpop.permute.xlu1 %2121 }
 0x486   : > { %9160 = vmatprep.mubr.bf16.mxu1 %v9328_v45 }
 0x48d   : > { %9161 = vmatmul.mubr.bf16.gmra.mxu1 %v9329_v54  ;;  %v9335_v54 = vld [vmem:[#allocation3 + $0x198] sm:$0xff]  }
 0x48e   : > { %9164 = vmatprep.mubr.bf16.mxu1 %v9330_v55 }
 0x495   : > { %9165 = vmatmul.mubr.bf16.gmra.mxu1 %v9331_v61 }
 0x496   : > { %9168 = vmatprep.mubr.bf16.mxu1 %v9332_v63 }
 0x49d   : > { %v9074_v19 = vpop.f32.mrf.mxu1  ;;  %9169 = vmatmul.mubr.bf16.gmra.mxu1 %v9333_v5 }
 0x49e   : > { %v2916_v20 = vadd.f32 %v9074_v19, %v10269_v53  ;;  %9172 = vmatprep.mubr.bf16.mxu1 %v9334_v1  ;;  %v10324_v53 = vpop.permute.xlu0 %2126 }
 0x49f   : > { %v2907_v26 = vpop.f32.mrf.mxu1 }
 0x4a0   : > { %v3420_v32 = vmax.f32 %v2916_v20, 0.0  ;;  %v2908_v33 = vadd.f32 %v2907_v26, %v1852_v16 }
 0x4a1   : > { %v9075_v45 = vpop.f32.mrf.mxu1 }
 0x4a2   : > { %v3676_v55 = vmax.f32 %v3420_v32, 0.0  ;;  %v3418_v61 = vmax.f32 %v2908_v33, 0.0  ;;  %v2919_v63 = vadd.f32 %v9075_v45, %v10271_v11  ;;  %v10327_v32 = vpop.permute.xlu1 %1951 }
 0x4a3   : > { %v2910_v40 = vpop.f32.mrf.mxu1 }
 0x4a4   : > { %v3421_v27 = vmax.f32 %v2919_v63, 0.0  ;;  %v2911_v5 = vadd.f32 %v2910_v40, %v10277_v6  ;;  %4065 = vmax.xlane.f32.xlu0 %v3676_v55  ;;  %v3674_v19 = vmax.f32 %v3418_v61, 0.0  ;;  %v9337_v40 = vld [vmem:[#allocation3 + $0x1a8] sm:$0xff]   ;;  %v10331_v61 = vpop.permute.xlu0 %1956 }
 0x4a5   : > { %v9078_v1 = vpop.f32.mrf.mxu1  ;;  %9173 = vmatmul.mubr.bf16.gmra.mxu1 %v9335_v54 }
 0x4a6   : > { %v3677_v16 = vmax.f32 %v3421_v27, 0.0  ;;  %v3419_v20 = vmax.f32 %v2911_v5, 0.0  ;;  %v2932_v26 = vadd.f32 %v9078_v1, %v10253_v56  ;;  %9176 = vmatprep.mubr.bf16.mxu1 %v9336_v7  ;;  %v9338_v27 = vld [vmem:[#allocation3 + $0x1b0] sm:$0xff]   ;;  %v10334_v1 = vpop.permute.xlu1 %2111 }
 0x4a7   : > { %v2923_v33 = vpop.f32.mrf.mxu1 }
 0x4a8   : > { %v3424_v11 = vmax.f32 %v2932_v26, 0.0  ;;  %v2924_v45 = vadd.f32 %v2923_v33, %v10261_v60  ;;  %4067 = vmax.xlane.f32.xlu1 %v3677_v16  ;;  %4061 = vmax.xlane.f32.xlu0 %v3674_v19  ;;  %v3675_v55 = vmax.f32 %v3419_v20, 0.0 }
 0x4a9   : > { %v9079_v6 = vpop.f32.mrf.mxu1 }
 0x4aa   : > { %v3680_v63 = vmax.f32 %v3424_v11, 0.0  ;;  %v3422_v36 = vmax.f32 %v2924_v45, 0.0  ;;  %v2935_v54 = vadd.f32 %v9079_v6, %v10255_v57  ;;  %v10338_v45 = vpop.permute.xlu0 %2116  ;;  %v9339_v6 = vld [vmem:[#allocation3 + $0x1b8] sm:$0xff]  }
 0x4ab   : > { %v2926_v56 = vpop.f32.mrf.mxu1 }
 0x4ac   : > { %v3425_v7 = vmax.f32 %v2935_v54, 0.0  ;;  %v2927_v5 = vadd.f32 %v2926_v56, %v10263_v21  ;;  %4063 = vmax.xlane.f32.xlu1 %v3675_v55  ;;  %4073 = vmax.xlane.f32.xlu0 %v3680_v63  ;;  %v3678_v19 = vmax.f32 %v3422_v36, 0.0  ;;  %v1942_v56 = vpop.permute.xlu1 %1941 }
 0x4ad   : > { %v9082_v60 = vpop.f32.mrf.mxu1  ;;  %9177 = vmatmul.mubr.bf16.gmra.mxu1 %v9337_v40  ;;  %v9340_v40 = vld [vmem:[#allocation3 + $0x1c0] sm:$0xff]  }
 0x4ae   : > { %v3681_v16 = vmax.f32 %v3425_v7, 0.0  ;;  %v3423_v20 = vmax.f32 %v2927_v5, 0.0  ;;  %v2948_v26 = vadd.f32 %v9082_v60, %v10237_v42  ;;  %9180 = vmatprep.mubr.bf16.mxu1 %v9338_v27 }
 0x4af   : > { %v2939_v57 = vpop.f32.mrf.mxu1 }
 0x4b0   : > { %v3428_v33 = vmax.f32 %v2948_v26, 0.0  ;;  %v2940_v11 = vadd.f32 %v2939_v57, %v10245_v48  ;;  %4075 = vmax.xlane.f32.xlu1 %v3681_v16  ;;  %4069 = vmax.xlane.f32.xlu0 %v3678_v19  ;;  %v3679_v55 = vmax.f32 %v3423_v20, 0.0  ;;  %v1947_v20 = vpop.permute.xlu0 %1946  ;;  %v10344_v57 = vpop.permute.xlu1 %2101 }
 0x4b1   : > { %v9083_v21 = vpop.f32.mrf.mxu1 }
 0x4b2   : > { %v3684_v63 = vmax.f32 %v3428_v33, 0.0  ;;  %v3426_v54 = vmax.f32 %v2940_v11, 0.0  ;;  %v2951_v36 = vadd.f32 %v9083_v21, %v10239_v43 }
 0x4b3   : > { %v2942_v7 = vpop.f32.mrf.mxu1 }
 0x4b4   : > { %v3429_v42 = vmax.f32 %v2951_v36, 0.0  ;;  %v2943_v27 = vadd.f32 %v2942_v7, %v10247_v50  ;;  %4071 = vmax.xlane.f32.xlu1 %v3679_v55  ;;  %4081 = vmax.xlane.f32.xlu0 %v3684_v63  ;;  %v3682_v5 = vmax.f32 %v3426_v54, 0.0  ;;  %v9341_v50 = vld [vmem:[#allocation3 + $0x1c8] sm:$0xff]   ;;  %v9342_v63 = vld [vmem:[#allocation3 + $0x1d0] sm:$0xff]   ;;  %v10348_v7 = vpop.permute.xlu0 %2106 }
 0x4b5   : > { %v9086_v48 = vpop.f32.mrf.mxu1  ;;  %9181 = vmatmul.mubr.bf16.gmra.mxu1 %v9339_v6 }
 0x4b6   : > { %v3685_v60 = vmax.f32 %v3429_v42, 0.0  ;;  %v3427_v19 = vmax.f32 %v2943_v27, 0.0  ;;  %v2964_v16 = vadd.f32 %v9086_v48, %v10221_v29  ;;  %9184 = vmatprep.mubr.bf16.mxu1 %v9340_v40 }
 0x4b7   : > { %v2955_v26 = vpop.f32.mrf.mxu1 }
 0x4b8   : > { %v2956_v43 = vadd.f32 %v2955_v26, %v10229_v35  ;;  %4083 = vmax.xlane.f32.xlu1 %v3685_v60  ;;  %4077 = vmax.xlane.f32.xlu0 %v3682_v5  ;;  %v3683_v11 = vmax.f32 %v3427_v19, 0.0  ;;  %v3432_v21 = vmax.f32 %v2964_v16, 0.0  ;;  %v1932_v5 = vpop.permute.xlu1 %1931 }
 0x4b9   : > { %v9087_v33 = vpop.f32.mrf.mxu1 }
 0x4ba   : > { %v3430_v55 = vmax.f32 %v2956_v43, 0.0  ;;  %v2967_v6 = vadd.f32 %v9087_v33, %v10223_v30  ;;  %v3688_v42 = vmax.f32 %v3432_v21, 0.0  ;;  %v9343_v43 = vld [vmem:[#allocation3 + $0x1d8] sm:$0xff]  }
 0x4bb   : > { %v2958_v54 = vpop.f32.mrf.mxu1 }
 0x4bc   : > { %v3686_v36 = vmax.f32 %v3430_v55, 0.0  ;;  %v3433_v29 = vmax.f32 %v2967_v6, 0.0  ;;  %v2959_v40 = vadd.f32 %v2958_v54, %v10231_v37  ;;  %4079 = vmax.xlane.f32.xlu1 %v3683_v11  ;;  %v9344_v11 = vld [vmem:[#allocation3 + $0x1e0] sm:$0xff]   ;;  %v1937_v55 = vpop.permute.xlu0 %1936 }
 0x4bd   : > { %v9090_v35 = vpop.f32.mrf.mxu1  ;;  %9185 = vmatmul.mubr.bf16.gmra.mxu1 %v9341_v50 }
 0x4be   : > { %v3431_v27 = vmax.f32 %v2959_v40, 0.0  ;;  %v2980_v48 = vadd.f32 %v9090_v35, %v1942_v56  ;;  %4085 = vmax.xlane.f32.xlu0 %v3686_v36  ;;  %9188 = vmatprep.mubr.bf16.mxu1 %v9342_v63  ;;  %v3689_v19 = vmax.f32 %v3433_v29, 0.0 }
 0x4bf   : > { %v2971_v60 = vpop.f32.mrf.mxu1 }
 0x4c0   : > { %v3436_v30 = vmax.f32 %v2980_v48, 0.0  ;;  %v2972_v16 = vadd.f32 %v2971_v60, %v1932_v5  ;;  %4089 = vmax.xlane.f32.xlu1 %v3688_v42  ;;  %v3687_v33 = vmax.f32 %v3431_v27, 0.0  ;;  %v9345_v5 = vld [vmem:[#allocation3 + $0x1e8] sm:$0xff]  }
 0x4c1   : > { %v9091_v26 = vpop.f32.mrf.mxu1 }
 0x4c2   : > { %v2983_v37 = vadd.f32 %v9091_v26, %v1947_v20  ;;  %4091 = vmax.xlane.f32.xlu0 %v3689_v19  ;;  %v3692_v50 = vmax.f32 %v3436_v30, 0.0  ;;  %v3434_v21 = vmax.f32 %v2972_v16, 0.0  ;;  %v9346_v30 = vld [vmem:[#allocation3 + $0x1f0] sm:$0xff]  }
 0x4c3   : > { %v2974_v6 = vpop.f32.mrf.mxu1 }
 0x4c4   : > { %v3437_v54 = vmax.f32 %v2983_v37, 0.0  ;;  %v2975_v56 = vadd.f32 %v2974_v6, %v1937_v55  ;;  %4087 = vmax.xlane.f32.xlu1 %v3687_v33  ;;  %v3690_v42 = vmax.f32 %v3434_v21, 0.0 }
 0x4c5   : > { %v9094_v63 = vpop.f32.mrf.mxu1  ;;  %9189 = vmatmul.mubr.bf16.gmra.mxu1 %v9343_v43 }
 0x4c6   : > { %v3693_v36 = vmax.f32 %v3437_v54, 0.0  ;;  %v3435_v29 = vmax.f32 %v2975_v56, 0.0  ;;  %v2996_v40 = vadd.f32 %v9094_v63, %v10315_v17  ;;  %4097 = vmax.xlane.f32.xlu0 %v3692_v50  ;;  %9192 = vmatprep.mubr.bf16.mxu1 %v9344_v11  ;;  %v9347_v56 = vld [vmem:[#allocation3 + $0x1f8] sm:$0xff]  }
 0x4c7   : > { %v2987_v35 = vpop.f32.mrf.mxu1 }
 0x4c8   : > { %v3440_v20 = vmax.f32 %v2996_v40, 0.0  ;;  %v2988_v27 = vadd.f32 %v2987_v35, %v10327_v32  ;;  %4099 = vmax.xlane.f32.xlu1 %v3693_v36  ;;  %v3691_v60 = vmax.f32 %v3435_v29, 0.0 }
 0x4c9   : > { %v9095_v48 = vpop.f32.mrf.mxu1 }
 0x4ca   : > { %v2999_v19 = vadd.f32 %v9095_v48, %v10318_v25  ;;  %4093 = vmax.xlane.f32.xlu0 %v3690_v42  ;;  %v3696_v26 = vmax.f32 %v3440_v20, 0.0  ;;  %v3438_v43 = vmax.f32 %v2988_v27, 0.0 }
 0x4cb   : > { %v2990_v16 = vpop.f32.mrf.mxu1 }
 0x4cc   : > { %v3441_v33 = vmax.f32 %v2999_v19, 0.0  ;;  %v2991_v17 = vadd.f32 %v2990_v16, %v10331_v61  ;;  %4095 = vmax.xlane.f32.xlu1 %v3691_v60  ;;  %v3694_v50 = vmax.f32 %v3438_v43, 0.0 }
 0x4cd   : > { %v9098_v37 = vpop.f32.mrf.mxu1  ;;  %9193 = vmatmul.mubr.bf16.gmra.mxu1 %v9345_v5 }
 0x4ce   : > { %v3697_v11 = vmax.f32 %v3441_v33, 0.0  ;;  %v3439_v55 = vmax.f32 %v2991_v17, 0.0  ;;  %v3012_v32 = vadd.f32 %v9098_v37, %v10299_v46  ;;  %4105 = vmax.xlane.f32.xlu0 %v3696_v26  ;;  %9196 = vmatprep.mubr.bf16.mxu1 %v9346_v30 }
 0x4cf   : > { %v3003_v6 = vpop.f32.mrf.mxu1 }
 0x4d0   : > { %v3444_v25 = vmax.f32 %v3012_v32, 0.0  ;;  %v3004_v21 = vadd.f32 %v3003_v6, %v10307_v59  ;;  %4107 = vmax.xlane.f32.xlu1 %v3697_v11  ;;  %v3695_v63 = vmax.f32 %v3439_v55, 0.0 }
 0x4d1   : > { %v9099_v54 = vpop.f32.mrf.mxu1 }
 0x4d2   : > { %v3015_v61 = vadd.f32 %v9099_v54, %v10301_v49  ;;  %4101 = vmax.xlane.f32.xlu0 %v3694_v50  ;;  %v3700_v29 = vmax.f32 %v3444_v25, 0.0  ;;  %v3442_v40 = vmax.f32 %v3004_v21, 0.0 }
 0x4d3   : > { %v3006_v36 = vpop.f32.mrf.mxu1 }
 0x4d4   : > { %v3445_v35 = vmax.f32 %v3015_v61, 0.0  ;;  %v3007_v46 = vadd.f32 %v3006_v36, %v10309_v8  ;;  %4103 = vmax.xlane.f32.xlu1 %v3695_v63  ;;  %v3698_v5 = vmax.f32 %v3442_v40, 0.0 }
 0x4d5   : > { %v9102_v42 = vpop.f32.mrf.mxu1  ;;  %9197 = vmatmul.mubr.bf16.gmra.mxu1 %v9347_v56 }
 0x4d6   : > { %v3701_v20 = vmax.f32 %v3445_v35, 0.0  ;;  %v3443_v27 = vmax.f32 %v3007_v46, 0.0  ;;  %v3028_v59 = vadd.f32 %v9102_v42, %v10283_v22  ;;  %4113 = vmax.xlane.f32.xlu0 %v3700_v29 }
 0x4d7   : > { %v3019_v48 = vpop.f32.mrf.mxu1 }
 0x4d8   : > { %v3448_v60 = vmax.f32 %v3028_v59, 0.0  ;;  %v3020_v49 = vadd.f32 %v3019_v48, %v10291_v28  ;;  %4115 = vmax.xlane.f32.xlu1 %v3701_v20  ;;  %v3699_v30 = vmax.f32 %v3443_v27, 0.0 }
 0x4d9   : > { %v9103_v19 = vpop.f32.mrf.mxu1 }
 0x4da   : > { %v3031_v16 = vadd.f32 %v9103_v19, %v10285_v23  ;;  %4109 = vmax.xlane.f32.xlu0 %v3698_v5  ;;  %v3704_v26 = vmax.f32 %v3448_v60, 0.0  ;;  %v3446_v43 = vmax.f32 %v3020_v49, 0.0 }
 0x4db   : > { %v3022_v8 = vpop.f32.mrf.mxu1 }
 0x4dc   : > { %v3449_v33 = vmax.f32 %v3031_v16, 0.0  ;;  %v3023_v17 = vadd.f32 %v3022_v8, %v10293_v62  ;;  %4111 = vmax.xlane.f32.xlu1 %v3699_v30  ;;  %v3702_v32 = vmax.f32 %v3446_v43, 0.0 }
 0x4dd   : > { %v9106_v22 = vpop.f32.mrf.mxu1 }
 0x4de   : > { %v3705_v37 = vmax.f32 %v3449_v33, 0.0  ;;  %v3447_v11 = vmax.f32 %v3023_v17, 0.0  ;;  %v3044_v55 = vadd.f32 %v9106_v22, %v10273_v10  ;;  %4121 = vmax.xlane.f32.xlu0 %v3704_v26 }
 0x4df   : > { %v3035_v28 = vpop.f32.mrf.mxu1 }
 0x4e0   : > { %v3452_v6 = vmax.f32 %v3044_v55, 0.0  ;;  %v3036_v50 = vadd.f32 %v3035_v28, %v10279_v18  ;;  %4123 = vmax.xlane.f32.xlu1 %v3705_v37  ;;  %v3703_v25 = vmax.f32 %v3447_v11, 0.0 }
 0x4e1   : > { %v9107_v23 = vpop.f32.mrf.mxu1 }
 0x4e2   : > { %v3047_v21 = vadd.f32 %v9107_v23, %v10275_v15  ;;  %4117 = vmax.xlane.f32.xlu0 %v3702_v32  ;;  %v3708_v62 = vmax.f32 %v3452_v6, 0.0  ;;  %v3450_v56 = vmax.f32 %v3036_v50, 0.0 }
 0x4e3   : > { %v3038_v54 = vpop.f32.mrf.mxu1 }
 0x4e4   : > { %v3453_v63 = vmax.f32 %v3047_v21, 0.0  ;;  %v3039_v61 = vadd.f32 %v3038_v54, %v10281_v4  ;;  %4119 = vmax.xlane.f32.xlu1 %v3703_v25  ;;  %v3706_v35 = vmax.f32 %v3450_v56, 0.0 }
 0x4e5   : > { %v9110_v10 = vpop.f32.mrf.mxu1 }
 0x4e6   : > { %v3709_v36 = vmax.f32 %v3453_v63, 0.0  ;;  %v3451_v29 = vmax.f32 %v3039_v61, 0.0  ;;  %v3060_v40 = vadd.f32 %v9110_v10, %v10257_v12  ;;  %4129 = vmax.xlane.f32.xlu0 %v3708_v62 }
 0x4e7   : > { %v3051_v18 = vpop.f32.mrf.mxu1 }
 0x4e8   : > { %v3456_v46 = vmax.f32 %v3060_v40, 0.0  ;;  %v3052_v42 = vadd.f32 %v3051_v18, %v10265_v0  ;;  %4131 = vmax.xlane.f32.xlu1 %v3709_v36  ;;  %v3707_v20 = vmax.f32 %v3451_v29, 0.0 }
 0x4e9   : > { %v9111_v15 = vpop.f32.mrf.mxu1 }
 0x4ea   : > { %v3063_v27 = vadd.f32 %v9111_v15, %v10259_v14  ;;  %4125 = vmax.xlane.f32.xlu0 %v3706_v35  ;;  %v3712_v4 = vmax.f32 %v3456_v46, 0.0  ;;  %v3454_v48 = vmax.f32 %v3052_v42, 0.0  ;;  %v2097_v15 = vpop.permute.xlu0 %2096 }
 0x4eb   : > { %v3054_v59 = vpop.f32.mrf.mxu1 }
 0x4ec   : > { %v3457_v5 = vmax.f32 %v3063_v27, 0.0  ;;  %v3055_v60 = vadd.f32 %v3054_v59, %v10267_v2  ;;  %4127 = vmax.xlane.f32.xlu1 %v3707_v20  ;;  %v3710_v16 = vmax.f32 %v3454_v48, 0.0 }
 0x4ed   : > { %v9114_v12 = vpop.f32.mrf.mxu1 }
 0x4ee   : > { %v3713_v49 = vmax.f32 %v3457_v5, 0.0  ;;  %v3455_v19 = vmax.f32 %v3055_v60, 0.0  ;;  %v3076_v30 = vadd.f32 %v9114_v12, %v10241_v44  ;;  %4137 = vmax.xlane.f32.xlu0 %v3712_v4 }
 0x4ef   : > { %v3067_v0 = vpop.f32.mrf.mxu1 }
 0x4f0   : > { %v3460_v8 = vmax.f32 %v3076_v30, 0.0  ;;  %v3068_v26 = vadd.f32 %v3067_v0, %v10249_v51  ;;  %4139 = vmax.xlane.f32.xlu1 %v3713_v49  ;;  %v3711_v43 = vmax.f32 %v3455_v19, 0.0 }
 0x4f1   : > { %v9115_v14 = vpop.f32.mrf.mxu1 }
 0x4f2   : > { %v3079_v33 = vadd.f32 %v9115_v14, %v10243_v47  ;;  %4133 = vmax.xlane.f32.xlu0 %v3710_v16  ;;  %v3716_v2 = vmax.f32 %v3460_v8, 0.0  ;;  %v3458_v22 = vmax.f32 %v3068_v26, 0.0 }
 0x4f3   : > { %v3070_v17 = vpop.f32.mrf.mxu1 }
 0x4f4   : > { %v3461_v37 = vmax.f32 %v3079_v33, 0.0  ;;  %v3071_v11 = vadd.f32 %v3070_v17, %v10251_v52  ;;  %4135 = vmax.xlane.f32.xlu1 %v3711_v43  ;;  %v3714_v6 = vmax.f32 %v3458_v22, 0.0 }
 0x4f5   : > { %v9118_v44 = vpop.f32.mrf.mxu1 }
 0x4f6   : > { %v3717_v55 = vmax.f32 %v3461_v37, 0.0  ;;  %v3459_v28 = vmax.f32 %v3071_v11, 0.0  ;;  %v3092_v32 = vadd.f32 %v9118_v44, %v10225_v31  ;;  %4145 = vmax.xlane.f32.xlu0 %v3716_v2 }
 0x4f7   : > { %v3083_v51 = vpop.f32.mrf.mxu1 }
 0x4f8   : > { %v3464_v50 = vmax.f32 %v3092_v32, 0.0  ;;  %v3084_v23 = vadd.f32 %v3083_v51, %v10233_v38  ;;  %4147 = vmax.xlane.f32.xlu1 %v3717_v55  ;;  %v3715_v25 = vmax.f32 %v3459_v28, 0.0  ;;  %v2092_v38 = vpop.permute.xlu1 %2091 }
 0x4f9   : > { %v9119_v47 = vpop.f32.mrf.mxu1 }
 0x4fa   : > { %v3095_v21 = vadd.f32 %v9119_v47, %v10227_v34  ;;  %4141 = vmax.xlane.f32.xlu0 %v3714_v6  ;;  %v3720_v52 = vmax.f32 %v3464_v50, 0.0  ;;  %v3462_v62 = vmax.f32 %v3084_v23, 0.0 }
 0x4fb   : > { %v3086_v54 = vpop.f32.mrf.mxu1 }
 0x4fc   : > { %v3465_v56 = vmax.f32 %v3095_v21, 0.0  ;;  %v3087_v63 = vadd.f32 %v3086_v54, %v10235_v39  ;;  %4143 = vmax.xlane.f32.xlu1 %v3715_v25  ;;  %v3718_v40 = vmax.f32 %v3462_v62, 0.0  ;;  %v10390_v23 = vpop.permute.xlu1 %2246 }
 0x4fd   : > { %v9122_v31 = vpop.f32.mrf.mxu1 }
 0x4fe   : > { %v3721_v61 = vmax.f32 %v3465_v56, 0.0  ;;  %v3463_v10 = vmax.f32 %v3087_v63, 0.0  ;;  %v3108_v36 = vadd.f32 %v9122_v31, %v10344_v57  ;;  %4153 = vmax.xlane.f32.xlu0 %v3720_v52  ;;  %v12870_v56 = vld [vmem:[#allocation13_spill] sm:$0xff] }
 0x4ff   : > { %v3099_v29 = vpop.f32.mrf.mxu1 }
 0x500   : > { %v3468_v18 = vmax.f32 %v3108_v36, 0.0  ;;  %v3100_v35 = vadd.f32 %v3099_v29, %v2092_v38  ;;  %4155 = vmax.xlane.f32.xlu1 %v3721_v61  ;;  %v3719_v46 = vmax.f32 %v3463_v10, 0.0  ;;  %v10397_v36 = vpop.permute.xlu1 %2401 }
 0x501   : > { %v9123_v34 = vpop.f32.mrf.mxu1  ;;  %12872 = vst [vmem:[#allocation13_spill] sm:$0xff] %v10397_v36  ;;  %v4401_v36 = vld [vmem:[%s12843_s11 + $0x2a0] sm:$0xff] }
 0x502   : > { %v3111_v42 = vadd.f32 %v9123_v34, %v10348_v7  ;;  %4149 = vmax.xlane.f32.xlu0 %v3718_v40  ;;  %v3724_v20 = vmax.f32 %v3468_v18, 0.0  ;;  %v3466_v27 = vmax.f32 %v3100_v35, 0.0  ;;  %v12873_v18 = vld [vmem:[#allocation14_spill] sm:$0xff] }
 0x503   : > { %v3102_v39 = vpop.f32.mrf.mxu1 }
 0x504   : > { %v3469_v59 = vmax.f32 %v3111_v42, 0.0  ;;  %v3103_v4 = vadd.f32 %v3102_v39, %v2097_v15  ;;  %4151 = vmax.xlane.f32.xlu1 %v3719_v46  ;;  %v3722_v49 = vmax.f32 %v3466_v27, 0.0  ;;  %v10402_v39 = vpop.permute.xlu1 %2231 }
 0x505   : > { %v9126_v57 = vpop.f32.mrf.mxu1 }
 0x506   : > { %v3725_v48 = vmax.f32 %v3469_v59, 0.0  ;;  %v3467_v5 = vmax.f32 %v3103_v4, 0.0  ;;  %v3124_v60 = vadd.f32 %v9126_v57, %v10320_v41  ;;  %4161 = vmax.xlane.f32.xlu0 %v3724_v20 }
 0x507   : > { %v3115_v12 = vpop.f32.mrf.mxu1 }
 0x508   : > { %v3472_v19 = vmax.f32 %v3124_v60, 0.0  ;;  %v3116_v30 = vadd.f32 %v3115_v12, %v10334_v1  ;;  %4163 = vmax.xlane.f32.xlu1 %v3725_v48  ;;  %v3723_v0 = vmax.f32 %v3467_v5, 0.0  ;;  %v10406_v59 = vpop.permute.xlu1 %2391  ;;  %v1827_v12 = vld [vmem:[%s12842_s10 + $0x350] sm:$0xff] }
 0x509   : > { %v9127_v7 = vpop.f32.mrf.mxu1  ;;  %12875 = vst [vmem:[#allocation14_spill] sm:$0xff] %v10406_v59 }
 0x50a   : > { %v3127_v16 = vadd.f32 %v9127_v7, %v10324_v53  ;;  %4157 = vmax.xlane.f32.xlu0 %v3722_v49  ;;  %v3728_v26 = vmax.f32 %v3472_v19, 0.0  ;;  %v3470_v14 = vmax.f32 %v3116_v30, 0.0  ;;  %v10386_v53 = vpop.permute.xlu0 %2241  ;;  %v1828_v19 = vld [vmem:[%s12842_s10 + $0x358] sm:$0xff]  ;;  %v1793_v7 = vld [vmem:[%s12842_s10 + $0x240] sm:$0xff] }
 0x50b   : > { %v3118_v8 = vpop.f32.mrf.mxu1 }
 0x50c   : > { %v3473_v43 = vmax.f32 %v3127_v16, 0.0  ;;  %v3119_v33 = vadd.f32 %v3118_v8, %v10338_v45  ;;  %4159 = vmax.xlane.f32.xlu1 %v3723_v0  ;;  %v3726_v37 = vmax.f32 %v3470_v14, 0.0  ;;  %v10410_v57 = vpop.permute.xlu1 %2221  ;;  %v1794_v8 = vld [vmem:[%s12842_s10 + $0x248] sm:$0xff]  ;;  %v1825_v14 = vld [vmem:[%s12842_s10 + $0x340] sm:$0xff] }
 0x50d   : > { %v9130_v41 = vpop.f32.mrf.mxu1 }
 0x50e   : > { %v3729_v17 = vmax.f32 %v3473_v43, 0.0  ;;  %v3471_v2 = vmax.f32 %v3119_v33, 0.0  ;;  %v3140_v22 = vadd.f32 %v9130_v41, %v10303_v3  ;;  %4169 = vmax.xlane.f32.xlu0 %v3728_v26  ;;  %v10393_v54 = vpop.permute.xlu0 %2406  ;;  %v1826_v41 = vld [vmem:[%s12842_s10 + $0x348] sm:$0xff] }
 0x50f   : > { %v3131_v1 = vpop.f32.mrf.mxu1  ;;  %12869 = vst [vmem:[#allocation15_spill] sm:$0xff] %v10393_v54 }
 0x510   : > { %v3476_v11 = vmax.f32 %v3140_v22, 0.0  ;;  %v3132_v44 = vadd.f32 %v3131_v1, %v10311_v9  ;;  %4171 = vmax.xlane.f32.xlu1 %v3729_v17  ;;  %v3727_v28 = vmax.f32 %v3471_v2, 0.0  ;;  %v1791_v2 = vld [vmem:[%s12842_s10 + $0x230] sm:$0xff] }
 0x511   : > { %v9131_v55 = vpop.f32.mrf.mxu1 }
 0x512   : > { %v3143_v32 = vadd.f32 %v9131_v55, %v10305_v58  ;;  %4165 = vmax.xlane.f32.xlu0 %v3726_v37  ;;  %v3732_v51 = vmax.f32 %v3476_v11, 0.0  ;;  %v3474_v6 = vmax.f32 %v3132_v44, 0.0  ;;  %v10400_v34 = vpop.permute.xlu0 %2236  ;;  %v1792_v37 = vld [vmem:[%s12842_s10 + $0x238] sm:$0xff]  ;;  %v1823_v11 = vld [vmem:[%s12842_s10 + $0x330] sm:$0xff] }
 0x513   : > { %v3134_v45 = vpop.f32.mrf.mxu1 }
 0x514   : > { %v3477_v50 = vmax.f32 %v3143_v32, 0.0  ;;  %v3135_v3 = vadd.f32 %v3134_v45, %v10313_v13  ;;  %4167 = vmax.xlane.f32.xlu1 %v3727_v28  ;;  %v3730_v58 = vmax.f32 %v3474_v6, 0.0  ;;  %v12871_v13 = vld [vmem:[#allocation12_spill] sm:$0xff]  ;;  %v1824_v32 = vld [vmem:[%s12842_s10 + $0x338] sm:$0xff] }
 0x515   : > { %v9134_v47 = vpop.f32.mrf.mxu1  ;;  %v1789_v45 = vld [vmem:[%s12842_s10 + $0x220] sm:$0xff] }
 0x516   : > { %v3733_v25 = vmax.f32 %v3477_v50, 0.0  ;;  %v3475_v9 = vmax.f32 %v3135_v3, 0.0  ;;  %v3156_v21 = vadd.f32 %v9134_v47, %v10287_v24  ;;  %4177 = vmax.xlane.f32.xlu0 %v3732_v51  ;;  %v10404_v27 = vpop.permute.xlu0 %2396  ;;  %v1790_v3 = vld [vmem:[%s12842_s10 + $0x228] sm:$0xff]  ;;  %v1821_v47 = vld [vmem:[%s12842_s10 + $0x320] sm:$0xff] }
 0x517   : > { %v3147_v52 = vpop.f32.mrf.mxu1  ;;  %12874 = vst [vmem:[#allocation12_spill] sm:$0xff] %v10404_v27  ;;  %v4334_v27 = vld [vmem:[%s12843_s11 + $0x88] sm:$0xff] }
 0x518   : > { %v3480_v62 = vmax.f32 %v3156_v21, 0.0  ;;  %v3148_v63 = vadd.f32 %v3147_v52, %v12870_v56  ;;  %4179 = vmax.xlane.f32.xlu1 %v3733_v25  ;;  %v3731_v61 = vmax.f32 %v3475_v9, 0.0 }
 0x519   : > { %v9135_v31 = vpop.f32.mrf.mxu1 }
 0x51a   : > { %v3159_v10 = vadd.f32 %v9135_v31, %v12871_v13  ;;  %4173 = vmax.xlane.f32.xlu0 %v3730_v58  ;;  %v3736_v29 = vmax.f32 %v3480_v62, 0.0  ;;  %v3478_v40 = vmax.f32 %v3148_v63, 0.0  ;;  %v10408_v4 = vpop.permute.xlu0 %2226  ;;  %v1822_v58 = vld [vmem:[%s12842_s10 + $0x328] sm:$0xff]  ;;  %v1787_v62 = vld [vmem:[%s12842_s10 + $0x210] sm:$0xff]  ;;  %v12876_v31 = vmov 0  }
 0x51b   : > { %v3150_v38 = vpop.f32.mrf.mxu1 }
 0x51c   : > { %v3481_v24 = vmax.f32 %v3159_v10, 0.0  ;;  %v3151_v35 = vadd.f32 %v3150_v38, %v12873_v18  ;;  %4175 = vmax.xlane.f32.xlu1 %v3731_v61  ;;  %v3734_v15 = vmax.f32 %v3478_v40, 0.0  ;;  %v1788_v10 = vld [vmem:[%s12842_s10 + $0x218] sm:$0xff]  ;;  %v1819_v38 = vld [vmem:[%s12842_s10 + $0x310] sm:$0xff] }
 0x51d   : > { %v10431_v0 = vpop.f32.mrf.mxu1 }
 0x51e   : > { %v3737_v46 = vmax.f32 %v3481_v24, 0.0  ;;  %v3479_v42 = vmax.f32 %v3151_v35, 0.0  ;;  %4185 = vmax.xlane.f32.xlu0 %v3736_v29  ;;  %v1820_v35 = vld [vmem:[%s12842_s10 + $0x318] sm:$0xff] }
 0x51f   : > { %v10443_v43 = vpop.f32.mrf.mxu1 }
 0x520   : > { %4187 = vmax.xlane.f32.xlu1 %v3737_v46  ;;  %v3735_v20 = vmax.f32 %v3479_v42, 0.0  ;;  %v1785_v46 = vld [vmem:[%s12842_s10 + $0x200] sm:$0xff] }
 0x521   : > { %v10453_v22 = vpop.f32.mrf.mxu1 }
 0x522   : > { %4181 = vmax.xlane.f32.xlu0 %v3734_v15 }
 0x523   : > { %v10461_v44 = vpop.f32.mrf.mxu1 }
 0x524   : > { %4183 = vmax.xlane.f32.xlu1 %v3735_v20 }
 0x525   : > { %v10469_v51 = vpop.f32.mrf.mxu1 }
 0x527   : > { %v10477_v25 = vpop.f32.mrf.mxu1 }
 0x529   : > { %v10485_v56 = vpop.f32.mrf.mxu1 }
 0x52b   : > { %v10498_v29 = vpop.f32.mrf.mxu1 }
 0x52d   : > { %v10412_v48 = vpop.xlane.xlu0 %4065  ;;  %v10511_v42 = vpop.f32.mrf.mxu1 }
 0x531   : > { %v10414_v5 = vpop.xlane.xlu1 %4067  ;;  %v10416_v60 = vpop.xlane.xlu0 %4061 }
 0x535   : > { %2381 = vperm.xlu1 %9267, %v1827_v12   ;;  %v10421_v49 = vpop.xlane.xlu1 %4063  ;;  %v10426_v30 = vpop.xlane.xlu0 %4073 }
 0x538   : > { %2386 = vperm.xlu0 %9265, %v1828_v19   ;;  %v1786_v19 = vld [vmem:[%s12842_s10 + $0x208] sm:$0xff] }
 0x539   : > { %2211 = vperm.xlu1 %9267, %v1793_v7   ;;  %v10433_v16 = vpop.xlane.xlu1 %4075  ;;  %v10438_v26 = vpop.xlane.xlu0 %4069  ;;  %v1817_v7 = vld [vmem:[%s12842_s10 + $0x300] sm:$0xff] }
 0x53c   : > { %2216 = vperm.xlu0 %9265, %v1794_v8   ;;  %v10527_v8 = vld [vmem:[%s12843_s11] sm:$0xff] }
 0x53d   : > { %2371 = vperm.xlu1 %9267, %v1825_v14   ;;  %v10445_v33 = vpop.xlane.xlu1 %4071  ;;  %v4082_v17 = vpop.xlane.xlu0 %4081  ;;  %v10532_v14 = vld [vmem:[%s12843_s11 + $0x20] sm:$0xff] }
 0x540   : > { %2376 = vperm.xlu0 %9265, %v1826_v41   ;;  %v10534_v41 = vpop.f32.mrf.mxu1 }
 0x541   : > { %2201 = vperm.xlu1 %9267, %v1791_v2   ;;  %v4084_v1 = vpop.xlane.xlu1 %4083  ;;  %v4078_v55 = vpop.xlane.xlu0 %4077  ;;  %v8315_v2 = vcombine.high %v10527_v8, %v10532_v14 }
 0x542   : > { %v4578_v24 = vpack.c.bf16 %v4084_v1, %v4082_v17  ;;  %v4576_v1 = vpack.c.bf16 %v10433_v16, %v10426_v30  ;;  %v1815_v16 = vld [vmem:[%s12842_s10 + $0x2f0] sm:$0xff] }
 0x543   : > { %6013 = vmatprep.mubr.bf16.mxu0 %v8315_v2 }
 0x544   : > { %2206 = vperm.xlu0 %9265, %v1792_v37   ;;  %v10546_v37 = vld [vmem:[%s12843_s11 + $0x8] sm:$0xff] }
 0x545   : > { %2361 = vperm.xlu1 %9267, %v1823_v11   ;;  %v4080_v28 = vpop.xlane.xlu1 %4079  ;;  %v10551_v11 = vld [vmem:[%s12843_s11 + $0x28] sm:$0xff] }
 0x546   : > { %v4577_v20 = vpack.c.bf16 %v4080_v28, %v4078_v55  ;;  %v1818_v28 = vld [vmem:[%s12842_s10 + $0x308] sm:$0xff]  ;;  %v8317_v30 = vcombine.high %v10546_v37, %v10551_v11 }
 0x547   : > { %v4086_v6 = vpop.xlane.xlu0 %4085 }
 0x548   : > { %2366 = vperm.xlu0 %9265, %v1824_v32   ;;  %6302 = vmatprep.mubr.bf16.mxu1 %v8317_v30  ;;  %v1812_v30 = vld [vmem:[%s12842_s10 + $0x2d8] sm:$0xff] }
 0x549   : > { %2191 = vperm.xlu1 %9267, %v1789_v45   ;;  %v4090_v50 = vpop.xlane.xlu1 %4089  ;;  %v10565_v45 = vpop.f32.mrf.mxu1 }
 0x54b   : > { %v4092_v9 = vpop.xlane.xlu0 %4091 }
 0x54c   : > { %v4580_v21 = vpack.c.bf16 %v4092_v9, %v4090_v50  ;;  %2196 = vperm.xlu0 %9265, %v1790_v3   ;;  %v4575_v50 = vpack.c.bf16 %v10445_v33, %v10438_v26  ;;  %v1847_v9 = vld [vmem:[%s12842_s10 + $0x3f0] sm:$0xff]  ;;  %v4574_v26 = vpack.c.bf16 %v10414_v5, %v10412_v48  ;;  %v4573_v48 = vpack.c.bf16 %v10421_v49, %v10416_v60  ;;  %v1846_v49 = vld [vmem:[%s12842_s10 + $0x3e8] sm:$0xff] }
 0x54d   : > { %2351 = vperm.xlu1 %9267, %v1821_v47   ;;  %v4088_v52 = vpop.xlane.xlu1 %4087  ;;  %v1816_v47 = vld [vmem:[%s12842_s10 + $0x2f8] sm:$0xff] }
 0x54e   : > { %5982 = vmatpush1.bf16.msra.mxu0 %v4580_v21  ;;  %v4579_v61 = vpack.c.bf16 %v4088_v52, %v4086_v6  ;;  %v10576_v21 = vpop.f32.mrf.mxu1 }
 0x54f   : > { %v10487_v63 = vpop.xlane.xlu0 %4097  ;;  %5983 = vmatprep.subr.bf16.mxu0 %v12876_v31 }
 0x550   : > { %2356 = vperm.xlu0 %9265, %v1822_v58   ;;  %v1848_v58 = vld [vmem:[%s12842_s10 + $0x3f8] sm:$0xff] }
 0x551   : > { %2181 = vperm.xlu1 %9267, %v1787_v62   ;;  %v10490_v13 = vpop.xlane.xlu1 %4099  ;;  %v1813_v62 = vld [vmem:[%s12842_s10 + $0x2e0] sm:$0xff] }
 0x552   : > { %5984 = vmatpush1.bf16.msra.mxu0 %v4579_v61  ;;  %v10587_v61 = vpop.f32.mrf.mxu1 }
 0x553   : > { %v10500_v40 = vpop.xlane.xlu0 %4093  ;;  %5985 = vmatprep.subr.bf16.mxu0 %v12876_v31 }
 0x554   : > { %2186 = vperm.xlu0 %9265, %v1788_v10  }
 0x555   : > { %2341 = vperm.xlu1 %9267, %v1819_v38   ;;  %v10503_v18 = vpop.xlane.xlu1 %4095  ;;  %v1814_v38 = vld [vmem:[%s12842_s10 + $0x2e8] sm:$0xff] }
 0x556   : > { %5986 = vmatpush1.bf16.msra.mxu0 %v4578_v24  ;;  %v1845_v24 = vld [vmem:[%s12842_s10 + $0x3e0] sm:$0xff] }
 0x557   : > { %v10513_v15 = vpop.xlane.xlu0 %4105  ;;  %5987 = vmatprep.subr.bf16.mxu0 %v12876_v31 }
 0x558   : > { %2346 = vperm.xlu0 %9265, %v1820_v35   ;;  %v10598_v35 = vpop.f32.mrf.mxu1 }
 0x559   : > { %2171 = vperm.xlu1 %9267, %v1785_v46   ;;  %v10516_v12 = vpop.xlane.xlu1 %4107 }
 0x55a   : > { %5988 = vmatpush1.bf16.msra.mxu0 %v4577_v20 }
 0x55b   : > { %v10536_v17 = vpop.xlane.xlu0 %4101  ;;  %5989 = vmatprep.subr.bf16.mxu0 %v12876_v31 }
 0x55c   : > { %2176 = vperm.xlu0 %9265, %v1786_v19   ;;  %v1811_v19 = vld [vmem:[%s12842_s10 + $0x2d0] sm:$0xff] }
 0x55d   : > { %2331 = vperm.xlu1 %9267, %v1817_v7   ;;  %v10553_v55 = vpop.xlane.xlu1 %4103  ;;  %v10607_v7 = vpop.f32.mrf.mxu1 }
 0x55e   : > { %5990 = vmatpush1.bf16.msra.mxu0 %v4576_v1 }
 0x55f   : > { %v4114_v6 = vpop.xlane.xlu0 %4113  ;;  %5991 = vmatprep.subr.bf16.mxu0 %v12876_v31 }
 0x560   : > { %2336 = vperm.xlu0 %9265, %v1818_v28  }
 0x561   : > { %2321 = vperm.xlu1 %9267, %v1815_v16   ;;  %v4116_v3 = vpop.xlane.xlu1 %4115  ;;  %v1843_v16 = vld [vmem:[%s12842_s10 + $0x3d0] sm:$0xff] }
 0x562   : > { %5992 = vmatpush1.bf16.msra.mxu0 %v4575_v50  ;;  %v10620_v50 = vpop.f32.mrf.mxu1 }
 0x563   : > { %v4110_v52 = vpop.xlane.xlu0 %4109  ;;  %5993 = vmatprep.subr.bf16.mxu0 %v12876_v31 }
 0x564   : > { %2326 = vperm.xlu0 %9265, %v1816_v47  }
 0x565   : > { %2481 = vperm.xlu1 %9267, %v1847_v9   ;;  %v4112_v33 = vpop.xlane.xlu1 %4111  ;;  %v4586_v9 = vpack.c.bf16 %v4116_v3, %v4114_v6 }
 0x566   : > { %5994 = vmatpush1.bf16.msra.mxu0 %v4574_v26  ;;  %v4585_v6 = vpack.c.bf16 %v4112_v33, %v4110_v52  ;;  %v4584_v52 = vpack.c.bf16 %v10516_v12, %v10513_v15  ;;  %v4583_v15 = vpack.c.bf16 %v10553_v55, %v10536_v17  ;;  %v4582_v17 = vpack.c.bf16 %v10490_v13, %v10487_v63  ;;  %v4325_v13 = vld [vmem:[%s12843_s11 + $0x40] sm:$0xff] }
 0x567   : > { %v4122_v10 = vpop.xlane.xlu0 %4121  ;;  %5995 = vmatprep.subr.bf16.mxu0 %v12876_v31  ;;  %v4581_v63 = vpack.c.bf16 %v10503_v18, %v10500_v40  ;;  %v1837_v40 = vld [vmem:[%s12842_s10 + $0x3a0] sm:$0xff]  ;;  %v8314_v18 = vcombine.low %v10527_v8, %v10532_v14  ;;  %v1803_v8 = vld [vmem:[%s12842_s10 + $0x290] sm:$0xff] }
 0x568   : > { %2486 = vperm.xlu0 %9265, %v1848_v58   ;;  %v1844_v58 = vld [vmem:[%s12842_s10 + $0x3d8] sm:$0xff] }
 0x569   : > { %2311 = vperm.xlu1 %9267, %v1813_v62   ;;  %v4124_v5 = vpop.xlane.xlu1 %4123  ;;  %v1809_v62 = vld [vmem:[%s12842_s10 + $0x2c0] sm:$0xff] }
 0x56a   : > { %5996 = vmatpush1.bf16.msra.mxu0 %v4573_v48  ;;  %v4588_v20 = vpack.c.bf16 %v4124_v5, %v4122_v10  ;;  %v10633_v10 = vpop.f32.mrf.mxu1  ;;  %v1810_v5 = vld [vmem:[%s12842_s10 + $0x2c8] sm:$0xff] }
 0x56b   : > { %v4118_v46 = vpop.xlane.xlu0 %4117  ;;  %5997 = vmatprep.subr.bf16.mxu0 %v12876_v31  ;;  %12877 = vst [vmem:[#allocation16_spill] sm:$0xff] %v10633_v10 }
 0x56c   : > { %2316 = vperm.xlu0 %9265, %v1814_v38   ;;  %v1841_v38 = vld [vmem:[%s12842_s10 + $0x3c0] sm:$0xff] }
 0x56d   : > { %2471 = vperm.xlu1 %9267, %v1845_v24   ;;  %v4120_v60 = vpop.xlane.xlu1 %4119  ;;  %v10646_v24 = vpop.f32.mrf.mxu1 }
 0x56e   : > { %5998 = vmatpush2.bf16.msra.mxu0 %v4588_v20  ;;  %v4587_v1 = vpack.c.bf16 %v4120_v60, %v4118_v46  ;;  %12878 = vst [vmem:[#allocation17_spill] sm:$0xff] %v10646_v24  ;;  %v1842_v20 = vld [vmem:[%s12842_s10 + $0x3c8] sm:$0xff]  ;;  %v1807_v60 = vld [vmem:[%s12842_s10 + $0x2b0] sm:$0xff] }
 0x56f   : > { %v10609_v2 = vpop.xlane.xlu0 %4129  ;;  %5999 = vmatprep.subr.bf16.mxu0 %v12876_v31 }
 0x570   : > { %2476 = vperm.xlu0 %9265, %v1846_v49   ;;  %v10661_v49 = vpop.f32.mrf.mxu1 }
 0x571   : > { %2301 = vperm.xlu1 %9267, %v1811_v19   ;;  %v10612_v28 = vpop.xlane.xlu1 %4131  ;;  %12879 = vst [vmem:[#allocation18_spill] sm:$0xff] %v10661_v49 }
 0x572   : > { %6000 = vmatpush2.bf16.msra.mxu0 %v4587_v1  ;;  %v1808_v1 = vld [vmem:[%s12842_s10 + $0x2b8] sm:$0xff] }
 0x573   : > { %v10622_v47 = vpop.xlane.xlu0 %4125  ;;  %6001 = vmatprep.subr.bf16.mxu0 %v12876_v31 }
 0x574   : > { %2306 = vperm.xlu0 %9265, %v1812_v30   ;;  %v1839_v30 = vld [vmem:[%s12842_s10 + $0x3b0] sm:$0xff] }
 0x575   : > { %2461 = vperm.xlu1 %9267, %v1843_v16   ;;  %v10625_v26 = vpop.xlane.xlu1 %4127  ;;  %v10674_v16 = vpop.f32.mrf.mxu1 }
 0x576   : > { %6002 = vmatpush2.bf16.msra.mxu0 %v4586_v9  ;;  %12880 = vst [vmem:[#allocation19_spill] sm:$0xff] %v10674_v16  ;;  %v4589_v16 = vpack.c.bf16 %v10625_v26, %v10622_v47 }
 0x577   : > { %v10635_v48 = vpop.xlane.xlu0 %4137  ;;  %6003 = vmatprep.subr.bf16.mxu0 %v12876_v31 }
 0x578   : > { %2466 = vperm.xlu0 %9265, %v1844_v58   ;;  %v1840_v58 = vld [vmem:[%s12842_s10 + $0x3b8] sm:$0xff] }
 0x579   : > { %2291 = vperm.xlu1 %9267, %v1809_v62   ;;  %v10638_v3 = vpop.xlane.xlu1 %4139  ;;  %v1805_v62 = vld [vmem:[%s12842_s10 + $0x2a0] sm:$0xff] }
 0x57a   : > { %6004 = vmatpush2.bf16.msra.mxu0 %v4585_v6  ;;  %v10687_v6 = vpop.f32.mrf.mxu1 }
 0x57b   : > { %v10648_v46 = vpop.xlane.xlu0 %4133  ;;  %6005 = vmatprep.subr.bf16.mxu0 %v12876_v31  ;;  %12881 = vst [vmem:[#allocation20_spill] sm:$0xff] %v10687_v6 }
 0x57c   : > { %2296 = vperm.xlu0 %9265, %v1810_v5  }
 0x57d   : > { %2451 = vperm.xlu1 %9267, %v1841_v38   ;;  %v10653_v33 = vpop.xlane.xlu1 %4135  ;;  %v4329_v38 = vld [vmem:[%s12843_s11 + $0x60] sm:$0xff] }
 0x57e   : > { %6006 = vmatpush2.bf16.msra.mxu0 %v4584_v52 }
 0x57f   : > { %v10663_v19 = vpop.xlane.xlu0 %4145  ;;  %6007 = vmatprep.subr.bf16.mxu0 %v12876_v31 }
 0x580   : > { %2456 = vperm.xlu0 %9265, %v1842_v20   ;;  %v1806_v20 = vld [vmem:[%s12842_s10 + $0x2a8] sm:$0xff] }
 0x581   : > { %2281 = vperm.xlu1 %9267, %v1807_v60   ;;  %v4148_v12 = vpop.xlane.xlu1 %4147 }
 0x582   : > { %6008 = vmatpush2.bf16.msra.mxu0 %v4583_v15  ;;  %v10706_v15 = vpop.f32.mrf.mxu1 }
 0x583   : > { %v10676_v9 = vpop.xlane.xlu0 %4141  ;;  %6009 = vmatprep.subr.bf16.mxu0 %v12876_v31  ;;  %12882 = vst [vmem:[#allocation21_spill] sm:$0xff] %v10706_v15 }
 0x584   : > { %2286 = vperm.xlu0 %9265, %v1808_v1   ;;  %v10716_v14 = vpop.f32.mrf.mxu1 }
 0x585   : > { %2441 = vperm.xlu1 %9267, %v1839_v30   ;;  %v4144_v55 = vpop.xlane.xlu1 %4143  ;;  %v8323_v30 = vcombine.high %v4325_v13, %v4329_v38  ;;  %12883 = vst [vmem:[#allocation22_spill] sm:$0xff] %v10716_v14 }
 0x586   : > { %6010 = vmatpush2.bf16.msra.mxu0 %v4582_v17 }
 0x587   : > { %v4154_v5 = vpop.xlane.xlu0 %4153  ;;  %6011 = vmatprep.subr.bf16.mxu0 %v12876_v31 }
 0x588   : > { %2446 = vperm.xlu0 %9265, %v1840_v58   ;;  %v1838_v58 = vld [vmem:[%s12842_s10 + $0x3a8] sm:$0xff] }
 0x589   : > { %2271 = vperm.xlu1 %9267, %v1805_v62   ;;  %v4156_v52 = vpop.xlane.xlu1 %4155 }
 0x58a   : > { %v4596_v60 = vpack.c.bf16 %v4156_v52, %v4154_v5  ;;  %6012 = vmatpush2.bf16.msra.mxu0 %v4581_v63  ;;  %v4333_v63 = vld [vmem:[%s12843_s11 + $0x80] sm:$0xff] }
 0x58b   : > { %v4150_v1 = vpop.xlane.xlu0 %4149  ;;  %6559 = vmatprep.subr.bf16.mxu0 %v12876_v31  ;;  %v4337_v52 = vld [vmem:[%s12843_s11 + $0xa0] sm:$0xff] }
 0x58c   : > { %2276 = vperm.xlu0 %9265, %v1806_v20   ;;  %6271 = vmatpush1.bf16.msra.mxu1 %v4596_v60  ;;  %v1804_v60 = vld [vmem:[%s12842_s10 + $0x298] sm:$0xff] }
 0x58d   : > { %2431 = vperm.xlu1 %9267, %v1837_v40   ;;  %v4152_v17 = vpop.xlane.xlu1 %4151  ;;  %6272 = vmatprep.subr.bf16.mxu1 %v12876_v31  ;;  %v4594_v40 = vpack.c.bf16 %v4148_v12, %v10663_v19  ;;  %v1836_v19 = vld [vmem:[%s12842_s10 + $0x398] sm:$0xff]  ;;  %v4593_v12 = vpack.c.bf16 %v4144_v55, %v10676_v9  ;;  %v4345_v9 = vld [vmem:[%s12843_s11 + $0xe0] sm:$0xff] }
 0x58e   : > { %v4595_v62 = vpack.c.bf16 %v4152_v17, %v4150_v1  ;;  %6014 = vmatmul.mubr.bf16.vlgmr.msra.gmra.mxu0 %v8314_v18  ;;  %v1835_v18 = vld [vmem:[%s12842_s10 + $0x390] sm:$0xff]  ;;  %v8322_v1 = vcombine.low %v4325_v13, %v4329_v38  ;;  %v1801_v13 = vld [vmem:[%s12842_s10 + $0x280] sm:$0xff] }
 0x58f   : > { %v10718_v5 = vpop.xlane.xlu0 %4161  ;;  %6021 = vmatprep.mubr.bf16.mxu0 %v8323_v30  ;;  %v10736_v30 = vpop.f32.mrf.mxu1 }
 0x590   : > { %2436 = vperm.xlu0 %9265, %v1838_v58   ;;  %6273 = vmatpush1.bf16.msra.mxu1 %v4595_v62  ;;  %12884 = vst [vmem:[#allocation23_spill] sm:$0xff] %v10736_v30  ;;  %v8331_v58 = vcombine.high %v4333_v63, %v4337_v52  ;;  %v4365_v30 = vld [vmem:[%s12843_s11 + $0x180] sm:$0xff] }
 0x591   : > { %2261 = vperm.xlu1 %9267, %v1803_v8   ;;  %v10726_v20 = vpop.xlane.xlu1 %4163  ;;  %6274 = vmatprep.subr.bf16.mxu1 %v12876_v31  ;;  %v10750_v38 = vpop.f32.mrf.mxu1 }
 0x592   : > { %12885 = vst [vmem:[#allocation24_spill] sm:$0xff] %v10750_v38 }
 0x593   : > { %v10738_v17 = vpop.xlane.xlu0 %4157 }
 0x594   : > { %2266 = vperm.xlu0 %9265, %v1804_v60   ;;  %6275 = vmatpush1.bf16.msra.mxu1 %v4594_v40  ;;  %v4341_v60 = vld [vmem:[%s12843_s11 + $0xc0] sm:$0xff]  ;;  %v1802_v40 = vld [vmem:[%s12842_s10 + $0x288] sm:$0xff] }
 0x595   : > { %2421 = vperm.xlu1 %9267, %v1835_v18   ;;  %v10740_v62 = vpop.xlane.xlu1 %4159  ;;  %6276 = vmatprep.subr.bf16.mxu1 %v12876_v31  ;;  %v4592_v18 = vpack.c.bf16 %v10638_v3, %v10635_v48  ;;  %v1834_v48 = vld [vmem:[%s12842_s10 + $0x388] sm:$0xff]  ;;  %v4591_v3 = vpack.c.bf16 %v10653_v33, %v10648_v46  ;;  %v4590_v46 = vpack.c.bf16 %v10612_v28, %v10609_v2  ;;  %v4357_v2 = vld [vmem:[%s12843_s11 + $0x140] sm:$0xff] }
 0x596   : > { %6022 = vmatmul.mubr.bf16.gmra.mxu0 %v8322_v1  ;;  %v1833_v1 = vld [vmem:[%s12842_s10 + $0x380] sm:$0xff]  ;;  %v8338_v33 = vcombine.low %v4341_v60, %v4345_v9 }
 0x597   : > { %v10752_v8 = vpop.xlane.xlu0 %4169  ;;  %6029 = vmatprep.mubr.bf16.mxu0 %v8331_v58  ;;  %v8330_v58 = vcombine.low %v4333_v63, %v4337_v52  ;;  %v4361_v28 = vld [vmem:[%s12843_s11 + $0x160] sm:$0xff] }
 0x598   : > { %2426 = vperm.xlu0 %9265, %v1836_v19   ;;  %6277 = vmatpush1.bf16.msra.mxu1 %v4593_v12  ;;  %v10771_v19 = vpop.f32.mrf.mxu1  ;;  %v8355_v26 = vcombine.high %v4357_v2, %v4361_v28 }
 0x599   : > { %2251 = vperm.xlu1 %9267, %v1801_v13   ;;  %v10760_v55 = vpop.xlane.xlu1 %4171  ;;  %6278 = vmatprep.subr.bf16.mxu1 %v12876_v31  ;;  %12886 = vst [vmem:[#allocation25_spill] sm:$0xff] %v10771_v19  ;;  %v8339_v13 = vcombine.high %v4341_v60, %v4345_v9  ;;  %v4393_v19 = vld [vmem:[%s12843_s11 + $0x260] sm:$0xff] }
 0x59a   : > { %v10783_v63 = vpop.f32.mrf.mxu1 }
 0x59b   : > { %v10773_v12 = vpop.xlane.xlu0 %4165  ;;  %12887 = vst [vmem:[#allocation26_spill] sm:$0xff] %v10783_v63 }
 0x59c   : > { %2256 = vperm.xlu0 %9265, %v1802_v40   ;;  %6279 = vmatpush1.bf16.msra.mxu1 %v4592_v18  ;;  %v4349_v40 = vld [vmem:[%s12843_s11 + $0x100] sm:$0xff] }
 0x59d   : > { %2411 = vperm.xlu1 %9267, %v1833_v1   ;;  %v10775_v32 = vpop.xlane.xlu1 %4167  ;;  %6280 = vmatprep.subr.bf16.mxu1 %v12876_v31  ;;  %v4353_v18 = vld [vmem:[%s12843_s11 + $0x120] sm:$0xff] }
 0x59e   : > { %6030 = vmatmul.mubr.bf16.gmra.mxu0 %v8330_v58  ;;  %v10794_v58 = vpop.f32.mrf.mxu1 }
 0x59f   : > { %v4178_v52 = vpop.xlane.xlu0 %4177  ;;  %6037 = vmatprep.mubr.bf16.mxu0 %v8339_v13  ;;  %12888 = vst [vmem:[#allocation27_spill] sm:$0xff] %v10794_v58  ;;  %v4330_v58 = vld [vmem:[%s12843_s11 + $0x68] sm:$0xff] }
 0x5a0   : > { %2416 = vperm.xlu0 %9265, %v1834_v48   ;;  %6281 = vmatpush1.bf16.msra.mxu1 %v4591_v3  ;;  %v8347_v48 = vcombine.high %v4349_v40, %v4353_v18  ;;  %v10799_v24 = vpop.f32.mrf.mxu1 }
 0x5a1   : > { %v4180_v1 = vpop.xlane.xlu1 %4179  ;;  %6282 = vmatprep.subr.bf16.mxu1 %v12876_v31 }
 0x5a2   : > { %v10808_v47 = vpop.f32.mrf.mxu1 }
 0x5a3   : > { %v4174_v13 = vpop.xlane.xlu0 %4173 }
 0x5a4   : > { %6283 = vmatpush1.bf16.msra.mxu1 %v4590_v46  ;;  %v8346_v46 = vcombine.low %v4349_v40, %v4353_v18  ;;  %v10811_v10 = vpop.f32.mrf.mxu1  ;;  %v4602_v18 = vpack.c.bf16 %v4180_v1, %v4178_v52  ;;  %v4373_v52 = vld [vmem:[%s12843_s11 + $0x1c0] sm:$0xff] }
 0x5a5   : > { %v4176_v3 = vpop.xlane.xlu1 %4175  ;;  %6284 = vmatprep.subr.bf16.mxu1 %v12876_v31  ;;  %v4377_v1 = vld [vmem:[%s12843_s11 + $0x1e0] sm:$0xff] }
 0x5a6   : > { %6038 = vmatmul.mubr.bf16.gmra.mxu0 %v8338_v33 }
 0x5a7   : > { %v4186_v49 = vpop.xlane.xlu0 %4185  ;;  %6045 = vmatprep.mubr.bf16.mxu0 %v8347_v48 }
 0x5a8   : > { %6285 = vmatpush1.bf16.msra.mxu1 %v4589_v16 }
 0x5a9   : > { %v4188_v60 = vpop.xlane.xlu1 %4187  ;;  %6286 = vmatprep.subr.bf16.mxu1 %v12876_v31 }
 0x5aa   : > { %v4604_v9 = vpack.c.bf16 %v4188_v60, %v4186_v49  ;;  %v4369_v49 = vld [vmem:[%s12843_s11 + $0x1a0] sm:$0xff]  ;;  %v8354_v60 = vcombine.low %v4357_v2, %v4361_v28 }
 0x5ab   : > { %v4182_v33 = vpop.xlane.xlu0 %4181 }
 0x5ac   : > { %6287 = vmatpush2.bf16.msra.mxu1 %v4604_v9  ;;  %v10822_v9 = vpop.f32.mrf.mxu1 }
 0x5ad   : > { %v4184_v48 = vpop.xlane.xlu1 %4183  ;;  %6288 = vmatprep.subr.bf16.mxu1 %v12876_v31 }
 0x5ae   : > { %v4603_v16 = vpack.c.bf16 %v4184_v48, %v4182_v33  ;;  %6046 = vmatmul.mubr.bf16.gmra.mxu0 %v8346_v46  ;;  %v4601_v48 = vpack.c.bf16 %v4176_v3, %v4174_v13  ;;  %v4600_v13 = vpack.c.bf16 %v10760_v55, %v10752_v8  ;;  %v8362_v3 = vcombine.low %v4365_v30, %v4369_v49  ;;  %v4385_v8 = vld [vmem:[%s12843_s11 + $0x220] sm:$0xff] }
 0x5af   : > { %6053 = vmatprep.mubr.bf16.mxu0 %v8355_v26  ;;  %v8363_v26 = vcombine.high %v4365_v30, %v4369_v49  ;;  %v4381_v30 = vld [vmem:[%s12843_s11 + $0x200] sm:$0xff] }
 0x5b0   : > { %6289 = vmatpush2.bf16.msra.mxu1 %v4603_v16  ;;  %v10829_v16 = vpop.f32.mrf.mxu1 }
 0x5b1   : > { %v10819_v40 = vpop.permute.xlu1 %2381  ;;  %6290 = vmatprep.subr.bf16.mxu1 %v12876_v31 }
 0x5b2   : > { %v10844_v28 = vpop.f32.mrf.mxu1 }
 0x5b3   : > { %v10824_v46 = vpop.permute.xlu0 %2386 }
 0x5b4   : > { %12889 = vst [vmem:[#allocation28_spill] sm:$0xff] %v10824_v46  ;;  %6291 = vmatpush2.bf16.msra.mxu1 %v4602_v18  ;;  %v10853_v14 = vpop.f32.mrf.mxu1 }
 0x5b5   : > { %v10826_v33 = vpop.permute.xlu1 %2211  ;;  %6292 = vmatprep.subr.bf16.mxu1 %v12876_v31 }
 0x5b6   : > { %6054 = vmatmul.mubr.bf16.gmra.mxu0 %v8354_v60  ;;  %v8371_v60 = vcombine.high %v4373_v52, %v4377_v1  ;;  %v10868_v49 = vpop.f32.mrf.mxu1 }
 0x5b7   : > { %v10831_v15 = vpop.permute.xlu0 %2216  ;;  %6061 = vmatprep.mubr.bf16.mxu0 %v8363_v26 }
 0x5b8   : > { %6293 = vmatpush2.bf16.msra.mxu1 %v4601_v48  ;;  %v4599_v48 = vpack.c.bf16 %v10775_v32, %v10773_v12  ;;  %v4598_v32 = vpack.c.bf16 %v10726_v20, %v10718_v5  ;;  %v8370_v12 = vcombine.low %v4373_v52, %v4377_v1  ;;  %v4597_v5 = vpack.c.bf16 %v10740_v62, %v10738_v17  ;;  %v10883_v20 = vpop.f32.mrf.mxu1 }
 0x5b9   : > { %v10839_v2 = vpop.permute.xlu1 %2371  ;;  %6294 = vmatprep.subr.bf16.mxu1 %v12876_v31  ;;  %v8378_v17 = vcombine.low %v4381_v30, %v4385_v8 }
 0x5ba   : > { %12890 = vst [vmem:[#allocation29_spill] sm:$0xff] %v10839_v2  ;;  %v10896_v62 = vpop.f32.mrf.mxu1 }
 0x5bb   : > { %v10846_v18 = vpop.permute.xlu0 %2376 }
 0x5bc   : > { %12891 = vst [vmem:[#allocation30_spill] sm:$0xff] %v10846_v18  ;;  %6295 = vmatpush2.bf16.msra.mxu1 %v4600_v13 }
 0x5bd   : > { %v10848_v26 = vpop.permute.xlu1 %2201  ;;  %6296 = vmatprep.subr.bf16.mxu1 %v12876_v31 }
 0x5be   : > { %6062 = vmatmul.mubr.bf16.gmra.mxu0 %v8362_v3  ;;  %v8379_v3 = vcombine.high %v4381_v30, %v4385_v8  ;;  %v10910_v8 = vpop.f32.mrf.mxu1 }
 0x5bf   : > { %v10855_v6 = vpop.permute.xlu0 %2206  ;;  %6069 = vmatprep.mubr.bf16.mxu0 %v8371_v60 }
 0x5c0   : > { %6297 = vmatpush2.bf16.msra.mxu1 %v4599_v48  ;;  %v4326_v48 = vld [vmem:[%s12843_s11 + $0x48] sm:$0xff]  ;;  %v10921_v2 = vpop.f32.mrf.mxu1 }
 0x5c1   : > { %v10863_v55 = vpop.permute.xlu1 %2361  ;;  %6298 = vmatprep.subr.bf16.mxu1 %v12876_v31  ;;  %v8325_v1 = vcombine.high %v4326_v48, %v4330_v58  ;;  %v8324_v54 = vcombine.low %v4326_v48, %v4330_v58 }
 0x5c3   : > { %v10870_v13 = vpop.permute.xlu0 %2366 }
 0x5c4   : > { %6299 = vmatpush2.bf16.msra.mxu1 %v4598_v32  ;;  %v4389_v32 = vld [vmem:[%s12843_s11 + $0x240] sm:$0xff] }
 0x5c5   : > { %v10872_v60 = vpop.permute.xlu1 %2191  ;;  %6300 = vmatprep.subr.bf16.mxu1 %v12876_v31 }
 0x5c6   : > { %6070 = vmatmul.mubr.bf16.gmra.mxu0 %v8370_v12 }
 0x5c7   : > { %v10885_v52 = vpop.permute.xlu0 %2196  ;;  %6077 = vmatprep.mubr.bf16.mxu0 %v8379_v3  ;;  %v12892_v3 = vcombine.low %v10546_v37, %v10551_v11 }
 0x5c8   : > { %6301 = vmatpush2.bf16.msra.mxu1 %v4597_v5  ;;  %v8387_v5 = vcombine.high %v4389_v32, %v4393_v19 }
 0x5c9   : > { %v10893_v63 = vpop.permute.xlu1 %2351  ;;  %6848 = vmatprep.subr.bf16.mxu1 %v12876_v31  ;;  %v4338_v31 = vld [vmem:[%s12843_s11 + $0xa8] sm:$0xff] }
 0x5cb   : > { %v10898_v12 = vpop.permute.xlu0 %2356  ;;  %6303 = vmatmul.mubr.bf16.vlgmr.msra.gmra.mxu1 %v12892_v3  ;;  %v4397_v3 = vld [vmem:[%s12843_s11 + $0x280] sm:$0xff] }
 0x5cc   : > { %6310 = vmatprep.mubr.bf16.mxu1 %v8325_v1  ;;  %v8333_v1 = vcombine.high %v4334_v27, %v4338_v31 }
 0x5cd   : > { %v2182_v38 = vpop.permute.xlu1 %2181 }
 0x5ce   : > { %v3172_v30 = vadd.f32 %v10431_v0, %v2182_v38  ;;  %6078 = vmatmul.mubr.bf16.gmra.mxu0 %v8378_v17  ;;  %v8386_v17 = vcombine.low %v4389_v32, %v4393_v19  ;;  %v3188_v19 = vadd.f32 %v10469_v51, %v10848_v26  ;;  %v4405_v51 = vld [vmem:[%s12843_s11 + $0x2c0] sm:$0xff]  ;;  %v8394_v26 = vcombine.low %v4397_v3, %v4401_v36 }
 0x5cf   : > { %v2187_v59 = vpop.permute.xlu0 %2186  ;;  %6085 = vmatprep.mubr.bf16.mxu0 %v8387_v5  ;;  %v4342_v5 = vld [vmem:[%s12843_s11 + $0xc8] sm:$0xff] }
 0x5d0   : > { %v3484_v37 = vmax.f32 %v3172_v30, 0.0  ;;  %v3175_v11 = vadd.f32 %v10453_v22, %v2187_v59  ;;  %v8395_v59 = vcombine.high %v4397_v3, %v4401_v36  ;;  %v4346_v30 = vld [vmem:[%s12843_s11 + $0xe8] sm:$0xff] }
 0x5d1   : > { %v10919_v18 = vpop.permute.xlu1 %2341  ;;  %v8341_v46 = vcombine.high %v4342_v5, %v4346_v30  ;;  %v4350_v36 = vld [vmem:[%s12843_s11 + $0x108] sm:$0xff] }
 0x5d2   : > { %v3740_v0 = vmax.f32 %v3484_v37, 0.0  ;;  %v3485_v38 = vmax.f32 %v3175_v11, 0.0  ;;  %v8332_v11 = vcombine.low %v4334_v27, %v4338_v31  ;;  %v3180_v27 = vadd.f32 %v10477_v25, %v10872_v60  ;;  %v4354_v25 = vld [vmem:[%s12843_s11 + $0x128] sm:$0xff] }
 0x5d3   : > { %v10923_v58 = vpop.permute.xlu0 %2346  ;;  %6311 = vmatmul.mubr.bf16.gmra.mxu1 %v8324_v54  ;;  %v10934_v54 = vpop.f32.mrf.mxu1  ;;  %v3204_v60 = vadd.f32 %v10511_v42, %v10410_v57  ;;  %v4413_v57 = vld [vmem:[%s12843_s11 + $0x300] sm:$0xff] }
 0x5d4   : > { %v3741_v22 = vmax.f32 %v3485_v38, 0.0  ;;  %4193 = vmax.xlane.f32.xlu0 %v3740_v0  ;;  %6318 = vmatprep.mubr.bf16.mxu1 %v8333_v1  ;;  %v3191_v1 = vadd.f32 %v10485_v56, %v10855_v6  ;;  %v4417_v42 = vld [vmem:[%s12843_s11 + $0x320] sm:$0xff] }
 0x5d5   : > { %v2172_v48 = vpop.permute.xlu1 %2171  ;;  %v10947_v56 = vpop.f32.mrf.mxu1 }
 0x5d6   : > { %v3164_v32 = vadd.f32 %v10443_v43, %v2172_v48  ;;  %4195 = vmax.xlane.f32.xlu1 %v3741_v22  ;;  %6086 = vmatmul.mubr.bf16.gmra.mxu0 %v8386_v17  ;;  %v4409_v43 = vld [vmem:[%s12843_s11 + $0x2e0] sm:$0xff]  ;;  %v3488_v17 = vmax.f32 %v3188_v19, 0.0  ;;  %v3489_v6 = vmax.f32 %v3191_v1, 0.0  ;;  %v3183_v22 = vadd.f32 %v10498_v29, %v10885_v52 }
 0x5d7   : > { %v2177_v37 = vpop.permute.xlu0 %2176  ;;  %6093 = vmatprep.mubr.bf16.mxu0 %v8395_v59  ;;  %v3486_v19 = vmax.f32 %v3180_v27, 0.0  ;;  %v10961_v29 = vpop.f32.mrf.mxu1  ;;  %v8340_v52 = vcombine.low %v4342_v5, %v4346_v30  ;;  %v3196_v5 = vadd.f32 %v10534_v41, %v10826_v33  ;;  %v4358_v41 = vld [vmem:[%s12843_s11 + $0x148] sm:$0xff] }
 0x5d8   : > { %v3482_v0 = vmax.f32 %v3164_v32, 0.0  ;;  %v3167_v38 = vadd.f32 %v10461_v44, %v2177_v37  ;;  %v8403_v44 = vcombine.high %v4405_v51, %v4409_v43  ;;  %v3744_v3 = vmax.f32 %v3488_v17, 0.0  ;;  %v4362_v33 = vld [vmem:[%s12843_s11 + $0x168] sm:$0xff] }
 0x5d9   : > { %v10951_v32 = vpop.permute.xlu1 %2331  ;;  %v3207_v37 = vadd.f32 %v10565_v45, %v10408_v4  ;;  %v3487_v1 = vmax.f32 %v3183_v22, 0.0  ;;  %v3742_v30 = vmax.f32 %v3486_v19, 0.0  ;;  %v10975_v4 = vpop.f32.mrf.mxu1  ;;  %v8411_v17 = vcombine.high %v4413_v57, %v4417_v42  ;;  %v4421_v19 = vld [vmem:[%s12843_s11 + $0x340] sm:$0xff] }
 0x5da   : > { %v3738_v31 = vmax.f32 %v3482_v0, 0.0  ;;  %v3483_v59 = vmax.f32 %v3167_v38, 0.0  ;;  %v8349_v0 = vcombine.high %v4350_v36, %v4354_v25  ;;  %v3492_v38 = vmax.f32 %v3204_v60, 0.0 }
 0x5db   : > { %6319 = vmatmul.mubr.bf16.gmra.mxu1 %v8332_v11  ;;  %v3745_v11 = vmax.f32 %v3489_v6, 0.0  ;;  %v3493_v27 = vmax.f32 %v3207_v37, 0.0  ;;  %v3490_v6 = vmax.f32 %v3196_v5, 0.0 }
 0x5dc   : > { %v3739_v48 = vmax.f32 %v3483_v59, 0.0  ;;  %4189 = vmax.xlane.f32.xlu0 %v3738_v31  ;;  %6326 = vmatprep.mubr.bf16.mxu1 %v8341_v46  ;;  %v10963_v46 = vpop.permute.xlu0 %2336  ;;  %v3199_v31 = vadd.f32 %v10576_v21, %v10831_v15  ;;  %v3743_v59 = vmax.f32 %v3487_v1, 0.0  ;;  %v10987_v21 = vpop.f32.mrf.mxu1  ;;  %v8348_v15 = vcombine.low %v4350_v36, %v4354_v25 }
 0x5dd   : > { %v2322_v45 = vpop.permute.xlu1 %2321  ;;  %v3749_v22 = vmax.f32 %v3493_v27, 0.0  ;;  %v3223_v36 = vadd.f32 %v10607_v7, %v10390_v23  ;;  %v3746_v25 = vmax.f32 %v3490_v6, 0.0  ;;  %v4366_v23 = vld [vmem:[%s12843_s11 + $0x188] sm:$0xff] }
 0x5de   : > { %4191 = vmax.xlane.f32.xlu1 %v3739_v48  ;;  %6094 = vmatmul.mubr.bf16.gmra.mxu0 %v8394_v26  ;;  %v8402_v26 = vcombine.low %v4405_v51, %v4409_v43  ;;  %v3748_v51 = vmax.f32 %v3492_v38, 0.0  ;;  %v3212_v43 = vadd.f32 %v10598_v35, %v10402_v39  ;;  %v3220_v48 = vadd.f32 %v10587_v61, %v10386_v53  ;;  %v4425_v39 = vld [vmem:[%s12843_s11 + $0x360] sm:$0xff]  ;;  %v11001_v61 = vpop.f32.mrf.mxu1  ;;  %v4370_v7 = vld [vmem:[%s12843_s11 + $0x1a8] sm:$0xff] }
 0x5df   : > { %6101 = vmatprep.mubr.bf16.mxu0 %v8403_v44  ;;  %v3491_v60 = vmax.f32 %v3199_v31, 0.0  ;;  %v8410_v53 = vcombine.low %v4413_v57, %v4417_v42  ;;  %v3497_v42 = vmax.f32 %v3223_v36, 0.0  ;;  %v3284_v5 = vadd.f32 %v10799_v24, %v2322_v45  ;;  %v4433_v24 = vld [vmem:[%s12843_s11 + $0x3a0] sm:$0xff] }
 0x5e0   : > { %4201 = vmax.xlane.f32.xlu0 %v3744_v3  ;;  %v2327_v44 = vpop.permute.xlu0 %2326  ;;  %v8357_v3 = vcombine.high %v4358_v41, %v4362_v33  ;;  %v3496_v1 = vmax.f32 %v3220_v48, 0.0  ;;  %v8365_v31 = vcombine.high %v4366_v23, %v4370_v7 }
 0x5e1   : > { %v10997_v35 = vpop.permute.xlu1 %2481  ;;  %v3747_v38 = vmax.f32 %v3491_v60, 0.0  ;;  %v3287_v27 = vadd.f32 %v10811_v10, %v2327_v44  ;;  %v4374_v60 = vld [vmem:[%s12843_s11 + $0x1c8] sm:$0xff] }
 0x5e2   : > { %4203 = vmax.xlane.f32.xlu1 %v3745_v11  ;;  %v8419_v11 = vcombine.high %v4421_v19, %v4425_v39 }
 0x5e3   : > { %6327 = vmatmul.mubr.bf16.gmra.mxu1 %v8340_v52  ;;  %v3494_v52 = vmax.f32 %v3212_v43, 0.0  ;;  %v3512_v43 = vmax.f32 %v3284_v5, 0.0 }
 0x5e4   : > { %4197 = vmax.xlane.f32.xlu0 %v3742_v30  ;;  %6334 = vmatprep.mubr.bf16.mxu1 %v8349_v0  ;;  %v11003_v37 = vpop.permute.xlu0 %2486  ;;  %v3215_v0 = vadd.f32 %v10620_v50, %v10400_v34  ;;  %v11014_v30 = vpop.f32.mrf.mxu1  ;;  %v8356_v50 = vcombine.low %v4358_v41, %v4362_v33  ;;  %v8418_v33 = vcombine.low %v4421_v19, %v4425_v39 }
 0x5e5   : > { %v3750_v57 = vmax.f32 %v3494_v52, 0.0  ;;  %v2312_v34 = vpop.permute.xlu1 %2311  ;;  %v3768_v19 = vmax.f32 %v3512_v43, 0.0  ;;  %v3303_v52 = vadd.f32 %v10853_v14, %v10923_v58 }
 0x5e6   : > { %4199 = vmax.xlane.f32.xlu1 %v3743_v59  ;;  %6102 = vmatmul.mubr.bf16.gmra.mxu0 %v8402_v26  ;;  %v3752_v26 = vmax.f32 %v3496_v1, 0.0  ;;  %v4429_v59 = vld [vmem:[%s12843_s11 + $0x380] sm:$0xff]  ;;  %v3276_v41 = vadd.f32 %v10808_v47, %v2312_v34  ;;  %v11024_v6 = vpop.f32.mrf.mxu1  ;;  %v4378_v47 = vld [vmem:[%s12843_s11 + $0x1e8] sm:$0xff] }
 0x5e7   : > { %6109 = vmatprep.mubr.bf16.mxu0 %v8411_v17  ;;  %v3495_v17 = vmax.f32 %v3215_v0, 0.0  ;;  %v8427_v10 = vcombine.high %v4429_v59, %v4433_v24  ;;  %v3292_v0 = vadd.f32 %v10844_v28, %v10951_v32  ;;  %v8426_v14 = vcombine.low %v4429_v59, %v4433_v24  ;;  %v4382_v28 = vld [vmem:[%s12843_s11 + $0x208] sm:$0xff]  ;;  %v4445_v24 = vld [vmem:[%s12843_s11 + $0x400] sm:$0xff] }
 0x5e8   : > { %4209 = vmax.xlane.f32.xlu0 %v3748_v51  ;;  %v2317_v45 = vpop.permute.xlu0 %2316  ;;  %v3753_v51 = vmax.f32 %v3497_v42, 0.0  ;;  %v11027_v48 = vpop.f32.mrf.mxu1  ;;  %v3510_v39 = vmax.f32 %v3276_v41, 0.0  ;;  %v4386_v32 = vld [vmem:[%s12843_s11 + $0x228] sm:$0xff] }
 0x5e9   : > { %v3751_v44 = vmax.f32 %v3495_v17, 0.0  ;;  %v11049_v58 = vpop.permute.xlu1 %2471  ;;  %v3319_v17 = vadd.f32 %v10910_v8, %v10870_v13  ;;  %v8381_v59 = vcombine.high %v4382_v28, %v4386_v32  ;;  %v3308_v13 = vadd.f32 %v10896_v62, %v10893_v63  ;;  %v4390_v63 = vld [vmem:[%s12843_s11 + $0x248] sm:$0xff] }
 0x5ea   : > { %4211 = vmax.xlane.f32.xlu1 %v3749_v22  ;;  %v3279_v22 = vadd.f32 %v10822_v9, %v2317_v45  ;;  %v8364_v9 = vcombine.low %v4366_v23, %v4370_v7  ;;  %v3517_v7 = vmax.f32 %v3303_v52, 0.0  ;;  %v4394_v62 = vld [vmem:[%s12843_s11 + $0x268] sm:$0xff] }
 0x5eb   : > { %6335 = vmatmul.mubr.bf16.gmra.mxu1 %v8348_v15  ;;  %v3513_v15 = vmax.f32 %v3287_v27, 0.0 }
 0x5ec   : > { %4205 = vmax.xlane.f32.xlu0 %v3746_v25  ;;  %6342 = vmatprep.mubr.bf16.mxu1 %v8357_v3  ;;  %v3300_v3 = vadd.f32 %v10829_v16, %v10919_v18  ;;  %v3511_v25 = vmax.f32 %v3279_v22, 0.0  ;;  %v4441_v16 = vld [vmem:[%s12843_s11 + $0x3e0] sm:$0xff]  ;;  %v11045_v18 = vpop.f32.mrf.mxu1  ;;  %v11055_v34 = vpop.permute.xlu0 %2476  ;;  %v3773_v27 = vmax.f32 %v3517_v7, 0.0 }
 0x5ed   : > { %v3769_v36 = vmax.f32 %v3513_v15, 0.0  ;;  %v11075_v45 = vpop.permute.xlu1 %2301 }
 0x5ee   : > { %4207 = vmax.xlane.f32.xlu1 %v3747_v38  ;;  %6110 = vmatmul.mubr.bf16.gmra.mxu0 %v8410_v53  ;;  %v8373_v53 = vcombine.high %v4374_v60, %v4378_v47  ;;  %v3516_v1 = vmax.f32 %v3300_v3, 0.0  ;;  %v3766_v38 = vmax.f32 %v3510_v39, 0.0  ;;  %v3767_v42 = vmax.f32 %v3511_v25, 0.0  ;;  %v11053_v5 = vpop.f32.mrf.mxu1  ;;  %v4453_v25 = vld [vmem:[%s12843_s11 + $0x440] sm:$0xff] }
 0x5ef   : > { %6117 = vmatprep.mubr.bf16.mxu0 %v8419_v11  ;;  %v4437_v11 = vld [vmem:[%s12843_s11 + $0x3c0] sm:$0xff]  ;;  %v3518_v3 = vmax.f32 %v3308_v13, 0.0 }
 0x5f0   : > { %4213 = vmax.xlane.f32.xlu0 %v3750_v57  ;;  %v8435_v23 = vcombine.high %v4437_v11, %v4441_v16  ;;  %v3295_v57 = vadd.f32 %v10868_v49, %v10963_v46  ;;  %v3514_v49 = vmax.f32 %v3292_v0, 0.0  ;;  %v8372_v46 = vcombine.low %v4374_v60, %v4378_v47  ;;  %v11079_v41 = vpop.permute.xlu0 %2306 }
 0x5f1   : > { %v8434_v43 = vcombine.low %v4437_v11, %v4441_v16  ;;  %v3332_v60 = vadd.f32 %v10934_v54, %v10819_v40  ;;  %v4457_v40 = vld [vmem:[%s12843_s11 + $0x460] sm:$0xff]  ;;  %v12894_v16 = vld [vmem:[#allocation29_spill] sm:$0xff] }
 0x5f2   : > { %4217 = vmax.xlane.f32.xlu1 %v3752_v26  ;;  %v3772_v26 = vmax.f32 %v3516_v1, 0.0  ;;  %v3770_v8 = vmax.f32 %v3514_v49, 0.0  ;;  %v3774_v1 = vmax.f32 %v3518_v3, 0.0 }
 0x5f3   : > { %6343 = vmatmul.mubr.bf16.gmra.mxu1 %v8356_v50  ;;  %v3316_v50 = vadd.f32 %v10883_v20, %v10863_v55  ;;  %v4449_v55 = vld [vmem:[%s12843_s11 + $0x420] sm:$0xff]  ;;  %v11073_v20 = vpop.f32.mrf.mxu1  ;;  %v3524_v11 = vmax.f32 %v3332_v60, 0.0 }
 0x5f4   : > { %4219 = vmax.xlane.f32.xlu0 %v3753_v51  ;;  %6350 = vmatprep.mubr.bf16.mxu1 %v8365_v31  ;;  %v3515_v31 = vmax.f32 %v3295_v57, 0.0  ;;  %v8442_v0 = vcombine.low %v4445_v24, %v4449_v55 }
 0x5f5   : > { %v3520_v51 = vmax.f32 %v3316_v50, 0.0  ;;  %v11083_v22 = vpop.f32.mrf.mxu1  ;;  %v12896_v50 = vld [vmem:[#allocation13_spill] sm:$0xff]  ;;  %v3780_v49 = vmax.f32 %v3524_v11, 0.0  ;;  %v12901_v11 = vld [vmem:[#allocation26_spill] sm:$0xff] }
 0x5f6   : > { %4215 = vmax.xlane.f32.xlu1 %v3751_v44  ;;  %6118 = vmatmul.mubr.bf16.gmra.mxu0 %v8418_v33  ;;  %v8443_v33 = vcombine.high %v4445_v24, %v4449_v55  ;;  %v3311_v44 = vadd.f32 %v10921_v2, %v10898_v12  ;;  %v3771_v15 = vmax.f32 %v3515_v31, 0.0  ;;  %v11093_v2 = vpop.permute.xlu1 %2461  ;;  %v8380_v12 = vcombine.low %v4382_v28, %v4386_v32  ;;  %v4398_v32 = vld [vmem:[%s12843_s11 + $0x288] sm:$0xff] }
 0x5f7   : > { %6125 = vmatprep.mubr.bf16.mxu0 %v8427_v10  ;;  %v3521_v10 = vmax.f32 %v3319_v17, 0.0  ;;  %v3776_v47 = vmax.f32 %v3520_v51, 0.0  ;;  %v11103_v54 = vpop.f32.mrf.mxu1  ;;  %v8388_v17 = vcombine.low %v4390_v63, %v4394_v62  ;;  %v4461_v51 = vld [vmem:[%s12843_s11 + $0x480] sm:$0xff] }
 0x5f8   : > { %4249 = vmax.xlane.f32.xlu0 %v3768_v19  ;;  %v12893_v19 = vld [vmem:[#allocation28_spill] sm:$0xff]  ;;  %v3519_v52 = vmax.f32 %v3311_v44, 0.0 }
 0x5f9   : > { %v3335_v39 = vadd.f32 %v10961_v29, %v12893_v19  ;;  %v3324_v29 = vadd.f32 %v10947_v56, %v12894_v16  ;;  %v4402_v56 = vld [vmem:[%s12843_s11 + $0x2a8] sm:$0xff]  ;;  %v3271_v16 = vadd.f32 %v12901_v11, %v11079_v41 }
 0x5fa   : > { %4251 = vmax.xlane.f32.xlu1 %v3769_v36  ;;  %v8389_v36 = vcombine.high %v4390_v63, %v4394_v62  ;;  %v3775_v57 = vmax.f32 %v3519_v52, 0.0  ;;  %v2292_v28 = vpop.permute.xlu1 %2291  ;;  %v8397_v55 = vcombine.high %v4398_v32, %v4402_v56  ;;  %v12899_v62 = vld [vmem:[#allocation12_spill] sm:$0xff]  ;;  %v4410_v19 = vld [vmem:[%s12843_s11 + $0x2e8] sm:$0xff] }
 0x5fb   : > { %6351 = vmatmul.mubr.bf16.gmra.mxu1 %v8364_v9  ;;  %v3777_v9 = vmax.f32 %v3521_v10, 0.0  ;;  %v3343_v60 = vadd.f32 %v11024_v6, %v12899_v62  ;;  %v12900_v52 = vld [vmem:[#allocation24_spill] sm:$0xff] }
 0x5fc   : > { %4245 = vmax.xlane.f32.xlu0 %v3766_v38  ;;  %6358 = vmatprep.mubr.bf16.mxu1 %v8373_v53  ;;  %v11105_v53 = vpop.permute.xlu0 %2466  ;;  %v8451_v38 = vcombine.high %v4453_v25, %v4457_v40  ;;  %v3268_v6 = vadd.f32 %v12900_v52, %v11075_v45 }
 0x5fe   : > { %4247 = vmax.xlane.f32.xlu1 %v3767_v42  ;;  %6126 = vmatmul.mubr.bf16.gmra.mxu0 %v8426_v14  ;;  %v3525_v14 = vmax.f32 %v3335_v39, 0.0  ;;  %v11111_v42 = vpop.f32.mrf.mxu1  ;;  %v11133_v44 = vpop.permute.xlu1 %2451 }
 0x5ff   : > { %6133 = vmatprep.mubr.bf16.mxu0 %v8435_v23  ;;  %v12895_v23 = vld [vmem:[#allocation30_spill] sm:$0xff] }
 0x600   : > { %4257 = vmax.xlane.f32.xlu0 %v3772_v26  ;;  %v3327_v7 = vadd.f32 %v10975_v4, %v12895_v23  ;;  %v3348_v26 = vadd.f32 %v10987_v21, %v12896_v50  ;;  %v2297_v4 = vpop.permute.xlu0 %2296  ;;  %v4465_v21 = vld [vmem:[%s12843_s11 + $0x4a0] sm:$0xff]  ;;  %v11129_v13 = vpop.f32.mrf.mxu1  ;;  %v3508_v23 = vmax.f32 %v3268_v6, 0.0 }
 0x602   : > { %4259 = vmax.xlane.f32.xlu1 %v3773_v27  ;;  %v12897_v27 = vld [vmem:[#allocation15_spill] sm:$0xff]  ;;  %v3523_v24 = vmax.f32 %v3327_v7, 0.0  ;;  %v11137_v3 = vpop.f32.mrf.mxu1  ;;  %v12902_v7 = vld [vmem:[#allocation25_spill] sm:$0xff] }
 0x603   : > { %6359 = vmatmul.mubr.bf16.gmra.mxu1 %v8372_v46  ;;  %v3522_v46 = vmax.f32 %v3324_v29, 0.0  ;;  %v3351_v31 = vadd.f32 %v11014_v30, %v12897_v27  ;;  %v8450_v30 = vcombine.low %v4453_v25, %v4457_v40  ;;  %v3527_v40 = vmax.f32 %v3343_v60, 0.0  ;;  %v4414_v27 = vld [vmem:[%s12843_s11 + $0x308] sm:$0xff] }
 0x604   : > { %4253 = vmax.xlane.f32.xlu0 %v3770_v8  ;;  %6366 = vmatprep.mubr.bf16.mxu1 %v8381_v59  ;;  %v3781_v59 = vmax.f32 %v3525_v14, 0.0  ;;  %v3528_v8 = vmax.f32 %v3348_v26, 0.0  ;;  %v11157_v45 = vpop.f32.mrf.mxu1  ;;  %v3509_v26 = vmax.f32 %v3271_v16, 0.0 }
 0x605   : > { %v3778_v10 = vmax.f32 %v3522_v46, 0.0  ;;  %v3529_v63 = vmax.f32 %v3351_v31, 0.0  ;;  %v3783_v50 = vmax.f32 %v3527_v40, 0.0  ;;  %v3764_v31 = vmax.f32 %v3508_v23, 0.0  ;;  %v4426_v40 = vld [vmem:[%s12843_s11 + $0x368] sm:$0xff] }
 0x606   : > { %4255 = vmax.xlane.f32.xlu1 %v3771_v15  ;;  %6134 = vmatmul.mubr.bf16.gmra.mxu0 %v8434_v43  ;;  %v12898_v43 = vld [vmem:[#allocation14_spill] sm:$0xff]  ;;  %v8459_v15 = vcombine.high %v4461_v51, %v4465_v21  ;;  %v3784_v39 = vmax.f32 %v3528_v8, 0.0 }
 0x607   : > { %6141 = vmatprep.mubr.bf16.mxu0 %v8443_v33  ;;  %v3340_v33 = vadd.f32 %v11001_v61, %v12898_v43  ;;  %v4406_v61 = vld [vmem:[%s12843_s11 + $0x2c8] sm:$0xff]  ;;  %v3785_v25 = vmax.f32 %v3529_v63, 0.0  ;;  %v12905_v43 = vld [vmem:[#allocation22_spill] sm:$0xff] }
 0x608   : > { %4265 = vmax.xlane.f32.xlu0 %v3776_v47  ;;  %v3779_v47 = vmax.f32 %v3523_v24, 0.0  ;;  %v8405_v29 = vcombine.high %v4406_v61, %v4410_v19  ;;  %v12904_v24 = vld [vmem:[#allocation20_spill] sm:$0xff] }
 0x60a   : > { %4267 = vmax.xlane.f32.xlu1 %v3777_v9  ;;  %v3526_v9 = vmax.f32 %v3340_v33, 0.0 }
 0x60b   : > { %6367 = vmatmul.mubr.bf16.gmra.mxu1 %v8380_v12  ;;  %v11139_v12 = vpop.permute.xlu0 %2456 }
 0x60c   : > { %4261 = vmax.xlane.f32.xlu0 %v3774_v1  ;;  %6374 = vmatprep.mubr.bf16.mxu1 %v8389_v36  ;;  %v8396_v36 = vcombine.low %v4398_v32, %v4402_v56  ;;  %v4469_v1 = vld [vmem:[%s12843_s11 + $0x4c0] sm:$0xff]  ;;  %v3782_v14 = vmax.f32 %v3526_v9, 0.0  ;;  %v8458_v32 = vcombine.low %v4461_v51, %v4465_v21  ;;  %v8404_v21 = vcombine.low %v4406_v61, %v4410_v19 }
 0x60e   : > { %4263 = vmax.xlane.f32.xlu1 %v3775_v57  ;;  %6142 = vmatmul.mubr.bf16.gmra.mxu0 %v8442_v0  ;;  %v4473_v0 = vld [vmem:[%s12843_s11 + $0x4e0] sm:$0xff]  ;;  %v3260_v57 = vadd.f32 %v12902_v7, %v2292_v28  ;;  %v4418_v28 = vld [vmem:[%s12843_s11 + $0x328] sm:$0xff] }
 0x60f   : > { %6149 = vmatprep.mubr.bf16.mxu0 %v8451_v38  ;;  %v2282_v38 = vpop.permute.xlu1 %2281  ;;  %v2287_v41 = vpop.permute.xlu0 %2286  ;;  %v8467_v56 = vcombine.high %v4469_v1, %v4473_v0  ;;  %v8466_v19 = vcombine.low %v4469_v1, %v4473_v0 }
 0x610   : > { %4273 = vmax.xlane.f32.xlu0 %v3780_v49  ;;  %v12903_v49 = vld [vmem:[#allocation27_spill] sm:$0xff]  ;;  %v3255_v33 = vadd.f32 %v12905_v43, %v2287_v41 }
 0x611   : > { %v3263_v46 = vadd.f32 %v12903_v49, %v2297_v4  ;;  %v3765_v4 = vmax.f32 %v3509_v26, 0.0 }
 0x612   : > { %4275 = vmax.xlane.f32.xlu1 %v3781_v59  ;;  %v3506_v59 = vmax.f32 %v3260_v57, 0.0  ;;  %v3505_v52 = vmax.f32 %v3255_v33, 0.0  ;;  %v3388_v57 = vadd.f32 %v11157_v45, %v11133_v44  ;;  %v4434_v44 = vld [vmem:[%s12843_s11 + $0x3a8] sm:$0xff] }
 0x613   : > { %6375 = vmatmul.mubr.bf16.gmra.mxu1 %v8388_v17  ;;  %v9195_v17 = vpop.f32.mrf.mxu1  ;;  %v2442_v51 = vpop.permute.xlu1 %2441  ;;  %v3507_v8 = vmax.f32 %v3263_v46, 0.0 }
 0x614   : > { %4269 = vmax.xlane.f32.xlu0 %v3778_v10  ;;  %6382 = vmatprep.mubr.bf16.mxu1 %v8397_v55  ;;  %v3252_v55 = vadd.f32 %v12904_v24, %v2282_v38  ;;  %v8413_v10 = vcombine.high %v4414_v27, %v4418_v28  ;;  %v2447_v62 = vpop.permute.xlu0 %2446  ;;  %v3762_v60 = vmax.f32 %v3506_v59, 0.0  ;;  %v3380_v61 = vadd.f32 %v11083_v22, %v2442_v51 }
 0x615   : > { %v3390_v63 = vpop.f32.mrf.mxu1  ;;  %v3763_v9 = vmax.f32 %v3507_v8, 0.0  ;;  %v3383_v6 = vadd.f32 %v11111_v42, %v2447_v62  ;;  %v3396_v22 = vadd.f32 %v11137_v3, %v11093_v2  ;;  %v3399_v42 = vadd.f32 %v9195_v17, %v11105_v53  ;;  %v4489_v2 = vld [vmem:[%s12843_s11 + $0x560] sm:$0xff]  ;;  %v4430_v17 = vld [vmem:[%s12843_s11 + $0x388] sm:$0xff] }
 0x616   : > { %4271 = vmax.xlane.f32.xlu1 %v3779_v47  ;;  %6150 = vmatmul.mubr.bf16.gmra.mxu0 %v8450_v30  ;;  %v4477_v30 = vld [vmem:[%s12843_s11 + $0x500] sm:$0xff]  ;;  %v3504_v47 = vmax.f32 %v3252_v55, 0.0  ;;  %v3536_v16 = vmax.f32 %v3380_v61, 0.0  ;;  %v3761_v1 = vmax.f32 %v3505_v52, 0.0  ;;  %v3391_v26 = vadd.f32 %v3390_v63, %v11139_v12 }
 0x617   : > { %6157 = vmatprep.mubr.bf16.mxu0 %v8459_v15  ;;  %v4481_v15 = vld [vmem:[%s12843_s11 + $0x520] sm:$0xff]  ;;  %v3537_v0 = vmax.f32 %v3383_v6, 0.0  ;;  %v2272_v23 = vpop.permute.xlu1 %2271  ;;  %v3540_v7 = vmax.f32 %v3396_v22, 0.0  ;;  %v8429_v51 = vcombine.high %v4430_v17, %v4434_v44 }
 0x618   : > { %4281 = vmax.xlane.f32.xlu0 %v3784_v39  ;;  %v8475_v39 = vcombine.high %v4477_v30, %v4481_v15  ;;  %v3760_v11 = vmax.f32 %v3504_v47, 0.0  ;;  %v8474_v53 = vcombine.low %v4477_v30, %v4481_v15  ;;  %v2277_v41 = vpop.permute.xlu0 %2276  ;;  %v3539_v55 = vmax.f32 %v3391_v26, 0.0  ;;  %v4438_v47 = vld [vmem:[%s12843_s11 + $0x3c8] sm:$0xff] }
 0x619   : > { %v3793_v49 = vmax.f32 %v3537_v0, 0.0 }
 0x61a   : > { %4283 = vmax.xlane.f32.xlu1 %v3785_v25  ;;  %v4422_v25 = vld [vmem:[%s12843_s11 + $0x348] sm:$0xff]  ;;  %v3795_v62 = vmax.f32 %v3539_v55, 0.0 }
 0x61b   : > { %6383 = vmatmul.mubr.bf16.gmra.mxu1 %v8396_v36  ;;  %v9198_v36 = vpop.f32.mrf.mxu1  ;;  %v8421_v38 = vcombine.high %v4422_v25, %v4426_v40  ;;  %v8420_v12 = vcombine.low %v4422_v25, %v4426_v40  ;;  %v12907_v25 = vld [vmem:[#allocation23_spill] sm:$0xff] }
 0x61c   : > { %4277 = vmax.xlane.f32.xlu0 %v3782_v14  ;;  %6390 = vmatprep.mubr.bf16.mxu1 %v8405_v29  ;;  %v8412_v29 = vcombine.low %v4414_v27, %v4418_v28  ;;  %v4485_v14 = vld [vmem:[%s12843_s11 + $0x540] sm:$0xff]  ;;  %v3412_v45 = vadd.f32 %v9198_v36, %v10997_v35  ;;  %v3796_v27 = vmax.f32 %v3540_v7, 0.0  ;;  %v3538_v28 = vmax.f32 %v3388_v57, 0.0  ;;  %v2437_v8 = vpop.permute.xlu0 %2436  ;;  %v4446_v57 = vld [vmem:[%s12843_s11 + $0x408] sm:$0xff] }
 0x61d   : > { %v3403_v3 = vpop.f32.mrf.mxu1  ;;  %v4497_v35 = vld [vmem:[%s12843_s11 + $0x5a0] sm:$0xff]  ;;  %v3247_v40 = vadd.f32 %v12907_v25, %v2277_v41 }
 0x61e   : > { %4279 = vmax.xlane.f32.xlu1 %v3783_v50  ;;  %6158 = vmatmul.mubr.bf16.gmra.mxu0 %v8458_v32  ;;  %v3792_v32 = vmax.f32 %v3536_v16, 0.0  ;;  %v3541_v50 = vmax.f32 %v3399_v42, 0.0  ;;  %v3544_v43 = vmax.f32 %v3412_v45, 0.0  ;;  %v3404_v33 = vadd.f32 %v3403_v3, %v11049_v58  ;;  %v4442_v58 = vld [vmem:[%s12843_s11 + $0x3e8] sm:$0xff]  ;;  %v4505_v16 = vld [vmem:[%s12843_s11 + $0x5e0] sm:$0xff] }
 0x61f   : > { %6165 = vmatprep.mubr.bf16.mxu0 %v8467_v56  ;;  %v8483_v56 = vcombine.high %v4485_v14, %v4489_v2  ;;  %v9199_v46 = vpop.f32.mrf.mxu1  ;;  %v8437_v22 = vcombine.high %v4438_v47, %v4442_v58  ;;  %v3503_v3 = vmax.f32 %v3247_v40, 0.0  ;;  %v12908_v41 = vld [vmem:[#allocation16_spill] sm:$0xff]  ;;  %v4462_v40 = vld [vmem:[%s12843_s11 + $0x488] sm:$0xff] }
 0x620   : > { %4241 = vmax.xlane.f32.xlu0 %v3764_v31  ;;  %v2432_v31 = vpop.permute.xlu1 %2431  ;;  %v3415_v59 = vadd.f32 %v9199_v46, %v11003_v37  ;;  %v3797_v24 = vmax.f32 %v3541_v50, 0.0  ;;  %v8482_v37 = vcombine.low %v4485_v14, %v4489_v2  ;;  %v3800_v61 = vmax.f32 %v3544_v43, 0.0  ;;  %v2267_v52 = vpop.permute.xlu0 %2266  ;;  %v4513_v45 = vld [vmem:[%s12843_s11 + $0x620] sm:$0xff] }
 0x621   : > { %v8436_v50 = vcombine.low %v4438_v47, %v4442_v58  ;;  %v4517_v47 = vld [vmem:[%s12843_s11 + $0x640] sm:$0xff] }
 0x622   : > { %4243 = vmax.xlane.f32.xlu1 %v3765_v4  ;;  %v3406_v4 = vpop.f32.mrf.mxu1  ;;  %v3545_v15 = vmax.f32 %v3415_v59, 0.0  ;;  %v4521_v58 = vld [vmem:[%s12843_s11 + $0x660] sm:$0xff] }
 0x623   : > { %6391 = vmatmul.mubr.bf16.gmra.mxu1 %v8404_v21  ;;  %v4493_v21 = vld [vmem:[%s12843_s11 + $0x580] sm:$0xff]  ;;  %v3407_v63 = vadd.f32 %v3406_v4, %v11055_v34  ;;  %v8428_v34 = vcombine.low %v4430_v17, %v4434_v44  ;;  %v4454_v4 = vld [vmem:[%s12843_s11 + $0x448] sm:$0xff] }
 0x624   : > { %4237 = vmax.xlane.f32.xlu0 %v3762_v60  ;;  %6398 = vmatprep.mubr.bf16.mxu1 %v8413_v10  ;;  %v3794_v10 = vmax.f32 %v3538_v28, 0.0  ;;  %v8491_v30 = vcombine.high %v4493_v21, %v4497_v35  ;;  %v2262_v60 = vpop.permute.xlu1 %2261  ;;  %v3801_v6 = vmax.f32 %v3545_v15, 0.0  ;;  %v8490_v0 = vcombine.low %v4493_v21, %v4497_v35  ;;  %v2427_v7 = vpop.permute.xlu0 %2426  ;;  %v4509_v44 = vld [vmem:[%s12843_s11 + $0x600] sm:$0xff] }
 0x625   : > { %v3543_v36 = vmax.f32 %v3407_v63, 0.0  ;;  %v8507_v55 = vcombine.high %v4509_v44, %v4513_v45  ;;  %v3367_v35 = vadd.f32 %v11053_v5, %v2427_v7  ;;  %v12911_v63 = vld [vmem:[#allocation19_spill] sm:$0xff] }
 0x626   : > { %4239 = vmax.xlane.f32.xlu1 %v3763_v9  ;;  %6166 = vmatmul.mubr.bf16.gmra.mxu0 %v8466_v19  ;;  %v3542_v19 = vmax.f32 %v3404_v33, 0.0  ;;  %v12910_v33 = vld [vmem:[#allocation17_spill] sm:$0xff] }
 0x627   : > { %6173 = vmatprep.mubr.bf16.mxu0 %v8475_v39  ;;  %v12906_v39 = vld [vmem:[#allocation21_spill] sm:$0xff]  ;;  %v3799_v2 = vmax.f32 %v3543_v36, 0.0  ;;  %v3533_v15 = vmax.f32 %v3367_v35, 0.0  ;;  %v4545_v35 = vld [vmem:[%s12843_s11 + $0x720] sm:$0xff] }
 0x628   : > { %4233 = vmax.xlane.f32.xlu0 %v3760_v11  ;;  %v3244_v9 = vadd.f32 %v12906_v39, %v2272_v23  ;;  %v4501_v11 = vld [vmem:[%s12843_s11 + $0x5c0] sm:$0xff]  ;;  %v3375_v23 = vadd.f32 %v11129_v13, %v2437_v8  ;;  %v3759_v13 = vmax.f32 %v3503_v3, 0.0  ;;  %v4458_v8 = vld [vmem:[%s12843_s11 + $0x468] sm:$0xff] }
 0x629   : > { %v8499_v14 = vcombine.high %v4501_v11, %v4505_v16  ;;  %v8498_v59 = vcombine.low %v4501_v11, %v4505_v16 }
 0x62a   : > { %4235 = vmax.xlane.f32.xlu1 %v3761_v1  ;;  %v3502_v42 = vmax.f32 %v3244_v9, 0.0  ;;  %v3372_v1 = vadd.f32 %v11103_v54, %v2432_v31  ;;  %v4450_v54 = vld [vmem:[%s12843_s11 + $0x428] sm:$0xff]  ;;  %v3535_v26 = vmax.f32 %v3375_v23, 0.0  ;;  %v8514_v23 = vcombine.low %v4517_v47, %v4521_v58 }
 0x62b   : > { %6399 = vmatmul.mubr.bf16.gmra.mxu1 %v8412_v29  ;;  %v3798_v29 = vmax.f32 %v3542_v19, 0.0  ;;  %v8445_v17 = vcombine.high %v4446_v57, %v4450_v54 }
 0x62c   : > { %4297 = vmax.xlane.f32.xlu0 %v3792_v32  ;;  %6406 = vmatprep.mubr.bf16.mxu1 %v8421_v38  ;;  %v2422_v38 = vpop.permute.xlu1 %2421  ;;  %v3758_v32 = vmax.f32 %v3502_v42, 0.0 }
 0x62e   : > { %4299 = vmax.xlane.f32.xlu1 %v3793_v49  ;;  %6174 = vmatmul.mubr.bf16.gmra.mxu0 %v8474_v53  ;;  %v3534_v53 = vmax.f32 %v3372_v1, 0.0  ;;  %v12909_v49 = vld [vmem:[#allocation18_spill] sm:$0xff] }
 0x62f   : > { %6181 = vmatprep.mubr.bf16.mxu0 %v8483_v56  ;;  %v3236_v56 = vadd.f32 %v12908_v41, %v2262_v60  ;;  %v3239_v46 = vadd.f32 %v12909_v49, %v2267_v52  ;;  %v8453_v60 = vcombine.high %v4454_v4, %v4458_v8  ;;  %v8506_v52 = vcombine.low %v4509_v44, %v4513_v45  ;;  %v4537_v49 = vld [vmem:[%s12843_s11 + $0x6e0] sm:$0xff] }
 0x630   : > { %4305 = vmax.xlane.f32.xlu0 %v3796_v27  ;;  %v2252_v27 = vpop.permute.xlu1 %2251  ;;  %v3790_v28 = vmax.f32 %v3534_v53, 0.0  ;;  %v4474_v53 = vld [vmem:[%s12843_s11 + $0x4e8] sm:$0xff] }
 0x631   : > { %v3500_v31 = vmax.f32 %v3236_v56, 0.0  ;;  %v3501_v21 = vmax.f32 %v3239_v46, 0.0 }
 0x632   : > { %4307 = vmax.xlane.f32.xlu1 %v3797_v24  ;;  %v2257_v24 = vpop.permute.xlu0 %2256 }
 0x633   : > { %6407 = vmatmul.mubr.bf16.gmra.mxu1 %v8420_v12  ;;  %v3364_v12 = vadd.f32 %v11027_v48, %v2422_v38  ;;  %v3756_v48 = vmax.f32 %v3500_v31, 0.0  ;;  %v3757_v5 = vmax.f32 %v3501_v21, 0.0  ;;  %v4525_v38 = vld [vmem:[%s12843_s11 + $0x680] sm:$0xff] }
 0x634   : > { %4301 = vmax.xlane.f32.xlu0 %v3794_v10  ;;  %6414 = vmatprep.mubr.bf16.mxu1 %v8429_v51  ;;  %v3791_v51 = vmax.f32 %v3535_v26, 0.0  ;;  %v3228_v10 = vadd.f32 %v12910_v33, %v2252_v27  ;;  %v4533_v26 = vld [vmem:[%s12843_s11 + $0x6c0] sm:$0xff]  ;;  %v4478_v27 = vld [vmem:[%s12843_s11 + $0x508] sm:$0xff] }
 0x635   : > { %v3532_v43 = vmax.f32 %v3364_v12, 0.0  ;;  %v8531_v44 = vcombine.high %v4533_v26, %v4537_v49  ;;  %v11302_v12 = vld [vmem:[%s12843_s11 + $0x10] sm:$0xff]  ;;  %v4541_v21 = vld [vmem:[%s12843_s11 + $0x700] sm:$0xff] }
 0x636   : > { %4303 = vmax.xlane.f32.xlu1 %v3795_v62  ;;  %6182 = vmatmul.mubr.bf16.gmra.mxu0 %v8482_v37  ;;  %v2412_v37 = vpop.permute.xlu1 %2411  ;;  %v3231_v62 = vadd.f32 %v12911_v63, %v2257_v24  ;;  %v3498_v39 = vmax.f32 %v3228_v10, 0.0  ;;  %v8539_v10 = vcombine.high %v4541_v21, %v4545_v35 }
 0x637   : > { %6189 = vmatprep.mubr.bf16.mxu0 %v8491_v30  ;;  %v8444_v30 = vcombine.low %v4446_v57, %v4450_v54  ;;  %v3788_v19 = vmax.f32 %v3532_v43, 0.0  ;;  %v3356_v9 = vadd.f32 %v11045_v18, %v2412_v37  ;;  %v8530_v43 = vcombine.low %v4533_v26, %v4537_v49 }
 0x638   : > { %4313 = vmax.xlane.f32.xlu0 %v3800_v61  ;;  %v2417_v61 = vpop.permute.xlu0 %2416  ;;  %v3499_v36 = vmax.f32 %v3231_v62, 0.0  ;;  %v3754_v11 = vmax.f32 %v3498_v39, 0.0 }
 0x639   : > { %v3359_v25 = vadd.f32 %v11073_v20, %v2417_v61  ;;  %v3530_v18 = vmax.f32 %v3356_v9, 0.0  ;;  %v4549_v61 = vld [vmem:[%s12843_s11 + $0x740] sm:$0xff] }
 0x63a   : > { %4315 = vmax.xlane.f32.xlu1 %v3801_v6  ;;  %v3789_v6 = vmax.f32 %v3533_v15, 0.0  ;;  %v3755_v42 = vmax.f32 %v3499_v36, 0.0  ;;  %v4490_v15 = vld [vmem:[%s12843_s11 + $0x568] sm:$0xff] }
 0x63b   : > { %6415 = vmatmul.mubr.bf16.gmra.mxu1 %v8428_v34  ;;  %v8515_v34 = vcombine.high %v4517_v47, %v4521_v58  ;;  %v3531_v20 = vmax.f32 %v3359_v25, 0.0 }
 0x63c   : > { %4309 = vmax.xlane.f32.xlu0 %v3798_v29  ;;  %6422 = vmatprep.mubr.bf16.mxu1 %v8437_v22  ;;  %v4466_v22 = vld [vmem:[%s12843_s11 + $0x4a8] sm:$0xff]  ;;  %v8452_v29 = vcombine.low %v4454_v4, %v4458_v8 }
 0x63d   : > { %v8461_v1 = vcombine.high %v4462_v40, %v4466_v22  ;;  %v3787_v57 = vmax.f32 %v3531_v20, 0.0  ;;  %v8460_v56 = vcombine.low %v4462_v40, %v4466_v22  ;;  %v4494_v40 = vld [vmem:[%s12843_s11 + $0x588] sm:$0xff] }
 0x63e   : > { %4311 = vmax.xlane.f32.xlu1 %v3799_v2  ;;  %6190 = vmatmul.mubr.bf16.gmra.mxu0 %v8490_v0  ;;  %v3786_v2 = vmax.f32 %v3530_v18, 0.0  ;;  %v4498_v22 = vld [vmem:[%s12843_s11 + $0x5a8] sm:$0xff] }
 0x63f   : > { %6197 = vmatprep.mubr.bf16.mxu0 %v8499_v14  ;;  %v4529_v14 = vld [vmem:[%s12843_s11 + $0x6a0] sm:$0xff] }
 0x640   : > { %4229 = vmax.xlane.f32.xlu0 %v3758_v32  ;;  %v8523_v7 = vcombine.high %v4525_v38, %v4529_v14  ;;  %v4470_v32 = vld [vmem:[%s12843_s11 + $0x4c8] sm:$0xff] }
 0x641   : > { %v8468_v24 = vcombine.low %v4470_v32, %v4474_v53 }
 0x642   : > { %4231 = vmax.xlane.f32.xlu1 %v3759_v13 }
 0x643   : > { %6423 = vmatmul.mubr.bf16.gmra.mxu1 %v8436_v50  ;;  %v8469_v50 = vcombine.high %v4470_v32, %v4474_v53  ;;  %v4502_v32 = vld [vmem:[%s12843_s11 + $0x5c8] sm:$0xff] }
 0x644   : > { %4293 = vmax.xlane.f32.xlu0 %v3790_v28  ;;  %6430 = vmatprep.mubr.bf16.mxu1 %v8445_v17  ;;  %v8522_v17 = vcombine.low %v4525_v38, %v4529_v14  ;;  %v4482_v28 = vld [vmem:[%s12843_s11 + $0x528] sm:$0xff] }
 0x645   : > { %v4506_v53 = vld [vmem:[%s12843_s11 + $0x5e8] sm:$0xff] }
 0x646   : > { %4295 = vmax.xlane.f32.xlu1 %v3791_v51  ;;  %6198 = vmatmul.mubr.bf16.gmra.mxu0 %v8498_v59  ;;  %v11307_v59 = vld [vmem:[%s12843_s11 + $0x30] sm:$0xff]  ;;  %v8501_v26 = vcombine.high %v4502_v32, %v4506_v53 }
 0x647   : > { %6205 = vmatprep.mubr.bf16.mxu0 %v8507_v55  ;;  %v8477_v55 = vcombine.high %v4478_v27, %v4482_v28  ;;  %v8318_v4 = vcombine.low %v11302_v12, %v11307_v59 }
 0x648   : > { %4225 = vmax.xlane.f32.xlu0 %v3756_v48 }
 0x64a   : > { %4227 = vmax.xlane.f32.xlu1 %v3757_v5  ;;  %v4486_v5 = vld [vmem:[%s12843_s11 + $0x548] sm:$0xff] }
 0x64b   : > { %6431 = vmatmul.mubr.bf16.gmra.mxu1 %v8444_v30  ;;  %v8485_v47 = vcombine.high %v4486_v5, %v4490_v15 }
 0x64c   : > { %4289 = vmax.xlane.f32.xlu0 %v3788_v19  ;;  %6438 = vmatprep.mubr.bf16.mxu1 %v8453_v60  ;;  %v8476_v60 = vcombine.low %v4478_v27, %v4482_v28  ;;  %v4553_v19 = vld [vmem:[%s12843_s11 + $0x760] sm:$0xff] }
 0x64e   : > { %4291 = vmax.xlane.f32.xlu1 %v3789_v6  ;;  %v11265_v16 = vpop.f32.mrf.mxu0  ;;  %6206 = vmatmul.mubr.bf16.gmra.mxu0 %v8506_v52  ;;  %v8538_v52 = vcombine.low %v4541_v21, %v4545_v35  ;;  %v8547_v6 = vcombine.high %v4549_v61, %v4553_v19  ;;  %v4510_v35 = vld [vmem:[%s12843_s11 + $0x608] sm:$0xff] }
 0x64f   : > { %6213 = vmatprep.mubr.bf16.mxu0 %v8515_v34 }
 0x650   : > { %4221 = vmax.xlane.f32.xlu0 %v3754_v11  ;;  %v6017_v0 = vpop.f32.mrf.mxu0 }
 0x651   : > { %v4561_v0 = vld [vmem:[%s12843_s11 + $0x7a0] sm:$0xff] }
 0x652   : > { %4223 = vmax.xlane.f32.xlu1 %v3755_v42  ;;  %v11273_v3 = vpop.f32.mrf.mxu0  ;;  %v8493_v42 = vcombine.high %v4494_v40, %v4498_v22 }
 0x653   : > { %6439 = vmatmul.mubr.bf16.gmra.mxu1 %v8452_v29  ;;  %v8484_v29 = vcombine.low %v4486_v5, %v4490_v15  ;;  %v8500_v15 = vcombine.low %v4502_v32, %v4506_v53 }
 0x654   : > { %4285 = vmax.xlane.f32.xlu0 %v3786_v2  ;;  %6446 = vmatprep.mubr.bf16.mxu1 %v8461_v1  ;;  %v6020_v54 = vpop.f32.mrf.mxu0  ;;  %v4557_v1 = vld [vmem:[%s12843_s11 + $0x780] sm:$0xff]  ;;  %v8546_v2 = vcombine.low %v4549_v61, %v4553_v19  ;;  %v12912_v61 = vmov 0  }
 0x655   : > { %v8554_v28 = vcombine.low %v4557_v1, %v4561_v0 }
 0x656   : > { %4287 = vmax.xlane.f32.xlu1 %v3787_v57  ;;  %v11281_v41 = vpop.f32.mrf.mxu0  ;;  %6214 = vmatmul.mubr.bf16.gmra.mxu0 %v8514_v23 }
 0x657   : > { %6221 = vmatprep.mubr.bf16.mxu0 %v8523_v7  ;;  %v8555_v7 = vcombine.high %v4557_v1, %v4561_v0  ;;  %v4522_v1 = vld [vmem:[%s12843_s11 + $0x668] sm:$0xff] }
 0x658   : > { %v6025_v13 = vpop.f32.mrf.mxu0 }
 0x659   : > { %v8492_v13 = vcombine.low %v4494_v40, %v4498_v22  ;;  %v8319_v40 = vcombine.high %v11302_v12, %v11307_v59  ;;  %v4339_v12 = vld [vmem:[%s12843_s11 + $0xb0] sm:$0xff] }
 0x65a   : > { %v11289_v46 = vpop.f32.mrf.mxu0 }
 0x65b   : > { %6447 = vmatmul.mubr.bf16.gmra.mxu1 %v8460_v56 }
 0x65c   : > { %6454 = vmatprep.mubr.bf16.mxu1 %v8469_v50  ;;  %v6028_v45 = vpop.f32.mrf.mxu0 }
 0x65d   : > { %v11317_v8 = vpop.xlane.xlu0 %4193 }
 0x65e   : > { %v11297_v31 = vpop.f32.mrf.mxu0  ;;  %6222 = vmatmul.mubr.bf16.gmra.mxu0 %v8522_v17  ;;  %v4565_v17 = vld [vmem:[%s12843_s11 + $0x7c0] sm:$0xff] }
 0x65f   : > { %6229 = vmatprep.mubr.bf16.mxu0 %v8531_v44  ;;  %v11321_v33 = vpop.xlane.xlu1 %4195  ;;  %v4569_v44 = vld [vmem:[%s12843_s11 + $0x7e0] sm:$0xff] }
 0x660   : > { %v6033_v51 = vpop.f32.mrf.mxu0 }
 0x662   : > { %v11319_v48 = vpop.f32.mrf.mxu0 }
 0x663   : > { %6455 = vmatmul.mubr.bf16.gmra.mxu1 %v8468_v24 }
 0x664   : > { %6462 = vmatprep.mubr.bf16.mxu1 %v8477_v55  ;;  %v6036_v37 = vpop.f32.mrf.mxu0  ;;  %v8563_v55 = vcombine.high %v4565_v17, %v4569_v44 }
 0x665   : > { %v11323_v30 = vpop.xlane.xlu0 %4189 }
 0x666   : > { %v11331_v63 = vpop.f32.mrf.mxu0  ;;  %6230 = vmatmul.mubr.bf16.gmra.mxu0 %v8530_v43  ;;  %v4514_v43 = vld [vmem:[%s12843_s11 + $0x628] sm:$0xff] }
 0x667   : > { %v11333_v62 = vpop.xlane.xlu1 %4191  ;;  %6237 = vmatprep.mubr.bf16.mxu0 %v8539_v10 }
 0x668   : > { %v6041_v58 = vpop.f32.mrf.mxu0 }
 0x669   : > { %v11341_v39 = vpop.xlane.xlu0 %4201 }
 0x66a   : > { %v11343_v9 = vpop.f32.mrf.mxu0 }
 0x66b   : > { %v11345_v34 = vpop.xlane.xlu1 %4203  ;;  %6463 = vmatmul.mubr.bf16.gmra.mxu1 %v8476_v60  ;;  %v8509_v60 = vcombine.high %v4510_v35, %v4514_v43 }
 0x66c   : > { %6470 = vmatprep.mubr.bf16.mxu1 %v8485_v47  ;;  %v6044_v36 = vpop.f32.mrf.mxu0 }
 0x66d   : > { %v11347_v25 = vpop.xlane.xlu0 %4197 }
 0x66e   : > { %v11355_v11 = vpop.f32.mrf.mxu0  ;;  %6238 = vmatmul.mubr.bf16.gmra.mxu0 %v8538_v52 }
 0x66f   : > { %v11357_v18 = vpop.xlane.xlu1 %4199  ;;  %6245 = vmatprep.mubr.bf16.mxu0 %v8547_v6  ;;  %v8562_v6 = vcombine.low %v4565_v17, %v4569_v44 }
 0x670   : > { %v6049_v20 = vpop.f32.mrf.mxu0 }
 0x671   : > { %v4210_v38 = vpop.xlane.xlu0 %4209  ;;  %v4518_v20 = vld [vmem:[%s12843_s11 + $0x648] sm:$0xff] }
 0x672   : > { %v11365_v14 = vpop.f32.mrf.mxu0  ;;  %v8517_v53 = vcombine.high %v4518_v20, %v4522_v1 }
 0x673   : > { %v4212_v23 = vpop.xlane.xlu1 %4211  ;;  %6471 = vmatmul.mubr.bf16.gmra.mxu1 %v8484_v29 }
 0x674   : > { %6478 = vmatprep.mubr.bf16.mxu1 %v8493_v42  ;;  %v6052_v57 = vpop.f32.mrf.mxu0  ;;  %v4637_v42 = vld [vmem:[%s12844_s12] sm:$0xff]  ;;  %v4610_v0 = vpack.c.bf16 %v4212_v23, %v4210_v38  ;;  %v4638_v38 = vld [vmem:[%s12844_s12 + $0x8] sm:$0xff] }
 0x675   : > { %v11367_v54 = vpop.xlane.xlu0 %4205  ;;  %v8508_v57 = vcombine.low %v4510_v35, %v4514_v43  ;;  %v6016_v32 = vadd.f32 %v11265_v16, %v4637_v42 }
 0x676   : > { %v11375_v56 = vpop.f32.mrf.mxu0  ;;  %6246 = vmatmul.mubr.bf16.gmra.mxu0 %v8546_v2 }
 0x677   : > { %v4208_v50 = vpop.xlane.xlu1 %4207  ;;  %6253 = vmatprep.mubr.bf16.mxu0 %v8555_v7 }
 0x678   : > { %v6057_v49 = vpop.f32.mrf.mxu0  ;;  %v4609_v23 = vpack.c.bf16 %v4208_v50, %v11367_v54  ;;  %v4639_v54 = vld [vmem:[%s12844_s12 + $0x10] sm:$0xff]  ;;  %v4526_v50 = vld [vmem:[%s12843_s11 + $0x688] sm:$0xff] }
 0x679   : > { %v4214_v45 = vpop.xlane.xlu0 %4213 }
 0x67a   : > { %v11383_v27 = vpop.f32.mrf.mxu0 }
 0x67b   : > { %v4218_v24 = vpop.xlane.xlu1 %4217  ;;  %6479 = vmatmul.mubr.bf16.gmra.mxu1 %v8492_v13 }
 0x67c   : > { %6486 = vmatprep.mubr.bf16.mxu1 %v8501_v26  ;;  %v6060_v51 = vpop.f32.mrf.mxu0 }
 0x67d   : > { %v4220_v21 = vpop.xlane.xlu0 %4219  ;;  %v4530_v51 = vld [vmem:[%s12843_s11 + $0x6a8] sm:$0xff] }
 0x67e   : > { %v4612_v10 = vpack.c.bf16 %v4220_v21, %v4218_v24  ;;  %v11391_v37 = vpop.f32.mrf.mxu0  ;;  %6254 = vmatmul.mubr.bf16.gmra.mxu0 %v8554_v28 }
 0x67f   : > { %v4216_v5 = vpop.xlane.xlu1 %4215  ;;  %6261 = vmatprep.mubr.bf16.mxu0 %v8563_v55 }
 0x680   : > { %6560 = vmatpush1.bf16.msra.mxu0 %v4612_v10  ;;  %v6065_v47 = vpop.f32.mrf.mxu0  ;;  %v4611_v19 = vpack.c.bf16 %v4216_v5, %v4214_v45  ;;  %v6019_v45 = vadd.f32 %v11273_v3, %v4638_v38  ;;  %v4608_v3 = vpack.c.bf16 %v11345_v34, %v11341_v39  ;;  %v8516_v10 = vcombine.low %v4518_v20, %v4522_v1  ;;  %v4640_v39 = vld [vmem:[%s12844_s12 + $0x18] sm:$0xff] }
 0x681   : > { %v11393_v58 = vpop.xlane.xlu0 %4249  ;;  %6561 = vmatprep.subr.bf16.mxu0 %v12912_v61  ;;  %v4607_v34 = vpack.c.bf16 %v11357_v18, %v11347_v25  ;;  %v6027_v20 = vadd.f32 %v11289_v46, %v4640_v39  ;;  %v4641_v25 = vld [vmem:[%s12844_s12 + $0x20] sm:$0xff]  ;;  %v4534_v18 = vld [vmem:[%s12843_s11 + $0x6c8] sm:$0xff]  ;;  %v4606_v46 = vpack.c.bf16 %v11321_v33, %v11317_v8  ;;  %v4605_v33 = vpack.c.bf16 %v11333_v62, %v11323_v30  ;;  %v4643_v30 = vld [vmem:[%s12844_s12 + $0x30] sm:$0xff] }
 0x682   : > { %v11396_v52 = vpop.f32.mrf.mxu0  ;;  %v4642_v8 = vld [vmem:[%s12844_s12 + $0x28] sm:$0xff] }
 0x683   : > { %v11398_v36 = vpop.xlane.xlu1 %4251  ;;  %6487 = vmatmul.mubr.bf16.gmra.mxu1 %v8500_v15  ;;  %v6024_v15 = vadd.f32 %v11281_v41, %v4639_v54  ;;  %v4542_v62 = vld [vmem:[%s12843_s11 + $0x708] sm:$0xff] }
 0x684   : > { %6562 = vmatpush1.bf16.msra.mxu0 %v4611_v19  ;;  %6494 = vmatprep.mubr.bf16.mxu1 %v8509_v60  ;;  %v6068_v22 = vpop.f32.mrf.mxu0  ;;  %v8525_v60 = vcombine.high %v4526_v50, %v4530_v51 }
 0x685   : > { %v11402_v29 = vpop.xlane.xlu0 %4245  ;;  %6563 = vmatprep.subr.bf16.mxu0 %v12912_v61 }
 0x686   : > { %v11414_v2 = vpop.f32.mrf.mxu0  ;;  %6262 = vmatmul.mubr.bf16.gmra.mxu0 %v8562_v6 }
 0x687   : > { %v11416_v7 = vpop.xlane.xlu1 %4247  ;;  %6591 = vmatprep.mubr.bf16.mxu0 %v8319_v40 }
 0x688   : > { %6564 = vmatpush1.bf16.msra.mxu0 %v4610_v0  ;;  %v6073_v13 = vpop.f32.mrf.mxu0 }
 0x689   : > { %v11419_v26 = vpop.xlane.xlu0 %4257  ;;  %6565 = vmatprep.subr.bf16.mxu0 %v12912_v61 }
 0x68a   : > { %v11426_v49 = vpop.f32.mrf.mxu0 }
 0x68b   : > { %v11428_v17 = vpop.xlane.xlu1 %4259  ;;  %v6304_v44 = vpop.f32.mrf.mxu1  ;;  %6495 = vmatmul.mubr.bf16.gmra.mxu1 %v8508_v57 }
 0x68c   : > { %6566 = vmatpush1.bf16.msra.mxu0 %v4609_v23  ;;  %v11430_v16 = vadd.f32 %v6304_v44, %v6016_v32  ;;  %6502 = vmatprep.mubr.bf16.mxu1 %v8517_v53  ;;  %v6076_v28 = vpop.f32.mrf.mxu0  ;;  %v4538_v32 = vld [vmem:[%s12843_s11 + $0x6e8] sm:$0xff]  ;;  %v8524_v23 = vcombine.low %v4526_v50, %v4530_v51 }
 0x68d   : > { %v11433_v24 = vpop.xlane.xlu0 %4253  ;;  %6567 = vmatprep.subr.bf16.mxu0 %v12912_v61  ;;  %v6306_v55 = vpop.f32.mrf.mxu1  ;;  %v8533_v28 = vcombine.high %v4534_v18, %v4538_v32 }
 0x68e   : > { %v11447_v21 = vpop.f32.mrf.mxu0 }
 0x68f   : > { %v11449_v35 = vpop.xlane.xlu1 %4255  ;;  %v6307_v43 = vpop.f32.mrf.mxu1 }
 0x690   : > { %6568 = vmatpush1.bf16.msra.mxu0 %v4608_v3  ;;  %v11451_v5 = vadd.f32 %v6307_v43, %v6019_v45  ;;  %v6081_v47 = vpop.f32.mrf.mxu0  ;;  %v6032_v45 = vadd.f32 %v11297_v31, %v4641_v25 }
 0x691   : > { %v11454_v19 = vpop.xlane.xlu0 %4265  ;;  %6569 = vmatprep.subr.bf16.mxu0 %v12912_v61  ;;  %v6309_v6 = vpop.f32.mrf.mxu1 }
 0x692   : > { %v11462_v40 = vpop.f32.mrf.mxu0  ;;  %v4546_v6 = vld [vmem:[%s12843_s11 + $0x728] sm:$0xff] }
 0x693   : > { %v11464_v22 = vpop.xlane.xlu1 %4267  ;;  %v6312_v42 = vpop.f32.mrf.mxu1  ;;  %6503 = vmatmul.mubr.bf16.gmra.mxu1 %v8516_v10  ;;  %v6035_v10 = vadd.f32 %v11319_v48, %v4642_v8  ;;  %v4620_v48 = vpack.c.bf16 %v11398_v36, %v11393_v58  ;;  %v8541_v25 = vcombine.high %v4542_v62, %v4546_v6  ;;  %v4644_v58 = vld [vmem:[%s12844_s12 + $0x38] sm:$0xff]  ;;  %v4619_v36 = vpack.c.bf16 %v11416_v7, %v11402_v29  ;;  %v4645_v29 = vld [vmem:[%s12844_s12 + $0x40] sm:$0xff]  ;;  %v4550_v7 = vld [vmem:[%s12843_s11 + $0x748] sm:$0xff] }
 0x694   : > { %6570 = vmatpush1.bf16.msra.mxu0 %v4607_v34  ;;  %v11466_v41 = vadd.f32 %v6312_v42, %v6024_v15  ;;  %6510 = vmatprep.mubr.bf16.mxu1 %v8525_v60  ;;  %v6084_v1 = vpop.f32.mrf.mxu0 }
 0x695   : > { %v11469_v0 = vpop.xlane.xlu0 %4261  ;;  %6571 = vmatprep.subr.bf16.mxu0 %v12912_v61  ;;  %v6314_v57 = vpop.f32.mrf.mxu1 }
 0x696   : > { %v11483_v53 = vpop.f32.mrf.mxu0  ;;  %v6040_v57 = vadd.f32 %v11331_v63, %v4643_v30 }
 0x697   : > { %v11485_v13 = vpop.xlane.xlu1 %4263  ;;  %v6315_v38 = vpop.f32.mrf.mxu1 }
 0x698   : > { %6572 = vmatpush1.bf16.msra.mxu0 %v4606_v46  ;;  %v11487_v44 = vadd.f32 %v6315_v38, %v6027_v20  ;;  %v6089_v55 = vpop.f32.mrf.mxu0  ;;  %v8532_v20 = vcombine.low %v4534_v18, %v4538_v32 }
 0x699   : > { %v11490_v54 = vpop.xlane.xlu0 %4273  ;;  %6573 = vmatprep.subr.bf16.mxu0 %v12912_v61  ;;  %v6317_v3 = vpop.f32.mrf.mxu1  ;;  %v6043_v55 = vadd.f32 %v11343_v9, %v4644_v58 }
 0x69a   : > { %v11498_v50 = vpop.f32.mrf.mxu0 }
 0x69b   : > { %v11500_v51 = vpop.xlane.xlu1 %4275  ;;  %v6320_v43 = vpop.f32.mrf.mxu1  ;;  %6511 = vmatmul.mubr.bf16.gmra.mxu1 %v8524_v23 }
 0x69c   : > { %6574 = vmatpush1.bf16.msra.mxu0 %v4605_v33  ;;  %v11502_v31 = vadd.f32 %v6320_v43, %v6032_v45  ;;  %6518 = vmatprep.mubr.bf16.mxu1 %v8533_v28  ;;  %v6092_v15 = vpop.f32.mrf.mxu0  ;;  %v4554_v43 = vld [vmem:[%s12843_s11 + $0x768] sm:$0xff] }
 0x69d   : > { %v11505_v60 = vpop.xlane.xlu0 %4269  ;;  %6575 = vmatprep.subr.bf16.mxu0 %v12912_v61  ;;  %v6322_v47 = vpop.f32.mrf.mxu1 }
 0x69e   : > { %v11519_v39 = vpop.f32.mrf.mxu0  ;;  %v8540_v47 = vcombine.low %v4542_v62, %v4546_v6  ;;  %v4626_v6 = vpack.c.bf16 %v11500_v51, %v11490_v54  ;;  %v4562_v54 = vld [vmem:[%s12843_s11 + $0x7a8] sm:$0xff] }
 0x69f   : > { %v11521_v34 = vpop.xlane.xlu1 %4271  ;;  %v6323_v42 = vpop.f32.mrf.mxu1 }
 0x6a0   : > { %6576 = vmatpush2.bf16.msra.mxu0 %v4620_v48  ;;  %v11523_v1 = vadd.f32 %v6323_v42, %v6035_v10  ;;  %v6097_v46 = vpop.f32.mrf.mxu0  ;;  %v6048_v42 = vadd.f32 %v11355_v11, %v4645_v29  ;;  %v8548_v29 = vcombine.low %v4550_v7, %v4554_v43 }
 0x6a1   : > { %v4282_v38 = vpop.xlane.xlu0 %4281  ;;  %6577 = vmatprep.subr.bf16.mxu0 %v12912_v61  ;;  %v6325_v23 = vpop.f32.mrf.mxu1 }
 0x6a2   : > { %v11532_v45 = vpop.f32.mrf.mxu0 }
 0x6a3   : > { %v4284_v18 = vpop.xlane.xlu1 %4283  ;;  %v6328_v32 = vpop.f32.mrf.mxu1  ;;  %6519 = vmatmul.mubr.bf16.gmra.mxu1 %v8532_v20  ;;  %v8549_v20 = vcombine.high %v4550_v7, %v4554_v43 }
 0x6a4   : > { %v4628_v28 = vpack.c.bf16 %v4284_v18, %v4282_v38  ;;  %6578 = vmatpush2.bf16.msra.mxu0 %v4619_v36  ;;  %v11534_v63 = vadd.f32 %v6328_v32, %v6040_v57  ;;  %6526 = vmatprep.mubr.bf16.mxu1 %v8541_v25  ;;  %v6100_v3 = vpop.f32.mrf.mxu0  ;;  %v4646_v38 = vld [vmem:[%s12844_s12 + $0x48] sm:$0xff] }
 0x6a5   : > { %v4278_v8 = vpop.xlane.xlu0 %4277  ;;  %6579 = vmatprep.subr.bf16.mxu0 %v12912_v61  ;;  %v6330_v33 = vpop.f32.mrf.mxu1  ;;  %v6051_v18 = vadd.f32 %v11365_v14, %v4646_v38  ;;  %v4647_v3 = vld [vmem:[%s12844_s12 + $0x50] sm:$0xff] }
 0x6a6   : > { %6849 = vmatpush1.bf16.msra.mxu1 %v4628_v28  ;;  %v11547_v9 = vpop.f32.mrf.mxu0 }
 0x6a7   : > { %v4280_v10 = vpop.xlane.xlu1 %4279  ;;  %6850 = vmatprep.subr.bf16.mxu1 %v12912_v61  ;;  %v6331_v15 = vpop.f32.mrf.mxu1 }
 0x6a8   : > { %v4627_v30 = vpack.c.bf16 %v4280_v10, %v4278_v8  ;;  %v11550_v48 = vadd.f32 %v6331_v15, %v6043_v55  ;;  %v6105_v57 = vpop.f32.mrf.mxu0  ;;  %v4558_v8 = vld [vmem:[%s12843_s11 + $0x788] sm:$0xff]  ;;  %v4625_v10 = vpack.c.bf16 %v11521_v34, %v11505_v60 }
 0x6a9   : > { %v4242_v25 = vpop.xlane.xlu0 %4241  ;;  %v6333_v46 = vpop.f32.mrf.mxu1 }
 0x6aa   : > { %6851 = vmatpush1.bf16.msra.mxu1 %v4627_v30  ;;  %v11556_v23 = vpop.f32.mrf.mxu0  ;;  %v6056_v30 = vadd.f32 %v11375_v56, %v4647_v3  ;;  %v8557_v46 = vcombine.high %v4558_v8, %v4562_v54  ;;  %v4624_v56 = vpack.c.bf16 %v11464_v22, %v11454_v19  ;;  %v4566_v19 = vld [vmem:[%s12843_s11 + $0x7c8] sm:$0xff] }
 0x6ab   : > { %v4244_v58 = vpop.xlane.xlu1 %4243  ;;  %6852 = vmatprep.subr.bf16.mxu1 %v12912_v61  ;;  %v6336_v62 = vpop.f32.mrf.mxu1  ;;  %6527 = vmatmul.mubr.bf16.gmra.mxu1 %v8540_v47  ;;  %v4570_v22 = vld [vmem:[%s12843_s11 + $0x7e8] sm:$0xff] }
 0x6ac   : > { %v4618_v11 = vpack.c.bf16 %v4244_v58, %v4242_v25  ;;  %v11561_v36 = vadd.f32 %v6336_v62, %v6048_v42  ;;  %6534 = vmatprep.mubr.bf16.mxu1 %v8549_v20  ;;  %v6108_v32 = vpop.f32.mrf.mxu0  ;;  %v4648_v25 = vld [vmem:[%s12844_s12 + $0x58] sm:$0xff] }
 0x6ad   : > { %v4238_v28 = vpop.xlane.xlu0 %4237  ;;  %v6338_v55 = vpop.f32.mrf.mxu1  ;;  %v6059_v58 = vadd.f32 %v11383_v27, %v4648_v25 }
 0x6ae   : > { %6580 = vmatpush2.bf16.msra.mxu0 %v4618_v11  ;;  %6853 = vmatpush1.bf16.msra.mxu1 %v4626_v6  ;;  %v11573_v51 = vpop.f32.mrf.mxu0  ;;  %v4623_v55 = vpack.c.bf16 %v11485_v13, %v11469_v0 }
 0x6af   : > { %v4240_v14 = vpop.xlane.xlu1 %4239  ;;  %6581 = vmatprep.subr.bf16.mxu0 %v12912_v61  ;;  %6854 = vmatprep.subr.bf16.mxu1 %v12912_v61  ;;  %v6339_v33 = vpop.f32.mrf.mxu1 }
 0x6b0   : > { %v4617_v15 = vpack.c.bf16 %v4240_v14, %v4238_v28  ;;  %v11579_v47 = vadd.f32 %v6339_v33, %v6051_v18  ;;  %v6113_v42 = vpop.f32.mrf.mxu0  ;;  %v4649_v18 = vld [vmem:[%s12844_s12 + $0x60] sm:$0xff]  ;;  %v8556_v33 = vcombine.low %v4558_v8, %v4562_v54 }
 0x6b1   : > { %v4234_v20 = vpop.xlane.xlu0 %4233  ;;  %v6341_v57 = vpop.f32.mrf.mxu1  ;;  %v6064_v14 = vadd.f32 %v11391_v37, %v4649_v18  ;;  %v8565_v42 = vcombine.high %v4566_v19, %v4570_v22  ;;  %v4622_v37 = vpack.c.bf16 %v11428_v17, %v11419_v26  ;;  %v11644_v26 = vld [vmem:[%s12843_s11 + $0x38] sm:$0xff] }
 0x6b2   : > { %6582 = vmatpush2.bf16.msra.mxu0 %v4617_v15  ;;  %6855 = vmatpush1.bf16.msra.mxu1 %v4625_v10  ;;  %v11585_v38 = vpop.f32.mrf.mxu0 }
 0x6b3   : > { %v4236_v7 = vpop.xlane.xlu1 %4235  ;;  %6583 = vmatprep.subr.bf16.mxu0 %v12912_v61  ;;  %6856 = vmatprep.subr.bf16.mxu1 %v12912_v61  ;;  %v6344_v60 = vpop.f32.mrf.mxu1 }
 0x6b4   : > { %v4616_v34 = vpack.c.bf16 %v4236_v7, %v4234_v20  ;;  %v11591_v43 = vadd.f32 %v6344_v60, %v6056_v30  ;;  %6535 = vmatmul.mubr.bf16.gmra.mxu1 %v8548_v29  ;;  %v6116_v62 = vpop.f32.mrf.mxu0  ;;  %v4650_v30 = vld [vmem:[%s12844_s12 + $0x68] sm:$0xff]  ;;  %v4651_v7 = vld [vmem:[%s12844_s12 + $0x70] sm:$0xff]  ;;  %v11639_v60 = vld [vmem:[%s12843_s11 + $0x18] sm:$0xff] }
 0x6b5   : > { %v11594_v6 = vpop.xlane.xlu0 %4297  ;;  %v6346_v11 = vpop.f32.mrf.mxu1  ;;  %6542 = vmatprep.mubr.bf16.mxu1 %v8557_v46  ;;  %v6067_v8 = vadd.f32 %v11396_v52, %v4650_v30  ;;  %v6072_v62 = vadd.f32 %v11414_v2, %v4651_v7 }
 0x6b6   : > { %6584 = vmatpush2.bf16.msra.mxu0 %v4616_v34  ;;  %6857 = vmatpush1.bf16.msra.mxu1 %v4624_v56  ;;  %v11605_v27 = vpop.f32.mrf.mxu0  ;;  %v4621_v34 = vpack.c.bf16 %v11449_v35, %v11433_v24  ;;  %v8564_v11 = vcombine.low %v4566_v19, %v4570_v22 }
 0x6b7   : > { %v11607_v32 = vpop.xlane.xlu1 %4299  ;;  %6858 = vmatprep.subr.bf16.mxu1 %v12912_v61  ;;  %v6347_v28 = vpop.f32.mrf.mxu1  ;;  %6585 = vmatprep.subr.bf16.mxu0 %v12912_v61 }
 0x6b8   : > { %v11613_v3 = vadd.f32 %v6347_v28, %v6059_v58  ;;  %v6121_v29 = vpop.f32.mrf.mxu0 }
 0x6b9   : > { %v11616_v10 = vpop.xlane.xlu0 %4305  ;;  %v6349_v15 = vpop.f32.mrf.mxu1 }
 0x6ba   : > { %6859 = vmatpush1.bf16.msra.mxu1 %v4623_v55  ;;  %v11621_v20 = vpop.f32.mrf.mxu0 }
 0x6bb   : > { %v11623_v57 = vpop.xlane.xlu1 %4307  ;;  %6860 = vmatprep.subr.bf16.mxu1 %v12912_v61  ;;  %v6352_v0 = vpop.f32.mrf.mxu1 }
 0x6bc   : > { %v11628_v13 = vadd.f32 %v6352_v0, %v6064_v14  ;;  %6543 = vmatmul.mubr.bf16.gmra.mxu1 %v8556_v33  ;;  %v6124_v54 = vpop.f32.mrf.mxu0  ;;  %v4652_v14 = vld [vmem:[%s12844_s12 + $0x78] sm:$0xff]  ;;  %v8321_v33 = vcombine.high %v11639_v60, %v11644_v26  ;;  %v4653_v0 = vld [vmem:[%s12844_s12 + $0x80] sm:$0xff] }
 0x6bd   : > { %v11631_v25 = vpop.xlane.xlu0 %4301  ;;  %v6354_v46 = vpop.f32.mrf.mxu1  ;;  %6550 = vmatprep.mubr.bf16.mxu1 %v8565_v42  ;;  %v6075_v19 = vadd.f32 %v11426_v49, %v4652_v14  ;;  %v6080_v49 = vadd.f32 %v11447_v21, %v4653_v0  ;;  %v4634_v14 = vpack.c.bf16 %v11623_v57, %v11616_v10 }
 0x6be   : > { %6861 = vmatpush1.bf16.msra.mxu1 %v4622_v37  ;;  %v11646_v52 = vpop.f32.mrf.mxu0 }
 0x6bf   : > { %v11648_v17 = vpop.xlane.xlu1 %4303  ;;  %6862 = vmatprep.subr.bf16.mxu1 %v12912_v61  ;;  %v6355_v56 = vpop.f32.mrf.mxu1 }
 0x6c0   : > { %v11653_v58 = vadd.f32 %v6355_v56, %v6067_v8  ;;  %v6129_v18 = vpop.f32.mrf.mxu0 }
 0x6c1   : > { %v4314_v28 = vpop.xlane.xlu0 %4313  ;;  %v6357_v55 = vpop.f32.mrf.mxu1 }
 0x6c2   : > { %6863 = vmatpush1.bf16.msra.mxu1 %v4621_v34  ;;  %v11661_v29 = vpop.f32.mrf.mxu0 }
 0x6c3   : > { %v4316_v15 = vpop.xlane.xlu1 %4315  ;;  %6864 = vmatprep.subr.bf16.mxu1 %v12912_v61  ;;  %v6360_v24 = vpop.f32.mrf.mxu1 }
 0x6c4   : > { %v4636_v35 = vpack.c.bf16 %v4316_v15, %v4314_v28  ;;  %v11664_v2 = vadd.f32 %v6360_v24, %v6072_v62  ;;  %6551 = vmatmul.mubr.bf16.gmra.mxu1 %v8564_v11  ;;  %v6132_v22 = vpop.f32.mrf.mxu0  ;;  %v4654_v11 = vld [vmem:[%s12844_s12 + $0x88] sm:$0xff] }
 0x6c5   : > { %v4310_v30 = vpop.xlane.xlu0 %4309  ;;  %v6362_v42 = vpop.f32.mrf.mxu1  ;;  %6880 = vmatprep.mubr.bf16.mxu1 %v8321_v33  ;;  %v6083_v21 = vadd.f32 %v11462_v40, %v4654_v11  ;;  %v4655_v22 = vld [vmem:[%s12844_s12 + $0x90] sm:$0xff]  ;;  %v4633_v40 = vpack.c.bf16 %v11648_v17, %v11631_v25  ;;  %v4632_v25 = vpack.c.bf16 %v11607_v32, %v11594_v6 }
 0x6c6   : > { %6865 = vmatpush2.bf16.msra.mxu1 %v4636_v35  ;;  %v11670_v37 = vpop.f32.mrf.mxu0  ;;  %v6088_v0 = vadd.f32 %v11483_v53, %v4655_v22 }
 0x6c7   : > { %v4312_v8 = vpop.xlane.xlu1 %4311  ;;  %6866 = vmatprep.subr.bf16.mxu1 %v12912_v61  ;;  %v6363_v54 = vpop.f32.mrf.mxu1 }
 0x6c8   : > { %v4635_v46 = vpack.c.bf16 %v4312_v8, %v4310_v30  ;;  %v11673_v7 = vadd.f32 %v6363_v54, %v6075_v19  ;;  %v6137_v56 = vpop.f32.mrf.mxu0 }
 0x6c9   : > { %v4230_v34 = vpop.xlane.xlu0 %4229  ;;  %v6365_v62 = vpop.f32.mrf.mxu1 }
 0x6ca   : > { %6867 = vmatpush2.bf16.msra.mxu1 %v4635_v46  ;;  %v11679_v18 = vpop.f32.mrf.mxu0 }
 0x6cb   : > { %v4232_v28 = vpop.xlane.xlu1 %4231  ;;  %6868 = vmatprep.subr.bf16.mxu1 %v12912_v61  ;;  %v6368_v55 = vpop.f32.mrf.mxu1 }
 0x6cc   : > { %v4615_v33 = vpack.c.bf16 %v4232_v28, %v4230_v34  ;;  %v11684_v15 = vadd.f32 %v6368_v55, %v6080_v49  ;;  %v6140_v24 = vpop.f32.mrf.mxu0  ;;  %v4656_v49 = vld [vmem:[%s12844_s12 + $0x98] sm:$0xff] }
 0x6cd   : > { %v4294_v35 = vpop.xlane.xlu0 %4293  ;;  %v6370_v19 = vpop.f32.mrf.mxu1  ;;  %v6091_v53 = vadd.f32 %v11498_v50, %v4656_v49 }
 0x6ce   : > { %6586 = vmatpush2.bf16.msra.mxu0 %v4615_v33  ;;  %6869 = vmatpush2.bf16.msra.mxu1 %v4634_v14  ;;  %v11690_v30 = vpop.f32.mrf.mxu0  ;;  %v4657_v33 = vld [vmem:[%s12844_s12 + $0xa0] sm:$0xff] }
 0x6cf   : > { %v4296_v42 = vpop.xlane.xlu1 %4295  ;;  %6870 = vmatprep.subr.bf16.mxu1 %v12912_v61  ;;  %6587 = vmatprep.subr.bf16.mxu0 %v12912_v61  ;;  %v6371_v10 = vpop.f32.mrf.mxu1  ;;  %v6096_v50 = vadd.f32 %v11519_v39, %v4657_v33  ;;  %v4331_v39 = vld [vmem:[%s12843_s11 + $0x70] sm:$0xff] }
 0x6d0   : > { %v11696_v57 = vadd.f32 %v6371_v10, %v6083_v21  ;;  %v6145_v8 = vpop.f32.mrf.mxu0  ;;  %v4631_v32 = vpack.c.bf16 %v4296_v42, %v4294_v35  ;;  %v4327_v35 = vld [vmem:[%s12843_s11 + $0x50] sm:$0xff] }
 0x6d1   : > { %v4226_v54 = vpop.xlane.xlu0 %4225  ;;  %v6373_v46 = vpop.f32.mrf.mxu1 }
 0x6d2   : > { %6871 = vmatpush2.bf16.msra.mxu1 %v4633_v40  ;;  %v11702_v56 = vpop.f32.mrf.mxu0 }
 0x6d3   : > { %v4228_v34 = vpop.xlane.xlu1 %4227  ;;  %6872 = vmatprep.subr.bf16.mxu1 %v12912_v61  ;;  %v6376_v62 = vpop.f32.mrf.mxu1 }
 0x6d4   : > { %v4614_v17 = vpack.c.bf16 %v4228_v34, %v4226_v54  ;;  %v11707_v11 = vadd.f32 %v6376_v62, %v6088_v0  ;;  %v6148_v28 = vpop.f32.mrf.mxu0  ;;  %v4658_v0 = vld [vmem:[%s12844_s12 + $0xa8] sm:$0xff] }
 0x6d5   : > { %v4290_v55 = vpop.xlane.xlu0 %4289  ;;  %v6378_v14 = vpop.f32.mrf.mxu1  ;;  %v6099_v62 = vadd.f32 %v11532_v45, %v4658_v0  ;;  %v4332_v45 = vld [vmem:[%s12843_s11 + $0x78] sm:$0xff] }
 0x6d6   : > { %6588 = vmatpush2.bf16.msra.mxu0 %v4614_v17  ;;  %6873 = vmatpush2.bf16.msra.mxu1 %v4632_v25  ;;  %v11713_v21 = vpop.f32.mrf.mxu0  ;;  %v8327_v14 = vcombine.high %v4327_v35, %v4331_v39  ;;  %v4660_v0 = vld [vmem:[%s12844_s12 + $0xb8] sm:$0xff] }
 0x6d7   : > { %v4292_v24 = vpop.xlane.xlu1 %4291  ;;  %6874 = vmatprep.subr.bf16.mxu1 %v12912_v61  ;;  %6589 = vmatprep.subr.bf16.mxu0 %v12912_v61  ;;  %v6379_v6 = vpop.f32.mrf.mxu1 }
 0x6d8   : > { %v11717_v19 = vadd.f32 %v6379_v6, %v6091_v53  ;;  %v6153_v22 = vpop.f32.mrf.mxu0  ;;  %v4630_v46 = vpack.c.bf16 %v4292_v24, %v4290_v55  ;;  %v4659_v53 = vld [vmem:[%s12844_s12 + $0xb0] sm:$0xff]  ;;  %v4328_v55 = vld [vmem:[%s12843_s11 + $0x58] sm:$0xff] }
 0x6d9   : > { %v4222_v10 = vpop.xlane.xlu0 %4221  ;;  %v6381_v40 = vpop.f32.mrf.mxu1  ;;  %v6104_v22 = vadd.f32 %v11547_v9, %v4659_v53  ;;  %v4335_v9 = vld [vmem:[%s12843_s11 + $0x90] sm:$0xff]  ;;  %v4336_v53 = vld [vmem:[%s12843_s11 + $0x98] sm:$0xff] }
 0x6da   : > { %6875 = vmatpush2.bf16.msra.mxu1 %v4631_v32  ;;  %v11723_v8 = vpop.f32.mrf.mxu0 }
 0x6db   : > { %v4224_v54 = vpop.xlane.xlu1 %4223  ;;  %6876 = vmatprep.subr.bf16.mxu1 %v12912_v61  ;;  %v6384_v42 = vpop.f32.mrf.mxu1 }
 0x6dc   : > { %v4613_v49 = vpack.c.bf16 %v4224_v54, %v4222_v10  ;;  %v11732_v34 = vadd.f32 %v6384_v42, %v6096_v50  ;;  %v6156_v25 = vpop.f32.mrf.mxu0  ;;  %v8329_v54 = vcombine.high %v4328_v55, %v4332_v45 }
 0x6dd   : > { %v6386_v17 = vpop.f32.mrf.mxu1  ;;  %v4286_v28 = vpop.xlane.xlu0 %4285  ;;  %v8335_v25 = vcombine.high %v4335_v9, %v4339_v12 }
 0x6de   : > { %6590 = vmatpush2.bf16.msra.mxu0 %v4613_v49  ;;  %6877 = vmatpush2.bf16.msra.mxu1 %v4630_v46  ;;  %v11738_v33 = vpop.f32.mrf.mxu0  ;;  %v8326_v46 = vcombine.low %v4327_v35, %v4331_v39 }
 0x6df   : > { %v4288_v6 = vpop.xlane.xlu1 %4287  ;;  %6878 = vmatprep.subr.bf16.mxu1 %v12912_v61  ;;  %v6387_v24 = vpop.f32.mrf.mxu1  ;;  %v8320_v61 = vcombine.low %v11639_v60, %v11644_v26  ;;  %v6107_v60 = vadd.f32 %v11556_v23, %v4660_v0  ;;  %v4340_v23 = vld [vmem:[%s12843_s11 + $0xb8] sm:$0xff] }
 0x6e0   : > { %v4629_v32 = vpack.c.bf16 %v4288_v6, %v4286_v28  ;;  %v11747_v50 = vadd.f32 %v6387_v24, %v6099_v62  ;;  %v6161_v10 = vpop.f32.mrf.mxu0  ;;  %v4661_v62 = vld [vmem:[%s12844_s12 + $0xc0] sm:$0xff]  ;;  %v8328_v6 = vcombine.low %v4328_v55, %v4332_v45 }
 0x6e1   : > { %6592 = vmatmul.mubr.bf16.vlgmr.msra.gmra.mxu0 %v8318_v4  ;;  %v6389_v40 = vpop.f32.mrf.mxu1  ;;  %v6112_v35 = vadd.f32 %v11573_v51, %v4661_v62  ;;  %v4347_v51 = vld [vmem:[%s12843_s11 + $0xf0] sm:$0xff] }
 0x6e2   : > { %6879 = vmatpush2.bf16.msra.mxu1 %v4629_v32  ;;  %6599 = vmatprep.mubr.bf16.mxu0 %v8327_v14  ;;  %v11758_v42 = vpop.f32.mrf.mxu0  ;;  %v4662_v32 = vld [vmem:[%s12844_s12 + $0xc8] sm:$0xff] }
 0x6e3   : > { %v6392_v59 = vpop.f32.mrf.mxu1  ;;  %v6115_v55 = vadd.f32 %v11585_v38, %v4662_v32  ;;  %v4348_v38 = vld [vmem:[%s12843_s11 + $0xf8] sm:$0xff]  ;;  %v4351_v32 = vld [vmem:[%s12843_s11 + $0x110] sm:$0xff] }
 0x6e4   : > { %v11766_v4 = vadd.f32 %v6392_v59, %v6104_v22  ;;  %v6164_v26 = vpop.f32.mrf.mxu0  ;;  %v8337_v22 = vcombine.high %v4336_v53, %v4340_v23 }
 0x6e5   : > { %6881 = vmatmul.mubr.bf16.vlgmr.msra.gmra.mxu1 %v8320_v61  ;;  %v6394_v49 = vpop.f32.mrf.mxu1  ;;  %v4343_v61 = vld [vmem:[%s12843_s11 + $0xd0] sm:$0xff] }
 0x6e6   : > { %6888 = vmatprep.mubr.bf16.mxu1 %v8329_v54  ;;  %v11772_v17 = vpop.f32.mrf.mxu0  ;;  %v8334_v54 = vcombine.low %v4335_v9, %v4339_v12  ;;  %v8343_v26 = vcombine.high %v4343_v61, %v4347_v51  ;;  %v4344_v49 = vld [vmem:[%s12843_s11 + $0xd8] sm:$0xff] }
 0x6e7   : > { %v6395_v28 = vpop.f32.mrf.mxu1 }
 0x6e8   : > { %v11780_v14 = vadd.f32 %v6395_v28, %v6107_v60  ;;  %v6169_v39 = vpop.f32.mrf.mxu0  ;;  %v4663_v60 = vld [vmem:[%s12844_s12 + $0xd0] sm:$0xff]  ;;  %v8336_v28 = vcombine.low %v4336_v53, %v4340_v23 }
 0x6e9   : > { %6600 = vmatmul.mubr.bf16.gmra.mxu0 %v8326_v46  ;;  %v6397_v24 = vpop.f32.mrf.mxu1  ;;  %v6120_v9 = vadd.f32 %v11605_v27, %v4663_v60  ;;  %v4664_v39 = vld [vmem:[%s12844_s12 + $0xd8] sm:$0xff]  ;;  %v4355_v27 = vld [vmem:[%s12843_s11 + $0x130] sm:$0xff] }
 0x6ea   : > { %6607 = vmatprep.mubr.bf16.mxu0 %v8335_v25  ;;  %v11786_v10 = vpop.f32.mrf.mxu0  ;;  %v6123_v53 = vadd.f32 %v11621_v20, %v4664_v39  ;;  %v4356_v20 = vld [vmem:[%s12843_s11 + $0x138] sm:$0xff] }
 0x6eb   : > { %v6400_v40 = vpop.f32.mrf.mxu1 }
 0x6ec   : > { %v11794_v0 = vadd.f32 %v6400_v40, %v6112_v35  ;;  %v6172_v45 = vpop.f32.mrf.mxu0 }
 0x6ed   : > { %6889 = vmatmul.mubr.bf16.gmra.mxu1 %v8328_v6  ;;  %v6402_v59 = vpop.f32.mrf.mxu1  ;;  %v8345_v6 = vcombine.high %v4344_v49, %v4348_v38 }
 0x6ee   : > { %6896 = vmatprep.mubr.bf16.mxu1 %v8337_v22  ;;  %v11800_v46 = vpop.f32.mrf.mxu0  ;;  %v8351_v59 = vcombine.high %v4351_v32, %v4355_v27 }
 0x6ef   : > { %v6403_v62 = vpop.f32.mrf.mxu1 }
 0x6f0   : > { %v11808_v25 = vadd.f32 %v6403_v62, %v6115_v55  ;;  %v6177_v12 = vpop.f32.mrf.mxu0  ;;  %v8342_v55 = vcombine.low %v4343_v61, %v4347_v51 }
 0x6f1   : > { %6608 = vmatmul.mubr.bf16.gmra.mxu0 %v8334_v54  ;;  %v6405_v35 = vpop.f32.mrf.mxu1  ;;  %v4665_v54 = vld [vmem:[%s12844_s12 + $0xe0] sm:$0xff]  ;;  %v8344_v12 = vcombine.low %v4344_v49, %v4348_v38 }
 0x6f2   : > { %6615 = vmatprep.mubr.bf16.mxu0 %v8343_v26  ;;  %v11814_v24 = vpop.f32.mrf.mxu0  ;;  %v4352_v26 = vld [vmem:[%s12843_s11 + $0x118] sm:$0xff]  ;;  %v6128_v61 = vadd.f32 %v11646_v52, %v4665_v54  ;;  %v4666_v35 = vld [vmem:[%s12844_s12 + $0xe8] sm:$0xff]  ;;  %v4363_v52 = vld [vmem:[%s12843_s11 + $0x170] sm:$0xff] }
 0x6f3   : > { %v6408_v22 = vpop.f32.mrf.mxu1  ;;  %v8353_v39 = vcombine.high %v4352_v26, %v4356_v20  ;;  %v6131_v49 = vadd.f32 %v11661_v29, %v4666_v35  ;;  %v4667_v54 = vld [vmem:[%s12844_s12 + $0xf0] sm:$0xff]  ;;  %v4364_v29 = vld [vmem:[%s12843_s11 + $0x178] sm:$0xff] }
 0x6f4   : > { %v11822_v40 = vadd.f32 %v6408_v22, %v6120_v9  ;;  %v6180_v23 = vpop.f32.mrf.mxu0  ;;  %v4359_v22 = vld [vmem:[%s12843_s11 + $0x150] sm:$0xff] }
 0x6f5   : > { %6897 = vmatmul.mubr.bf16.gmra.mxu1 %v8336_v28  ;;  %v6410_v45 = vpop.f32.mrf.mxu1 }
 0x6f6   : > { %6904 = vmatprep.mubr.bf16.mxu1 %v8345_v6  ;;  %v11828_v60 = vpop.f32.mrf.mxu0 }
 0x6f7   : > { %v6411_v62 = vpop.f32.mrf.mxu1 }
 0x6f8   : > { %v11836_v9 = vadd.f32 %v6411_v62, %v6123_v53  ;;  %v6185_v51 = vpop.f32.mrf.mxu0 }
 0x6f9   : > { %6616 = vmatmul.mubr.bf16.gmra.mxu0 %v8342_v55  ;;  %v6413_v28 = vpop.f32.mrf.mxu1  ;;  %v8350_v55 = vcombine.low %v4351_v32, %v4355_v27  ;;  %v4360_v51 = vld [vmem:[%s12843_s11 + $0x158] sm:$0xff]  ;;  %v6136_v32 = vadd.f32 %v11670_v37, %v4667_v54  ;;  %v4371_v37 = vld [vmem:[%s12843_s11 + $0x1b0] sm:$0xff]  ;;  %v8358_v54 = vcombine.low %v4359_v22, %v4363_v52 }
 0x6fa   : > { %6623 = vmatprep.mubr.bf16.mxu0 %v8351_v59  ;;  %v11842_v6 = vpop.f32.mrf.mxu0  ;;  %v8359_v59 = vcombine.high %v4359_v22, %v4363_v52  ;;  %v8352_v28 = vcombine.low %v4352_v26, %v4356_v20 }
 0x6fb   : > { %v6416_v53 = vpop.f32.mrf.mxu1 }
 0x6fc   : > { %v11850_v23 = vadd.f32 %v6416_v53, %v6128_v61  ;;  %v6188_v38 = vpop.f32.mrf.mxu0  ;;  %v8361_v53 = vcombine.high %v4360_v51, %v4364_v29 }
 0x6fd   : > { %6905 = vmatmul.mubr.bf16.gmra.mxu1 %v8344_v12  ;;  %v6418_v45 = vpop.f32.mrf.mxu1 }
 0x6fe   : > { %6912 = vmatprep.mubr.bf16.mxu1 %v8353_v39  ;;  %v11856_v62 = vpop.f32.mrf.mxu0  ;;  %v4668_v39 = vld [vmem:[%s12844_s12 + $0xf8] sm:$0xff]  ;;  %v4367_v45 = vld [vmem:[%s12843_s11 + $0x190] sm:$0xff] }
 0x6ff   : > { %v6419_v61 = vpop.f32.mrf.mxu1  ;;  %v6139_v26 = vadd.f32 %v11679_v18, %v4668_v39  ;;  %v4372_v18 = vld [vmem:[%s12843_s11 + $0x1b8] sm:$0xff]  ;;  %v8360_v39 = vcombine.low %v4360_v51, %v4364_v29 }
 0x700   : > { %v11864_v12 = vadd.f32 %v6419_v61, %v6131_v49  ;;  %v6193_v27 = vpop.f32.mrf.mxu0  ;;  %v4669_v61 = vld [vmem:[%s12844_s12 + $0x100] sm:$0xff] }
 0x701   : > { %6624 = vmatmul.mubr.bf16.gmra.mxu0 %v8350_v55  ;;  %v6421_v35 = vpop.f32.mrf.mxu1  ;;  %v8367_v27 = vcombine.high %v4367_v45, %v4371_v37  ;;  %v6144_v22 = vadd.f32 %v11690_v30, %v4669_v61  ;;  %v4379_v30 = vld [vmem:[%s12843_s11 + $0x1f0] sm:$0xff]  ;;  %v8366_v61 = vcombine.low %v4367_v45, %v4371_v37 }
 0x702   : > { %12913 = vst [vmem:[#allocation28_spill] sm:$0xff] %v11864_v12  ;;  %6631 = vmatprep.mubr.bf16.mxu0 %v8359_v59  ;;  %v11870_v38 = vpop.f32.mrf.mxu0  ;;  %v4368_v12 = vld [vmem:[%s12843_s11 + $0x198] sm:$0xff] }
 0x703   : > { %v6424_v49 = vpop.f32.mrf.mxu1 }
 0x704   : > { %v11878_v55 = vadd.f32 %v6424_v49, %v6136_v32  ;;  %v6196_v20 = vpop.f32.mrf.mxu0  ;;  %v4670_v49 = vld [vmem:[%s12844_s12 + $0x108] sm:$0xff] }
 0x705   : > { %6913 = vmatmul.mubr.bf16.gmra.mxu1 %v8352_v28  ;;  %v6426_v59 = vpop.f32.mrf.mxu1  ;;  %v8369_v20 = vcombine.high %v4368_v12, %v4372_v18  ;;  %v6147_v51 = vadd.f32 %v11702_v56, %v4670_v49  ;;  %v4380_v56 = vld [vmem:[%s12843_s11 + $0x1f8] sm:$0xff]  ;;  %v8368_v49 = vcombine.low %v4368_v12, %v4372_v18 }
 0x706   : > { %12914 = vst [vmem:[#allocation29_spill] sm:$0xff] %v11878_v55  ;;  %6920 = vmatprep.mubr.bf16.mxu1 %v8361_v53  ;;  %v11884_v35 = vpop.f32.mrf.mxu0  ;;  %v4375_v55 = vld [vmem:[%s12843_s11 + $0x1d0] sm:$0xff] }
 0x707   : > { %v6427_v32 = vpop.f32.mrf.mxu1 }
 0x708   : > { %v11892_v28 = vadd.f32 %v6427_v32, %v6139_v26  ;;  %v6201_v52 = vpop.f32.mrf.mxu0  ;;  %v4671_v32 = vld [vmem:[%s12844_s12 + $0x110] sm:$0xff] }
 0x709   : > { %6632 = vmatmul.mubr.bf16.gmra.mxu0 %v8358_v54  ;;  %v6429_v53 = vpop.f32.mrf.mxu1  ;;  %v8375_v52 = vcombine.high %v4375_v55, %v4379_v30  ;;  %v6152_v45 = vadd.f32 %v11713_v21, %v4671_v32  ;;  %v4387_v21 = vld [vmem:[%s12843_s11 + $0x230] sm:$0xff]  ;;  %v8374_v32 = vcombine.low %v4375_v55, %v4379_v30 }
 0x70a   : > { %12915 = vst [vmem:[#allocation30_spill] sm:$0xff] %v11892_v28  ;;  %6639 = vmatprep.mubr.bf16.mxu0 %v8367_v27  ;;  %v11898_v59 = vpop.f32.mrf.mxu0  ;;  %v4376_v28 = vld [vmem:[%s12843_s11 + $0x1d8] sm:$0xff] }
 0x70b   : > { %v6432_v26 = vpop.f32.mrf.mxu1 }
 0x70c   : > { %v11906_v54 = vadd.f32 %v6432_v26, %v6144_v22  ;;  %v6204_v29 = vpop.f32.mrf.mxu0  ;;  %v4672_v26 = vld [vmem:[%s12844_s12 + $0x118] sm:$0xff] }
 0x70d   : > { %6921 = vmatmul.mubr.bf16.gmra.mxu1 %v8360_v39  ;;  %v6434_v27 = vpop.f32.mrf.mxu1  ;;  %v8377_v29 = vcombine.high %v4376_v28, %v4380_v56  ;;  %v6155_v12 = vadd.f32 %v11723_v8, %v4672_v26  ;;  %v4388_v8 = vld [vmem:[%s12843_s11 + $0x238] sm:$0xff]  ;;  %v8376_v26 = vcombine.low %v4376_v28, %v4380_v56 }
 0x70e   : > { %12916 = vst [vmem:[#allocation13_spill] sm:$0xff] %v11906_v54  ;;  %6928 = vmatprep.mubr.bf16.mxu1 %v8369_v20  ;;  %v11912_v53 = vpop.f32.mrf.mxu0  ;;  %v4383_v54 = vld [vmem:[%s12843_s11 + $0x210] sm:$0xff] }
 0x70f   : > { %v6435_v22 = vpop.f32.mrf.mxu1 }
 0x710   : > { %v11920_v39 = vadd.f32 %v6435_v22, %v6147_v51  ;;  %v6209_v37 = vpop.f32.mrf.mxu0  ;;  %v4673_v22 = vld [vmem:[%s12844_s12 + $0x120] sm:$0xff] }
 0x711   : > { %6640 = vmatmul.mubr.bf16.gmra.mxu0 %v8366_v61  ;;  %v6437_v20 = vpop.f32.mrf.mxu1  ;;  %v8383_v37 = vcombine.high %v4383_v54, %v4387_v21  ;;  %v6160_v55 = vadd.f32 %v11738_v33, %v4673_v22  ;;  %v4395_v33 = vld [vmem:[%s12843_s11 + $0x270] sm:$0xff]  ;;  %v8382_v22 = vcombine.low %v4383_v54, %v4387_v21 }
 0x712   : > { %12917 = vst [vmem:[#allocation15_spill] sm:$0xff] %v11920_v39  ;;  %6647 = vmatprep.mubr.bf16.mxu0 %v8375_v52  ;;  %v11926_v27 = vpop.f32.mrf.mxu0  ;;  %v4384_v39 = vld [vmem:[%s12843_s11 + $0x218] sm:$0xff] }
 0x713   : > { %v6440_v51 = vpop.f32.mrf.mxu1 }
 0x714   : > { %v11934_v61 = vadd.f32 %v6440_v51, %v6152_v45  ;;  %v6212_v18 = vpop.f32.mrf.mxu0  ;;  %v4674_v51 = vld [vmem:[%s12844_s12 + $0x128] sm:$0xff] }
 0x715   : > { %6929 = vmatmul.mubr.bf16.gmra.mxu1 %v8368_v49  ;;  %v6442_v52 = vpop.f32.mrf.mxu1  ;;  %v8385_v18 = vcombine.high %v4384_v39, %v4388_v8  ;;  %v6163_v28 = vadd.f32 %v11758_v42, %v4674_v51  ;;  %v4396_v42 = vld [vmem:[%s12843_s11 + $0x278] sm:$0xff]  ;;  %v8384_v51 = vcombine.low %v4384_v39, %v4388_v8 }
 0x716   : > { %12918 = vst [vmem:[#allocation14_spill] sm:$0xff] %v11934_v61  ;;  %6936 = vmatprep.mubr.bf16.mxu1 %v8377_v29  ;;  %v11940_v20 = vpop.f32.mrf.mxu0  ;;  %v4391_v61 = vld [vmem:[%s12843_s11 + $0x250] sm:$0xff] }
 0x717   : > { %v6443_v45 = vpop.f32.mrf.mxu1 }
 0x718   : > { %v11948_v49 = vadd.f32 %v6443_v45, %v6155_v12  ;;  %v6217_v30 = vpop.f32.mrf.mxu0  ;;  %v4675_v45 = vld [vmem:[%s12844_s12 + $0x130] sm:$0xff] }
 0x719   : > { %6648 = vmatmul.mubr.bf16.gmra.mxu0 %v8374_v32  ;;  %v6445_v29 = vpop.f32.mrf.mxu1  ;;  %v8391_v30 = vcombine.high %v4391_v61, %v4395_v33  ;;  %v6168_v54 = vadd.f32 %v11772_v17, %v4675_v45  ;;  %v4403_v17 = vld [vmem:[%s12843_s11 + $0x2b0] sm:$0xff]  ;;  %v8390_v45 = vcombine.low %v4391_v61, %v4395_v33 }
 0x71a   : > { %12919 = vst [vmem:[#allocation12_spill] sm:$0xff] %v11948_v49  ;;  %6655 = vmatprep.mubr.bf16.mxu0 %v8383_v37  ;;  %v11954_v52 = vpop.f32.mrf.mxu0  ;;  %v4392_v49 = vld [vmem:[%s12843_s11 + $0x258] sm:$0xff] }
 0x71b   : > { %v6448_v12 = vpop.f32.mrf.mxu1 }
 0x71c   : > { %v11962_v32 = vadd.f32 %v6448_v12, %v6160_v55  ;;  %v6220_v56 = vpop.f32.mrf.mxu0  ;;  %v4676_v12 = vld [vmem:[%s12844_s12 + $0x138] sm:$0xff] }
 0x71d   : > { %6937 = vmatmul.mubr.bf16.gmra.mxu1 %v8376_v26  ;;  %v6450_v37 = vpop.f32.mrf.mxu1  ;;  %v8393_v56 = vcombine.high %v4392_v49, %v4396_v42  ;;  %v6171_v39 = vadd.f32 %v11786_v10, %v4676_v12  ;;  %v4404_v10 = vld [vmem:[%s12843_s11 + $0x2b8] sm:$0xff]  ;;  %v8392_v12 = vcombine.low %v4392_v49, %v4396_v42 }
 0x71e   : > { %12920 = vst [vmem:[#allocation24_spill] sm:$0xff] %v11962_v32  ;;  %6944 = vmatprep.mubr.bf16.mxu1 %v8385_v18  ;;  %v11968_v29 = vpop.f32.mrf.mxu0  ;;  %v4399_v32 = vld [vmem:[%s12843_s11 + $0x290] sm:$0xff] }
 0x71f   : > { %v6451_v55 = vpop.f32.mrf.mxu1 }
 0x720   : > { %v11976_v26 = vadd.f32 %v6451_v55, %v6163_v28  ;;  %v6225_v21 = vpop.f32.mrf.mxu0  ;;  %v4677_v55 = vld [vmem:[%s12844_s12 + $0x140] sm:$0xff] }
 0x721   : > { %6656 = vmatmul.mubr.bf16.gmra.mxu0 %v8382_v22  ;;  %v6453_v18 = vpop.f32.mrf.mxu1  ;;  %v8399_v21 = vcombine.high %v4399_v32, %v4403_v17  ;;  %v6176_v61 = vadd.f32 %v11800_v46, %v4677_v55  ;;  %v4411_v46 = vld [vmem:[%s12843_s11 + $0x2f0] sm:$0xff]  ;;  %v8398_v55 = vcombine.low %v4399_v32, %v4403_v17 }
 0x722   : > { %12921 = vst [vmem:[#allocation26_spill] sm:$0xff] %v11976_v26  ;;  %6663 = vmatprep.mubr.bf16.mxu0 %v8391_v30  ;;  %v11982_v37 = vpop.f32.mrf.mxu0  ;;  %v4400_v26 = vld [vmem:[%s12843_s11 + $0x298] sm:$0xff] }
 0x723   : > { %v6456_v28 = vpop.f32.mrf.mxu1 }
 0x724   : > { %v11990_v22 = vadd.f32 %v6456_v28, %v6168_v54  ;;  %v6228_v8 = vpop.f32.mrf.mxu0  ;;  %v4678_v28 = vld [vmem:[%s12844_s12 + $0x148] sm:$0xff] }
 0x725   : > { %6945 = vmatmul.mubr.bf16.gmra.mxu1 %v8384_v51  ;;  %v6458_v30 = vpop.f32.mrf.mxu1  ;;  %v8401_v8 = vcombine.high %v4400_v26, %v4404_v10  ;;  %v6179_v49 = vadd.f32 %v11814_v24, %v4678_v28  ;;  %v4412_v24 = vld [vmem:[%s12843_s11 + $0x2f8] sm:$0xff]  ;;  %v8400_v28 = vcombine.low %v4400_v26, %v4404_v10 }
 0x726   : > { %12922 = vst [vmem:[#allocation25_spill] sm:$0xff] %v11990_v22  ;;  %6952 = vmatprep.mubr.bf16.mxu1 %v8393_v56  ;;  %v11996_v18 = vpop.f32.mrf.mxu0  ;;  %v4407_v22 = vld [vmem:[%s12843_s11 + $0x2d0] sm:$0xff] }
 0x727   : > { %v6459_v54 = vpop.f32.mrf.mxu1 }
 0x728   : > { %v12004_v51 = vadd.f32 %v6459_v54, %v6171_v39  ;;  %v6233_v33 = vpop.f32.mrf.mxu0  ;;  %v4679_v54 = vld [vmem:[%s12844_s12 + $0x150] sm:$0xff] }
 0x729   : > { %6664 = vmatmul.mubr.bf16.gmra.mxu0 %v8390_v45  ;;  %v6461_v56 = vpop.f32.mrf.mxu1  ;;  %v8407_v33 = vcombine.high %v4407_v22, %v4411_v46  ;;  %v6184_v32 = vadd.f32 %v11828_v60, %v4679_v54  ;;  %v4419_v60 = vld [vmem:[%s12843_s11 + $0x330] sm:$0xff]  ;;  %v8406_v54 = vcombine.low %v4407_v22, %v4411_v46 }
 0x72a   : > { %12923 = vst [vmem:[#allocation27_spill] sm:$0xff] %v12004_v51  ;;  %6671 = vmatprep.mubr.bf16.mxu0 %v8399_v21  ;;  %v12010_v30 = vpop.f32.mrf.mxu0  ;;  %v4408_v51 = vld [vmem:[%s12843_s11 + $0x2d8] sm:$0xff] }
 0x72b   : > { %v6464_v39 = vpop.f32.mrf.mxu1 }
 0x72c   : > { %v12018_v45 = vadd.f32 %v6464_v39, %v6176_v61  ;;  %v6236_v42 = vpop.f32.mrf.mxu0  ;;  %v4680_v39 = vld [vmem:[%s12844_s12 + $0x158] sm:$0xff] }
 0x72d   : > { %6953 = vmatmul.mubr.bf16.gmra.mxu1 %v8392_v12  ;;  %v6466_v21 = vpop.f32.mrf.mxu1  ;;  %v8409_v42 = vcombine.high %v4408_v51, %v4412_v24  ;;  %v6187_v26 = vadd.f32 %v11842_v6, %v4680_v39  ;;  %v4420_v6 = vld [vmem:[%s12843_s11 + $0x338] sm:$0xff]  ;;  %v8408_v39 = vcombine.low %v4408_v51, %v4412_v24 }
 0x72e   : > { %12924 = vst [vmem:[#allocation20_spill] sm:$0xff] %v12018_v45  ;;  %6960 = vmatprep.mubr.bf16.mxu1 %v8401_v8  ;;  %v12024_v56 = vpop.f32.mrf.mxu0  ;;  %v4415_v45 = vld [vmem:[%s12843_s11 + $0x310] sm:$0xff] }
 0x72f   : > { %v6467_v61 = vpop.f32.mrf.mxu1 }
 0x730   : > { %v12032_v12 = vadd.f32 %v6467_v61, %v6179_v49  ;;  %v6241_v17 = vpop.f32.mrf.mxu0  ;;  %v4681_v61 = vld [vmem:[%s12844_s12 + $0x160] sm:$0xff] }
 0x731   : > { %6672 = vmatmul.mubr.bf16.gmra.mxu0 %v8398_v55  ;;  %v6469_v8 = vpop.f32.mrf.mxu1  ;;  %v8415_v17 = vcombine.high %v4415_v45, %v4419_v60  ;;  %v6192_v22 = vadd.f32 %v11856_v62, %v4681_v61  ;;  %v4427_v62 = vld [vmem:[%s12843_s11 + $0x370] sm:$0xff]  ;;  %v8414_v61 = vcombine.low %v4415_v45, %v4419_v60 }
 0x732   : > { %12925 = vst [vmem:[#allocation22_spill] sm:$0xff] %v12032_v12  ;;  %6679 = vmatprep.mubr.bf16.mxu0 %v8407_v33  ;;  %v12038_v21 = vpop.f32.mrf.mxu0  ;;  %v4416_v12 = vld [vmem:[%s12843_s11 + $0x318] sm:$0xff] }
 0x733   : > { %v6472_v49 = vpop.f32.mrf.mxu1 }
 0x734   : > { %v12046_v55 = vadd.f32 %v6472_v49, %v6184_v32  ;;  %v6244_v10 = vpop.f32.mrf.mxu0  ;;  %v4682_v49 = vld [vmem:[%s12844_s12 + $0x168] sm:$0xff] }
 0x735   : > { %6961 = vmatmul.mubr.bf16.gmra.mxu1 %v8400_v28  ;;  %v6474_v33 = vpop.f32.mrf.mxu1  ;;  %v8417_v10 = vcombine.high %v4416_v12, %v4420_v6  ;;  %v6195_v51 = vadd.f32 %v11870_v38, %v4682_v49  ;;  %v4428_v38 = vld [vmem:[%s12843_s11 + $0x378] sm:$0xff]  ;;  %v8416_v49 = vcombine.low %v4416_v12, %v4420_v6 }
 0x736   : > { %12926 = vst [vmem:[#allocation21_spill] sm:$0xff] %v12046_v55  ;;  %6968 = vmatprep.mubr.bf16.mxu1 %v8409_v42  ;;  %v12052_v8 = vpop.f32.mrf.mxu0  ;;  %v4423_v55 = vld [vmem:[%s12843_s11 + $0x350] sm:$0xff] }
 0x737   : > { %v6475_v32 = vpop.f32.mrf.mxu1 }
 0x738   : > { %v12060_v28 = vadd.f32 %v6475_v32, %v6187_v26  ;;  %v6249_v46 = vpop.f32.mrf.mxu0  ;;  %v4683_v32 = vld [vmem:[%s12844_s12 + $0x170] sm:$0xff] }
 0x739   : > { %6680 = vmatmul.mubr.bf16.gmra.mxu0 %v8406_v54  ;;  %v6477_v42 = vpop.f32.mrf.mxu1  ;;  %v8423_v46 = vcombine.high %v4423_v55, %v4427_v62  ;;  %v6200_v45 = vadd.f32 %v11884_v35, %v4683_v32  ;;  %v4435_v35 = vld [vmem:[%s12843_s11 + $0x3b0] sm:$0xff]  ;;  %v8422_v32 = vcombine.low %v4423_v55, %v4427_v62 }
 0x73a   : > { %12927 = vst [vmem:[#allocation23_spill] sm:$0xff] %v12060_v28  ;;  %6687 = vmatprep.mubr.bf16.mxu0 %v8415_v17  ;;  %v12066_v33 = vpop.f32.mrf.mxu0  ;;  %v4424_v28 = vld [vmem:[%s12843_s11 + $0x358] sm:$0xff] }
 0x73b   : > { %v6480_v26 = vpop.f32.mrf.mxu1 }
 0x73c   : > { %v12074_v54 = vadd.f32 %v6480_v26, %v6192_v22  ;;  %v6252_v24 = vpop.f32.mrf.mxu0  ;;  %v4684_v26 = vld [vmem:[%s12844_s12 + $0x178] sm:$0xff] }
 0x73d   : > { %6969 = vmatmul.mubr.bf16.gmra.mxu1 %v8408_v39  ;;  %v6482_v17 = vpop.f32.mrf.mxu1  ;;  %v8425_v24 = vcombine.high %v4424_v28, %v4428_v38  ;;  %v6203_v12 = vadd.f32 %v11898_v59, %v4684_v26  ;;  %v4436_v59 = vld [vmem:[%s12843_s11 + $0x3b8] sm:$0xff]  ;;  %v8424_v26 = vcombine.low %v4424_v28, %v4428_v38 }
 0x73e   : > { %12928 = vst [vmem:[#allocation16_spill] sm:$0xff] %v12074_v54  ;;  %6976 = vmatprep.mubr.bf16.mxu1 %v8417_v10  ;;  %v12080_v42 = vpop.f32.mrf.mxu0  ;;  %v4431_v54 = vld [vmem:[%s12843_s11 + $0x390] sm:$0xff] }
 0x73f   : > { %v6483_v22 = vpop.f32.mrf.mxu1 }
 0x740   : > { %v12088_v39 = vadd.f32 %v6483_v22, %v6195_v51  ;;  %v6257_v60 = vpop.f32.mrf.mxu0  ;;  %v4685_v22 = vld [vmem:[%s12844_s12 + $0x180] sm:$0xff] }
 0x741   : > { %6688 = vmatmul.mubr.bf16.gmra.mxu0 %v8414_v61  ;;  %v6485_v10 = vpop.f32.mrf.mxu1  ;;  %v8431_v60 = vcombine.high %v4431_v54, %v4435_v35  ;;  %v6208_v55 = vadd.f32 %v11912_v53, %v4685_v22  ;;  %v4443_v53 = vld [vmem:[%s12843_s11 + $0x3f0] sm:$0xff]  ;;  %v8430_v22 = vcombine.low %v4431_v54, %v4435_v35 }
 0x742   : > { %12929 = vst [vmem:[#allocation18_spill] sm:$0xff] %v12088_v39  ;;  %6695 = vmatprep.mubr.bf16.mxu0 %v8423_v46  ;;  %v12094_v17 = vpop.f32.mrf.mxu0  ;;  %v4432_v39 = vld [vmem:[%s12843_s11 + $0x398] sm:$0xff] }
 0x743   : > { %v6488_v51 = vpop.f32.mrf.mxu1  ;;  %v8432_v35 = vcombine.low %v4432_v39, %v4436_v59 }
 0x744   : > { %v12102_v61 = vadd.f32 %v6488_v51, %v6200_v45  ;;  %v6260_v6 = vpop.f32.mrf.mxu0  ;;  %v4686_v51 = vld [vmem:[%s12844_s12 + $0x188] sm:$0xff] }
 0x745   : > { %6977 = vmatmul.mubr.bf16.gmra.mxu1 %v8416_v49  ;;  %v6490_v46 = vpop.f32.mrf.mxu1  ;;  %v8433_v6 = vcombine.high %v4432_v39, %v4436_v59  ;;  %v6211_v28 = vadd.f32 %v11926_v27, %v4686_v51  ;;  %v4688_v51 = vld [vmem:[%s12844_s12 + $0x198] sm:$0xff] }
 0x746   : > { %12930 = vst [vmem:[#allocation17_spill] sm:$0xff] %v12102_v61  ;;  %6984 = vmatprep.mubr.bf16.mxu1 %v8425_v24  ;;  %v12108_v10 = vpop.f32.mrf.mxu0  ;;  %v4439_v61 = vld [vmem:[%s12843_s11 + $0x3d0] sm:$0xff] }
 0x747   : > { %v6491_v45 = vpop.f32.mrf.mxu1  ;;  %v8438_v39 = vcombine.low %v4439_v61, %v4443_v53 }
 0x748   : > { %v12116_v49 = vadd.f32 %v6491_v45, %v6203_v12  ;;  %v6265_v62 = vpop.f32.mrf.mxu0  ;;  %v4687_v45 = vld [vmem:[%s12844_s12 + $0x190] sm:$0xff] }
 0x749   : > { %6696 = vmatmul.mubr.bf16.gmra.mxu0 %v8422_v32  ;;  %v6493_v24 = vpop.f32.mrf.mxu1  ;;  %v8439_v62 = vcombine.high %v4439_v61, %v4443_v53  ;;  %v6216_v54 = vadd.f32 %v11940_v20, %v4687_v45  ;;  %v6219_v20 = vadd.f32 %v11954_v52, %v4688_v51 }
 0x74a   : > { %6703 = vmatprep.mubr.bf16.mxu0 %v8431_v60  ;;  %v12122_v46 = vpop.f32.mrf.mxu0  ;;  %v4440_v24 = vld [vmem:[%s12843_s11 + $0x3d8] sm:$0xff] }
 0x74b   : > { %v6496_v12 = vpop.f32.mrf.mxu1 }
 0x74c   : > { %v12130_v32 = vadd.f32 %v6496_v12, %v6208_v55  ;;  %v6268_v38 = vpop.f32.mrf.mxu0  ;;  %v4444_v55 = vld [vmem:[%s12843_s11 + $0x3f8] sm:$0xff] }
 0x74d   : > { %6985 = vmatmul.mubr.bf16.gmra.mxu1 %v8424_v26  ;;  %v6498_v60 = vpop.f32.mrf.mxu1  ;;  %v4447_v38 = vld [vmem:[%s12843_s11 + $0x410] sm:$0xff]  ;;  %v8440_v61 = vcombine.low %v4440_v24, %v4444_v55 }
 0x74e   : > { %6992 = vmatprep.mubr.bf16.mxu1 %v8433_v6  ;;  %v8441_v6 = vcombine.high %v4440_v24, %v4444_v55 }
 0x74f   : > { %v6499_v12 = vpop.f32.mrf.mxu1 }
 0x750   : > { %v12142_v27 = vadd.f32 %v6499_v12, %v6211_v28  ;;  %v4451_v28 = vld [vmem:[%s12843_s11 + $0x430] sm:$0xff] }
 0x751   : > { %6704 = vmatmul.mubr.bf16.gmra.mxu0 %v8430_v22  ;;  %v6501_v26 = vpop.f32.mrf.mxu1  ;;  %v4689_v22 = vld [vmem:[%s12844_s12 + $0x1a0] sm:$0xff]  ;;  %v8447_v45 = vcombine.high %v4447_v38, %v4451_v28  ;;  %v8446_v24 = vcombine.low %v4447_v38, %v4451_v28 }
 0x752   : > { %6711 = vmatprep.mubr.bf16.mxu0 %v8439_v62  ;;  %v4448_v62 = vld [vmem:[%s12843_s11 + $0x418] sm:$0xff]  ;;  %v6224_v52 = vadd.f32 %v11968_v29, %v4689_v22 }
 0x753   : > { %v6504_v60 = vpop.f32.mrf.mxu1 }
 0x754   : > { %v12154_v12 = vadd.f32 %v6504_v60, %v6216_v54  ;;  %v4452_v54 = vld [vmem:[%s12843_s11 + $0x438] sm:$0xff] }
 0x755   : > { %6993 = vmatmul.mubr.bf16.gmra.mxu1 %v8432_v35  ;;  %v6506_v59 = vpop.f32.mrf.mxu1  ;;  %v4690_v35 = vld [vmem:[%s12844_s12 + $0x1a8] sm:$0xff]  ;;  %v8449_v51 = vcombine.high %v4448_v62, %v4452_v54  ;;  %v8448_v38 = vcombine.low %v4448_v62, %v4452_v54 }
 0x756   : > { %7000 = vmatprep.mubr.bf16.mxu1 %v8441_v6  ;;  %v4455_v6 = vld [vmem:[%s12843_s11 + $0x450] sm:$0xff]  ;;  %v6227_v29 = vadd.f32 %v11982_v37, %v4690_v35 }
 0x757   : > { %v6507_v26 = vpop.f32.mrf.mxu1 }
 0x758   : > { %v12166_v60 = vadd.f32 %v6507_v26, %v6219_v20  ;;  %v4459_v20 = vld [vmem:[%s12843_s11 + $0x470] sm:$0xff] }
 0x759   : > { %6712 = vmatmul.mubr.bf16.gmra.mxu0 %v8438_v39  ;;  %v6509_v53 = vpop.f32.mrf.mxu1  ;;  %v4691_v39 = vld [vmem:[%s12844_s12 + $0x1b0] sm:$0xff]  ;;  %v8455_v22 = vcombine.high %v4455_v6, %v4459_v20  ;;  %v8454_v62 = vcombine.low %v4455_v6, %v4459_v20 }
 0x75a   : > { %6719 = vmatprep.mubr.bf16.mxu0 %v8447_v45  ;;  %v4456_v45 = vld [vmem:[%s12843_s11 + $0x458] sm:$0xff]  ;;  %v6232_v37 = vadd.f32 %v11996_v18, %v4691_v39 }
 0x75b   : > { %v6512_v59 = vpop.f32.mrf.mxu1 }
 0x75c   : > { %v12178_v26 = vadd.f32 %v6512_v59, %v6224_v52  ;;  %v4460_v52 = vld [vmem:[%s12843_s11 + $0x478] sm:$0xff] }
 0x75d   : > { %7001 = vmatmul.mubr.bf16.gmra.mxu1 %v8440_v61  ;;  %v6514_v55 = vpop.f32.mrf.mxu1  ;;  %v4692_v61 = vld [vmem:[%s12844_s12 + $0x1b8] sm:$0xff]  ;;  %v8457_v35 = vcombine.high %v4456_v45, %v4460_v52  ;;  %v8456_v6 = vcombine.low %v4456_v45, %v4460_v52 }
 0x75e   : > { %7008 = vmatprep.mubr.bf16.mxu1 %v8449_v51  ;;  %v4463_v51 = vld [vmem:[%s12843_s11 + $0x490] sm:$0xff]  ;;  %v6235_v18 = vadd.f32 %v12010_v30, %v4692_v61 }
 0x75f   : > { %v6515_v53 = vpop.f32.mrf.mxu1 }
 0x760   : > { %v12190_v59 = vadd.f32 %v6515_v53, %v6227_v29  ;;  %v4467_v29 = vld [vmem:[%s12843_s11 + $0x4b0] sm:$0xff] }
 0x761   : > { %6720 = vmatmul.mubr.bf16.gmra.mxu0 %v8446_v24  ;;  %v6517_v28 = vpop.f32.mrf.mxu1  ;;  %v4693_v24 = vld [vmem:[%s12844_s12 + $0x1c0] sm:$0xff]  ;;  %v8463_v39 = vcombine.high %v4463_v51, %v4467_v29  ;;  %v8462_v45 = vcombine.low %v4463_v51, %v4467_v29 }
 0x762   : > { %6727 = vmatprep.mubr.bf16.mxu0 %v8455_v22  ;;  %v4464_v22 = vld [vmem:[%s12843_s11 + $0x498] sm:$0xff]  ;;  %v6240_v30 = vadd.f32 %v12024_v56, %v4693_v24  ;;  %v4695_v24 = vld [vmem:[%s12844_s12 + $0x1d0] sm:$0xff] }
 0x763   : > { %v6520_v55 = vpop.f32.mrf.mxu1  ;;  %v6248_v51 = vadd.f32 %v12052_v8, %v4695_v24  ;;  %v4697_v24 = vld [vmem:[%s12844_s12 + $0x1e0] sm:$0xff] }
 0x764   : > { %v12202_v53 = vadd.f32 %v6520_v55, %v6232_v37  ;;  %v4468_v37 = vld [vmem:[%s12843_s11 + $0x4b8] sm:$0xff] }
 0x765   : > { %7009 = vmatmul.mubr.bf16.gmra.mxu1 %v8448_v38  ;;  %v6522_v54 = vpop.f32.mrf.mxu1  ;;  %v4694_v38 = vld [vmem:[%s12844_s12 + $0x1c8] sm:$0xff]  ;;  %v8465_v61 = vcombine.high %v4464_v22, %v4468_v37 }
 0x766   : > { %7016 = vmatprep.mubr.bf16.mxu1 %v8457_v35  ;;  %v4471_v35 = vld [vmem:[%s12843_s11 + $0x4d0] sm:$0xff]  ;;  %v6243_v56 = vadd.f32 %v12038_v21, %v4694_v38  ;;  %v8464_v21 = vcombine.low %v4464_v22, %v4468_v37  ;;  %v4696_v38 = vld [vmem:[%s12844_s12 + $0x1d8] sm:$0xff] }
 0x767   : > { %v6523_v28 = vpop.f32.mrf.mxu1  ;;  %v6251_v8 = vadd.f32 %v12066_v33, %v4696_v38  ;;  %v6256_v33 = vadd.f32 %v12080_v42, %v4697_v24  ;;  %v4698_v38 = vld [vmem:[%s12844_s12 + $0x1e8] sm:$0xff]  ;;  %v4699_v24 = vld [vmem:[%s12844_s12 + $0x1f0] sm:$0xff] }
 0x768   : > { %v12214_v55 = vadd.f32 %v6523_v28, %v6235_v18  ;;  %v4475_v18 = vld [vmem:[%s12843_s11 + $0x4f0] sm:$0xff]  ;;  %v6259_v42 = vadd.f32 %v12094_v17, %v4698_v38  ;;  %v6264_v17 = vadd.f32 %v12108_v10, %v4699_v24  ;;  %v4700_v38 = vld [vmem:[%s12844_s12 + $0x1f8] sm:$0xff] }
 0x769   : > { %6728 = vmatmul.mubr.bf16.gmra.mxu0 %v8454_v62  ;;  %v6525_v20 = vpop.f32.mrf.mxu1  ;;  %v8471_v62 = vcombine.high %v4471_v35, %v4475_v18  ;;  %v8470_v22 = vcombine.low %v4471_v35, %v4475_v18  ;;  %v6267_v10 = vadd.f32 %v12122_v46, %v4700_v38  ;;  %v4496_v24 = vld [vmem:[%s12843_s11 + $0x598] sm:$0xff]  ;;  %v4503_v46 = vld [vmem:[%s12843_s11 + $0x5d0] sm:$0xff] }
 0x76a   : > { %6735 = vmatprep.mubr.bf16.mxu0 %v8463_v39  ;;  %v4472_v39 = vld [vmem:[%s12843_s11 + $0x4d8] sm:$0xff] }
 0x76b   : > { %v6528_v54 = vpop.f32.mrf.mxu1 }
 0x76c   : > { %v12226_v28 = vadd.f32 %v6528_v54, %v6240_v30  ;;  %v4476_v30 = vld [vmem:[%s12843_s11 + $0x4f8] sm:$0xff] }
 0x76d   : > { %7017 = vmatmul.mubr.bf16.gmra.mxu1 %v8456_v6  ;;  %v6530_v52 = vpop.f32.mrf.mxu1  ;;  %v8473_v6 = vcombine.high %v4472_v39, %v4476_v30  ;;  %v8472_v18 = vcombine.low %v4472_v39, %v4476_v30 }
 0x76e   : > { %7024 = vmatprep.mubr.bf16.mxu1 %v8465_v61  ;;  %v4479_v61 = vld [vmem:[%s12843_s11 + $0x510] sm:$0xff] }
 0x76f   : > { %v6531_v20 = vpop.f32.mrf.mxu1 }
 0x770   : > { %v12238_v54 = vadd.f32 %v6531_v20, %v6243_v56  ;;  %v4483_v56 = vld [vmem:[%s12843_s11 + $0x530] sm:$0xff]  ;;  %v4480_v20 = vld [vmem:[%s12843_s11 + $0x518] sm:$0xff] }
 0x771   : > { %6736 = vmatmul.mubr.bf16.gmra.mxu0 %v8462_v45  ;;  %v6533_v29 = vpop.f32.mrf.mxu1  ;;  %v8479_v45 = vcombine.high %v4479_v61, %v4483_v56  ;;  %v8478_v30 = vcombine.low %v4479_v61, %v4483_v56 }
 0x772   : > { %6743 = vmatprep.mubr.bf16.mxu0 %v8471_v62 }
 0x774   : > { %v6536_v52 = vpop.f32.mrf.mxu1 }
 0x775   : > { %7025 = vmatmul.mubr.bf16.gmra.mxu1 %v8464_v21  ;;  %v12250_v37 = vadd.f32 %v6536_v52, %v6248_v51  ;;  %v4484_v21 = vld [vmem:[%s12843_s11 + $0x538] sm:$0xff]  ;;  %v4487_v52 = vld [vmem:[%s12843_s11 + $0x550] sm:$0xff] }
 0x776   : > { %7032 = vmatprep.mubr.bf16.mxu1 %v8473_v6  ;;  %v6538_v62 = vpop.f32.mrf.mxu1  ;;  %v8481_v29 = vcombine.high %v4480_v20, %v4484_v21  ;;  %v8480_v56 = vcombine.low %v4480_v20, %v4484_v21 }
 0x778   : > { %v6539_v35 = vpop.f32.mrf.mxu1 }
 0x779   : > { %6744 = vmatmul.mubr.bf16.gmra.mxu0 %v8470_v22  ;;  %v12262_v51 = vadd.f32 %v6539_v35, %v6251_v8  ;;  %v4491_v22 = vld [vmem:[%s12843_s11 + $0x570] sm:$0xff]  ;;  %v4488_v35 = vld [vmem:[%s12843_s11 + $0x558] sm:$0xff] }
 0x77a   : > { %6751 = vmatprep.mubr.bf16.mxu0 %v8479_v45  ;;  %v6541_v6 = vpop.f32.mrf.mxu1  ;;  %v8487_v45 = vcombine.high %v4487_v52, %v4491_v22  ;;  %v8486_v21 = vcombine.low %v4487_v52, %v4491_v22 }
 0x77c   : > { %v6544_v39 = vpop.f32.mrf.mxu1 }
 0x77d   : > { %7033 = vmatmul.mubr.bf16.gmra.mxu1 %v8472_v18  ;;  %v12274_v8 = vadd.f32 %v6544_v39, %v6256_v33  ;;  %v4492_v18 = vld [vmem:[%s12843_s11 + $0x578] sm:$0xff]  ;;  %v4495_v39 = vld [vmem:[%s12843_s11 + $0x590] sm:$0xff] }
 0x77e   : > { %7040 = vmatprep.mubr.bf16.mxu1 %v8481_v29  ;;  %v6546_v62 = vpop.f32.mrf.mxu1  ;;  %v8489_v29 = vcombine.high %v4488_v35, %v4492_v18 }
 0x780   : > { %v6547_v61 = vpop.f32.mrf.mxu1 }
 0x781   : > { %6752 = vmatmul.mubr.bf16.gmra.mxu0 %v8478_v30  ;;  %v12286_v33 = vadd.f32 %v6547_v61, %v6259_v42  ;;  %v4499_v30 = vld [vmem:[%s12843_s11 + $0x5b0] sm:$0xff]  ;;  %v4500_v61 = vld [vmem:[%s12843_s11 + $0x5b8] sm:$0xff] }
 0x782   : > { %6759 = vmatprep.mubr.bf16.mxu0 %v8487_v45  ;;  %v6549_v6 = vpop.f32.mrf.mxu1  ;;  %v8495_v45 = vcombine.high %v4495_v39, %v4499_v30  ;;  %v8497_v52 = vcombine.high %v4496_v24, %v4500_v61 }
 0x783   : > { %12931 = vst [vmem:[#allocation19_spill] sm:$0xff] %v12286_v33  ;;  %v8488_v33 = vcombine.low %v4488_v35, %v4492_v18  ;;  %v4504_v35 = vld [vmem:[%s12843_s11 + $0x5d8] sm:$0xff] }
 0x784   : > { %v6552_v20 = vpop.f32.mrf.mxu1  ;;  %v4508_v18 = vld [vmem:[%s12843_s11 + $0x5f8] sm:$0xff] }
 0x785   : > { %7041 = vmatmul.mubr.bf16.gmra.mxu1 %v8480_v56  ;;  %v12298_v42 = vadd.f32 %v6552_v20, %v6264_v17  ;;  %v4507_v17 = vld [vmem:[%s12843_s11 + $0x5f0] sm:$0xff]  ;;  %v8496_v20 = vcombine.low %v4496_v24, %v4500_v61  ;;  %v8504_v24 = vcombine.low %v4504_v35, %v4508_v18 }
 0x786   : > { %7048 = vmatprep.mubr.bf16.mxu1 %v8489_v29  ;;  %v6554_v62 = vpop.f32.mrf.mxu1  ;;  %v8494_v29 = vcombine.low %v4495_v39, %v4499_v30  ;;  %v8503_v38 = vcombine.high %v4503_v46, %v4507_v17  ;;  %v8502_v39 = vcombine.low %v4503_v46, %v4507_v17  ;;  %v4520_v17 = vld [vmem:[%s12843_s11 + $0x658] sm:$0xff] }
 0x787   : > { %12932 = vst [vmem:[#allocation31_spill] sm:$0xff] %v12298_v42  ;;  %v4516_v62 = vld [vmem:[%s12843_s11 + $0x638] sm:$0xff] }
 0x788   : > { %v6555_v6 = vpop.f32.mrf.mxu1 }
 0x789   : > { %6760 = vmatmul.mubr.bf16.gmra.mxu0 %v8486_v21  ;;  %v12307_v56 = vadd.f32 %v6555_v6, %v6267_v10  ;;  %v8505_v21 = vcombine.high %v4504_v35, %v4508_v18  ;;  %v4511_v10 = vld [vmem:[%s12843_s11 + $0x610] sm:$0xff] }
 0x78a   : > { %6767 = vmatprep.mubr.bf16.mxu0 %v8495_v45  ;;  %v6557_v22 = vpop.f32.mrf.mxu1  ;;  %v4512_v45 = vld [vmem:[%s12843_s11 + $0x618] sm:$0xff]  ;;  %v4519_v6 = vld [vmem:[%s12843_s11 + $0x650] sm:$0xff] }
 0x78b   : > { %12933 = vst [vmem:[#allocation32_spill] sm:$0xff] %v12307_v56  ;;  %v8513_v61 = vcombine.high %v4512_v45, %v4516_v62  ;;  %v8512_v35 = vcombine.low %v4512_v45, %v4516_v62 }
 0x78d   : > { %7049 = vmatmul.mubr.bf16.gmra.mxu1 %v8488_v33  ;;  %v4515_v33 = vld [vmem:[%s12843_s11 + $0x630] sm:$0xff] }
 0x78e   : > { %7056 = vmatprep.mubr.bf16.mxu1 %v8497_v52  ;;  %v8511_v30 = vcombine.high %v4511_v10, %v4515_v33  ;;  %v4523_v52 = vld [vmem:[%s12843_s11 + $0x670] sm:$0xff]  ;;  %v8510_v22 = vcombine.low %v4511_v10, %v4515_v33 }
 0x78f   : > { %v8519_v46 = vcombine.high %v4519_v6, %v4523_v52  ;;  %v4527_v10 = vld [vmem:[%s12843_s11 + $0x690] sm:$0xff] }
 0x790   : > { %v4531_v33 = vld [vmem:[%s12843_s11 + $0x6b0] sm:$0xff] }
 0x791   : > { %6768 = vmatmul.mubr.bf16.gmra.mxu0 %v8494_v29  ;;  %v4524_v29 = vld [vmem:[%s12843_s11 + $0x678] sm:$0xff] }
 0x792   : > { %6775 = vmatprep.mubr.bf16.mxu0 %v8503_v38 }
 0x795   : > { %7057 = vmatmul.mubr.bf16.gmra.mxu1 %v8496_v20  ;;  %v8521_v20 = vcombine.high %v4520_v17, %v4524_v29 }
 0x796   : > { %7064 = vmatprep.mubr.bf16.mxu1 %v8505_v21 }
 0x799   : > { %6776 = vmatmul.mubr.bf16.gmra.mxu0 %v8502_v39 }
 0x79a   : > { %6783 = vmatprep.mubr.bf16.mxu0 %v8511_v30 }
 0x79d   : > { %7065 = vmatmul.mubr.bf16.gmra.mxu1 %v8504_v24  ;;  %v8518_v24 = vcombine.low %v4519_v6, %v4523_v52 }
 0x79e   : > { %7072 = vmatprep.mubr.bf16.mxu1 %v8513_v61 }
 0x7a1   : > { %v6593_v38 = vpop.f32.mrf.mxu0  ;;  %6784 = vmatmul.mubr.bf16.gmra.mxu0 %v8510_v22 }
 0x7a2   : > { %v6594_v18 = vadd.f32 %v6593_v38, %v11430_v16  ;;  %6791 = vmatprep.mubr.bf16.mxu0 %v8519_v46  ;;  %v8527_v16 = vcombine.high %v4527_v10, %v4531_v33  ;;  %v4528_v46 = vld [vmem:[%s12843_s11 + $0x698] sm:$0xff] }
 0x7a3   : > { %v6595_v21 = vpop.f32.mrf.mxu0  ;;  %v4532_v38 = vld [vmem:[%s12843_s11 + $0x6b8] sm:$0xff] }
 0x7a4   : > { %v8529_v52 = vcombine.high %v4528_v46, %v4532_v38 }
 0x7a5   : > { %v6596_v39 = vpop.f32.mrf.mxu0  ;;  %v6882_v30 = vpop.f32.mrf.mxu1  ;;  %7073 = vmatmul.mubr.bf16.gmra.mxu1 %v8512_v35  ;;  %v8520_v35 = vcombine.low %v4520_v17, %v4524_v29  ;;  %v8526_v17 = vcombine.low %v4527_v10, %v4531_v33  ;;  %v8528_v33 = vcombine.low %v4528_v46, %v4532_v38 }
 0x7a6   : > { %v6597_v61 = vadd.f32 %v6596_v39, %v11451_v5  ;;  %v6883_v45 = vadd.f32 %v6882_v30, %v6594_v18  ;;  %7080 = vmatprep.mubr.bf16.mxu1 %v8521_v20  ;;  %v4535_v39 = vld [vmem:[%s12843_s11 + $0x6d0] sm:$0xff] }
 0x7a7   : > { %v6598_v62 = vpop.f32.mrf.mxu0  ;;  %v6884_v22 = vpop.f32.mrf.mxu1  ;;  %v4539_v30 = vld [vmem:[%s12843_s11 + $0x6f0] sm:$0xff] }
 0x7a8   : > { %v7137_v62 = vmax.f32 %v6883_v45, 0.0  ;;  %v4540_v45 = vld [vmem:[%s12843_s11 + $0x6f8] sm:$0xff]  ;;  %v8534_v46 = vcombine.low %v4535_v39, %v4539_v30 }
 0x7a9   : > { %v6601_v21 = vpop.f32.mrf.mxu0  ;;  %6792 = vmatmul.mubr.bf16.gmra.mxu0 %v8518_v24  ;;  %v6885_v56 = vpop.f32.mrf.mxu1 }
 0x7aa   : > { %v6602_v6 = vadd.f32 %v6601_v21, %v11466_v41  ;;  %v6886_v5 = vadd.f32 %v6885_v56, %v6597_v61  ;;  %6799 = vmatprep.mubr.bf16.mxu0 %v8527_v16  ;;  %v8535_v61 = vcombine.high %v4535_v39, %v4539_v30 }
 0x7ab   : > { %v6603_v18 = vpop.f32.mrf.mxu0  ;;  %v6887_v20 = vpop.f32.mrf.mxu1 }
 0x7ac   : > { %v7138_v22 = vmax.f32 %v6886_v5, 0.0  ;;  %v4536_v18 = vld [vmem:[%s12843_s11 + $0x6d8] sm:$0xff]  ;;  %v4543_v20 = vld [vmem:[%s12843_s11 + $0x710] sm:$0xff] }
 0x7ad   : > { %v6604_v24 = vpop.f32.mrf.mxu0  ;;  %v6890_v42 = vpop.f32.mrf.mxu1  ;;  %7081 = vmatmul.mubr.bf16.gmra.mxu1 %v8520_v35  ;;  %v8536_v30 = vcombine.low %v4536_v18, %v4540_v45 }
 0x7ae   : > { %v12366_v41 = vpack.c.bf16 %v7138_v22, %v7137_v62  ;;  %v6605_v56 = vadd.f32 %v6604_v24, %v11487_v44  ;;  %v6891_v29 = vadd.f32 %v6890_v42, %v6602_v6  ;;  %7088 = vmatprep.mubr.bf16.mxu1 %v8529_v52  ;;  %v8537_v42 = vcombine.high %v4536_v18, %v4540_v45  ;;  %v4547_v62 = vld [vmem:[%s12843_s11 + $0x730] sm:$0xff] }
 0x7af   : > { %v6606_v16 = vpop.f32.mrf.mxu0  ;;  %v6892_v21 = vpop.f32.mrf.mxu1  ;;  %v8542_v18 = vcombine.low %v4543_v20, %v4547_v62 }
 0x7b0   : > { %v7139_v22 = vmax.f32 %v6891_v29, 0.0  ;;  %v4548_v29 = vld [vmem:[%s12843_s11 + $0x738] sm:$0xff] }
 0x7b1   : > { %v6609_v5 = vpop.f32.mrf.mxu0  ;;  %6800 = vmatmul.mubr.bf16.gmra.mxu0 %v8526_v17  ;;  %v6893_v10 = vpop.f32.mrf.mxu1 }
 0x7b2   : > { %v6610_v35 = vadd.f32 %v6609_v5, %v11502_v31  ;;  %v6894_v44 = vadd.f32 %v6893_v10, %v6605_v56  ;;  %6807 = vmatprep.mubr.bf16.mxu0 %v8535_v61  ;;  %v8543_v61 = vcombine.high %v4543_v20, %v4547_v62  ;;  %v4544_v10 = vld [vmem:[%s12843_s11 + $0x718] sm:$0xff] }
 0x7b3   : > { %v6611_v6 = vpop.f32.mrf.mxu0  ;;  %v6895_v52 = vpop.f32.mrf.mxu1  ;;  %v8544_v62 = vcombine.low %v4544_v10, %v4548_v29 }
 0x7b4   : > { %v7140_v24 = vmax.f32 %v6894_v44, 0.0  ;;  %v4551_v52 = vld [vmem:[%s12843_s11 + $0x750] sm:$0xff] }
 0x7b5   : > { %v6612_v17 = vpop.f32.mrf.mxu0  ;;  %v6898_v16 = vpop.f32.mrf.mxu1  ;;  %7089 = vmatmul.mubr.bf16.gmra.mxu1 %v8528_v33 }
 0x7b6   : > { %v12382_v31 = vpack.c.bf16 %v7140_v24, %v7139_v22  ;;  %v6613_v38 = vadd.f32 %v6612_v17, %v11523_v1  ;;  %v6899_v56 = vadd.f32 %v6898_v16, %v6610_v35  ;;  %7096 = vmatprep.mubr.bf16.mxu1 %v8537_v42  ;;  %v8545_v35 = vcombine.high %v4544_v10, %v4548_v29  ;;  %v4555_v22 = vld [vmem:[%s12843_s11 + $0x770] sm:$0xff] }
 0x7b7   : > { %v6614_v21 = vpop.f32.mrf.mxu0  ;;  %v6900_v5 = vpop.f32.mrf.mxu1  ;;  %v8550_v10 = vcombine.low %v4551_v52, %v4555_v22 }
 0x7b8   : > { %v7141_v24 = vmax.f32 %v6899_v56, 0.0  ;;  %v4556_v56 = vld [vmem:[%s12843_s11 + $0x778] sm:$0xff] }
 0x7b9   : > { %v6617_v44 = vpop.f32.mrf.mxu0  ;;  %6808 = vmatmul.mubr.bf16.gmra.mxu0 %v8534_v46  ;;  %v6901_v39 = vpop.f32.mrf.mxu1 }
 0x7ba   : > { %v6618_v33 = vadd.f32 %v6617_v44, %v11534_v63  ;;  %v6902_v1 = vadd.f32 %v6901_v39, %v6613_v38  ;;  %6815 = vmatprep.mubr.bf16.mxu0 %v8543_v61  ;;  %v8551_v61 = vcombine.high %v4551_v52, %v4555_v22  ;;  %v4552_v44 = vld [vmem:[%s12843_s11 + $0x758] sm:$0xff] }
 0x7bb   : > { %v6619_v42 = vpop.f32.mrf.mxu0  ;;  %v6903_v6 = vpop.f32.mrf.mxu1  ;;  %v8552_v22 = vcombine.low %v4552_v44, %v4556_v56 }
 0x7bc   : > { %v7142_v17 = vmax.f32 %v6902_v1, 0.0  ;;  %v4559_v42 = vld [vmem:[%s12843_s11 + $0x790] sm:$0xff] }
 0x7bd   : > { %v6620_v16 = vpop.f32.mrf.mxu0  ;;  %v6906_v46 = vpop.f32.mrf.mxu1  ;;  %7097 = vmatmul.mubr.bf16.gmra.mxu1 %v8536_v30  ;;  %v4563_v6 = vld [vmem:[%s12843_s11 + $0x7b0] sm:$0xff] }
 0x7be   : > { %v12398_v63 = vpack.c.bf16 %v7142_v17, %v7141_v24  ;;  %v6621_v45 = vadd.f32 %v6620_v16, %v11550_v48  ;;  %v6907_v38 = vadd.f32 %v6906_v46, %v6618_v33  ;;  %7104 = vmatprep.mubr.bf16.mxu1 %v8545_v35  ;;  %v8553_v33 = vcombine.high %v4552_v44, %v4556_v56 }
 0x7bf   : > { %v6622_v21 = vpop.f32.mrf.mxu0  ;;  %v6908_v5 = vpop.f32.mrf.mxu1  ;;  %v8558_v44 = vcombine.low %v4559_v42, %v4563_v6 }
 0x7c0   : > { %v7143_v24 = vmax.f32 %v6907_v38, 0.0  ;;  %v4560_v5 = vld [vmem:[%s12843_s11 + $0x798] sm:$0xff] }
 0x7c1   : > { %v6625_v39 = vpop.f32.mrf.mxu0  ;;  %6816 = vmatmul.mubr.bf16.gmra.mxu0 %v8542_v18  ;;  %v6909_v20 = vpop.f32.mrf.mxu1  ;;  %v4564_v38 = vld [vmem:[%s12843_s11 + $0x7b8] sm:$0xff] }
 0x7c2   : > { %v6626_v30 = vadd.f32 %v6625_v39, %v11561_v36  ;;  %v6910_v48 = vadd.f32 %v6909_v20, %v6621_v45  ;;  %6823 = vmatprep.mubr.bf16.mxu0 %v8551_v61  ;;  %v8559_v45 = vcombine.high %v4559_v42, %v4563_v6  ;;  %v8560_v6 = vcombine.low %v4560_v5, %v4564_v38 }
 0x7c3   : > { %v6627_v1 = vpop.f32.mrf.mxu0  ;;  %v6911_v35 = vpop.f32.mrf.mxu1 }
 0x7c4   : > { %v7144_v17 = vmax.f32 %v6910_v48, 0.0  ;;  %v4571_v1 = vld [vmem:[%s12843_s11 + $0x7f0] sm:$0xff] }
 0x7c5   : > { %v6628_v16 = vpop.f32.mrf.mxu0  ;;  %v6914_v46 = vpop.f32.mrf.mxu1  ;;  %7105 = vmatmul.mubr.bf16.gmra.mxu1 %v8544_v62  ;;  %v8561_v62 = vcombine.high %v4560_v5, %v4564_v38  ;;  %v9350_v5 = vld [vmem:[#allocation5 + $0x4] ss:$16 sps:$4 sm:$0xff]  }
 0x7c6   : > { %v12414_v36 = vpack.c.bf16 %v7144_v17, %v7143_v24  ;;  %v6629_v29 = vadd.f32 %v6628_v16, %v11579_v47  ;;  %v6915_v18 = vadd.f32 %v6914_v46, %v6626_v30  ;;  %7112 = vmatprep.mubr.bf16.mxu1 %v8553_v33  ;;  %v4567_v33 = vld [vmem:[%s12843_s11 + $0x7d0] sm:$0xff] }
 0x7c7   : > { %v6630_v61 = vpop.f32.mrf.mxu0  ;;  %v6916_v21 = vpop.f32.mrf.mxu1 }
 0x7c8   : > { %v7145_v35 = vmax.f32 %v6915_v18, 0.0  ;;  %v4568_v61 = vld [vmem:[%s12843_s11 + $0x7d8] sm:$0xff] }
 0x7c9   : > { %v6633_v39 = vpop.f32.mrf.mxu0  ;;  %6824 = vmatmul.mubr.bf16.gmra.mxu0 %v8550_v10  ;;  %v6917_v52 = vpop.f32.mrf.mxu1  ;;  %v8567_v10 = vcombine.high %v4567_v33, %v4571_v1  ;;  %v4572_v18 = vld [vmem:[%s12843_s11 + $0x7f8] sm:$0xff] }
 0x7ca   : > { %v6634_v20 = vadd.f32 %v6633_v39, %v11591_v43  ;;  %v6918_v47 = vadd.f32 %v6917_v52, %v6629_v29  ;;  %6831 = vmatprep.mubr.bf16.mxu0 %v8559_v45  ;;  %v8569_v52 = vcombine.high %v4568_v61, %v4572_v18 }
 0x7cb   : > { %v6635_v30 = vpop.f32.mrf.mxu0  ;;  %v6919_v48 = vpop.f32.mrf.mxu1 }
 0x7cc   : > { %v7146_v24 = vmax.f32 %v6918_v47, 0.0 }
 0x7cd   : > { %v6636_v17 = vpop.f32.mrf.mxu0  ;;  %v6922_v16 = vpop.f32.mrf.mxu1  ;;  %7113 = vmatmul.mubr.bf16.gmra.mxu1 %v8552_v22 }
 0x7ce   : > { %v12430_v43 = vpack.c.bf16 %v7146_v24, %v7145_v35  ;;  %v6637_v56 = vadd.f32 %v6636_v17, %v11613_v3  ;;  %v6923_v46 = vadd.f32 %v6922_v16, %v6634_v20  ;;  %7120 = vmatprep.mubr.bf16.mxu1 %v8561_v62  ;;  %v8566_v35 = vcombine.low %v4567_v33, %v4571_v1 }
 0x7cf   : > { %v6638_v29 = vpop.f32.mrf.mxu0  ;;  %v6924_v45 = vpop.f32.mrf.mxu1 }
 0x7d0   : > { %v7147_v47 = vmax.f32 %v6923_v46, 0.0 }
 0x7d1   : > { %v6641_v21 = vpop.f32.mrf.mxu0  ;;  %6832 = vmatmul.mubr.bf16.gmra.mxu0 %v8558_v44  ;;  %v6925_v42 = vpop.f32.mrf.mxu1 }
 0x7d2   : > { %v6642_v39 = vadd.f32 %v6641_v21, %v11628_v13  ;;  %v6926_v3 = vadd.f32 %v6925_v42, %v6637_v56  ;;  %6839 = vmatprep.mubr.bf16.mxu0 %v8567_v10  ;;  %v8568_v10 = vcombine.low %v4568_v61, %v4572_v18 }
 0x7d3   : > { %v6643_v22 = vpop.f32.mrf.mxu0  ;;  %v6927_v20 = vpop.f32.mrf.mxu1 }
 0x7d4   : > { %v7148_v62 = vmax.f32 %v6926_v3, 0.0 }
 0x7d5   : > { %v6644_v30 = vpop.f32.mrf.mxu0  ;;  %v6930_v48 = vpop.f32.mrf.mxu1  ;;  %7121 = vmatmul.mubr.bf16.gmra.mxu1 %v8560_v6 }
 0x7d6   : > { %v12440_v24 = vpack.c.bf16 %v7148_v62, %v7147_v47  ;;  %v6645_v17 = vadd.f32 %v6644_v30, %v11653_v58  ;;  %v6931_v16 = vadd.f32 %v6930_v48, %v6642_v39  ;;  %7128 = vmatprep.mubr.bf16.mxu1 %v8569_v52 }
 0x7d7   : > { %v6646_v38 = vpop.f32.mrf.mxu0  ;;  %v6932_v13 = vpop.f32.mrf.mxu1 }
 0x7d8   : > { %v7149_v33 = vmax.f32 %v6931_v16, 0.0 }
 0x7d9   : > { %v6649_v44 = vpop.f32.mrf.mxu0  ;;  %6840 = vmatmul.mubr.bf16.gmra.mxu0 %v8566_v35  ;;  %v6933_v56 = vpop.f32.mrf.mxu1 }
 0x7da   : > { %v6650_v46 = vadd.f32 %v6649_v44, %v11664_v2  ;;  %v6934_v29 = vadd.f32 %v6933_v56, %v6645_v17  ;;  %7681 = vmatprep.mubr.bf16.mxu0 %v9350_v5 }
 0x7db   : > { %v6651_v45 = vpop.f32.mrf.mxu0  ;;  %v6935_v21 = vpop.f32.mrf.mxu1 }
 0x7dc   : > { %v7150_v1 = vmax.f32 %v6934_v29, 0.0 }
 0x7dd   : > { %v6652_v42 = vpop.f32.mrf.mxu0  ;;  %v6938_v6 = vpop.f32.mrf.mxu1  ;;  %7129 = vmatmul.mubr.bf16.gmra.mxu1 %v8568_v10 }
 0x7de   : > { %v12444_v58 = vpack.c.bf16 %v7150_v1, %v7149_v33  ;;  %v6653_v39 = vadd.f32 %v6652_v42, %v11673_v7  ;;  %v6939_v3 = vadd.f32 %v6938_v6, %v6650_v46 }
 0x7df   : > { %v6654_v52 = vpop.f32.mrf.mxu0  ;;  %v6940_v22 = vpop.f32.mrf.mxu1 }
 0x7e0   : > { %v7151_v30 = vmax.f32 %v6939_v3, 0.0 }
 0x7e1   : > { %v6657_v20 = vpop.f32.mrf.mxu0  ;;  %v6941_v61 = vpop.f32.mrf.mxu1 }
 0x7e2   : > { %v6658_v2 = vadd.f32 %v6657_v20, %v11684_v15  ;;  %v6942_v18 = vadd.f32 %v6941_v61, %v6653_v39 }
 0x7e3   : > { %v6659_v47 = vpop.f32.mrf.mxu0  ;;  %v6943_v62 = vpop.f32.mrf.mxu1 }
 0x7e4   : > { %v7152_v48 = vmax.f32 %v6942_v18, 0.0 }
 0x7e5   : > { %v6660_v35 = vpop.f32.mrf.mxu0  ;;  %v6946_v17 = vpop.f32.mrf.mxu1 }
 0x7e6   : > { %v12448_v16 = vpack.c.bf16 %v7152_v48, %v7151_v30  ;;  %v6661_v5 = vadd.f32 %v6660_v35, %v11696_v57  ;;  %v6947_v38 = vadd.f32 %v6946_v17, %v6658_v2 }
 0x7e7   : > { %v6662_v7 = vpop.f32.mrf.mxu0  ;;  %v6948_v13 = vpop.f32.mrf.mxu1 }
 0x7e8   : > { %v7153_v45 = vmax.f32 %v6947_v38, 0.0 }
 0x7e9   : > { %v6665_v44 = vpop.f32.mrf.mxu0  ;;  %v6949_v56 = vpop.f32.mrf.mxu1 }
 0x7ea   : > { %v6666_v10 = vadd.f32 %v6665_v44, %v11707_v11  ;;  %v6950_v46 = vadd.f32 %v6949_v56, %v6661_v5 }
 0x7eb   : > { %v6667_v15 = vpop.f32.mrf.mxu0  ;;  %v6951_v29 = vpop.f32.mrf.mxu1 }
 0x7ec   : > { %v7154_v21 = vmax.f32 %v6950_v46, 0.0 }
 0x7ed   : > { %v6668_v33 = vpop.f32.mrf.mxu0  ;;  %v6954_v1 = vpop.f32.mrf.mxu1 }
 0x7ee   : > { %v12452_v42 = vpack.c.bf16 %v7154_v21, %v7153_v45  ;;  %v6669_v6 = vadd.f32 %v6668_v33, %v11717_v19  ;;  %v6955_v39 = vadd.f32 %v6954_v1, %v6666_v10 }
 0x7ef   : > { %v6670_v57 = vpop.f32.mrf.mxu0  ;;  %v6956_v3 = vpop.f32.mrf.mxu1 }
 0x7f0   : > { %v7155_v18 = vmax.f32 %v6955_v39, 0.0 }
 0x7f1   : > { %v6673_v52 = vpop.f32.mrf.mxu0  ;;  %v6957_v22 = vpop.f32.mrf.mxu1 }
 0x7f2   : > { %v6674_v20 = vadd.f32 %v6673_v52, %v11732_v34  ;;  %v6958_v61 = vadd.f32 %v6957_v22, %v6669_v6 }
 0x7f3   : > { %v6675_v11 = vpop.f32.mrf.mxu0  ;;  %v6959_v2 = vpop.f32.mrf.mxu1 }
 0x7f4   : > { %v7156_v47 = vmax.f32 %v6958_v61, 0.0 }
 0x7f5   : > { %v6676_v62 = vpop.f32.mrf.mxu0  ;;  %v6962_v30 = vpop.f32.mrf.mxu1 }
 0x7f6   : > { %v12456_v48 = vpack.c.bf16 %v7156_v47, %v7155_v18  ;;  %v6677_v19 = vadd.f32 %v6676_v62, %v11747_v50  ;;  %v6963_v5 = vadd.f32 %v6962_v30, %v6674_v20 }
 0x7f7   : > { %v6678_v35 = vpop.f32.mrf.mxu0  ;;  %v6964_v17 = vpop.f32.mrf.mxu1 }
 0x7f8   : > { %v7157_v34 = vmax.f32 %v6963_v5, 0.0 }
 0x7f9   : > { %v6681_v38 = vpop.f32.mrf.mxu0  ;;  %v6965_v7 = vpop.f32.mrf.mxu1 }
 0x7fa   : > { %v6966_v13 = vadd.f32 %v6965_v7, %v6677_v19  ;;  %v6682_v29 = vadd.f32 %v6681_v38, %v11766_v4 }
 0x7fb   : > { %v6683_v44 = vpop.f32.mrf.mxu0  ;;  %v6967_v56 = vpop.f32.mrf.mxu1 }
 0x7fc   : > { %v7158_v10 = vmax.f32 %v6966_v13, 0.0 }
 0x7fd   : > { %v6684_v46 = vpop.f32.mrf.mxu0  ;;  %v6970_v15 = vpop.f32.mrf.mxu1 }
 0x7fe   : > { %v12460_v45 = vpack.c.bf16 %v7158_v10, %v7157_v34  ;;  %v6685_v1 = vadd.f32 %v6684_v46, %v11780_v14  ;;  %v6971_v6 = vadd.f32 %v6970_v15, %v6682_v29 }
 0x7ff   : > { %v6686_v21 = vpop.f32.mrf.mxu0  ;;  %v6972_v33 = vpop.f32.mrf.mxu1 }
 0x800   : > { %v7159_v22 = vmax.f32 %v6971_v6, 0.0 }
 0x801   : > { %v6689_v50 = vpop.f32.mrf.mxu0  ;;  %v6973_v39 = vpop.f32.mrf.mxu1 }
 0x802   : > { %v6974_v57 = vadd.f32 %v6973_v39, %v6685_v1  ;;  %v6690_v2 = vadd.f32 %v6689_v50, %v11794_v0 }
 0x803   : > { %v6691_v3 = vpop.f32.mrf.mxu0  ;;  %v6975_v52 = vpop.f32.mrf.mxu1 }
 0x804   : > { %v7160_v20 = vmax.f32 %v6974_v57, 0.0 }
 0x805   : > { %v6692_v61 = vpop.f32.mrf.mxu0  ;;  %v6978_v11 = vpop.f32.mrf.mxu1 }
 0x806   : > { %v12464_v18 = vpack.c.bf16 %v7160_v20, %v7159_v22  ;;  %v6693_v62 = vadd.f32 %v6692_v61, %v11808_v25  ;;  %v6979_v30 = vadd.f32 %v6978_v11, %v6690_v2  ;;  %v12934_v20 = vld [vmem:[#allocation28_spill] sm:$0xff] }
 0x807   : > { %v6694_v4 = vpop.f32.mrf.mxu0  ;;  %v6980_v47 = vpop.f32.mrf.mxu1 }
 0x808   : > { %v7161_v38 = vmax.f32 %v6979_v30, 0.0 }
 0x809   : > { %v6697_v14 = vpop.f32.mrf.mxu0  ;;  %v6981_v35 = vpop.f32.mrf.mxu1 }
 0x80a   : > { %v6982_v17 = vadd.f32 %v6981_v35, %v6693_v62  ;;  %v6698_v56 = vadd.f32 %v6697_v14, %v11822_v40 }
 0x80b   : > { %v6699_v19 = vpop.f32.mrf.mxu0  ;;  %v6983_v5 = vpop.f32.mrf.mxu1 }
 0x80c   : > { %v7162_v7 = vmax.f32 %v6982_v17, 0.0  ;;  %v12935_v19 = vld [vmem:[#allocation29_spill] sm:$0xff] }
 0x80d   : > { %v6700_v13 = vpop.f32.mrf.mxu0  ;;  %v6986_v44 = vpop.f32.mrf.mxu1 }
 0x80e   : > { %v12468_v34 = vpack.c.bf16 %v7162_v7, %v7161_v38  ;;  %v6701_v46 = vadd.f32 %v6700_v13, %v11836_v9  ;;  %v6987_v15 = vadd.f32 %v6986_v44, %v6698_v56  ;;  %v12936_v13 = vld [vmem:[#allocation30_spill] sm:$0xff] }
 0x80f   : > { %v6702_v0 = vpop.f32.mrf.mxu0  ;;  %v6988_v10 = vpop.f32.mrf.mxu1 }
 0x810   : > { %v7163_v6 = vmax.f32 %v6987_v15, 0.0 }
 0x811   : > { %v6705_v25 = vpop.f32.mrf.mxu0  ;;  %v6989_v29 = vpop.f32.mrf.mxu1 }
 0x812   : > { %v6990_v21 = vadd.f32 %v6989_v29, %v6701_v46  ;;  %v6706_v3 = vadd.f32 %v6705_v25, %v11850_v23  ;;  %v12937_v46 = vld [vmem:[#allocation13_spill] sm:$0xff] }
 0x813   : > { %v6707_v33 = vpop.f32.mrf.mxu0  ;;  %v6991_v1 = vpop.f32.mrf.mxu1 }
 0x814   : > { %v7164_v50 = vmax.f32 %v6990_v21, 0.0 }
 0x815   : > { %v6708_v39 = vpop.f32.mrf.mxu0  ;;  %v6994_v57 = vpop.f32.mrf.mxu1 }
 0x816   : > { %v7278_v52 = vpack.c.bf16 %v7164_v50, %v7163_v6  ;;  %v6709_v61 = vadd.f32 %v6708_v39, %v12934_v20  ;;  %v6995_v11 = vadd.f32 %v6994_v57, %v6706_v3  ;;  %v12938_v57 = vld [vmem:[#allocation15_spill] sm:$0xff] }
 0x817   : > { %v6710_v40 = vpop.f32.mrf.mxu0  ;;  %v6996_v22 = vpop.f32.mrf.mxu1 }
 0x818   : > { %v7165_v30 = vmax.f32 %v6995_v11, 0.0 }
 0x819   : > { %v6713_v2 = vpop.f32.mrf.mxu0  ;;  %v6997_v9 = vpop.f32.mrf.mxu1 }
 0x81a   : > { %v6998_v4 = vadd.f32 %v6997_v9, %v6709_v61  ;;  %v6714_v5 = vadd.f32 %v6713_v2, %v12935_v19  ;;  %v12939_v2 = vld [vmem:[#allocation14_spill] sm:$0xff] }
 0x81b   : > { %v6715_v47 = vpop.f32.mrf.mxu0  ;;  %v6999_v62 = vpop.f32.mrf.mxu1 }
 0x81c   : > { %v7166_v14 = vmax.f32 %v6998_v4, 0.0 }
 0x81d   : > { %v6716_v35 = vpop.f32.mrf.mxu0  ;;  %v7002_v17 = vpop.f32.mrf.mxu1 }
 0x81e   : > { %v7279_v38 = vpack.c.bf16 %v7166_v14, %v7165_v30  ;;  %v6717_v44 = vadd.f32 %v6716_v35, %v12936_v13  ;;  %v7003_v56 = vadd.f32 %v7002_v17, %v6714_v5  ;;  %v12940_v5 = vld [vmem:[#allocation12_spill] sm:$0xff] }
 0x81f   : > { %v6718_v7 = vpop.f32.mrf.mxu0  ;;  %v7004_v23 = vpop.f32.mrf.mxu1 }
 0x820   : > { %v7167_v33 = vmax.f32 %v7003_v56, 0.0 }
 0x821   : > { %v6721_v0 = vpop.f32.mrf.mxu0  ;;  %v7005_v10 = vpop.f32.mrf.mxu1 }
 0x822   : > { %v6722_v15 = vadd.f32 %v6721_v0, %v12937_v46  ;;  %v7006_v25 = vadd.f32 %v7005_v10, %v6717_v44 }
 0x823   : > { %v6723_v29 = vpop.f32.mrf.mxu0  ;;  %v7007_v21 = vpop.f32.mrf.mxu1 }
 0x824   : > { %v7168_v1 = vmax.f32 %v7006_v25, 0.0 }
 0x825   : > { %v6724_v6 = vpop.f32.mrf.mxu0  ;;  %v7010_v50 = vpop.f32.mrf.mxu1 }
 0x826   : > { %v7280_v39 = vpack.c.bf16 %v7168_v1, %v7167_v33  ;;  %v6725_v3 = vadd.f32 %v6724_v6, %v12938_v57  ;;  %v7011_v40 = vadd.f32 %v7010_v50, %v6722_v15  ;;  %v12942_v33 = vld [vmem:[#allocation26_spill] sm:$0xff] }
 0x827   : > { %v6726_v22 = vpop.f32.mrf.mxu0  ;;  %v7012_v20 = vpop.f32.mrf.mxu1 }
 0x828   : > { %8742 = vmatprep.subr.bf16.mxu0 %v7280_v39  ;;  %v7169_v30 = vmax.f32 %v7011_v40, 0.0 }
 0x829   : > { %v6729_v61 = vpop.f32.mrf.mxu0  ;;  %v7013_v11 = vpop.f32.mrf.mxu1  ;;  %8743 = vmatpush3.bf16.msra.mxu0 %v12448_v16 }
 0x82a   : > { %v6730_v9 = vadd.f32 %v6729_v61, %v12939_v2  ;;  %v7014_v4 = vadd.f32 %v7013_v11, %v6725_v3  ;;  %8744 = vmatprep.subr.bf16.mxu0 %v7279_v38  ;;  %v12941_v38 = vld [vmem:[#allocation24_spill] sm:$0xff] }
 0x82b   : > { %v6731_v47 = vpop.f32.mrf.mxu0  ;;  %v7015_v62 = vpop.f32.mrf.mxu1 }
 0x82c   : > { %v7170_v14 = vmax.f32 %v7014_v4, 0.0 }
 0x82d   : > { %v6732_v35 = vpop.f32.mrf.mxu0  ;;  %v7018_v17 = vpop.f32.mrf.mxu1  ;;  %8745 = vmatpush3.bf16.msra.mxu0 %v12444_v58 }
 0x82e   : > { %v12480_v19 = vpack.c.bf16 %v7170_v14, %v7169_v30  ;;  %v6733_v7 = vadd.f32 %v6732_v35, %v12940_v5  ;;  %v7019_v23 = vadd.f32 %v7018_v17, %v6730_v9  ;;  %8746 = vmatprep.subr.bf16.mxu0 %v7278_v52  ;;  %v12944_v9 = vld [vmem:[#allocation27_spill] sm:$0xff] }
 0x82f   : > { %v6734_v13 = vpop.f32.mrf.mxu0  ;;  %v7020_v16 = vpop.f32.mrf.mxu1 }
 0x830   : > { %v7171_v58 = vmax.f32 %v7019_v23, 0.0  ;;  %v9348_v13 = vld [vmem:[#allocation5] ss:$16 sps:$4 sm:$0xff]  }
 0x831   : > { %v6737_v44 = vpop.f32.mrf.mxu0  ;;  %v7021_v56 = vpop.f32.mrf.mxu1  ;;  %8747 = vmatpush3.bf16.msra.mxu0 %v12440_v24 }
 0x832   : > { %v6738_v0 = vadd.f32 %v6737_v44, %v12941_v38  ;;  %v7022_v10 = vadd.f32 %v7021_v56, %v6733_v7  ;;  %8748 = vmatprep.subr.bf16.mxu0 %v12468_v34  ;;  %v12943_v34 = vld [vmem:[#allocation25_spill] sm:$0xff]  ;;  %v12946_v38 = vld [vmem:[#allocation22_spill] sm:$0xff] }
 0x833   : > { %v6739_v46 = vpop.f32.mrf.mxu0  ;;  %v7023_v15 = vpop.f32.mrf.mxu1 }
 0x834   : > { %v7172_v25 = vmax.f32 %v7022_v10, 0.0 }
 0x835   : > { %v6740_v29 = vpop.f32.mrf.mxu0  ;;  %v7026_v21 = vpop.f32.mrf.mxu1  ;;  %8749 = vmatpush3.bf16.msra.mxu0 %v12430_v43 }
 0x836   : > { %v12487_v52 = vpack.c.bf16 %v7172_v25, %v7171_v58  ;;  %v6741_v1 = vadd.f32 %v6740_v29, %v12942_v33  ;;  %v7027_v6 = vadd.f32 %v7026_v21, %v6738_v0  ;;  %8750 = vmatprep.subr.bf16.mxu0 %v12464_v18  ;;  %v12947_v58 = vld [vmem:[#allocation21_spill] sm:$0xff] }
 0x837   : > { %v6742_v24 = vpop.f32.mrf.mxu0  ;;  %v7028_v50 = vpop.f32.mrf.mxu1 }
 0x838   : > { %v7173_v20 = vmax.f32 %v7027_v6, 0.0 }
 0x839   : > { %v6745_v39 = vpop.f32.mrf.mxu0  ;;  %v7029_v57 = vpop.f32.mrf.mxu1  ;;  %8751 = vmatpush3.bf16.msra.mxu0 %v12414_v36 }
 0x83a   : > { %v6746_v3 = vadd.f32 %v6745_v39, %v12943_v34  ;;  %v7030_v40 = vadd.f32 %v7029_v57, %v6741_v1  ;;  %8752 = vmatprep.subr.bf16.mxu0 %v12460_v45  ;;  %v12945_v45 = vld [vmem:[#allocation20_spill] sm:$0xff]  ;;  %v12948_v34 = vld [vmem:[#allocation23_spill] sm:$0xff] }
 0x83b   : > { %v6747_v22 = vpop.f32.mrf.mxu0  ;;  %v7031_v43 = vpop.f32.mrf.mxu1  ;;  %v9356_v39 = vld [vmem:[#allocation5 + $0x44] ss:$16 sps:$4 sm:$0xff]  }
 0x83c   : > { %v7174_v61 = vmax.f32 %v7030_v40, 0.0 }
 0x83d   : > { %v6748_v11 = vpop.f32.mrf.mxu0  ;;  %v7034_v2 = vpop.f32.mrf.mxu1  ;;  %8753 = vmatpush3.bf16.msra.mxu0 %v12398_v63 }
 0x83e   : > { %v12495_v18 = vpack.c.bf16 %v7174_v61, %v7173_v20  ;;  %v6749_v4 = vadd.f32 %v6748_v11, %v12944_v9  ;;  %v7035_v47 = vadd.f32 %v7034_v2, %v6746_v3  ;;  %8754 = vmatprep.subr.bf16.mxu0 %v12456_v48  ;;  %v9353_v48 = vld [vmem:[#allocation5 + $0x24] ss:$16 sps:$4 sm:$0xff]  }
 0x83f   : > { %v6750_v36 = vpop.f32.mrf.mxu0  ;;  %v7036_v62 = vpop.f32.mrf.mxu1  ;;  %v12949_v11 = vld [vmem:[#allocation16_spill] sm:$0xff] }
 0x840   : > { %v7175_v7 = vmax.f32 %v7035_v47, 0.0 }
 0x841   : > { %v6753_v30 = vpop.f32.mrf.mxu0  ;;  %v7037_v14 = vpop.f32.mrf.mxu1  ;;  %8755 = vmatpush3.bf16.msra.mxu0 %v12382_v31 }
 0x842   : > { %v6754_v35 = vadd.f32 %v6753_v30, %v12945_v45  ;;  %v7038_v17 = vadd.f32 %v7037_v14, %v6749_v4  ;;  %8756 = vmatprep.subr.bf16.mxu0 %v12452_v42  ;;  %v9354_v30 = vld [vmem:[#allocation5 + $0x40] ss:$16 sps:$4 sm:$0xff]  }
 0x843   : > { %v6755_v5 = vpop.f32.mrf.mxu0  ;;  %v7039_v63 = vpop.f32.mrf.mxu1 }
 0x844   : > { %v7176_v23 = vmax.f32 %v7038_v17, 0.0  ;;  %v12950_v5 = vld [vmem:[#allocation18_spill] sm:$0xff] }
 0x845   : > { %v6756_v16 = vpop.f32.mrf.mxu0  ;;  %v7042_v44 = vpop.f32.mrf.mxu1  ;;  %8757 = vmatpush3.bf16.msra.mxu0 %v12366_v41  ;;  %v9351_v41 = vld [vmem:[#allocation5 + $0x20] ss:$16 sps:$4 sm:$0xff]  }
 0x846   : > { %v12503_v56 = vpack.c.bf16 %v7176_v23, %v7175_v7  ;;  %v6757_v0 = vadd.f32 %v6756_v16, %v12946_v38  ;;  %v7043_v31 = vadd.f32 %v7042_v44, %v6754_v35  ;;  %v9359_v35 = vld [vmem:[#allocation5 + $0x64] ss:$16 sps:$4 sm:$0xff]  }
 0x847   : > { %v6758_v10 = vpop.f32.mrf.mxu0  ;;  %v7044_v46 = vpop.f32.mrf.mxu1 }
 0x848   : > { %7682 = vmatmul.mubr.bf16.vlgmr.msra.gmra.mxu0 %v9348_v13  ;;  %v7177_v1 = vmax.f32 %v7043_v31, 0.0 }
 0x849   : > { %v6761_v15 = vpop.f32.mrf.mxu0  ;;  %v7045_v42 = vpop.f32.mrf.mxu1  ;;  %7689 = vmatprep.mubr.bf16.mxu0 %v9353_v48  ;;  %v12951_v48 = vld [vmem:[#allocation17_spill] sm:$0xff] }
 0x84a   : > { %v6762_v25 = vadd.f32 %v6761_v15, %v12947_v58  ;;  %v7046_v29 = vadd.f32 %v7045_v42, %v6757_v0  ;;  %v9357_v42 = vld [vmem:[#allocation5 + $0x60] ss:$16 sps:$4 sm:$0xff]  }
 0x84b   : > { %v6763_v21 = vpop.f32.mrf.mxu0  ;;  %v7047_v33 = vpop.f32.mrf.mxu1 }
 0x84c   : > { %v7178_v6 = vmax.f32 %v7046_v29, 0.0  ;;  %v9362_v29 = vld [vmem:[#allocation5 + $0x84] ss:$16 sps:$4 sm:$0xff]  }
 0x84d   : > { %v6764_v24 = vpop.f32.mrf.mxu0  ;;  %v7050_v50 = vpop.f32.mrf.mxu1 }
 0x84e   : > { %v12507_v57 = vpack.c.bf16 %v7178_v6, %v7177_v1  ;;  %v6765_v3 = vadd.f32 %v6764_v24, %v12948_v34  ;;  %v7051_v40 = vadd.f32 %v7050_v50, %v6762_v25 }
 0x84f   : > { %v6766_v22 = vpop.f32.mrf.mxu0  ;;  %v7052_v43 = vpop.f32.mrf.mxu1 }
 0x850   : > { %7690 = vmatmul.mubr.bf16.gmra.mxu0 %v9351_v41  ;;  %v7179_v36 = vmax.f32 %v7051_v40, 0.0 }
 0x851   : > { %v6769_v20 = vpop.f32.mrf.mxu0  ;;  %v7053_v61 = vpop.f32.mrf.mxu1  ;;  %7697 = vmatprep.mubr.bf16.mxu0 %v9356_v39 }
 0x852   : > { %v6770_v2 = vadd.f32 %v6769_v20, %v12949_v11  ;;  %v7054_v9 = vadd.f32 %v7053_v61, %v6765_v3  ;;  %v9360_v20 = vld [vmem:[#allocation5 + $0x80] ss:$16 sps:$4 sm:$0xff]  }
 0x853   : > { %v6771_v4 = vpop.f32.mrf.mxu0  ;;  %v7055_v47 = vpop.f32.mrf.mxu1 }
 0x854   : > { %v7180_v62 = vmax.f32 %v7054_v9, 0.0 }
 0x855   : > { %v6772_v14 = vpop.f32.mrf.mxu0  ;;  %v7058_v45 = vpop.f32.mrf.mxu1 }
 0x856   : > { %v12511_v17 = vpack.c.bf16 %v7180_v62, %v7179_v36  ;;  %v6773_v63 = vadd.f32 %v6772_v14, %v12950_v5  ;;  %v7059_v7 = vadd.f32 %v7058_v45, %v6770_v2  ;;  %v9365_v2 = vld [vmem:[#allocation5 + $0xa4] ss:$16 sps:$4 sm:$0xff]  }
 0x857   : > { %v6774_v23 = vpop.f32.mrf.mxu0  ;;  %v7060_v13 = vpop.f32.mrf.mxu1 }
 0x858   : > { %7698 = vmatmul.mubr.bf16.gmra.mxu0 %v9354_v30  ;;  %v7181_v46 = vmax.f32 %v7059_v7, 0.0  ;;  %v9363_v7 = vld [vmem:[#allocation5 + $0xa0] ss:$16 sps:$4 sm:$0xff]  }
 0x859   : > { %v6777_v16 = vpop.f32.mrf.mxu0  ;;  %v7061_v44 = vpop.f32.mrf.mxu1  ;;  %7705 = vmatprep.mubr.bf16.mxu0 %v9359_v35 }
 0x85a   : > { %v6778_v38 = vadd.f32 %v6777_v16, %v12951_v48  ;;  %v7062_v0 = vadd.f32 %v7061_v44, %v6773_v63  ;;  %v9368_v16 = vld [vmem:[#allocation5 + $0xc4] ss:$16 sps:$4 sm:$0xff]  }
 0x85b   : > { %v6779_v31 = vpop.f32.mrf.mxu0  ;;  %v7063_v10 = vpop.f32.mrf.mxu1 }
 0x85c   : > { %v7182_v15 = vmax.f32 %v7062_v0, 0.0 }
 0x85d   : > { %v6780_v58 = vpop.f32.mrf.mxu0  ;;  %v7066_v25 = vpop.f32.mrf.mxu1 }
 0x85e   : > { %v12515_v21 = vpack.c.bf16 %v7182_v15, %v7181_v46  ;;  %v6781_v33 = vadd.f32 %v6780_v58, %v12116_v49  ;;  %v7067_v1 = vadd.f32 %v7066_v25, %v6778_v38 }
 0x85f   : > { %v6782_v6 = vpop.f32.mrf.mxu0  ;;  %v7068_v41 = vpop.f32.mrf.mxu1 }
 0x860   : > { %7706 = vmatmul.mubr.bf16.gmra.mxu0 %v9357_v42  ;;  %v7183_v22 = vmax.f32 %v7067_v1, 0.0  ;;  %v9371_v6 = vld [vmem:[#allocation5 + $0xe4] ss:$16 sps:$4 sm:$0xff]  }
 0x861   : > { %v6785_v24 = vpop.f32.mrf.mxu0  ;;  %v7069_v50 = vpop.f32.mrf.mxu1  ;;  %7713 = vmatprep.mubr.bf16.mxu0 %v9362_v29  ;;  %v9366_v29 = vld [vmem:[#allocation5 + $0xc0] ss:$16 sps:$4 sm:$0xff]  }
 0x862   : > { %v6786_v39 = vadd.f32 %v6785_v24, %v12130_v32  ;;  %v7070_v34 = vadd.f32 %v7069_v50, %v6781_v33 }
 0x863   : > { %v6787_v3 = vpop.f32.mrf.mxu0  ;;  %v7071_v40 = vpop.f32.mrf.mxu1 }
 0x864   : > { %v7184_v43 = vmax.f32 %v7070_v34, 0.0 }
 0x865   : > { %v6788_v61 = vpop.f32.mrf.mxu0  ;;  %v7074_v11 = vpop.f32.mrf.mxu1 }
 0x866   : > { %v12519_v9 = vpack.c.bf16 %v7184_v43, %v7183_v22  ;;  %v6789_v49 = vadd.f32 %v6788_v61, %v12142_v27  ;;  %v7075_v4 = vadd.f32 %v7074_v11, %v6786_v39  ;;  %v9369_v61 = vld [vmem:[#allocation5 + $0xe0] ss:$16 sps:$4 sm:$0xff]  }
 0x867   : > { %v6790_v47 = vpop.f32.mrf.mxu0  ;;  %v7076_v36 = vpop.f32.mrf.mxu1 }
 0x868   : > { %7714 = vmatmul.mubr.bf16.gmra.mxu0 %v9360_v20  ;;  %v7185_v5 = vmax.f32 %v7075_v4, 0.0 }
 0x869   : > { %v6793_v62 = vpop.f32.mrf.mxu0  ;;  %v7077_v30 = vpop.f32.mrf.mxu1  ;;  %7721 = vmatprep.mubr.bf16.mxu0 %v9365_v2 }
 0x86a   : > { %v6794_v32 = vadd.f32 %v6793_v62, %v12154_v12  ;;  %v7078_v14 = vadd.f32 %v7077_v30, %v6789_v49  ;;  %v9374_v49 = vld [vmem:[#allocation5 + $0x104] ss:$16 sps:$4 sm:$0xff]  }
 0x86b   : > { %v6795_v45 = vpop.f32.mrf.mxu0  ;;  %v7079_v35 = vpop.f32.mrf.mxu1 }
 0x86c   : > { %v7186_v63 = vmax.f32 %v7078_v14, 0.0 }
 0x86d   : > { %v6796_v23 = vpop.f32.mrf.mxu0  ;;  %v7082_v13 = vpop.f32.mrf.mxu1 }
 0x86e   : > { %v12523_v44 = vpack.c.bf16 %v7186_v63, %v7185_v5  ;;  %v6797_v27 = vadd.f32 %v6796_v23, %v12166_v60  ;;  %v7083_v48 = vadd.f32 %v7082_v13, %v6794_v32  ;;  %v9372_v23 = vld [vmem:[#allocation5 + $0x100] ss:$16 sps:$4 sm:$0xff]  }
 0x86f   : > { %v6798_v38 = vpop.f32.mrf.mxu0  ;;  %v7084_v0 = vpop.f32.mrf.mxu1 }
 0x870   : > { %7722 = vmatmul.mubr.bf16.gmra.mxu0 %v9363_v7  ;;  %v7187_v58 = vmax.f32 %v7083_v48, 0.0 }
 0x871   : > { %v6801_v31 = vpop.f32.mrf.mxu0  ;;  %v7085_v10 = vpop.f32.mrf.mxu1  ;;  %7729 = vmatprep.mubr.bf16.mxu0 %v9368_v16 }
 0x872   : > { %v6802_v12 = vadd.f32 %v6801_v31, %v12178_v26  ;;  %v7086_v46 = vadd.f32 %v7085_v10, %v6797_v27 }
 0x873   : > { %v6803_v15 = vpop.f32.mrf.mxu0  ;;  %v7087_v42 = vpop.f32.mrf.mxu1 }
 0x874   : > { %v7188_v25 = vmax.f32 %v7086_v46, 0.0 }
 0x875   : > { %v6804_v33 = vpop.f32.mrf.mxu0  ;;  %v7090_v1 = vpop.f32.mrf.mxu1 }
 0x876   : > { %v12527_v41 = vpack.c.bf16 %v7188_v25, %v7187_v58  ;;  %v6805_v50 = vadd.f32 %v6804_v33, %v12190_v59  ;;  %v7091_v39 = vadd.f32 %v7090_v1, %v6802_v12 }
 0x877   : > { %v6806_v60 = vpop.f32.mrf.mxu0  ;;  %v7092_v24 = vpop.f32.mrf.mxu1 }
 0x878   : > { %7730 = vmatmul.mubr.bf16.gmra.mxu0 %v9366_v29  ;;  %v7189_v43 = vmax.f32 %v7091_v39, 0.0  ;;  %v9375_v29 = vld [vmem:[#allocation5 + $0x120] ss:$16 sps:$4 sm:$0xff]  }
 0x879   : > { %v6809_v34 = vpop.f32.mrf.mxu0  ;;  %v7093_v3 = vpop.f32.mrf.mxu1  ;;  %7737 = vmatprep.mubr.bf16.mxu0 %v9371_v6 }
 0x87a   : > { %v7094_v26 = vadd.f32 %v7093_v3, %v6805_v50  ;;  %v6810_v4 = vadd.f32 %v6809_v34, %v12202_v53  ;;  %v9377_v53 = vld [vmem:[#allocation5 + $0x124] ss:$16 sps:$4 sm:$0xff]  }
 0x87b   : > { %v6811_v40 = vpop.f32.mrf.mxu0  ;;  %v7095_v22 = vpop.f32.mrf.mxu1 }
 0x87c   : > { %v7190_v20 = vmax.f32 %v7094_v26, 0.0 }
 0x87d   : > { %v6812_v11 = vpop.f32.mrf.mxu0  ;;  %v7098_v2 = vpop.f32.mrf.mxu1 }
 0x87e   : > { %v12531_v47 = vpack.c.bf16 %v7190_v20, %v7189_v43  ;;  %v6813_v62 = vadd.f32 %v6812_v11, %v12214_v55  ;;  %v7099_v30 = vadd.f32 %v7098_v2, %v6810_v4 }
 0x87f   : > { %v6814_v36 = vpop.f32.mrf.mxu0  ;;  %v7100_v59 = vpop.f32.mrf.mxu1 }
 0x880   : > { %7738 = vmatmul.mubr.bf16.gmra.mxu0 %v9369_v61  ;;  %v7191_v63 = vmax.f32 %v7099_v30, 0.0  ;;  %v9378_v61 = vld [vmem:[#allocation5 + $0x140] ss:$16 sps:$4 sm:$0xff]  }
 0x881   : > { %v6817_v32 = vpop.f32.mrf.mxu0  ;;  %v7101_v14 = vpop.f32.mrf.mxu1  ;;  %7745 = vmatprep.mubr.bf16.mxu0 %v9374_v49 }
 0x882   : > { %v7102_v45 = vadd.f32 %v7101_v14, %v6813_v62  ;;  %v6818_v27 = vadd.f32 %v6817_v32, %v12226_v28  ;;  %v9380_v28 = vld [vmem:[#allocation5 + $0x144] ss:$16 sps:$4 sm:$0xff]  }
 0x883   : > { %v6819_v35 = vpop.f32.mrf.mxu0  ;;  %v7103_v5 = vpop.f32.mrf.mxu1 }
 0x884   : > { %v7192_v7 = vmax.f32 %v7102_v45, 0.0 }
 0x885   : > { %v6820_v13 = vpop.f32.mrf.mxu0  ;;  %v7106_v16 = vpop.f32.mrf.mxu1 }
 0x886   : > { %v12535_v48 = vpack.c.bf16 %v7192_v7, %v7191_v63  ;;  %v6821_v0 = vadd.f32 %v6820_v13, %v12238_v54  ;;  %v7107_v31 = vadd.f32 %v7106_v16, %v6818_v27 }
 0x887   : > { %v6822_v38 = vpop.f32.mrf.mxu0  ;;  %v7108_v55 = vpop.f32.mrf.mxu1 }
 0x888   : > { %7746 = vmatmul.mubr.bf16.gmra.mxu0 %v9372_v23  ;;  %v7193_v58 = vmax.f32 %v7107_v31, 0.0  ;;  %v9381_v23 = vld [vmem:[#allocation5 + $0x160] ss:$16 sps:$4 sm:$0xff]  }
 0x889   : > { %v6825_v10 = vpop.f32.mrf.mxu0  ;;  %v7109_v12 = vpop.f32.mrf.mxu1  ;;  %7753 = vmatprep.mubr.bf16.mxu0 %v9377_v53  ;;  %v9386_v53 = vld [vmem:[#allocation5 + $0x184] ss:$16 sps:$4 sm:$0xff]  }
 0x88a   : > { %v7110_v46 = vadd.f32 %v7109_v12, %v6821_v0  ;;  %v6826_v6 = vadd.f32 %v6825_v10, %v12250_v37  ;;  %v9383_v37 = vld [vmem:[#allocation5 + $0x164] ss:$16 sps:$4 sm:$0xff]  }
 0x88b   : > { %v6827_v15 = vpop.f32.mrf.mxu0  ;;  %v7111_v42 = vpop.f32.mrf.mxu1  ;;  %v12954_v31 = vld [vmem:[#allocation32_spill] sm:$0xff] }
 0x88c   : > { %v7194_v25 = vmax.f32 %v7110_v46, 0.0 }
 0x88d   : > { %v6828_v33 = vpop.f32.mrf.mxu0  ;;  %v7114_v1 = vpop.f32.mrf.mxu1 }
 0x88e   : > { %v12539_v60 = vpack.c.bf16 %v7194_v25, %v7193_v58  ;;  %v6829_v50 = vadd.f32 %v6828_v33, %v12262_v51  ;;  %v7115_v39 = vadd.f32 %v7114_v1, %v6826_v6  ;;  %v12952_v51 = vld [vmem:[#allocation19_spill] sm:$0xff]  ;;  %v9389_v33 = vld [vmem:[#allocation5 + $0x1a4] ss:$16 sps:$4 sm:$0xff]  }
 0x88f   : > { %v6830_v24 = vpop.f32.mrf.mxu0  ;;  %v7116_v54 = vpop.f32.mrf.mxu1  ;;  %v9392_v6 = vld [vmem:[#allocation5 + $0x1c4] ss:$16 sps:$4 sm:$0xff]  }
 0x890   : > { %7754 = vmatmul.mubr.bf16.gmra.mxu0 %v9375_v29  ;;  %v7195_v43 = vmax.f32 %v7115_v39, 0.0  ;;  %v9384_v29 = vld [vmem:[#allocation5 + $0x180] ss:$16 sps:$4 sm:$0xff]   ;;  %v9395_v54 = vld [vmem:[#allocation5 + $0x1e4] ss:$16 sps:$4 sm:$0xff]  }
 0x891   : > { %v6833_v34 = vpop.f32.mrf.mxu0  ;;  %v7117_v3 = vpop.f32.mrf.mxu1  ;;  %7761 = vmatprep.mubr.bf16.mxu0 %v9380_v28  ;;  %v9387_v28 = vld [vmem:[#allocation5 + $0x1a0] ss:$16 sps:$4 sm:$0xff]   ;;  %v9414_v39 = vld [vmem:[#allocation5 + $0xc8] ss:$16 sps:$4 sm:$0xff]  }
 0x892   : > { %v7118_v26 = vadd.f32 %v7117_v3, %v6829_v50  ;;  %v6834_v49 = vadd.f32 %v6833_v34, %v12274_v8  ;;  %v12953_v8 = vld [vmem:[#allocation31_spill] sm:$0xff]  ;;  %v9390_v24 = vld [vmem:[#allocation5 + $0x1c0] ss:$16 sps:$4 sm:$0xff]  }
 0x893   : > { %v6835_v40 = vpop.f32.mrf.mxu0  ;;  %v7119_v22 = vpop.f32.mrf.mxu1  ;;  %v9416_v50 = vld [vmem:[#allocation5 + $0xcc] ss:$16 sps:$4 sm:$0xff]   ;;  %v9417_v3 = vld [vmem:[#allocation5 + $0xe8] ss:$16 sps:$4 sm:$0xff]  }
 0x894   : > { %v7196_v20 = vmax.f32 %v7118_v26, 0.0  ;;  %v9419_v34 = vld [vmem:[#allocation5 + $0xec] ss:$16 sps:$4 sm:$0xff]   ;;  %v9420_v40 = vld [vmem:[#allocation5 + $0x108] ss:$16 sps:$4 sm:$0xff]  }
 0x895   : > { %v6836_v11 = vpop.f32.mrf.mxu0  ;;  %v7122_v2 = vpop.f32.mrf.mxu1  ;;  %v9422_v26 = vld [vmem:[#allocation5 + $0x10c] ss:$16 sps:$4 sm:$0xff]  }
 0x896   : > { %v7294_v4 = vpack.c.bf16 %v7196_v20, %v7195_v43  ;;  %v6837_v62 = vadd.f32 %v6836_v11, %v12952_v51  ;;  %v7123_v30 = vadd.f32 %v7122_v2, %v6834_v49  ;;  %v9425_v22 = vld [vmem:[#allocation5 + $0x12c] ss:$16 sps:$4 sm:$0xff]   ;;  %v9423_v2 = vld [vmem:[#allocation5 + $0x128] ss:$16 sps:$4 sm:$0xff]  }
 0x897   : > { %v6838_v36 = vpop.f32.mrf.mxu0  ;;  %v7124_v59 = vpop.f32.mrf.mxu1 }
 0x898   : > { %7762 = vmatmul.mubr.bf16.gmra.mxu0 %v9378_v61  ;;  %v7197_v63 = vmax.f32 %v7123_v30, 0.0  ;;  %v9426_v30 = vld [vmem:[#allocation5 + $0x148] ss:$16 sps:$4 sm:$0xff]  }
 0x899   : > { %v6841_v32 = vpop.f32.mrf.mxu0  ;;  %v7125_v14 = vpop.f32.mrf.mxu1  ;;  %7769 = vmatprep.mubr.bf16.mxu0 %v9383_v37  ;;  %v9428_v37 = vld [vmem:[#allocation5 + $0x14c] ss:$16 sps:$4 sm:$0xff]  }
 0x89a   : > { %v7126_v45 = vadd.f32 %v7125_v14, %v6837_v62  ;;  %v6842_v27 = vadd.f32 %v6841_v32, %v12953_v8  ;;  %v9431_v32 = vld [vmem:[#allocation5 + $0x16c] ss:$16 sps:$4 sm:$0xff]  }
 0x89b   : > { %v6843_v35 = vpop.f32.mrf.mxu0  ;;  %v7127_v5 = vpop.f32.mrf.mxu1 }
 0x89c   : > { %v7198_v7 = vmax.f32 %v7126_v45, 0.0 }
 0x89d   : > { %v6844_v13 = vpop.f32.mrf.mxu0  ;;  %v7130_v16 = vpop.f32.mrf.mxu1 }
 0x89e   : > { %v7295_v38 = vpack.c.bf16 %v7198_v7, %v7197_v63  ;;  %v6845_v10 = vadd.f32 %v6844_v13, %v12954_v31  ;;  %v7131_v12 = vadd.f32 %v7130_v16, %v6842_v27  ;;  %v9434_v13 = vld [vmem:[#allocation5 + $0x18c] ss:$16 sps:$4 sm:$0xff]  }
 0x89f   : > { %v6846_v55 = vpop.f32.mrf.mxu0  ;;  %v7132_v0 = vpop.f32.mrf.mxu1  ;;  %v9437_v31 = vld [vmem:[#allocation5 + $0x1ac] ss:$16 sps:$4 sm:$0xff]  }
 0x8a0   : > { %7770 = vmatmul.mubr.bf16.gmra.mxu0 %v9381_v23  ;;  %v7199_v58 = vmax.f32 %v7131_v12, 0.0  ;;  %v9429_v23 = vld [vmem:[#allocation5 + $0x168] ss:$16 sps:$4 sm:$0xff]  }
 0x8a1   : > { %v7133_v46 = vpop.f32.mrf.mxu1  ;;  %7777 = vmatprep.mubr.bf16.mxu0 %v9386_v53  ;;  %v9432_v0 = vld [vmem:[#allocation5 + $0x188] ss:$16 sps:$4 sm:$0xff]  }
 0x8a2   : > { %v7134_v15 = vadd.f32 %v7133_v46, %v6845_v10 }
 0x8a3   : > { %v7135_v42 = vpop.f32.mrf.mxu1 }
 0x8a4   : > { %v7200_v25 = vmax.f32 %v7134_v15, 0.0 }
 0x8a6   : > { %v7296_v1 = vpack.c.bf16 %v7200_v25, %v7199_v58  ;;  %v9435_v25 = vld [vmem:[#allocation5 + $0x1a8] ss:$16 sps:$4 sm:$0xff]  }
 0x8a8   : > { %7778 = vmatmul.mubr.bf16.gmra.mxu0 %v9384_v29  ;;  %8854 = vmatprep.subr.bf16.mxu0 %v7296_v1  ;;  %v9440_v29 = vld [vmem:[#allocation5 + $0x1cc] ss:$16 sps:$4 sm:$0xff]  }
 0x8a9   : > { %8855 = vmatpush3.bf16.msra.mxu0 %v12519_v9  ;;  %7785 = vmatprep.mubr.bf16.mxu0 %v9389_v33  ;;  %v9398_v9 = vld [vmem:[#allocation5 + $0xc] ss:$16 sps:$4 sm:$0xff]  }
 0x8aa   : > { %8856 = vmatprep.subr.bf16.mxu0 %v7295_v38 }
 0x8ad   : > { %8857 = vmatpush3.bf16.msra.mxu0 %v12515_v21  ;;  %v9393_v21 = vld [vmem:[#allocation5 + $0x1e0] ss:$16 sps:$4 sm:$0xff]  }
 0x8ae   : > { %8858 = vmatprep.subr.bf16.mxu0 %v7294_v4 }
 0x8b0   : > { %7786 = vmatmul.mubr.bf16.gmra.mxu0 %v9387_v28 }
 0x8b1   : > { %8859 = vmatpush3.bf16.msra.mxu0 %v12511_v17  ;;  %7793 = vmatprep.mubr.bf16.mxu0 %v9392_v6  ;;  %v9401_v17 = vld [vmem:[#allocation5 + $0x2c] ss:$16 sps:$4 sm:$0xff]  }
 0x8b2   : > { %8860 = vmatprep.subr.bf16.mxu0 %v12539_v60  ;;  %v9410_v60 = vld [vmem:[#allocation5 + $0x8c] ss:$16 sps:$4 sm:$0xff]  }
 0x8b5   : > { %8861 = vmatpush3.bf16.msra.mxu0 %v12507_v57  ;;  %v9396_v57 = vld [vmem:[#allocation5 + $0x8] ss:$16 sps:$4 sm:$0xff]  }
 0x8b6   : > { %8862 = vmatprep.subr.bf16.mxu0 %v12535_v48  ;;  %v9407_v48 = vld [vmem:[#allocation5 + $0x6c] ss:$16 sps:$4 sm:$0xff]  }
 0x8b8   : > { %7794 = vmatmul.mubr.bf16.gmra.mxu0 %v9390_v24 }
 0x8b9   : > { %8863 = vmatpush3.bf16.msra.mxu0 %v12503_v56  ;;  %7801 = vmatprep.mubr.bf16.mxu0 %v9395_v54  ;;  %v9399_v56 = vld [vmem:[#allocation5 + $0x28] ss:$16 sps:$4 sm:$0xff]  }
 0x8ba   : > { %8864 = vmatprep.subr.bf16.mxu0 %v12531_v47  ;;  %v9404_v47 = vld [vmem:[#allocation5 + $0x4c] ss:$16 sps:$4 sm:$0xff]  }
 0x8bd   : > { %8865 = vmatpush3.bf16.msra.mxu0 %v12495_v18  ;;  %v9402_v18 = vld [vmem:[#allocation5 + $0x48] ss:$16 sps:$4 sm:$0xff]  }
 0x8be   : > { %8866 = vmatprep.subr.bf16.mxu0 %v12527_v41  ;;  %v9405_v41 = vld [vmem:[#allocation5 + $0x68] ss:$16 sps:$4 sm:$0xff]  }
 0x8c0   : > { %7802 = vmatmul.mubr.bf16.gmra.mxu0 %v9393_v21  ;;  %v9438_v21 = vld [vmem:[#allocation5 + $0x1c8] ss:$16 sps:$4 sm:$0xff]  }
 0x8c1   : > { %8867 = vmatpush3.bf16.msra.mxu0 %v12487_v52  ;;  %7842 = vmatprep.mubr.bf16.mxu0 %v9398_v9  ;;  %v9408_v52 = vld [vmem:[#allocation5 + $0x88] ss:$16 sps:$4 sm:$0xff]   ;;  %v9443_v9 = vld [vmem:[#allocation5 + $0x1ec] ss:$16 sps:$4 sm:$0xff]  }
 0x8c2   : > { %8868 = vmatprep.subr.bf16.mxu0 %v12523_v44  ;;  %v9413_v44 = vld [vmem:[#allocation5 + $0xac] ss:$16 sps:$4 sm:$0xff]  }
 0x8c5   : > { %8869 = vmatpush3.bf16.msra.mxu0 %v12480_v19  ;;  %v9411_v19 = vld [vmem:[#allocation5 + $0xa8] ss:$16 sps:$4 sm:$0xff]  }
 0x8c8   : > { %7843 = vmatmul.mubr.bf16.vlgmr.msra.gmra.mxu0 %v9396_v57 }
 0x8c9   : > { %7850 = vmatprep.mubr.bf16.mxu0 %v9401_v17 }
 0x8d0   : > { %7851 = vmatmul.mubr.bf16.gmra.mxu0 %v9399_v56 }
 0x8d1   : > { %7858 = vmatprep.mubr.bf16.mxu0 %v9404_v47 }
 0x8d8   : > { %7859 = vmatmul.mubr.bf16.gmra.mxu0 %v9402_v18 }
 0x8d9   : > { %7866 = vmatprep.mubr.bf16.mxu0 %v9407_v48 }
 0x8e0   : > { %7867 = vmatmul.mubr.bf16.gmra.mxu0 %v9405_v41  ;;  %v9441_v41 = vld [vmem:[#allocation5 + $0x1e8] ss:$16 sps:$4 sm:$0xff]  }
 0x8e1   : > { %7874 = vmatprep.mubr.bf16.mxu0 %v9410_v60 }
 0x8e8   : > { %7875 = vmatmul.mubr.bf16.gmra.mxu0 %v9408_v52 }
 0x8e9   : > { %7882 = vmatprep.mubr.bf16.mxu0 %v9413_v44 }
 0x8f0   : > { %7883 = vmatmul.mubr.bf16.gmra.mxu0 %v9411_v19 }
 0x8f1   : > { %7890 = vmatprep.mubr.bf16.mxu0 %v9416_v50 }
 0x8f8   : > { %7891 = vmatmul.mubr.bf16.gmra.mxu0 %v9414_v39 }
 0x8f9   : > { %7898 = vmatprep.mubr.bf16.mxu0 %v9419_v34 }
 0x900   : > { %7899 = vmatmul.mubr.bf16.gmra.mxu0 %v9417_v3 }
 0x901   : > { %7906 = vmatprep.mubr.bf16.mxu0 %v9422_v26 }
 0x908   : > { %v8758_v43 = vpop.f32.mrf.mxu0  ;;  %7907 = vmatmul.mubr.bf16.gmra.mxu0 %v9420_v40 }
 0x909   : > { %7914 = vmatprep.mubr.bf16.mxu0 %v9425_v22 }
 0x90a   : > { %v8759_v20 = vpop.f32.mrf.mxu0 }
 0x90b   : > { %v12559_v61 = vadd.f32 %v8759_v20, %v8758_v43 }
 0x90c   : > { %v8761_v11 = vpop.f32.mrf.mxu0 }
 0x90e   : > { %v8762_v49 = vpop.f32.mrf.mxu0 }
 0x90f   : > { %v12561_v4 = vadd.f32 %v8762_v49, %v8761_v11 }
 0x910   : > { %v8764_v36 = vpop.f32.mrf.mxu0  ;;  %7915 = vmatmul.mubr.bf16.gmra.mxu0 %v9423_v2 }
 0x911   : > { %7922 = vmatprep.mubr.bf16.mxu0 %v9428_v37 }
 0x912   : > { %v8765_v59 = vpop.f32.mrf.mxu0 }
 0x913   : > { %v12563_v51 = vadd.f32 %v8765_v59, %v8764_v36 }
 0x914   : > { %v8767_v62 = vpop.f32.mrf.mxu0 }
 0x916   : > { %v8768_v14 = vpop.f32.mrf.mxu0 }
 0x917   : > { %v12565_v45 = vadd.f32 %v8768_v14, %v8767_v62 }
 0x918   : > { %v8770_v35 = vpop.f32.mrf.mxu0  ;;  %7923 = vmatmul.mubr.bf16.gmra.mxu0 %v9426_v30 }
 0x919   : > { %7930 = vmatprep.mubr.bf16.mxu0 %v9431_v32 }
 0x91a   : > { %v8771_v5 = vpop.f32.mrf.mxu0 }
 0x91b   : > { %v12567_v63 = vadd.f32 %v8771_v5, %v8770_v35 }
 0x91c   : > { %v8773_v7 = vpop.f32.mrf.mxu0 }
 0x91e   : > { %v8774_v16 = vpop.f32.mrf.mxu0 }
 0x91f   : > { %v12569_v53 = vadd.f32 %v8774_v16, %v8773_v7 }
 0x920   : > { %v8776_v8 = vpop.f32.mrf.mxu0  ;;  %7931 = vmatmul.mubr.bf16.gmra.mxu0 %v9429_v23 }
 0x921   : > { %7938 = vmatprep.mubr.bf16.mxu0 %v9434_v13 }
 0x922   : > { %v8777_v27 = vpop.f32.mrf.mxu0 }
 0x923   : > { %v12571_v38 = vadd.f32 %v8777_v27, %v8776_v8 }
 0x924   : > { %v8779_v55 = vpop.f32.mrf.mxu0 }
 0x926   : > { %v8780_v10 = vpop.f32.mrf.mxu0 }
 0x927   : > { %v12573_v12 = vadd.f32 %v8780_v10, %v8779_v55 }
 0x928   : > { %v8782_v46 = vpop.f32.mrf.mxu0  ;;  %7939 = vmatmul.mubr.bf16.gmra.mxu0 %v9432_v0 }
 0x929   : > { %7946 = vmatprep.mubr.bf16.mxu0 %v9437_v31 }
 0x92a   : > { %v8783_v15 = vpop.f32.mrf.mxu0 }
 0x92b   : > { %v12575_v42 = vadd.f32 %v8783_v15, %v8782_v46 }
 0x92c   : > { %v8785_v58 = vpop.f32.mrf.mxu0 }
 0x92e   : > { %v8786_v33 = vpop.f32.mrf.mxu0 }
 0x92f   : > { %v12577_v1 = vadd.f32 %v8786_v33, %v8785_v58 }
 0x930   : > { %v8788_v28 = vpop.f32.mrf.mxu0  ;;  %7947 = vmatmul.mubr.bf16.gmra.mxu0 %v9435_v25 }
 0x931   : > { %7954 = vmatprep.mubr.bf16.mxu0 %v9440_v29 }
 0x932   : > { %v8789_v6 = vpop.f32.mrf.mxu0 }
 0x933   : > { %v12579_v24 = vadd.f32 %v8789_v6, %v8788_v28 }
 0x934   : > { %v8791_v54 = vpop.f32.mrf.mxu0 }
 0x936   : > { %v8792_v57 = vpop.f32.mrf.mxu0 }
 0x937   : > { %v12581_v17 = vadd.f32 %v8792_v57, %v8791_v54 }
 0x938   : > { %v8794_v56 = vpop.f32.mrf.mxu0  ;;  %7955 = vmatmul.mubr.bf16.gmra.mxu0 %v9438_v21 }
 0x939   : > { %7962 = vmatprep.mubr.bf16.mxu0 %v9443_v9 }
 0x93a   : > { %v8795_v47 = vpop.f32.mrf.mxu0 }
 0x93b   : > { %v12583_v18 = vadd.f32 %v8795_v47, %v8794_v56 }
 0x93c   : > { %v8797_v48 = vpop.f32.mrf.mxu0 }
 0x93e   : > { %v8798_v60 = vpop.f32.mrf.mxu0 }
 0x93f   : > { %v12585_v52 = vadd.f32 %v8798_v60, %v8797_v48 }
 0x940   : > { %v8800_v44 = vpop.f32.mrf.mxu0  ;;  %7963 = vmatmul.mubr.bf16.gmra.mxu0 %v9441_v41 }
 0x942   : > { %v8801_v19 = vpop.f32.mrf.mxu0 }
 0x943   : > { %v12587_v50 = vadd.f32 %v8801_v19, %v8800_v44 }
 0x944   : > { %v8803_v39 = vpop.f32.mrf.mxu0 }
 0x946   : > { %v8804_v34 = vpop.f32.mrf.mxu0 }
 0x947   : > { %v12589_v3 = vadd.f32 %v8804_v34, %v8803_v39 }
 0x948   : > { %v8806_v26 = vpop.f32.mrf.mxu0 }
 0x94a   : > { %v8807_v40 = vpop.f32.mrf.mxu0 }
 0x94b   : > { %v12591_v22 = vadd.f32 %v8807_v40, %v8806_v26  ;;  %v7297_v26 = vld [vmem:[%s12846_s14] sm:$0xff] }
 0x94c   : > { %v8809_v43 = vpop.f32.mrf.mxu0 }
 0x94e   : > { %v8810_v20 = vpop.f32.mrf.mxu0 }
 0x94f   : > { %v12593_v11 = vadd.f32 %v8810_v20, %v8809_v43  ;;  %v7684_v20 = vadd.f32 %v12559_v61, %v7297_v26 }
 0x950   : > { %v8812_v2 = vpop.f32.mrf.mxu0 }
 0x952   : > { %v8813_v37 = vpop.f32.mrf.mxu0 }
 0x953   : > { %v12595_v49 = vadd.f32 %v8813_v37, %v8812_v2  ;;  %v7298_v37 = vld [vmem:[%s12846_s14 + $0x8] sm:$0xff] }
 0x954   : > { %v8815_v36 = vpop.f32.mrf.mxu0 }
 0x956   : > { %v8816_v59 = vpop.f32.mrf.mxu0 }
 0x957   : > { %v12597_v62 = vadd.f32 %v8816_v59, %v8815_v36 }
 0x958   : > { %v8818_v30 = vpop.f32.mrf.mxu0 }
 0x95a   : > { %v8819_v32 = vpop.f32.mrf.mxu0 }
 0x95b   : > { %v12599_v14 = vadd.f32 %v8819_v32, %v8818_v30  ;;  %v7687_v32 = vadd.f32 %v12561_v4, %v7298_v37  ;;  %v7303_v37 = vld [vmem:[%s12846_s14 + $0x30] sm:$0xff] }
 0x95c   : > { %v8821_v35 = vpop.f32.mrf.mxu0 }
 0x95e   : > { %v8822_v5 = vpop.f32.mrf.mxu0 }
 0x95f   : > { %v12601_v7 = vadd.f32 %v8822_v5, %v8821_v35  ;;  %v7299_v5 = vld [vmem:[%s12846_s14 + $0x10] sm:$0xff] }
 0x960   : > { %v8824_v23 = vpop.f32.mrf.mxu0  ;;  %v7692_v61 = vadd.f32 %v12563_v51, %v7299_v5 }
 0x962   : > { %v8825_v13 = vpop.f32.mrf.mxu0 }
 0x963   : > { %v12603_v16 = vadd.f32 %v8825_v13, %v8824_v23 }
 0x964   : > { %v8827_v8 = vpop.f32.mrf.mxu0 }
 0x966   : > { %v8828_v27 = vpop.f32.mrf.mxu0 }
 0x967   : > { %v12605_v55 = vadd.f32 %v8828_v27, %v8827_v8 }
 0x968   : > { %v8830_v0 = vpop.f32.mrf.mxu0 }
 0x96a   : > { %v8831_v31 = vpop.f32.mrf.mxu0 }
 0x96b   : > { %v12607_v10 = vadd.f32 %v8831_v31, %v8830_v0 }
 0x96c   : > { %v8833_v46 = vpop.f32.mrf.mxu0 }
 0x96e   : > { %v8834_v15 = vpop.f32.mrf.mxu0 }
 0x96f   : > { %v12609_v58 = vadd.f32 %v8834_v15, %v8833_v46  ;;  %v7300_v46 = vld [vmem:[%s12846_s14 + $0x18] sm:$0xff] }
 0x970   : > { %v8836_v25 = vpop.f32.mrf.mxu0 }
 0x972   : > { %v8837_v29 = vpop.f32.mrf.mxu0 }
 0x973   : > { %v12611_v33 = vadd.f32 %v8837_v29, %v8836_v25 }
 0x974   : > { %v8839_v28 = vpop.f32.mrf.mxu0 }
 0x976   : > { %v8840_v6 = vpop.f32.mrf.mxu0 }
 0x977   : > { %v12613_v54 = vadd.f32 %v8840_v6, %v8839_v28  ;;  %v7695_v28 = vadd.f32 %v12565_v45, %v7300_v46 }
 0x978   : > { %v8842_v21 = vpop.f32.mrf.mxu0 }
 0x97a   : > { %v8843_v9 = vpop.f32.mrf.mxu0 }
 0x97b   : > { %v12615_v57 = vadd.f32 %v8843_v9, %v8842_v21  ;;  %v7301_v21 = vld [vmem:[%s12846_s14 + $0x20] sm:$0xff] }
 0x97c   : > { %v8845_v56 = vpop.f32.mrf.mxu0 }
 0x97e   : > { %v8846_v47 = vpop.f32.mrf.mxu0 }
 0x97f   : > { %v12617_v48 = vadd.f32 %v8846_v47, %v8845_v56  ;;  %v7700_v47 = vadd.f32 %v12567_v63, %v7301_v21  ;;  %v7306_v21 = vld [vmem:[%s12846_s14 + $0x48] sm:$0xff] }
 0x980   : > { %v8848_v41 = vpop.f32.mrf.mxu0 }
 0x982   : > { %v8849_v60 = vpop.f32.mrf.mxu0 }
 0x983   : > { %v12619_v44 = vadd.f32 %v8849_v60, %v8848_v41 }
 0x984   : > { %v8851_v19 = vpop.f32.mrf.mxu0 }
 0x986   : > { %v8852_v39 = vpop.f32.mrf.mxu0 }
 0x987   : > { %v12621_v34 = vadd.f32 %v8852_v39, %v8851_v19  ;;  %v7302_v39 = vld [vmem:[%s12846_s14 + $0x28] sm:$0xff] }
 0x988   : > { %v8870_v40 = vpop.f32.mrf.mxu0 }
 0x98a   : > { %v8871_v43 = vpop.f32.mrf.mxu0 }
 0x98b   : > { %v8872_v2 = vadd.f32 %v8871_v43, %v8870_v40 }
 0x98c   : > { %v8873_v36 = vpop.f32.mrf.mxu0 }
 0x98d   : > { %v7845_v59 = vadd.f32 %v8872_v2, %v7684_v20  ;;  %v7703_v20 = vadd.f32 %v12569_v53, %v7302_v39 }
 0x98e   : > { %v8874_v30 = vpop.f32.mrf.mxu0 }
 0x98f   : > { %v8875_v35 = vadd.f32 %v8874_v30, %v8873_v36  ;;  %v7971_v27 = vmax.f32 %v7845_v59, 0.0  ;;  %v7708_v30 = vadd.f32 %v12571_v38, %v7303_v37  ;;  %v7308_v37 = vld [vmem:[%s12846_s14 + $0x58] sm:$0xff] }
 0x990   : > { %v8876_v23 = vpop.f32.mrf.mxu0 }
 0x991   : > { %v7848_v13 = vadd.f32 %v8875_v35, %v7687_v32 }
 0x992   : > { %v8877_v8 = vpop.f32.mrf.mxu0 }
 0x993   : > { %v7972_v0 = vmax.f32 %v7848_v13, 0.0  ;;  %v8878_v31 = vadd.f32 %v8877_v8, %v8876_v23  ;;  %v7304_v23 = vld [vmem:[%s12846_s14 + $0x38] sm:$0xff] }
 0x994   : > { %v8879_v15 = vpop.f32.mrf.mxu0 }
 0x995   : > { %v12638_v25 = vpack.c.bf16 %v7972_v0, %v7971_v27  ;;  %v7853_v4 = vadd.f32 %v8878_v31, %v7692_v61  ;;  %v7711_v27 = vadd.f32 %v12573_v12, %v7304_v23  ;;  %v7305_v31 = vld [vmem:[%s12846_s14 + $0x40] sm:$0xff] }
 0x996   : > { %v8880_v29 = vpop.f32.mrf.mxu0  ;;  %v9446_v12 = vld [vmem:[%s12847_s15 + $0x4] ss:$8 sps:$4 sm:$0xff]  }
 0x997   : > { %v8881_v6 = vadd.f32 %v8880_v29, %v8879_v15  ;;  %v7973_v41 = vmax.f32 %v7853_v4, 0.0  ;;  %v7716_v4 = vadd.f32 %v12575_v42, %v7305_v31  ;;  %8088 = vmatprep.mubr.bf16.mxu1 %v9446_v12 }
 0x998   : > { %v8882_v51 = vpop.f32.mrf.mxu0 }
 0x999   : > { %v7856_v9 = vadd.f32 %v8881_v6, %v7695_v28 }
 0x99a   : > { %v8883_v56 = vpop.f32.mrf.mxu0 }
 0x99b   : > { %v7974_v60 = vmax.f32 %v7856_v9, 0.0  ;;  %v8884_v19 = vadd.f32 %v8883_v56, %v8882_v51 }
 0x99c   : > { %v8885_v26 = vpop.f32.mrf.mxu0 }
 0x99d   : > { %v12648_v40 = vpack.c.bf16 %v7974_v60, %v7973_v41  ;;  %v7861_v45 = vadd.f32 %v8884_v19, %v7700_v47  ;;  %v7719_v41 = vadd.f32 %v12577_v1, %v7306_v21  ;;  %v7307_v60 = vld [vmem:[%s12846_s14 + $0x50] sm:$0xff] }
 0x99e   : > { %v8886_v43 = vpop.f32.mrf.mxu0 }
 0x99f   : > { %v8887_v2 = vadd.f32 %v8886_v43, %v8885_v26  ;;  %v7975_v32 = vmax.f32 %v7861_v45, 0.0  ;;  %v7724_v45 = vadd.f32 %v12579_v24, %v7307_v60 }
 0x9a0   : > { %v8888_v63 = vpop.f32.mrf.mxu0 }
 0x9a1   : > { %v7864_v36 = vadd.f32 %v8887_v2, %v7703_v20 }
 0x9a2   : > { %v8889_v59 = vpop.f32.mrf.mxu0 }
 0x9a3   : > { %v7976_v35 = vmax.f32 %v7864_v36, 0.0  ;;  %v8890_v5 = vadd.f32 %v8889_v59, %v8888_v63 }
 0x9a4   : > { %v8891_v13 = vpop.f32.mrf.mxu0 }
 0x9a5   : > { %v12658_v8 = vpack.c.bf16 %v7976_v35, %v7975_v32  ;;  %v7869_v53 = vadd.f32 %v8890_v5, %v7708_v30  ;;  %v7727_v30 = vadd.f32 %v12581_v17, %v7308_v37  ;;  %v7309_v35 = vld [vmem:[%s12846_s14 + $0x60] sm:$0xff] }
 0x9a6   : > { %v8892_v61 = vpop.f32.mrf.mxu0 }
 0x9a7   : > { %v8893_v0 = vadd.f32 %v8892_v61, %v8891_v13  ;;  %v7977_v29 = vmax.f32 %v7869_v53, 0.0  ;;  %v7732_v13 = vadd.f32 %v12583_v18, %v7309_v35 }
 0x9a8   : > { %v8894_v38 = vpop.f32.mrf.mxu0 }
 0x9a9   : > { %v7872_v46 = vadd.f32 %v8893_v0, %v7711_v27  ;;  %v7310_v0 = vld [vmem:[%s12846_s14 + $0x68] sm:$0xff] }
 0x9aa   : > { %v8895_v15 = vpop.f32.mrf.mxu0 }
 0x9ab   : > { %v7978_v28 = vmax.f32 %v7872_v46, 0.0  ;;  %v8896_v6 = vadd.f32 %v8895_v15, %v8894_v38  ;;  %v7735_v15 = vadd.f32 %v12585_v52, %v7310_v0 }
 0x9ac   : > { %v8897_v51 = vpop.f32.mrf.mxu0 }
 0x9ad   : > { %v12671_v9 = vpack.c.bf16 %v7978_v28, %v7977_v29  ;;  %v7877_v56 = vadd.f32 %v8896_v6, %v7716_v4  ;;  %v7311_v29 = vld [vmem:[%s12846_s14 + $0x70] sm:$0xff] }
 0x9ae   : > { %v8898_v47 = vpop.f32.mrf.mxu0  ;;  %v7740_v21 = vadd.f32 %v12587_v50, %v7311_v29 }
 0x9af   : > { %v8899_v42 = vadd.f32 %v8898_v47, %v8897_v51  ;;  %v7979_v43 = vmax.f32 %v7877_v56, 0.0  ;;  %v7312_v47 = vld [vmem:[%s12846_s14 + $0x78] sm:$0xff] }
 0x9b0   : > { %v8900_v19 = vpop.f32.mrf.mxu0 }
 0x9b1   : > { %v7880_v39 = vadd.f32 %v8899_v42, %v7719_v41 }
 0x9b2   : > { %v8901_v26 = vpop.f32.mrf.mxu0 }
 0x9b3   : > { %v7980_v20 = vmax.f32 %v7880_v39, 0.0  ;;  %v8902_v2 = vadd.f32 %v8901_v26, %v8900_v19  ;;  %v7743_v19 = vadd.f32 %v12589_v3, %v7312_v47  ;;  %v7313_v26 = vld [vmem:[%s12846_s14 + $0x80] sm:$0xff]  ;;  %v7318_v47 = vld [vmem:[%s12846_s14 + $0xa8] sm:$0xff] }
 0x9b4   : > { %v8903_v63 = vpop.f32.mrf.mxu0 }
 0x9b5   : > { %v12681_v36 = vpack.c.bf16 %v7980_v20, %v7979_v43  ;;  %v7885_v1 = vadd.f32 %v8902_v2, %v7724_v45  ;;  %v7748_v20 = vadd.f32 %v12591_v22, %v7313_v26 }
 0x9b6   : > { %v8904_v59 = vpop.f32.mrf.mxu0 }
 0x9b7   : > { %v8905_v32 = vadd.f32 %v8904_v59, %v8903_v63  ;;  %v7981_v53 = vmax.f32 %v7885_v1, 0.0  ;;  %v7314_v1 = vld [vmem:[%s12846_s14 + $0x88] sm:$0xff] }
 0x9b8   : > { %v8906_v24 = vpop.f32.mrf.mxu0  ;;  %v7751_v35 = vadd.f32 %v12593_v11, %v7314_v1 }
 0x9b9   : > { %v7888_v5 = vadd.f32 %v8905_v32, %v7727_v30 }
 0x9ba   : > { %v8907_v23 = vpop.f32.mrf.mxu0 }
 0x9bb   : > { %v7982_v61 = vmax.f32 %v7888_v5, 0.0  ;;  %v8908_v27 = vadd.f32 %v8907_v23, %v8906_v24  ;;  %v7315_v5 = vld [vmem:[%s12846_s14 + $0x90] sm:$0xff] }
 0x9bc   : > { %v8909_v31 = vpop.f32.mrf.mxu0 }
 0x9bd   : > { %v12691_v38 = vpack.c.bf16 %v7982_v61, %v7981_v53  ;;  %v7893_v17 = vadd.f32 %v8908_v27, %v7732_v13  ;;  %v7756_v53 = vadd.f32 %v12595_v49, %v7315_v5 }
 0x9be   : > { %v8910_v46 = vpop.f32.mrf.mxu0 }
 0x9bf   : > { %v8911_v4 = vadd.f32 %v8910_v46, %v8909_v31  ;;  %v7983_v51 = vmax.f32 %v7893_v17, 0.0  ;;  %v7316_v31 = vld [vmem:[%s12846_s14 + $0x98] sm:$0xff] }
 0x9c0   : > { %v8912_v18 = vpop.f32.mrf.mxu0 }
 0x9c1   : > { %v7896_v28 = vadd.f32 %v8911_v4, %v7735_v15  ;;  %v7759_v4 = vadd.f32 %v12597_v62, %v7316_v31 }
 0x9c2   : > { %v8913_v6 = vpop.f32.mrf.mxu0 }
 0x9c3   : > { %v7984_v12 = vmax.f32 %v7896_v28, 0.0  ;;  %v8914_v56 = vadd.f32 %v8913_v6, %v8912_v18  ;;  %v7317_v18 = vld [vmem:[%s12846_s14 + $0xa0] sm:$0xff] }
 0x9c4   : > { %v8915_v41 = vpop.f32.mrf.mxu0 }
 0x9c5   : > { %v12701_v42 = vpack.c.bf16 %v7984_v12, %v7983_v51  ;;  %v7901_v52 = vadd.f32 %v8914_v56, %v7740_v21  ;;  %v7764_v21 = vadd.f32 %v12599_v14, %v7317_v18  ;;  %v7319_v14 = vld [vmem:[%s12846_s14 + $0xb0] sm:$0xff] }
 0x9c6   : > { %v8916_v60 = vpop.f32.mrf.mxu0  ;;  %v7772_v1 = vadd.f32 %v12603_v16, %v7319_v14  ;;  %v7322_v16 = vld [vmem:[%s12846_s14 + $0xc8] sm:$0xff]  ;;  %v7323_v18 = vld [vmem:[%s12846_s14 + $0xd0] sm:$0xff] }
 0x9c7   : > { %v8917_v39 = vadd.f32 %v8916_v60, %v8915_v41  ;;  %v7985_v2 = vmax.f32 %v7901_v52, 0.0 }
 0x9c8   : > { %v8918_v50 = vpop.f32.mrf.mxu0 }
 0x9c9   : > { %v7904_v45 = vadd.f32 %v8917_v39, %v7743_v19  ;;  %v7767_v19 = vadd.f32 %v12601_v7, %v7318_v47 }
 0x9ca   : > { %v8919_v43 = vpop.f32.mrf.mxu0 }
 0x9cb   : > { %v7986_v37 = vmax.f32 %v7904_v45, 0.0  ;;  %v8920_v63 = vadd.f32 %v8919_v43, %v8918_v50 }
 0x9cc   : > { %v8921_v59 = vpop.f32.mrf.mxu0 }
 0x9cd   : > { %v12711_v30 = vpack.c.bf16 %v7986_v37, %v7985_v2  ;;  %v7909_v3 = vadd.f32 %v8920_v63, %v7748_v20  ;;  %v7320_v37 = vld [vmem:[%s12846_s14 + $0xb8] sm:$0xff] }
 0x9ce   : > { %v8922_v32 = vpop.f32.mrf.mxu0 }
 0x9cf   : > { %v8923_v24 = vadd.f32 %v8922_v32, %v8921_v59  ;;  %v7987_v61 = vmax.f32 %v7909_v3, 0.0  ;;  %v7775_v3 = vadd.f32 %v12605_v55, %v7320_v37 }
 0x9d0   : > { %v8924_v22 = vpop.f32.mrf.mxu0 }
 0x9d1   : > { %v7912_v23 = vadd.f32 %v8923_v24, %v7751_v35 }
 0x9d2   : > { %v8925_v13 = vpop.f32.mrf.mxu0 }
 0x9d3   : > { %v7988_v27 = vmax.f32 %v7912_v23, 0.0  ;;  %v8926_v0 = vadd.f32 %v8925_v13, %v8924_v22  ;;  %v7321_v22 = vld [vmem:[%s12846_s14 + $0xc0] sm:$0xff] }
 0x9d4   : > { %v8927_v17 = vpop.f32.mrf.mxu0 }
 0x9d5   : > { %v7917_v46 = vadd.f32 %v8926_v0, %v7756_v53  ;;  %v12721_v11 = vpack.c.bf16 %v7988_v27, %v7987_v61  ;;  %v7780_v0 = vadd.f32 %v12607_v10, %v7321_v22  ;;  %v7324_v10 = vld [vmem:[%s12846_s14 + $0xd8] sm:$0xff] }
 0x9d6   : > { %v8928_v15 = vpop.f32.mrf.mxu0  ;;  %v7791_v47 = vadd.f32 %v12613_v54, %v7324_v10  ;;  %v8027_v10 = vld [vmem:[%s12848_s16 + $0x18] sm:$0xff] }
 0x9d7   : > { %v8929_v29 = vadd.f32 %v8928_v15, %v8927_v17  ;;  %v7989_v51 = vmax.f32 %v7917_v46, 0.0  ;;  %v7783_v17 = vadd.f32 %v12609_v58, %v7322_v16 }
 0x9d8   : > { %v8930_v49 = vpop.f32.mrf.mxu0 }
 0x9d9   : > { %v7920_v28 = vadd.f32 %v8929_v29, %v7759_v4 }
 0x9da   : > { %v8931_v6 = vpop.f32.mrf.mxu0 }
 0x9db   : > { %v7990_v12 = vmax.f32 %v7920_v28, 0.0  ;;  %v8932_v56 = vadd.f32 %v8931_v6, %v8930_v49 }
 0x9dc   : > { %v8933_v41 = vpop.f32.mrf.mxu0 }
 0x9dd   : > { %v7925_v52 = vadd.f32 %v8932_v56, %v7764_v21  ;;  %v12731_v62 = vpack.c.bf16 %v7990_v12, %v7989_v51  ;;  %v7788_v12 = vadd.f32 %v12611_v33, %v7323_v18  ;;  %v7326_v33 = vld [vmem:[%s12846_s14 + $0xe8] sm:$0xff]  ;;  %v8026_v18 = vld [vmem:[%s12848_s16 + $0x10] sm:$0xff] }
 0x9de   : > { %v8934_v60 = vpop.f32.mrf.mxu0  ;;  %v7799_v37 = vadd.f32 %v12617_v48, %v7326_v33 }
 0x9df   : > { %v8935_v39 = vadd.f32 %v8934_v60, %v8933_v41  ;;  %v7991_v43 = vmax.f32 %v7925_v52, 0.0 }
 0x9e0   : > { %v8936_v26 = vpop.f32.mrf.mxu0 }
 0x9e1   : > { %v7928_v50 = vadd.f32 %v8935_v39, %v7767_v19  ;;  %v7325_v39 = vld [vmem:[%s12846_s14 + $0xe0] sm:$0xff] }
 0x9e2   : > { %v8937_v45 = vpop.f32.mrf.mxu0 }
 0x9e3   : > { %v7992_v20 = vmax.f32 %v7928_v50, 0.0  ;;  %v8938_v2 = vadd.f32 %v8937_v45, %v8936_v26 }
 0x9e4   : > { %v8939_v63 = vpop.f32.mrf.mxu0 }
 0x9e5   : > { %v12741_v59 = vpack.c.bf16 %v7992_v20, %v7991_v43  ;;  %v7933_v32 = vadd.f32 %v8938_v2, %v7772_v1  ;;  %v7796_v20 = vadd.f32 %v12615_v57, %v7325_v39  ;;  %v7328_v57 = vld [vmem:[%s12846_s14 + $0xf8] sm:$0xff] }
 0x9e6   : > { %v8940_v7 = vpop.f32.mrf.mxu0 }
 0x9e7   : > { %v8941_v35 = vadd.f32 %v8940_v7, %v8939_v63  ;;  %v7993_v13 = vmax.f32 %v7933_v32, 0.0  ;;  %v7327_v32 = vld [vmem:[%s12846_s14 + $0xf0] sm:$0xff] }
 0x9e8   : > { %v8942_v24 = vpop.f32.mrf.mxu0 }
 0x9e9   : > { %v7936_v5 = vadd.f32 %v8941_v35, %v7775_v3 }
 0x9ea   : > { %v8943_v23 = vpop.f32.mrf.mxu0 }
 0x9eb   : > { %v7994_v53 = vmax.f32 %v7936_v5, 0.0  ;;  %v8944_v61 = vadd.f32 %v8943_v23, %v8942_v24 }
 0x9ec   : > { %v8945_v27 = vpop.f32.mrf.mxu0 }
 0x9ed   : > { %v8019_v55 = vpack.c.bf16 %v7994_v53, %v7993_v13  ;;  %v7941_v46 = vadd.f32 %v8944_v61, %v7780_v0  ;;  %v7804_v13 = vadd.f32 %v12619_v44, %v7327_v32  ;;  %v7807_v61 = vadd.f32 %v12621_v34, %v7328_v57  ;;  %v9444_v44 = vld [vmem:[%s12847_s15] ss:$8 sps:$4 sm:$0xff]   ;;  %v9449_v34 = vld [vmem:[%s12847_s15 + $0x14] ss:$8 sps:$4 sm:$0xff]  }
 0x9ee   : > { %v8946_v31 = vpop.f32.mrf.mxu0 }
 0x9ef   : > { %v8947_v15 = vadd.f32 %v8946_v31, %v8945_v27  ;;  %v7995_v28 = vmax.f32 %v7941_v46, 0.0 }
 0x9f0   : > { %v8948_v4 = vpop.f32.mrf.mxu0 }
 0x9f1   : > { %v7944_v29 = vadd.f32 %v8947_v15, %v7783_v17 }
 0x9f2   : > { %v8949_v49 = vpop.f32.mrf.mxu0 }
 0x9f3   : > { %v7996_v6 = vmax.f32 %v7944_v29, 0.0  ;;  %v8950_v21 = vadd.f32 %v8949_v49, %v8948_v4 }
 0x9f4   : > { %v8951_v51 = vpop.f32.mrf.mxu0 }
 0x9f5   : > { %v8020_v58 = vpack.c.bf16 %v7996_v6, %v7995_v28  ;;  %v7949_v41 = vadd.f32 %v8950_v21, %v7788_v12 }
 0x9f6   : > { %v8952_v56 = vpop.f32.mrf.mxu0 }
 0x9f7   : > { %v8953_v52 = vadd.f32 %v8952_v56, %v8951_v51  ;;  %v7997_v50 = vmax.f32 %v7949_v41, 0.0 }
 0x9f8   : > { %v8954_v60 = vpop.f32.mrf.mxu0 }
 0x9f9   : > { %v7952_v19 = vadd.f32 %v8953_v52, %v7791_v47  ;;  %v8028_v47 = vld [vmem:[%s12848_s16 + $0x20] sm:$0xff] }
 0x9fa   : > { %v8955_v26 = vpop.f32.mrf.mxu0 }
 0x9fb   : > { %v7998_v14 = vmax.f32 %v7952_v19, 0.0  ;;  %v8956_v45 = vadd.f32 %v8955_v26, %v8954_v60 }
 0x9fc   : > { %v8957_v43 = vpop.f32.mrf.mxu0 }
 0x9fd   : > { %v8021_v54 = vpack.c.bf16 %v7998_v14, %v7997_v50  ;;  %v7957_v63 = vadd.f32 %v8956_v45, %v7796_v20 }
 0x9fe   : > { %v8958_v2 = vpop.f32.mrf.mxu0 }
 0x9ff   : > { %v8959_v1 = vadd.f32 %v8958_v2, %v8957_v43  ;;  %v7999_v24 = vmax.f32 %v7957_v63, 0.0 }
 0xa00   : > { %v8960_v7 = vpop.f32.mrf.mxu0 }
 0xa01   : > { %v7960_v3 = vadd.f32 %v8959_v1, %v7799_v37 }
 0xa02   : > { %v8961_v35 = vpop.f32.mrf.mxu0 }
 0xa03   : > { %v8000_v5 = vmax.f32 %v7960_v3, 0.0  ;;  %v8962_v22 = vadd.f32 %v8961_v35, %v8960_v7 }
 0xa04   : > { %v8963_v23 = vpop.f32.mrf.mxu0 }
 0xa05   : > { %v8022_v48 = vpack.c.bf16 %v8000_v5, %v7999_v24  ;;  %v7965_v16 = vadd.f32 %v8962_v22, %v7804_v13 }
 0xa06   : > { %v8964_v53 = vpop.f32.mrf.mxu0 }
 0xa07   : > { %v8965_v27 = vadd.f32 %v8964_v53, %v8963_v23  ;;  %v8001_v31 = vmax.f32 %v7965_v16, 0.0 }
 0xa09   : > { %v7968_v0 = vadd.f32 %v8965_v27, %v7807_v61 }
 0xa0b   : > { %v8002_v17 = vmax.f32 %v7968_v0, 0.0 }
 0xa0d   : > { %v8023_v46 = vpack.c.bf16 %v8002_v17, %v8001_v31 }
 0xa0f   : > { %8966 = vmatprep.subr.bf16.mxu1 %v8023_v46 }
 0xa10   : > { %8967 = vmatpush3.bf16.msra.mxu1 %v12711_v30 }
 0xa11   : > { %8968 = vmatprep.subr.bf16.mxu1 %v8022_v48 }
 0xa14   : > { %8969 = vmatpush3.bf16.msra.mxu1 %v12701_v42 }
 0xa15   : > { %8970 = vmatprep.subr.bf16.mxu1 %v8021_v54 }
 0xa18   : > { %8971 = vmatpush3.bf16.msra.mxu1 %v12691_v38  ;;  %v8024_v38 = vld [vmem:[%s12848_s16] sm:$0xff] }
 0xa19   : > { %8972 = vmatprep.subr.bf16.mxu1 %v8020_v58 }
 0xa1c   : > { %8973 = vmatpush3.bf16.msra.mxu1 %v12681_v36 }
 0xa1d   : > { %8974 = vmatprep.subr.bf16.mxu1 %v8019_v55 }
 0xa20   : > { %8975 = vmatpush3.bf16.msra.mxu1 %v12671_v9 }
 0xa21   : > { %8976 = vmatprep.subr.bf16.mxu1 %v12741_v59  ;;  %v8025_v59 = vld [vmem:[%s12848_s16 + $0x8] sm:$0xff] }
 0xa24   : > { %8977 = vmatpush3.bf16.msra.mxu1 %v12658_v8  ;;  %v8007_v8 = vld [vmem:[%s12847_s15 + $0x20] sm:$0xff] }
 0xa25   : > { %8978 = vmatprep.subr.bf16.mxu1 %v12731_v62  ;;  %v8639_v9 = vcombine.high %v8007_v8, %v8007_v8  ;;  %v8638_v36 = vcombine.low %v8007_v8, %v8007_v8 }
 0xa28   : > { %8979 = vmatpush3.bf16.msra.mxu1 %v12648_v40  ;;  %v9447_v40 = vld [vmem:[%s12847_s15 + $0x10] ss:$8 sps:$4 sm:$0xff]  }
 0xa29   : > { %8980 = vmatprep.subr.bf16.mxu1 %v12721_v11 }
 0xa2c   : > { %8981 = vmatpush3.bf16.msra.mxu1 %v12638_v25 }
 0xa2f   : > { %8089 = vmatmul.mubr.bf16.vlgmr.msra.gmra.mxu1 %v9444_v44 }
 0xa30   : > { %8096 = vmatprep.mubr.bf16.mxu1 %v9449_v34 }
 0xa37   : > { %8097 = vmatmul.mubr.bf16.gmra.mxu1 %v9447_v40 }
 0xa38   : > { %8104 = vmatprep.mubr.bf16.mxu1 %v8639_v9 }
 0xa3f   : > { %8105 = vmatmul.mubr.bf16.gmra.mxu1 %v8638_v36 }
 0xaef   : > { %v8982_v25 = vpop.f32.mrf.mxu1 }
 0xaf1   : > { %v8983_v42 = vpop.f32.mrf.mxu1 }
 0xaf2   : > { %v8984_v30 = vadd.f32 %v8983_v42, %v8982_v25 }
 0xaf3   : > { %v8985_v11 = vpop.f32.mrf.mxu1 }
 0xaf4   : > { %v8091_v62 = vadd.f32 %v8984_v30, %v8024_v38 }
 0xaf5   : > { %v8986_v55 = vpop.f32.mrf.mxu1 }
 0xaf6   : > { %8113 = vst.msk [vmem:[%s598_s18] sm:$0xff] %vm8112_vm1, %v8091_v62  ;;  %v8987_v15 = vadd.f32 %v8986_v55, %v8985_v11 }
 0xaf7   : > { %v8988_v4 = vpop.f32.mrf.mxu1 }
 0xaf8   : > { %v8094_v29 = vadd.f32 %v8987_v15, %v8025_v59 }
 0xaf9   : > { %v8989_v49 = vpop.f32.mrf.mxu1 }
 0xafa   : > { %8114 = vst.msk [vmem:[%s598_s18 + $0x8] sm:$0xff] %vm8112_vm1, %v8094_v29  ;;  %v8990_v28 = vadd.f32 %v8989_v49, %v8988_v4 }
 0xafb   : > { %v8991_v6 = vpop.f32.mrf.mxu1 }
 0xafc   : > { %v8099_v21 = vadd.f32 %v8990_v28, %v8026_v18 }
 0xafd   : > { %v8992_v51 = vpop.f32.mrf.mxu1 }
 0xafe   : > { %8115 = vst.msk [vmem:[%s598_s18 + $0x10] sm:$0xff] %vm8112_vm1, %v8099_v21  ;;  %v8993_v12 = vadd.f32 %v8992_v51, %v8991_v6 }
 0xaff   : > { %v8994_v58 = vpop.f32.mrf.mxu1 }
 0xb00   : > { %v8102_v56 = vadd.f32 %v8993_v12, %v8027_v10 }
 0xb01   : > { %v8995_v41 = vpop.f32.mrf.mxu1 }
 0xb02   : > { %8116 = vst.msk [vmem:[%s598_s18 + $0x18] sm:$0xff] %vm8112_vm1, %v8102_v56  ;;  %v8996_v52 = vadd.f32 %v8995_v41, %v8994_v58 }
 0xb03   : > { %v8997_v60 = vpop.f32.mrf.mxu1 }
 0xb04   : > { %v8107_v19 = vadd.f32 %v8996_v52, %v8028_v47 }
 0xb05   : > { %v8998_v39 = vpop.f32.mrf.mxu1 }
 0xb06   : > { %8117 = vst.msk [vmem:[%s598_s18 + $0x20] sm:$0xff] %vm8112_vm1, %v8107_v19 }
 0xb07 PF: > { %s12955_s1 = sld [smem:[#allocation10_spill]] }
 0xb08   : > { %s12956_s24 = sld [smem:[#allocation9_spill]] }
 0xb09   : > { %s12957_s25 = sld [smem:[#allocation11_spill]] }
 0xb0d   : > { %s29_s26 = sadd.s32 1, %s12955_s1  }
 0xb0e   : > { %p26_p4 = scmp.ge.s32.totalorder %s29_s26, 4  }
 0xb10   :  { %28 = sbr.rel (!%p26_p4) target bundleno = 6 (0x6), region = 135 }
 0xb15   :  { %8139 = vsyncpa [#allocation4], 1 }
 0xb16   :  { %8141 = vsyncpa [#allocation4 + $0x1], 1 }
 0xb17   :  { %8142 = vsyncpa [#allocation6], 1 }

</bundles_post_ra>
